<compile_context>
chip_gen: v7x
topology: tpu7x:2x2x1
jax: 0.10.0
libtpu: 0.0.40
codegen_flags: <defaults>
</compile_context>

<pallas_src>
import jax
import jax.numpy as jnp
import numpy as np
from jax.experimental import pallas as pl
from jax.experimental.pallas import tpu as pltpu

# Problem sizes fixed by the module definition (regress1):
#   conv_in = 512, 1x1-conv out = 128, Linear(2048 -> 1024), Linear(1024 -> 2)
#   2048 = 128 * 4 * 4  =>  pooled spatial is 4x4  =>  input spatial 14x14
B, H, W, CIN = 2, 14, 14, 512
COUT = 128                                   # 1x1 conv output channels
POOL_K, POOL_S = 5, 3
PH = PW = (H - POOL_K) // POOL_S + 1         # 4
HW = PH * PW                                 # 16
FLAT = COUT * HW                             # 2048
HID = 1024
OUT = 2

NCORE = 2                                    # HID split (v7x dual-TC; serial elsewhere)
HIDC = HID // NCORE                          # 512 output columns per grid step
NCHUNK = 4                                   # W1 K-chunks for DMA/compute overlap
KC = FLAT // NCHUNK                          # 512


def _regression_kernel(x_ref, wc_ref, bc_ref, w1q_hbm, s1_ref, b1_ref, w2_ref,
                       out_ref, pooled_scr, yflat_scr, w1_vmem, dma_sems):
    # x_ref:    [B, 14, 14, 512] f32   (NHWC)
    # wc_ref:   [512, 128]       bf16  (1x1 conv weight, transposed)
    # bc_ref:   [1, 128]         f32
    # w1q_hbm:  [NCORE*NCHUNK, 512, 512] int8 in HBM (Linear1 weight, permuted+quantized)
    # s1_ref:   [1, 1, 512]      f32   (per-output-channel dequant scale, this half)
    # b1_ref:   [1, 1, 512]      f32
    # w2_ref:   [1, 512, 2]      f32   (Linear2 weight half, transposed)
    # out_ref:  [1, B, 2]        f32   (partial xy for this HID half)
    i = pl.program_id(0)

    # 1) Kick off all W1 chunk DMAs for this HID half (int8, ~256 KiB each) so
    #    they overlap with the pooling / 1x1-conv work below.
    for c in range(NCHUNK):
        pltpu.make_async_copy(w1q_hbm.at[i * NCHUNK + c], w1_vmem.at[c],
                              dma_sems.at[c]).start()

    inv_area = 1.0 / float(POOL_K * POOL_K)

    # 2) Separable AvgPool2d(5, 3): 14x14 -> 4x4.  H-reduction over leading-axis
    #    slices first, then W-reduction; pooled rows land in a [32, 512] scratch
    #    (row = hw*B + b) so the 1x1 conv can be one batched dot.
    for oh in range(PH):
        h0 = oh * POOL_S
        hsum = x_ref[:, h0, :, :]
        for dh in range(1, POOL_K):
            hsum = hsum + x_ref[:, h0 + dh, :, :]            # [B, 14, 512] f32
        for ow in range(PW):
            w0 = ow * POOL_S
            wsum = hsum[:, w0, :]
            for dw in range(1, POOL_K):
                wsum = wsum + hsum[:, w0 + dw, :]            # [B, 512] f32
            hw = oh * PW + ow
            pooled_scr[hw * B:(hw + 1) * B, :] = wsum * inv_area

    # 3) 1x1 conv + bias + ReLU as ONE [32,512] @ [512,128] MXU dot
    #    (single weight push instead of 16).
    pooled_all = pooled_scr[...].astype(jnp.bfloat16)        # [32, 512] bf16
    y_all = jnp.dot(pooled_all, wc_ref[...], preferred_element_type=jnp.float32)
    y_all = jnp.maximum(y_all + bc_ref[...], 0.0)            # [32, 128] f32

    # 4) Scatter into the PyTorch-flatten layout y_flat[b, hw*128 + c]:
    #    lane-offset stores (multiples of 128) -> no sublane->lane relayout.
    for hw in range(HW):
        yflat_scr[:, hw * COUT:(hw + 1) * COUT] = y_all[hw * B:(hw + 1) * B, :]

    # 5) Linear(2048 -> 512 columns of this half) as a K-streamed matmul,
    #    chunked so each dot only waits on its own W1 DMA chunk (overlap of
    #    MXU weight push with the DMA tail).  int8 -> bf16 dequant is a cast;
    #    the per-column scale is applied once on the f32 accumulator.
    h_acc = None
    for c in range(NCHUNK):
        pltpu.make_async_copy(w1q_hbm.at[i * NCHUNK + c], w1_vmem.at[c],
                              dma_sems.at[c]).wait()
        wq = w1_vmem[c].astype(jnp.bfloat16)                 # [512, 512] bf16
        lhs = yflat_scr[:, c * KC:(c + 1) * KC].astype(jnp.bfloat16)   # [B, 512]
        part = jnp.dot(lhs, wq, preferred_element_type=jnp.float32)
        h_acc = part if h_acc is None else h_acc + part
    h_acc = jnp.maximum(h_acc * s1_ref[0] + b1_ref[0], 0.0)  # [B, 512] f32
    # TODO(synk): nn.Dropout(0.7) is stochastic (training mode); eval-mode identity here.

    # 6) Linear(1024, 2) partial: this half contributes h_half @ w2_half.
    xy = jnp.dot(h_acc, w2_ref[0], preferred_element_type=jnp.float32)  # [B, 2]
    out_ref[...] = xy[None].astype(out_ref.dtype)


@jax.jit
def regression_forward(x_nhwc, wc_t, bc, w1q, s1, b1, w2t, b2):
    """x_nhwc: [B, 14, 14, 512] float32 -> [B, 2] float32."""
    partials = pl.pallas_call(
        _regression_kernel,
        out_shape=jax.ShapeDtypeStruct((NCORE, B, OUT), jnp.float32),
        grid=(NCORE,),
        in_specs=[
            pl.BlockSpec((B, H, W, CIN), lambda i: (0, 0, 0, 0)),   # x (shared)
            pl.BlockSpec((CIN, COUT), lambda i: (0, 0)),            # conv weight
            pl.BlockSpec((1, COUT), lambda i: (0, 0)),              # conv bias
            pl.BlockSpec(memory_space=pl.ANY),                      # W1 int8 stays in HBM
            pl.BlockSpec((1, 1, HIDC), lambda i: (i, 0, 0)),        # dequant scale half
            pl.BlockSpec((1, 1, HIDC), lambda i: (i, 0, 0)),        # b1 half
            pl.BlockSpec((1, HIDC, OUT), lambda i: (i, 0, 0)),      # W2 half
        ],
        out_specs=pl.BlockSpec((1, B, OUT), lambda i: (i, 0, 0)),
        scratch_shapes=[
            pltpu.VMEM((HW * B, CIN), jnp.float32),    # pooled rows   (64 KiB)
            pltpu.VMEM((B, FLAT), jnp.float32),        # flattened conv out (16 KiB)
            pltpu.VMEM((NCHUNK, KC, HIDC), jnp.int8),  # W1 half landing buf (1 MiB)
            pltpu.SemaphoreType.DMA((NCHUNK,)),
        ],
        compiler_params=pltpu.CompilerParams(
            dimension_semantics=("parallel",),          # 2 TCs on v7x; serial elsewhere
            vmem_limit_bytes=16 * 1024 * 1024),
    )(x_nhwc, wc_t, bc, w1q, s1, b1, w2t)
    # Partial sums over the two HID halves + final bias (tiny [2,2] op).
    return partials[0] + partials[1] + b2


def _make_params(key):
    """Deterministic synthetic parameters in PyTorch shapes."""
    ks = jax.random.split(key, 6)
    wc = jax.random.normal(ks[0], (COUT, CIN), jnp.float32) * 0.05   # Conv2d [out,in,1,1] squeezed
    bc = jax.random.normal(ks[1], (COUT,), jnp.float32) * 0.05
    w1 = jax.random.normal(ks[2], (HID, FLAT), jnp.float32) * 0.05   # Linear(2048,1024).weight
    b1 = jax.random.normal(ks[3], (HID,), jnp.float32) * 0.05
    w2 = jax.random.normal(ks[4], (OUT, HID), jnp.float32) * 0.05    # Linear(1024,2).weight
    b2 = jax.random.normal(ks[5], (OUT,), jnp.float32) * 0.05
    return wc, bc, w1, b1, w2, b2


def prepare_kernel_params(wc, bc, w1, b1, w2, b2):
    """Weight views for the kernel.  Do this ONCE at model load, not per call:
    it includes the W1 permutation, int8 quantization and HID-half split."""
    wc_t = wc.T.astype(jnp.bfloat16)                                  # [512, 128] bf16
    # PyTorch flatten: f = c*16 + hw.  Kernel K index: k = hw*128 + c.
    w1k = jnp.transpose(w1.reshape(HID, COUT, HW), (2, 1, 0)).reshape(FLAT, HID)
    # Per-output-channel (per-j) symmetric int8 quantization.
    scale = jnp.maximum(jnp.max(jnp.abs(w1k), axis=0), 1e-8) / 127.0  # [1024] f32
    w1q = jnp.clip(jnp.round(w1k / scale[None, :]), -127, 127).astype(jnp.int8)
    # Split j into NCORE halves, then k into NCHUNK DMA chunks:
    #   [2048, 1024] -> [NCORE*NCHUNK, KC, HIDC] with index i*NCHUNK + c.
    w1q = (w1q.reshape(FLAT, NCORE, HIDC).transpose(1, 0, 2)
              .reshape(NCORE * NCHUNK, KC, HIDC))
    s1 = scale.reshape(NCORE, 1, HIDC).astype(jnp.float32)
    b1r = b1.reshape(NCORE, 1, HIDC)
    w2t = w2.T.reshape(NCORE, HIDC, OUT)                              # [2, 512, 2] f32
    return (wc_t, bc.reshape(1, COUT), w1q, s1, b1r, w2t, b2.reshape(1, OUT))


def _reference(x_nchw, wc, bc, w1, b1, w2, b2):
    """Pure-JAX replica of the PyTorch forward (NCHW, eval mode, f32)."""
    pooled = jax.lax.reduce_window(
        x_nchw, 0.0, jax.lax.add,
        window_dimensions=(1, 1, POOL_K, POOL_K),
        window_strides=(1, 1, POOL_S, POOL_S),
        padding="VALID") / float(POOL_K * POOL_K)                     # [B,512,4,4]
    conv = jnp.einsum("bchw,oc->bohw", pooled, wc) + bc[None, :, None, None]
    conv = jnp.maximum(conv, 0.0)                                     # [B,128,4,4]
    flat = conv.reshape(conv.shape[0], -1)                            # [B,2048] (c-major)
    h = jnp.maximum(flat @ w1.T + b1, 0.0)                            # [B,1024]
    return h @ w2.T + b2                                              # [B,2]


if __name__ == "__main__":
    key = jax.random.PRNGKey(0)
    k_x, k_p = jax.random.split(key)

    # Logical PyTorch input is NCHW [B, 512, 14, 14]; kernel consumes NHWC.
    x_nchw = jax.random.normal(k_x, (B, CIN, H, W), jnp.float32)
    x_nhwc = jnp.transpose(x_nchw, (0, 2, 3, 1))

    wc, bc, w1, b1, w2, b2 = _make_params(k_p)
    # Prepared once (as at model-load time), not in the per-step forward path.
    kernel_params = jax.block_until_ready(prepare_kernel_params(wc, bc, w1, b1, w2, b2))

    xy = jax.block_until_ready(regression_forward(x_nhwc, *kernel_params))

    ref = jax.block_until_ready(_reference(x_nchw, wc, bc, w1, b1, w2, b2))
    np.testing.assert_allclose(np.asarray(xy), np.asarray(ref), rtol=5e-2, atol=5e-2)

    print("KERNEL_OK")
</pallas_src>

<mosaic_0001>
module attributes {stable_mosaic.version = 11 : i64} {
  func.func @_regression_kernel(%arg0: i32, %arg1: memref<2x14x14x512xf32, #tpu.memory_space<vmem>>, %arg2: memref<512x128xbf16, #tpu.memory_space<vmem>>, %arg3: memref<1x128xf32, #tpu.memory_space<vmem>>, %arg4: memref<8x512x512xi8, #tpu.memory_space<any>>, %arg5: memref<1x1x512xf32, #tpu.memory_space<vmem>>, %arg6: memref<1x1x512xf32, #tpu.memory_space<vmem>>, %arg7: memref<1x512x2xf32, #tpu.memory_space<vmem>>, %arg8: memref<1x2x2xf32, #tpu.memory_space<vmem>>, %arg9: memref<32x512xf32, #tpu.memory_space<vmem>>, %arg10: memref<2x2048xf32, #tpu.memory_space<vmem>>, %arg11: memref<4x512x512xi8, #tpu.memory_space<vmem>>, %arg12: memref<4x!tpu.dma_semaphore, #tpu.memory_space<semaphore_mem>>) attributes {dimension_semantics = [#tpu.dimension_semantics<parallel>], iteration_bounds = array<i64: 2>, scalar_prefetch = 0 : i64, scratch_operands = 4 : i64, tpu.core_type = #tpu.core_type<tc>, window_params = [{pipeline_mode = #tpu.pipeline_mode<synchronous>, transform_indices = @transform_0, window_bounds = array<i64: 2, 14, 14, 512>}, {pipeline_mode = #tpu.pipeline_mode<synchronous>, transform_indices = @transform_1, window_bounds = array<i64: 512, 128>}, {pipeline_mode = #tpu.pipeline_mode<synchronous>, transform_indices = @transform_2, window_bounds = array<i64: 1, 128>}, {}, {transform_indices = @transform_4, window_bounds = array<i64: 1, 1, 512>}, {transform_indices = @transform_5, window_bounds = array<i64: 1, 1, 512>}, {transform_indices = @transform_6, window_bounds = array<i64: 1, 512, 2>}, {transform_indices = @transform_7, window_bounds = array<i64: 1, 2, 2>}]} {
    %c4_i32 = arith.constant 4 : i32
    %0 = arith.muli %arg0, %c4_i32 : i32
    %c0_i32 = arith.constant 0 : i32
    %1 = arith.addi %0, %c0_i32 : i32
    %c0_i32_0 = arith.constant 0 : i32
    %c0_i32_1 = arith.constant 0 : i32
    %c0_i32_2 = arith.constant 0 : i32
    %c0_i32_3 = arith.constant 0 : i32
    %2 = tpu.memref_slice %arg4[%1, %c0_i32_2, %c0_i32_3] : memref<8x512x512xi8, #tpu.memory_space<any>> -> memref<1x512x512xi8, #tpu.memory_space<any>>
    %3 = tpu.memref_squeeze %2 : memref<1x512x512xi8, #tpu.memory_space<any>> -> memref<512x512xi8, #tpu.memory_space<any>>
    %c0_i32_4 = arith.constant 0 : i32
    %c0_i32_5 = arith.constant 0 : i32
    %4 = tpu.memref_slice %arg11[%c0_i32_0, %c0_i32_4, %c0_i32_5] : memref<4x512x512xi8, #tpu.memory_space<vmem>> -> memref<1x512x512xi8, #tpu.memory_space<vmem>>
    %5 = tpu.memref_squeeze %4 : memref<1x512x512xi8, #tpu.memory_space<vmem>> -> memref<512x512xi8, #tpu.memory_space<vmem>>
    %6 = tpu.memref_slice %arg12[%c0_i32_1] : memref<4x!tpu.dma_semaphore, #tpu.memory_space<semaphore_mem>> -> memref<1x!tpu.dma_semaphore, #tpu.memory_space<semaphore_mem>>
    %7 = tpu.memref_squeeze %6 : memref<1x!tpu.dma_semaphore, #tpu.memory_space<semaphore_mem>> -> memref<!tpu.dma_semaphore, #tpu.memory_space<semaphore_mem>>
    tpu.enqueue_dma source(%3 : memref<512x512xi8, #tpu.memory_space<any>>) target(%5 : memref<512x512xi8, #tpu.memory_space<vmem>>) target_semaphore(%7 : memref<!tpu.dma_semaphore, #tpu.memory_space<semaphore_mem>>)
    %c4_i32_6 = arith.constant 4 : i32
    %8 = arith.muli %arg0, %c4_i32_6 : i32
    %c1_i32 = arith.constant 1 : i32
    %9 = arith.addi %8, %c1_i32 : i32
    %c1_i32_7 = arith.constant 1 : i32
    %c1_i32_8 = arith.constant 1 : i32
    %c0_i32_9 = arith.constant 0 : i32
    %c0_i32_10 = arith.constant 0 : i32
    %10 = tpu.memref_slice %arg4[%9, %c0_i32_9, %c0_i32_10] : memref<8x512x512xi8, #tpu.memory_space<any>> -> memref<1x512x512xi8, #tpu.memory_space<any>>
    %11 = tpu.memref_squeeze %10 : memref<1x512x512xi8, #tpu.memory_space<any>> -> memref<512x512xi8, #tpu.memory_space<any>>
    %c0_i32_11 = arith.constant 0 : i32
    %c0_i32_12 = arith.constant 0 : i32
    %12 = tpu.memref_slice %arg11[%c1_i32_7, %c0_i32_11, %c0_i32_12] : memref<4x512x512xi8, #tpu.memory_space<vmem>> -> memref<1x512x512xi8, #tpu.memory_space<vmem>>
    %13 = tpu.memref_squeeze %12 : memref<1x512x512xi8, #tpu.memory_space<vmem>> -> memref<512x512xi8, #tpu.memory_space<vmem>>
    %14 = tpu.memref_slice %arg12[%c1_i32_8] : memref<4x!tpu.dma_semaphore, #tpu.memory_space<semaphore_mem>> -> memref<1x!tpu.dma_semaphore, #tpu.memory_space<semaphore_mem>>
    %15 = tpu.memref_squeeze %14 : memref<1x!tpu.dma_semaphore, #tpu.memory_space<semaphore_mem>> -> memref<!tpu.dma_semaphore, #tpu.memory_space<semaphore_mem>>
    tpu.enqueue_dma source(%11 : memref<512x512xi8, #tpu.memory_space<any>>) target(%13 : memref<512x512xi8, #tpu.memory_space<vmem>>) target_semaphore(%15 : memref<!tpu.dma_semaphore, #tpu.memory_space<semaphore_mem>>)
    %c4_i32_13 = arith.constant 4 : i32
    %16 = arith.muli %arg0, %c4_i32_13 : i32
    %c2_i32 = arith.constant 2 : i32
    %17 = arith.addi %16, %c2_i32 : i32
    %c2_i32_14 = arith.constant 2 : i32
    %c2_i32_15 = arith.constant 2 : i32
    %c0_i32_16 = arith.constant 0 : i32
    %c0_i32_17 = arith.constant 0 : i32
    %18 = tpu.memref_slice %arg4[%17, %c0_i32_16, %c0_i32_17] : memref<8x512x512xi8, #tpu.memory_space<any>> -> memref<1x512x512xi8, #tpu.memory_space<any>>
    %19 = tpu.memref_squeeze %18 : memref<1x512x512xi8, #tpu.memory_space<any>> -> memref<512x512xi8, #tpu.memory_space<any>>
    %c0_i32_18 = arith.constant 0 : i32
    %c0_i32_19 = arith.constant 0 : i32
    %20 = tpu.memref_slice %arg11[%c2_i32_14, %c0_i32_18, %c0_i32_19] : memref<4x512x512xi8, #tpu.memory_space<vmem>> -> memref<1x512x512xi8, #tpu.memory_space<vmem>>
    %21 = tpu.memref_squeeze %20 : memref<1x512x512xi8, #tpu.memory_space<vmem>> -> memref<512x512xi8, #tpu.memory_space<vmem>>
    %22 = tpu.memref_slice %arg12[%c2_i32_15] : memref<4x!tpu.dma_semaphore, #tpu.memory_space<semaphore_mem>> -> memref<1x!tpu.dma_semaphore, #tpu.memory_space<semaphore_mem>>
    %23 = tpu.memref_squeeze %22 : memref<1x!tpu.dma_semaphore, #tpu.memory_space<semaphore_mem>> -> memref<!tpu.dma_semaphore, #tpu.memory_space<semaphore_mem>>
    tpu.enqueue_dma source(%19 : memref<512x512xi8, #tpu.memory_space<any>>) target(%21 : memref<512x512xi8, #tpu.memory_space<vmem>>) target_semaphore(%23 : memref<!tpu.dma_semaphore, #tpu.memory_space<semaphore_mem>>)
    %c4_i32_20 = arith.constant 4 : i32
    %24 = arith.muli %arg0, %c4_i32_20 : i32
    %c3_i32 = arith.constant 3 : i32
    %25 = arith.addi %24, %c3_i32 : i32
    %c3_i32_21 = arith.constant 3 : i32
    %c3_i32_22 = arith.constant 3 : i32
    %c0_i32_23 = arith.constant 0 : i32
    %c0_i32_24 = arith.constant 0 : i32
    %26 = tpu.memref_slice %arg4[%25, %c0_i32_23, %c0_i32_24] : memref<8x512x512xi8, #tpu.memory_space<any>> -> memref<1x512x512xi8, #tpu.memory_space<any>>
    %27 = tpu.memref_squeeze %26 : memref<1x512x512xi8, #tpu.memory_space<any>> -> memref<512x512xi8, #tpu.memory_space<any>>
    %c0_i32_25 = arith.constant 0 : i32
    %c0_i32_26 = arith.constant 0 : i32
    %28 = tpu.memref_slice %arg11[%c3_i32_21, %c0_i32_25, %c0_i32_26] : memref<4x512x512xi8, #tpu.memory_space<vmem>> -> memref<1x512x512xi8, #tpu.memory_space<vmem>>
    %29 = tpu.memref_squeeze %28 : memref<1x512x512xi8, #tpu.memory_space<vmem>> -> memref<512x512xi8, #tpu.memory_space<vmem>>
    %30 = tpu.memref_slice %arg12[%c3_i32_22] : memref<4x!tpu.dma_semaphore, #tpu.memory_space<semaphore_mem>> -> memref<1x!tpu.dma_semaphore, #tpu.memory_space<semaphore_mem>>
    %31 = tpu.memref_squeeze %30 : memref<1x!tpu.dma_semaphore, #tpu.memory_space<semaphore_mem>> -> memref<!tpu.dma_semaphore, #tpu.memory_space<semaphore_mem>>
    tpu.enqueue_dma source(%27 : memref<512x512xi8, #tpu.memory_space<any>>) target(%29 : memref<512x512xi8, #tpu.memory_space<vmem>>) target_semaphore(%31 : memref<!tpu.dma_semaphore, #tpu.memory_space<semaphore_mem>>)
    %c0 = arith.constant 0 : index
    %c0_27 = arith.constant 0 : index
    %c0_28 = arith.constant 0 : index
    %c0_29 = arith.constant 0 : index
    %32 = vector.load %arg1[%c0, %c0_27, %c0_28, %c0_29] : memref<2x14x14x512xf32, #tpu.memory_space<vmem>>, vector<2x1x14x512xf32>
    %33 = vector.shape_cast %32 : vector<2x1x14x512xf32> to vector<2x14x512xf32>
    %c0_30 = arith.constant 0 : index
    %c1 = arith.constant 1 : index
    %c0_31 = arith.constant 0 : index
    %c0_32 = arith.constant 0 : index
    %34 = vector.load %arg1[%c0_30, %c1, %c0_31, %c0_32] : memref<2x14x14x512xf32, #tpu.memory_space<vmem>>, vector<2x1x14x512xf32>
    %35 = vector.shape_cast %34 : vector<2x1x14x512xf32> to vector<2x14x512xf32>
    %36 = arith.addf %33, %35 : vector<2x14x512xf32>
    %c0_33 = arith.constant 0 : index
    %c2 = arith.constant 2 : index
    %c0_34 = arith.constant 0 : index
    %c0_35 = arith.constant 0 : index
    %37 = vector.load %arg1[%c0_33, %c2, %c0_34, %c0_35] : memref<2x14x14x512xf32, #tpu.memory_space<vmem>>, vector<2x1x14x512xf32>
    %38 = vector.shape_cast %37 : vector<2x1x14x512xf32> to vector<2x14x512xf32>
    %39 = arith.addf %36, %38 : vector<2x14x512xf32>
    %c0_36 = arith.constant 0 : index
    %c3 = arith.constant 3 : index
    %c0_37 = arith.constant 0 : index
    %c0_38 = arith.constant 0 : index
    %40 = vector.load %arg1[%c0_36, %c3, %c0_37, %c0_38] : memref<2x14x14x512xf32, #tpu.memory_space<vmem>>, vector<2x1x14x512xf32>
    %41 = vector.shape_cast %40 : vector<2x1x14x512xf32> to vector<2x14x512xf32>
    %42 = arith.addf %39, %41 : vector<2x14x512xf32>
    %c0_39 = arith.constant 0 : index
    %c4 = arith.constant 4 : index
    %c0_40 = arith.constant 0 : index
    %c0_41 = arith.constant 0 : index
    %43 = vector.load %arg1[%c0_39, %c4, %c0_40, %c0_41] : memref<2x14x14x512xf32, #tpu.memory_space<vmem>>, vector<2x1x14x512xf32>
    %44 = vector.shape_cast %43 : vector<2x1x14x512xf32> to vector<2x14x512xf32>
    %45 = arith.addf %42, %44 : vector<2x14x512xf32>
    %46 = vector.extract_strided_slice %45 {offsets = [0, 0, 0], sizes = [2, 1, 512], strides = [1, 1, 1]} : vector<2x14x512xf32> to vector<2x1x512xf32>
    %47 = vector.shape_cast %46 : vector<2x1x512xf32> to vector<2x512xf32>
    %48 = vector.extract_strided_slice %45 {offsets = [0, 1, 0], sizes = [2, 1, 512], strides = [1, 1, 1]} : vector<2x14x512xf32> to vector<2x1x512xf32>
    %49 = vector.shape_cast %48 : vector<2x1x512xf32> to vector<2x512xf32>
    %50 = arith.addf %47, %49 : vector<2x512xf32>
    %51 = vector.extract_strided_slice %45 {offsets = [0, 2, 0], sizes = [2, 1, 512], strides = [1, 1, 1]} : vector<2x14x512xf32> to vector<2x1x512xf32>
    %52 = vector.shape_cast %51 : vector<2x1x512xf32> to vector<2x512xf32>
    %53 = arith.addf %50, %52 : vector<2x512xf32>
    %54 = vector.extract_strided_slice %45 {offsets = [0, 3, 0], sizes = [2, 1, 512], strides = [1, 1, 1]} : vector<2x14x512xf32> to vector<2x1x512xf32>
    %55 = vector.shape_cast %54 : vector<2x1x512xf32> to vector<2x512xf32>
    %56 = arith.addf %53, %55 : vector<2x512xf32>
    %57 = vector.extract_strided_slice %45 {offsets = [0, 4, 0], sizes = [2, 1, 512], strides = [1, 1, 1]} : vector<2x14x512xf32> to vector<2x1x512xf32>
    %58 = vector.shape_cast %57 : vector<2x1x512xf32> to vector<2x512xf32>
    %59 = arith.addf %56, %58 : vector<2x512xf32>
    %cst = arith.constant 4.000000e-02 : f32
    %60 = vector.broadcast %cst : f32 to vector<2x512xf32>
    %61 = arith.mulf %59, %60 : vector<2x512xf32>
    %c0_42 = arith.constant 0 : index
    %c0_43 = arith.constant 0 : index
    %62 = vector.load %arg9[%c0_42, %c0_43] : memref<32x512xf32, #tpu.memory_space<vmem>>, vector<2x512xf32>
    tpu.vector_store %arg9[%c0_42, %c0_43], %61 {strides = array<i32>} : memref<32x512xf32, #tpu.memory_space<vmem>>, vector<2x512xf32>,
    %63 = vector.extract_strided_slice %45 {offsets = [0, 3, 0], sizes = [2, 1, 512], strides = [1, 1, 1]} : vector<2x14x512xf32> to vector<2x1x512xf32>
    %64 = vector.shape_cast %63 : vector<2x1x512xf32> to vector<2x512xf32>
    %65 = vector.extract_strided_slice %45 {offsets = [0, 4, 0], sizes = [2, 1, 512], strides = [1, 1, 1]} : vector<2x14x512xf32> to vector<2x1x512xf32>
    %66 = vector.shape_cast %65 : vector<2x1x512xf32> to vector<2x512xf32>
    %67 = arith.addf %64, %66 : vector<2x512xf32>
    %68 = vector.extract_strided_slice %45 {offsets = [0, 5, 0], sizes = [2, 1, 512], strides = [1, 1, 1]} : vector<2x14x512xf32> to vector<2x1x512xf32>
    %69 = vector.shape_cast %68 : vector<2x1x512xf32> to vector<2x512xf32>
    %70 = arith.addf %67, %69 : vector<2x512xf32>
    %71 = vector.extract_strided_slice %45 {offsets = [0, 6, 0], sizes = [2, 1, 512], strides = [1, 1, 1]} : vector<2x14x512xf32> to vector<2x1x512xf32>
    %72 = vector.shape_cast %71 : vector<2x1x512xf32> to vector<2x512xf32>
    %73 = arith.addf %70, %72 : vector<2x512xf32>
    %74 = vector.extract_strided_slice %45 {offsets = [0, 7, 0], sizes = [2, 1, 512], strides = [1, 1, 1]} : vector<2x14x512xf32> to vector<2x1x512xf32>
    %75 = vector.shape_cast %74 : vector<2x1x512xf32> to vector<2x512xf32>
    %76 = arith.addf %73, %75 : vector<2x512xf32>
    %cst_44 = arith.constant 4.000000e-02 : f32
    %77 = vector.broadcast %cst_44 : f32 to vector<2x512xf32>
    %78 = arith.mulf %76, %77 : vector<2x512xf32>
    %c2_45 = arith.constant 2 : index
    %c0_46 = arith.constant 0 : index
    %79 = vector.load %arg9[%c2_45, %c0_46] : memref<32x512xf32, #tpu.memory_space<vmem>>, vector<2x512xf32>
    tpu.vector_store %arg9[%c2_45, %c0_46], %78 {strides = array<i32>} : memref<32x512xf32, #tpu.memory_space<vmem>>, vector<2x512xf32>,
    %80 = vector.extract_strided_slice %45 {offsets = [0, 6, 0], sizes = [2, 1, 512], strides = [1, 1, 1]} : vector<2x14x512xf32> to vector<2x1x512xf32>
    %81 = vector.shape_cast %80 : vector<2x1x512xf32> to vector<2x512xf32>
    %82 = vector.extract_strided_slice %45 {offsets = [0, 7, 0], sizes = [2, 1, 512], strides = [1, 1, 1]} : vector<2x14x512xf32> to vector<2x1x512xf32>
    %83 = vector.shape_cast %82 : vector<2x1x512xf32> to vector<2x512xf32>
    %84 = arith.addf %81, %83 : vector<2x512xf32>
    %85 = vector.extract_strided_slice %45 {offsets = [0, 8, 0], sizes = [2, 1, 512], strides = [1, 1, 1]} : vector<2x14x512xf32> to vector<2x1x512xf32>
    %86 = vector.shape_cast %85 : vector<2x1x512xf32> to vector<2x512xf32>
    %87 = arith.addf %84, %86 : vector<2x512xf32>
    %88 = vector.extract_strided_slice %45 {offsets = [0, 9, 0], sizes = [2, 1, 512], strides = [1, 1, 1]} : vector<2x14x512xf32> to vector<2x1x512xf32>
    %89 = vector.shape_cast %88 : vector<2x1x512xf32> to vector<2x512xf32>
    %90 = arith.addf %87, %89 : vector<2x512xf32>
    %91 = vector.extract_strided_slice %45 {offsets = [0, 10, 0], sizes = [2, 1, 512], strides = [1, 1, 1]} : vector<2x14x512xf32> to vector<2x1x512xf32>
    %92 = vector.shape_cast %91 : vector<2x1x512xf32> to vector<2x512xf32>
    %93 = arith.addf %90, %92 : vector<2x512xf32>
    %cst_47 = arith.constant 4.000000e-02 : f32
    %94 = vector.broadcast %cst_47 : f32 to vector<2x512xf32>
    %95 = arith.mulf %93, %94 : vector<2x512xf32>
    %c4_48 = arith.constant 4 : index
    %c0_49 = arith.constant 0 : index
    %96 = vector.load %arg9[%c4_48, %c0_49] : memref<32x512xf32, #tpu.memory_space<vmem>>, vector<2x512xf32>
    tpu.vector_store %arg9[%c4_48, %c0_49], %95 {strides = array<i32>} : memref<32x512xf32, #tpu.memory_space<vmem>>, vector<2x512xf32>,
    %97 = vector.extract_strided_slice %45 {offsets = [0, 9, 0], sizes = [2, 1, 512], strides = [1, 1, 1]} : vector<2x14x512xf32> to vector<2x1x512xf32>
    %98 = vector.shape_cast %97 : vector<2x1x512xf32> to vector<2x512xf32>
    %99 = vector.extract_strided_slice %45 {offsets = [0, 10, 0], sizes = [2, 1, 512], strides = [1, 1, 1]} : vector<2x14x512xf32> to vector<2x1x512xf32>
    %100 = vector.shape_cast %99 : vector<2x1x512xf32> to vector<2x512xf32>
    %101 = arith.addf %98, %100 : vector<2x512xf32>
    %102 = vector.extract_strided_slice %45 {offsets = [0, 11, 0], sizes = [2, 1, 512], strides = [1, 1, 1]} : vector<2x14x512xf32> to vector<2x1x512xf32>
    %103 = vector.shape_cast %102 : vector<2x1x512xf32> to vector<2x512xf32>
    %104 = arith.addf %101, %103 : vector<2x512xf32>
    %105 = vector.extract_strided_slice %45 {offsets = [0, 12, 0], sizes = [2, 1, 512], strides = [1, 1, 1]} : vector<2x14x512xf32> to vector<2x1x512xf32>
    %106 = vector.shape_cast %105 : vector<2x1x512xf32> to vector<2x512xf32>
    %107 = arith.addf %104, %106 : vector<2x512xf32>
    %108 = vector.extract_strided_slice %45 {offsets = [0, 13, 0], sizes = [2, 1, 512], strides = [1, 1, 1]} : vector<2x14x512xf32> to vector<2x1x512xf32>
    %109 = vector.shape_cast %108 : vector<2x1x512xf32> to vector<2x512xf32>
    %110 = arith.addf %107, %109 : vector<2x512xf32>
    %cst_50 = arith.constant 4.000000e-02 : f32
    %111 = vector.broadcast %cst_50 : f32 to vector<2x512xf32>
    %112 = arith.mulf %110, %111 : vector<2x512xf32>
    %c6 = arith.constant 6 : index
    %c0_51 = arith.constant 0 : index
    %113 = vector.load %arg9[%c6, %c0_51] : memref<32x512xf32, #tpu.memory_space<vmem>>, vector<2x512xf32>
    tpu.vector_store %arg9[%c6, %c0_51], %112 {strides = array<i32>} : memref<32x512xf32, #tpu.memory_space<vmem>>, vector<2x512xf32>,
    %c0_52 = arith.constant 0 : index
    %c3_53 = arith.constant 3 : index
    %c0_54 = arith.constant 0 : index
    %c0_55 = arith.constant 0 : index
    %114 = vector.load %arg1[%c0_52, %c3_53, %c0_54, %c0_55] : memref<2x14x14x512xf32, #tpu.memory_space<vmem>>, vector<2x1x14x512xf32>
    %115 = vector.shape_cast %114 : vector<2x1x14x512xf32> to vector<2x14x512xf32>
    %c0_56 = arith.constant 0 : index
    %c4_57 = arith.constant 4 : index
    %c0_58 = arith.constant 0 : index
    %c0_59 = arith.constant 0 : index
    %116 = vector.load %arg1[%c0_56, %c4_57, %c0_58, %c0_59] : memref<2x14x14x512xf32, #tpu.memory_space<vmem>>, vector<2x1x14x512xf32>
    %117 = vector.shape_cast %116 : vector<2x1x14x512xf32> to vector<2x14x512xf32>
    %118 = arith.addf %115, %117 : vector<2x14x512xf32>
    %c0_60 = arith.constant 0 : index
    %c5 = arith.constant 5 : index
    %c0_61 = arith.constant 0 : index
    %c0_62 = arith.constant 0 : index
    %119 = vector.load %arg1[%c0_60, %c5, %c0_61, %c0_62] : memref<2x14x14x512xf32, #tpu.memory_space<vmem>>, vector<2x1x14x512xf32>
    %120 = vector.shape_cast %119 : vector<2x1x14x512xf32> to vector<2x14x512xf32>
    %121 = arith.addf %118, %120 : vector<2x14x512xf32>
    %c0_63 = arith.constant 0 : index
    %c6_64 = arith.constant 6 : index
    %c0_65 = arith.constant 0 : index
    %c0_66 = arith.constant 0 : index
    %122 = vector.load %arg1[%c0_63, %c6_64, %c0_65, %c0_66] : memref<2x14x14x512xf32, #tpu.memory_space<vmem>>, vector<2x1x14x512xf32>
    %123 = vector.shape_cast %122 : vector<2x1x14x512xf32> to vector<2x14x512xf32>
    %124 = arith.addf %121, %123 : vector<2x14x512xf32>
    %c0_67 = arith.constant 0 : index
    %c7 = arith.constant 7 : index
    %c0_68 = arith.constant 0 : index
    %c0_69 = arith.constant 0 : index
    %125 = vector.load %arg1[%c0_67, %c7, %c0_68, %c0_69] : memref<2x14x14x512xf32, #tpu.memory_space<vmem>>, vector<2x1x14x512xf32>
    %126 = vector.shape_cast %125 : vector<2x1x14x512xf32> to vector<2x14x512xf32>
    %127 = arith.addf %124, %126 : vector<2x14x512xf32>
    %128 = vector.extract_strided_slice %127 {offsets = [0, 0, 0], sizes = [2, 1, 512], strides = [1, 1, 1]} : vector<2x14x512xf32> to vector<2x1x512xf32>
    %129 = vector.shape_cast %128 : vector<2x1x512xf32> to vector<2x512xf32>
    %130 = vector.extract_strided_slice %127 {offsets = [0, 1, 0], sizes = [2, 1, 512], strides = [1, 1, 1]} : vector<2x14x512xf32> to vector<2x1x512xf32>
    %131 = vector.shape_cast %130 : vector<2x1x512xf32> to vector<2x512xf32>
    %132 = arith.addf %129, %131 : vector<2x512xf32>
    %133 = vector.extract_strided_slice %127 {offsets = [0, 2, 0], sizes = [2, 1, 512], strides = [1, 1, 1]} : vector<2x14x512xf32> to vector<2x1x512xf32>
    %134 = vector.shape_cast %133 : vector<2x1x512xf32> to vector<2x512xf32>
    %135 = arith.addf %132, %134 : vector<2x512xf32>
    %136 = vector.extract_strided_slice %127 {offsets = [0, 3, 0], sizes = [2, 1, 512], strides = [1, 1, 1]} : vector<2x14x512xf32> to vector<2x1x512xf32>
    %137 = vector.shape_cast %136 : vector<2x1x512xf32> to vector<2x512xf32>
    %138 = arith.addf %135, %137 : vector<2x512xf32>
    %139 = vector.extract_strided_slice %127 {offsets = [0, 4, 0], sizes = [2, 1, 512], strides = [1, 1, 1]} : vector<2x14x512xf32> to vector<2x1x512xf32>
    %140 = vector.shape_cast %139 : vector<2x1x512xf32> to vector<2x512xf32>
    %141 = arith.addf %138, %140 : vector<2x512xf32>
    %cst_70 = arith.constant 4.000000e-02 : f32
    %142 = vector.broadcast %cst_70 : f32 to vector<2x512xf32>
    %143 = arith.mulf %141, %142 : vector<2x512xf32>
    %c8 = arith.constant 8 : index
    %c0_71 = arith.constant 0 : index
    %144 = vector.load %arg9[%c8, %c0_71] : memref<32x512xf32, #tpu.memory_space<vmem>>, vector<2x512xf32>
    tpu.vector_store %arg9[%c8, %c0_71], %143 {strides = array<i32>} : memref<32x512xf32, #tpu.memory_space<vmem>>, vector<2x512xf32>,
    %145 = vector.extract_strided_slice %127 {offsets = [0, 3, 0], sizes = [2, 1, 512], strides = [1, 1, 1]} : vector<2x14x512xf32> to vector<2x1x512xf32>
    %146 = vector.shape_cast %145 : vector<2x1x512xf32> to vector<2x512xf32>
    %147 = vector.extract_strided_slice %127 {offsets = [0, 4, 0], sizes = [2, 1, 512], strides = [1, 1, 1]} : vector<2x14x512xf32> to vector<2x1x512xf32>
    %148 = vector.shape_cast %147 : vector<2x1x512xf32> to vector<2x512xf32>
    %149 = arith.addf %146, %148 : vector<2x512xf32>
    %150 = vector.extract_strided_slice %127 {offsets = [0, 5, 0], sizes = [2, 1, 512], strides = [1, 1, 1]} : vector<2x14x512xf32> to vector<2x1x512xf32>
    %151 = vector.shape_cast %150 : vector<2x1x512xf32> to vector<2x512xf32>
    %152 = arith.addf %149, %151 : vector<2x512xf32>
    %153 = vector.extract_strided_slice %127 {offsets = [0, 6, 0], sizes = [2, 1, 512], strides = [1, 1, 1]} : vector<2x14x512xf32> to vector<2x1x512xf32>
    %154 = vector.shape_cast %153 : vector<2x1x512xf32> to vector<2x512xf32>
    %155 = arith.addf %152, %154 : vector<2x512xf32>
    %156 = vector.extract_strided_slice %127 {offsets = [0, 7, 0], sizes = [2, 1, 512], strides = [1, 1, 1]} : vector<2x14x512xf32> to vector<2x1x512xf32>
    %157 = vector.shape_cast %156 : vector<2x1x512xf32> to vector<2x512xf32>
    %158 = arith.addf %155, %157 : vector<2x512xf32>
    %cst_72 = arith.constant 4.000000e-02 : f32
    %159 = vector.broadcast %cst_72 : f32 to vector<2x512xf32>
    %160 = arith.mulf %158, %159 : vector<2x512xf32>
    %c10 = arith.constant 10 : index
    %c0_73 = arith.constant 0 : index
    %161 = vector.load %arg9[%c10, %c0_73] : memref<32x512xf32, #tpu.memory_space<vmem>>, vector<2x512xf32>
    tpu.vector_store %arg9[%c10, %c0_73], %160 {strides = array<i32>} : memref<32x512xf32, #tpu.memory_space<vmem>>, vector<2x512xf32>,
    %162 = vector.extract_strided_slice %127 {offsets = [0, 6, 0], sizes = [2, 1, 512], strides = [1, 1, 1]} : vector<2x14x512xf32> to vector<2x1x512xf32>
    %163 = vector.shape_cast %162 : vector<2x1x512xf32> to vector<2x512xf32>
    %164 = vector.extract_strided_slice %127 {offsets = [0, 7, 0], sizes = [2, 1, 512], strides = [1, 1, 1]} : vector<2x14x512xf32> to vector<2x1x512xf32>
    %165 = vector.shape_cast %164 : vector<2x1x512xf32> to vector<2x512xf32>
    %166 = arith.addf %163, %165 : vector<2x512xf32>
    %167 = vector.extract_strided_slice %127 {offsets = [0, 8, 0], sizes = [2, 1, 512], strides = [1, 1, 1]} : vector<2x14x512xf32> to vector<2x1x512xf32>
    %168 = vector.shape_cast %167 : vector<2x1x512xf32> to vector<2x512xf32>
    %169 = arith.addf %166, %168 : vector<2x512xf32>
    %170 = vector.extract_strided_slice %127 {offsets = [0, 9, 0], sizes = [2, 1, 512], strides = [1, 1, 1]} : vector<2x14x512xf32> to vector<2x1x512xf32>
    %171 = vector.shape_cast %170 : vector<2x1x512xf32> to vector<2x512xf32>
    %172 = arith.addf %169, %171 : vector<2x512xf32>
    %173 = vector.extract_strided_slice %127 {offsets = [0, 10, 0], sizes = [2, 1, 512], strides = [1, 1, 1]} : vector<2x14x512xf32> to vector<2x1x512xf32>
    %174 = vector.shape_cast %173 : vector<2x1x512xf32> to vector<2x512xf32>
    %175 = arith.addf %172, %174 : vector<2x512xf32>
    %cst_74 = arith.constant 4.000000e-02 : f32
    %176 = vector.broadcast %cst_74 : f32 to vector<2x512xf32>
    %177 = arith.mulf %175, %176 : vector<2x512xf32>
    %c12 = arith.constant 12 : index
    %c0_75 = arith.constant 0 : index
    %178 = vector.load %arg9[%c12, %c0_75] : memref<32x512xf32, #tpu.memory_space<vmem>>, vector<2x512xf32>
    tpu.vector_store %arg9[%c12, %c0_75], %177 {strides = array<i32>} : memref<32x512xf32, #tpu.memory_space<vmem>>, vector<2x512xf32>,
    %179 = vector.extract_strided_slice %127 {offsets = [0, 9, 0], sizes = [2, 1, 512], strides = [1, 1, 1]} : vector<2x14x512xf32> to vector<2x1x512xf32>
    %180 = vector.shape_cast %179 : vector<2x1x512xf32> to vector<2x512xf32>
    %181 = vector.extract_strided_slice %127 {offsets = [0, 10, 0], sizes = [2, 1, 512], strides = [1, 1, 1]} : vector<2x14x512xf32> to vector<2x1x512xf32>
    %182 = vector.shape_cast %181 : vector<2x1x512xf32> to vector<2x512xf32>
    %183 = arith.addf %180, %182 : vector<2x512xf32>
    %184 = vector.extract_strided_slice %127 {offsets = [0, 11, 0], sizes = [2, 1, 512], strides = [1, 1, 1]} : vector<2x14x512xf32> to vector<2x1x512xf32>
    %185 = vector.shape_cast %184 : vector<2x1x512xf32> to vector<2x512xf32>
    %186 = arith.addf %183, %185 : vector<2x512xf32>
    %187 = vector.extract_strided_slice %127 {offsets = [0, 12, 0], sizes = [2, 1, 512], strides = [1, 1, 1]} : vector<2x14x512xf32> to vector<2x1x512xf32>
    %188 = vector.shape_cast %187 : vector<2x1x512xf32> to vector<2x512xf32>
    %189 = arith.addf %186, %188 : vector<2x512xf32>
    %190 = vector.extract_strided_slice %127 {offsets = [0, 13, 0], sizes = [2, 1, 512], strides = [1, 1, 1]} : vector<2x14x512xf32> to vector<2x1x512xf32>
    %191 = vector.shape_cast %190 : vector<2x1x512xf32> to vector<2x512xf32>
    %192 = arith.addf %189, %191 : vector<2x512xf32>
    %cst_76 = arith.constant 4.000000e-02 : f32
    %193 = vector.broadcast %cst_76 : f32 to vector<2x512xf32>
    %194 = arith.mulf %192, %193 : vector<2x512xf32>
    %c14 = arith.constant 14 : index
    %c0_77 = arith.constant 0 : index
    %195 = vector.load %arg9[%c14, %c0_77] : memref<32x512xf32, #tpu.memory_space<vmem>>, vector<2x512xf32>
    tpu.vector_store %arg9[%c14, %c0_77], %194 {strides = array<i32>} : memref<32x512xf32, #tpu.memory_space<vmem>>, vector<2x512xf32>,
    %c0_78 = arith.constant 0 : index
    %c6_79 = arith.constant 6 : index
    %c0_80 = arith.constant 0 : index
    %c0_81 = arith.constant 0 : index
    %196 = vector.load %arg1[%c0_78, %c6_79, %c0_80, %c0_81] : memref<2x14x14x512xf32, #tpu.memory_space<vmem>>, vector<2x1x14x512xf32>
    %197 = vector.shape_cast %196 : vector<2x1x14x512xf32> to vector<2x14x512xf32>
    %c0_82 = arith.constant 0 : index
    %c7_83 = arith.constant 7 : index
    %c0_84 = arith.constant 0 : index
    %c0_85 = arith.constant 0 : index
    %198 = vector.load %arg1[%c0_82, %c7_83, %c0_84, %c0_85] : memref<2x14x14x512xf32, #tpu.memory_space<vmem>>, vector<2x1x14x512xf32>
    %199 = vector.shape_cast %198 : vector<2x1x14x512xf32> to vector<2x14x512xf32>
    %200 = arith.addf %197, %199 : vector<2x14x512xf32>
    %c0_86 = arith.constant 0 : index
    %c8_87 = arith.constant 8 : index
    %c0_88 = arith.constant 0 : index
    %c0_89 = arith.constant 0 : index
    %201 = vector.load %arg1[%c0_86, %c8_87, %c0_88, %c0_89] : memref<2x14x14x512xf32, #tpu.memory_space<vmem>>, vector<2x1x14x512xf32>
    %202 = vector.shape_cast %201 : vector<2x1x14x512xf32> to vector<2x14x512xf32>
    %203 = arith.addf %200, %202 : vector<2x14x512xf32>
    %c0_90 = arith.constant 0 : index
    %c9 = arith.constant 9 : index
    %c0_91 = arith.constant 0 : index
    %c0_92 = arith.constant 0 : index
    %204 = vector.load %arg1[%c0_90, %c9, %c0_91, %c0_92] : memref<2x14x14x512xf32, #tpu.memory_space<vmem>>, vector<2x1x14x512xf32>
    %205 = vector.shape_cast %204 : vector<2x1x14x512xf32> to vector<2x14x512xf32>
    %206 = arith.addf %203, %205 : vector<2x14x512xf32>
    %c0_93 = arith.constant 0 : index
    %c10_94 = arith.constant 10 : index
    %c0_95 = arith.constant 0 : index
    %c0_96 = arith.constant 0 : index
    %207 = vector.load %arg1[%c0_93, %c10_94, %c0_95, %c0_96] : memref<2x14x14x512xf32, #tpu.memory_space<vmem>>, vector<2x1x14x512xf32>
    %208 = vector.shape_cast %207 : vector<2x1x14x512xf32> to vector<2x14x512xf32>
    %209 = arith.addf %206, %208 : vector<2x14x512xf32>
    %210 = vector.extract_strided_slice %209 {offsets = [0, 0, 0], sizes = [2, 1, 512], strides = [1, 1, 1]} : vector<2x14x512xf32> to vector<2x1x512xf32>
    %211 = vector.shape_cast %210 : vector<2x1x512xf32> to vector<2x512xf32>
    %212 = vector.extract_strided_slice %209 {offsets = [0, 1, 0], sizes = [2, 1, 512], strides = [1, 1, 1]} : vector<2x14x512xf32> to vector<2x1x512xf32>
    %213 = vector.shape_cast %212 : vector<2x1x512xf32> to vector<2x512xf32>
    %214 = arith.addf %211, %213 : vector<2x512xf32>
    %215 = vector.extract_strided_slice %209 {offsets = [0, 2, 0], sizes = [2, 1, 512], strides = [1, 1, 1]} : vector<2x14x512xf32> to vector<2x1x512xf32>
    %216 = vector.shape_cast %215 : vector<2x1x512xf32> to vector<2x512xf32>
    %217 = arith.addf %214, %216 : vector<2x512xf32>
    %218 = vector.extract_strided_slice %209 {offsets = [0, 3, 0], sizes = [2, 1, 512], strides = [1, 1, 1]} : vector<2x14x512xf32> to vector<2x1x512xf32>
    %219 = vector.shape_cast %218 : vector<2x1x512xf32> to vector<2x512xf32>
    %220 = arith.addf %217, %219 : vector<2x512xf32>
    %221 = vector.extract_strided_slice %209 {offsets = [0, 4, 0], sizes = [2, 1, 512], strides = [1, 1, 1]} : vector<2x14x512xf32> to vector<2x1x512xf32>
    %222 = vector.shape_cast %221 : vector<2x1x512xf32> to vector<2x512xf32>
    %223 = arith.addf %220, %222 : vector<2x512xf32>
    %cst_97 = arith.constant 4.000000e-02 : f32
    %224 = vector.broadcast %cst_97 : f32 to vector<2x512xf32>
    %225 = arith.mulf %223, %224 : vector<2x512xf32>
    %c16 = arith.constant 16 : index
    %c0_98 = arith.constant 0 : index
    %226 = vector.load %arg9[%c16, %c0_98] : memref<32x512xf32, #tpu.memory_space<vmem>>, vector<2x512xf32>
    tpu.vector_store %arg9[%c16, %c0_98], %225 {strides = array<i32>} : memref<32x512xf32, #tpu.memory_space<vmem>>, vector<2x512xf32>,
    %227 = vector.extract_strided_slice %209 {offsets = [0, 3, 0], sizes = [2, 1, 512], strides = [1, 1, 1]} : vector<2x14x512xf32> to vector<2x1x512xf32>
    %228 = vector.shape_cast %227 : vector<2x1x512xf32> to vector<2x512xf32>
    %229 = vector.extract_strided_slice %209 {offsets = [0, 4, 0], sizes = [2, 1, 512], strides = [1, 1, 1]} : vector<2x14x512xf32> to vector<2x1x512xf32>
    %230 = vector.shape_cast %229 : vector<2x1x512xf32> to vector<2x512xf32>
    %231 = arith.addf %228, %230 : vector<2x512xf32>
    %232 = vector.extract_strided_slice %209 {offsets = [0, 5, 0], sizes = [2, 1, 512], strides = [1, 1, 1]} : vector<2x14x512xf32> to vector<2x1x512xf32>
    %233 = vector.shape_cast %232 : vector<2x1x512xf32> to vector<2x512xf32>
    %234 = arith.addf %231, %233 : vector<2x512xf32>
    %235 = vector.extract_strided_slice %209 {offsets = [0, 6, 0], sizes = [2, 1, 512], strides = [1, 1, 1]} : vector<2x14x512xf32> to vector<2x1x512xf32>
    %236 = vector.shape_cast %235 : vector<2x1x512xf32> to vector<2x512xf32>
    %237 = arith.addf %234, %236 : vector<2x512xf32>
    %238 = vector.extract_strided_slice %209 {offsets = [0, 7, 0], sizes = [2, 1, 512], strides = [1, 1, 1]} : vector<2x14x512xf32> to vector<2x1x512xf32>
    %239 = vector.shape_cast %238 : vector<2x1x512xf32> to vector<2x512xf32>
    %240 = arith.addf %237, %239 : vector<2x512xf32>
    %cst_99 = arith.constant 4.000000e-02 : f32
    %241 = vector.broadcast %cst_99 : f32 to vector<2x512xf32>
    %242 = arith.mulf %240, %241 : vector<2x512xf32>
    %c18 = arith.constant 18 : index
    %c0_100 = arith.constant 0 : index
    %243 = vector.load %arg9[%c18, %c0_100] : memref<32x512xf32, #tpu.memory_space<vmem>>, vector<2x512xf32>
    tpu.vector_store %arg9[%c18, %c0_100], %242 {strides = array<i32>} : memref<32x512xf32, #tpu.memory_space<vmem>>, vector<2x512xf32>,
    %244 = vector.extract_strided_slice %209 {offsets = [0, 6, 0], sizes = [2, 1, 512], strides = [1, 1, 1]} : vector<2x14x512xf32> to vector<2x1x512xf32>
    %245 = vector.shape_cast %244 : vector<2x1x512xf32> to vector<2x512xf32>
    %246 = vector.extract_strided_slice %209 {offsets = [0, 7, 0], sizes = [2, 1, 512], strides = [1, 1, 1]} : vector<2x14x512xf32> to vector<2x1x512xf32>
    %247 = vector.shape_cast %246 : vector<2x1x512xf32> to vector<2x512xf32>
    %248 = arith.addf %245, %247 : vector<2x512xf32>
    %249 = vector.extract_strided_slice %209 {offsets = [0, 8, 0], sizes = [2, 1, 512], strides = [1, 1, 1]} : vector<2x14x512xf32> to vector<2x1x512xf32>
    %250 = vector.shape_cast %249 : vector<2x1x512xf32> to vector<2x512xf32>
    %251 = arith.addf %248, %250 : vector<2x512xf32>
    %252 = vector.extract_strided_slice %209 {offsets = [0, 9, 0], sizes = [2, 1, 512], strides = [1, 1, 1]} : vector<2x14x512xf32> to vector<2x1x512xf32>
    %253 = vector.shape_cast %252 : vector<2x1x512xf32> to vector<2x512xf32>
    %254 = arith.addf %251, %253 : vector<2x512xf32>
    %255 = vector.extract_strided_slice %209 {offsets = [0, 10, 0], sizes = [2, 1, 512], strides = [1, 1, 1]} : vector<2x14x512xf32> to vector<2x1x512xf32>
    %256 = vector.shape_cast %255 : vector<2x1x512xf32> to vector<2x512xf32>
    %257 = arith.addf %254, %256 : vector<2x512xf32>
    %cst_101 = arith.constant 4.000000e-02 : f32
    %258 = vector.broadcast %cst_101 : f32 to vector<2x512xf32>
    %259 = arith.mulf %257, %258 : vector<2x512xf32>
    %c20 = arith.constant 20 : index
    %c0_102 = arith.constant 0 : index
    %260 = vector.load %arg9[%c20, %c0_102] : memref<32x512xf32, #tpu.memory_space<vmem>>, vector<2x512xf32>
    tpu.vector_store %arg9[%c20, %c0_102], %259 {strides = array<i32>} : memref<32x512xf32, #tpu.memory_space<vmem>>, vector<2x512xf32>,
    %261 = vector.extract_strided_slice %209 {offsets = [0, 9, 0], sizes = [2, 1, 512], strides = [1, 1, 1]} : vector<2x14x512xf32> to vector<2x1x512xf32>
    %262 = vector.shape_cast %261 : vector<2x1x512xf32> to vector<2x512xf32>
    %263 = vector.extract_strided_slice %209 {offsets = [0, 10, 0], sizes = [2, 1, 512], strides = [1, 1, 1]} : vector<2x14x512xf32> to vector<2x1x512xf32>
    %264 = vector.shape_cast %263 : vector<2x1x512xf32> to vector<2x512xf32>
    %265 = arith.addf %262, %264 : vector<2x512xf32>
    %266 = vector.extract_strided_slice %209 {offsets = [0, 11, 0], sizes = [2, 1, 512], strides = [1, 1, 1]} : vector<2x14x512xf32> to vector<2x1x512xf32>
    %267 = vector.shape_cast %266 : vector<2x1x512xf32> to vector<2x512xf32>
    %268 = arith.addf %265, %267 : vector<2x512xf32>
    %269 = vector.extract_strided_slice %209 {offsets = [0, 12, 0], sizes = [2, 1, 512], strides = [1, 1, 1]} : vector<2x14x512xf32> to vector<2x1x512xf32>
    %270 = vector.shape_cast %269 : vector<2x1x512xf32> to vector<2x512xf32>
    %271 = arith.addf %268, %270 : vector<2x512xf32>
    %272 = vector.extract_strided_slice %209 {offsets = [0, 13, 0], sizes = [2, 1, 512], strides = [1, 1, 1]} : vector<2x14x512xf32> to vector<2x1x512xf32>
    %273 = vector.shape_cast %272 : vector<2x1x512xf32> to vector<2x512xf32>
    %274 = arith.addf %271, %273 : vector<2x512xf32>
    %cst_103 = arith.constant 4.000000e-02 : f32
    %275 = vector.broadcast %cst_103 : f32 to vector<2x512xf32>
    %276 = arith.mulf %274, %275 : vector<2x512xf32>
    %c22 = arith.constant 22 : index
    %c0_104 = arith.constant 0 : index
    %277 = vector.load %arg9[%c22, %c0_104] : memref<32x512xf32, #tpu.memory_space<vmem>>, vector<2x512xf32>
    tpu.vector_store %arg9[%c22, %c0_104], %276 {strides = array<i32>} : memref<32x512xf32, #tpu.memory_space<vmem>>, vector<2x512xf32>,
    %c0_105 = arith.constant 0 : index
    %c9_106 = arith.constant 9 : index
    %c0_107 = arith.constant 0 : index
    %c0_108 = arith.constant 0 : index
    %278 = vector.load %arg1[%c0_105, %c9_106, %c0_107, %c0_108] : memref<2x14x14x512xf32, #tpu.memory_space<vmem>>, vector<2x1x14x512xf32>
    %279 = vector.shape_cast %278 : vector<2x1x14x512xf32> to vector<2x14x512xf32>
    %c0_109 = arith.constant 0 : index
    %c10_110 = arith.constant 10 : index
    %c0_111 = arith.constant 0 : index
    %c0_112 = arith.constant 0 : index
    %280 = vector.load %arg1[%c0_109, %c10_110, %c0_111, %c0_112] : memref<2x14x14x512xf32, #tpu.memory_space<vmem>>, vector<2x1x14x512xf32>
    %281 = vector.shape_cast %280 : vector<2x1x14x512xf32> to vector<2x14x512xf32>
    %282 = arith.addf %279, %281 : vector<2x14x512xf32>
    %c0_113 = arith.constant 0 : index
    %c11 = arith.constant 11 : index
    %c0_114 = arith.constant 0 : index
    %c0_115 = arith.constant 0 : index
    %283 = vector.load %arg1[%c0_113, %c11, %c0_114, %c0_115] : memref<2x14x14x512xf32, #tpu.memory_space<vmem>>, vector<2x1x14x512xf32>
    %284 = vector.shape_cast %283 : vector<2x1x14x512xf32> to vector<2x14x512xf32>
    %285 = arith.addf %282, %284 : vector<2x14x512xf32>
    %c0_116 = arith.constant 0 : index
    %c12_117 = arith.constant 12 : index
    %c0_118 = arith.constant 0 : index
    %c0_119 = arith.constant 0 : index
    %286 = vector.load %arg1[%c0_116, %c12_117, %c0_118, %c0_119] : memref<2x14x14x512xf32, #tpu.memory_space<vmem>>, vector<2x1x14x512xf32>
    %287 = vector.shape_cast %286 : vector<2x1x14x512xf32> to vector<2x14x512xf32>
    %288 = arith.addf %285, %287 : vector<2x14x512xf32>
    %c0_120 = arith.constant 0 : index
    %c13 = arith.constant 13 : index
    %c0_121 = arith.constant 0 : index
    %c0_122 = arith.constant 0 : index
    %289 = vector.load %arg1[%c0_120, %c13, %c0_121, %c0_122] : memref<2x14x14x512xf32, #tpu.memory_space<vmem>>, vector<2x1x14x512xf32>
    %290 = vector.shape_cast %289 : vector<2x1x14x512xf32> to vector<2x14x512xf32>
    %291 = arith.addf %288, %290 : vector<2x14x512xf32>
    %292 = vector.extract_strided_slice %291 {offsets = [0, 0, 0], sizes = [2, 1, 512], strides = [1, 1, 1]} : vector<2x14x512xf32> to vector<2x1x512xf32>
    %293 = vector.shape_cast %292 : vector<2x1x512xf32> to vector<2x512xf32>
    %294 = vector.extract_strided_slice %291 {offsets = [0, 1, 0], sizes = [2, 1, 512], strides = [1, 1, 1]} : vector<2x14x512xf32> to vector<2x1x512xf32>
    %295 = vector.shape_cast %294 : vector<2x1x512xf32> to vector<2x512xf32>
    %296 = arith.addf %293, %295 : vector<2x512xf32>
    %297 = vector.extract_strided_slice %291 {offsets = [0, 2, 0], sizes = [2, 1, 512], strides = [1, 1, 1]} : vector<2x14x512xf32> to vector<2x1x512xf32>
    %298 = vector.shape_cast %297 : vector<2x1x512xf32> to vector<2x512xf32>
    %299 = arith.addf %296, %298 : vector<2x512xf32>
    %300 = vector.extract_strided_slice %291 {offsets = [0, 3, 0], sizes = [2, 1, 512], strides = [1, 1, 1]} : vector<2x14x512xf32> to vector<2x1x512xf32>
    %301 = vector.shape_cast %300 : vector<2x1x512xf32> to vector<2x512xf32>
    %302 = arith.addf %299, %301 : vector<2x512xf32>
    %303 = vector.extract_strided_slice %291 {offsets = [0, 4, 0], sizes = [2, 1, 512], strides = [1, 1, 1]} : vector<2x14x512xf32> to vector<2x1x512xf32>
    %304 = vector.shape_cast %303 : vector<2x1x512xf32> to vector<2x512xf32>
    %305 = arith.addf %302, %304 : vector<2x512xf32>
    %cst_123 = arith.constant 4.000000e-02 : f32
    %306 = vector.broadcast %cst_123 : f32 to vector<2x512xf32>
    %307 = arith.mulf %305, %306 : vector<2x512xf32>
    %c24 = arith.constant 24 : index
    %c0_124 = arith.constant 0 : index
    %308 = vector.load %arg9[%c24, %c0_124] : memref<32x512xf32, #tpu.memory_space<vmem>>, vector<2x512xf32>
    tpu.vector_store %arg9[%c24, %c0_124], %307 {strides = array<i32>} : memref<32x512xf32, #tpu.memory_space<vmem>>, vector<2x512xf32>,
    %309 = vector.extract_strided_slice %291 {offsets = [0, 3, 0], sizes = [2, 1, 512], strides = [1, 1, 1]} : vector<2x14x512xf32> to vector<2x1x512xf32>
    %310 = vector.shape_cast %309 : vector<2x1x512xf32> to vector<2x512xf32>
    %311 = vector.extract_strided_slice %291 {offsets = [0, 4, 0], sizes = [2, 1, 512], strides = [1, 1, 1]} : vector<2x14x512xf32> to vector<2x1x512xf32>
    %312 = vector.shape_cast %311 : vector<2x1x512xf32> to vector<2x512xf32>
    %313 = arith.addf %310, %312 : vector<2x512xf32>
    %314 = vector.extract_strided_slice %291 {offsets = [0, 5, 0], sizes = [2, 1, 512], strides = [1, 1, 1]} : vector<2x14x512xf32> to vector<2x1x512xf32>
    %315 = vector.shape_cast %314 : vector<2x1x512xf32> to vector<2x512xf32>
    %316 = arith.addf %313, %315 : vector<2x512xf32>
    %317 = vector.extract_strided_slice %291 {offsets = [0, 6, 0], sizes = [2, 1, 512], strides = [1, 1, 1]} : vector<2x14x512xf32> to vector<2x1x512xf32>
    %318 = vector.shape_cast %317 : vector<2x1x512xf32> to vector<2x512xf32>
    %319 = arith.addf %316, %318 : vector<2x512xf32>
    %320 = vector.extract_strided_slice %291 {offsets = [0, 7, 0], sizes = [2, 1, 512], strides = [1, 1, 1]} : vector<2x14x512xf32> to vector<2x1x512xf32>
    %321 = vector.shape_cast %320 : vector<2x1x512xf32> to vector<2x512xf32>
    %322 = arith.addf %319, %321 : vector<2x512xf32>
    %cst_125 = arith.constant 4.000000e-02 : f32
    %323 = vector.broadcast %cst_125 : f32 to vector<2x512xf32>
    %324 = arith.mulf %322, %323 : vector<2x512xf32>
    %c26 = arith.constant 26 : index
    %c0_126 = arith.constant 0 : index
    %325 = vector.load %arg9[%c26, %c0_126] : memref<32x512xf32, #tpu.memory_space<vmem>>, vector<2x512xf32>
    tpu.vector_store %arg9[%c26, %c0_126], %324 {strides = array<i32>} : memref<32x512xf32, #tpu.memory_space<vmem>>, vector<2x512xf32>,
    %326 = vector.extract_strided_slice %291 {offsets = [0, 6, 0], sizes = [2, 1, 512], strides = [1, 1, 1]} : vector<2x14x512xf32> to vector<2x1x512xf32>
    %327 = vector.shape_cast %326 : vector<2x1x512xf32> to vector<2x512xf32>
    %328 = vector.extract_strided_slice %291 {offsets = [0, 7, 0], sizes = [2, 1, 512], strides = [1, 1, 1]} : vector<2x14x512xf32> to vector<2x1x512xf32>
    %329 = vector.shape_cast %328 : vector<2x1x512xf32> to vector<2x512xf32>
    %330 = arith.addf %327, %329 : vector<2x512xf32>
    %331 = vector.extract_strided_slice %291 {offsets = [0, 8, 0], sizes = [2, 1, 512], strides = [1, 1, 1]} : vector<2x14x512xf32> to vector<2x1x512xf32>
    %332 = vector.shape_cast %331 : vector<2x1x512xf32> to vector<2x512xf32>
    %333 = arith.addf %330, %332 : vector<2x512xf32>
    %334 = vector.extract_strided_slice %291 {offsets = [0, 9, 0], sizes = [2, 1, 512], strides = [1, 1, 1]} : vector<2x14x512xf32> to vector<2x1x512xf32>
    %335 = vector.shape_cast %334 : vector<2x1x512xf32> to vector<2x512xf32>
    %336 = arith.addf %333, %335 : vector<2x512xf32>
    %337 = vector.extract_strided_slice %291 {offsets = [0, 10, 0], sizes = [2, 1, 512], strides = [1, 1, 1]} : vector<2x14x512xf32> to vector<2x1x512xf32>
    %338 = vector.shape_cast %337 : vector<2x1x512xf32> to vector<2x512xf32>
    %339 = arith.addf %336, %338 : vector<2x512xf32>
    %cst_127 = arith.constant 4.000000e-02 : f32
    %340 = vector.broadcast %cst_127 : f32 to vector<2x512xf32>
    %341 = arith.mulf %339, %340 : vector<2x512xf32>
    %c28 = arith.constant 28 : index
    %c0_128 = arith.constant 0 : index
    %342 = vector.load %arg9[%c28, %c0_128] : memref<32x512xf32, #tpu.memory_space<vmem>>, vector<2x512xf32>
    tpu.vector_store %arg9[%c28, %c0_128], %341 {strides = array<i32>} : memref<32x512xf32, #tpu.memory_space<vmem>>, vector<2x512xf32>,
    %343 = vector.extract_strided_slice %291 {offsets = [0, 9, 0], sizes = [2, 1, 512], strides = [1, 1, 1]} : vector<2x14x512xf32> to vector<2x1x512xf32>
    %344 = vector.shape_cast %343 : vector<2x1x512xf32> to vector<2x512xf32>
    %345 = vector.extract_strided_slice %291 {offsets = [0, 10, 0], sizes = [2, 1, 512], strides = [1, 1, 1]} : vector<2x14x512xf32> to vector<2x1x512xf32>
    %346 = vector.shape_cast %345 : vector<2x1x512xf32> to vector<2x512xf32>
    %347 = arith.addf %344, %346 : vector<2x512xf32>
    %348 = vector.extract_strided_slice %291 {offsets = [0, 11, 0], sizes = [2, 1, 512], strides = [1, 1, 1]} : vector<2x14x512xf32> to vector<2x1x512xf32>
    %349 = vector.shape_cast %348 : vector<2x1x512xf32> to vector<2x512xf32>
    %350 = arith.addf %347, %349 : vector<2x512xf32>
    %351 = vector.extract_strided_slice %291 {offsets = [0, 12, 0], sizes = [2, 1, 512], strides = [1, 1, 1]} : vector<2x14x512xf32> to vector<2x1x512xf32>
    %352 = vector.shape_cast %351 : vector<2x1x512xf32> to vector<2x512xf32>
    %353 = arith.addf %350, %352 : vector<2x512xf32>
    %354 = vector.extract_strided_slice %291 {offsets = [0, 13, 0], sizes = [2, 1, 512], strides = [1, 1, 1]} : vector<2x14x512xf32> to vector<2x1x512xf32>
    %355 = vector.shape_cast %354 : vector<2x1x512xf32> to vector<2x512xf32>
    %356 = arith.addf %353, %355 : vector<2x512xf32>
    %cst_129 = arith.constant 4.000000e-02 : f32
    %357 = vector.broadcast %cst_129 : f32 to vector<2x512xf32>
    %358 = arith.mulf %356, %357 : vector<2x512xf32>
    %c30 = arith.constant 30 : index
    %c0_130 = arith.constant 0 : index
    %359 = vector.load %arg9[%c30, %c0_130] : memref<32x512xf32, #tpu.memory_space<vmem>>, vector<2x512xf32>
    tpu.vector_store %arg9[%c30, %c0_130], %358 {strides = array<i32>} : memref<32x512xf32, #tpu.memory_space<vmem>>, vector<2x512xf32>,
    %c0_131 = arith.constant 0 : index
    %c0_132 = arith.constant 0 : index
    %360 = vector.load %arg9[%c0_131, %c0_132] : memref<32x512xf32, #tpu.memory_space<vmem>>, vector<32x512xf32>
    %361 = arith.truncf %360 : vector<32x512xf32> to vector<32x512xbf16>
    %c0_133 = arith.constant 0 : index
    %c0_134 = arith.constant 0 : index
    %362 = vector.load %arg2[%c0_133, %c0_134] : memref<512x128xbf16, #tpu.memory_space<vmem>>, vector<512x128xbf16>
    %cst_135 = arith.constant dense<0.000000e+00> : vector<32x128xf32>
    %363 = tpu.matmul %361, %362, %cst_135 {dimension_numbers = #tpu.dot_dimension_numbers<[1], [0], [0], [1], [0, 0, 1, 1], [], []>} : vector<32x512xbf16>, vector<512x128xbf16>, vector<32x128xf32> -> vector<32x128xf32>
    %c0_136 = arith.constant 0 : index
    %c0_137 = arith.constant 0 : index
    %364 = vector.load %arg3[%c0_136, %c0_137] : memref<1x128xf32, #tpu.memory_space<vmem>>, vector<1x128xf32>
    %365 = vector.broadcast %364 : vector<1x128xf32> to vector<32x128xf32>
    %366 = arith.addf %363, %365 : vector<32x128xf32>
    %cst_138 = arith.constant 0.000000e+00 : f32
    %367 = vector.broadcast %cst_138 : f32 to vector<32x128xf32>
    %368 = arith.maximumf %366, %367 : vector<32x128xf32>
    %369 = vector.extract_strided_slice %368 {offsets = [0, 0], sizes = [2, 128], strides = [1, 1]} : vector<32x128xf32> to vector<2x128xf32>
    %c0_139 = arith.constant 0 : index
    %c0_140 = arith.constant 0 : index
    %370 = vector.load %arg10[%c0_139, %c0_140] : memref<2x2048xf32, #tpu.memory_space<vmem>>, vector<2x128xf32>
    tpu.vector_store %arg10[%c0_139, %c0_140], %369 {strides = array<i32>} : memref<2x2048xf32, #tpu.memory_space<vmem>>, vector<2x128xf32>,
    %371 = vector.extract_strided_slice %368 {offsets = [2, 0], sizes = [2, 128], strides = [1, 1]} : vector<32x128xf32> to vector<2x128xf32>
    %c0_141 = arith.constant 0 : index
    %c128 = arith.constant 128 : index
    %372 = vector.load %arg10[%c0_141, %c128] : memref<2x2048xf32, #tpu.memory_space<vmem>>, vector<2x128xf32>
    tpu.vector_store %arg10[%c0_141, %c128], %371 {strides = array<i32>} : memref<2x2048xf32, #tpu.memory_space<vmem>>, vector<2x128xf32>,
    %373 = vector.extract_strided_slice %368 {offsets = [4, 0], sizes = [2, 128], strides = [1, 1]} : vector<32x128xf32> to vector<2x128xf32>
    %c0_142 = arith.constant 0 : index
    %c256 = arith.constant 256 : index
    %374 = vector.load %arg10[%c0_142, %c256] : memref<2x2048xf32, #tpu.memory_space<vmem>>, vector<2x128xf32>
    tpu.vector_store %arg10[%c0_142, %c256], %373 {strides = array<i32>} : memref<2x2048xf32, #tpu.memory_space<vmem>>, vector<2x128xf32>,
    %375 = vector.extract_strided_slice %368 {offsets = [6, 0], sizes = [2, 128], strides = [1, 1]} : vector<32x128xf32> to vector<2x128xf32>
    %c0_143 = arith.constant 0 : index
    %c384 = arith.constant 384 : index
    %376 = vector.load %arg10[%c0_143, %c384] : memref<2x2048xf32, #tpu.memory_space<vmem>>, vector<2x128xf32>
    tpu.vector_store %arg10[%c0_143, %c384], %375 {strides = array<i32>} : memref<2x2048xf32, #tpu.memory_space<vmem>>, vector<2x128xf32>,
    %377 = vector.extract_strided_slice %368 {offsets = [8, 0], sizes = [2, 128], strides = [1, 1]} : vector<32x128xf32> to vector<2x128xf32>
    %c0_144 = arith.constant 0 : index
    %c512 = arith.constant 512 : index
    %378 = vector.load %arg10[%c0_144, %c512] : memref<2x2048xf32, #tpu.memory_space<vmem>>, vector<2x128xf32>
    tpu.vector_store %arg10[%c0_144, %c512], %377 {strides = array<i32>} : memref<2x2048xf32, #tpu.memory_space<vmem>>, vector<2x128xf32>,
    %379 = vector.extract_strided_slice %368 {offsets = [10, 0], sizes = [2, 128], strides = [1, 1]} : vector<32x128xf32> to vector<2x128xf32>
    %c0_145 = arith.constant 0 : index
    %c640 = arith.constant 640 : index
    %380 = vector.load %arg10[%c0_145, %c640] : memref<2x2048xf32, #tpu.memory_space<vmem>>, vector<2x128xf32>
    tpu.vector_store %arg10[%c0_145, %c640], %379 {strides = array<i32>} : memref<2x2048xf32, #tpu.memory_space<vmem>>, vector<2x128xf32>,
    %381 = vector.extract_strided_slice %368 {offsets = [12, 0], sizes = [2, 128], strides = [1, 1]} : vector<32x128xf32> to vector<2x128xf32>
    %c0_146 = arith.constant 0 : index
    %c768 = arith.constant 768 : index
    %382 = vector.load %arg10[%c0_146, %c768] : memref<2x2048xf32, #tpu.memory_space<vmem>>, vector<2x128xf32>
    tpu.vector_store %arg10[%c0_146, %c768], %381 {strides = array<i32>} : memref<2x2048xf32, #tpu.memory_space<vmem>>, vector<2x128xf32>,
    %383 = vector.extract_strided_slice %368 {offsets = [14, 0], sizes = [2, 128], strides = [1, 1]} : vector<32x128xf32> to vector<2x128xf32>
    %c0_147 = arith.constant 0 : index
    %c896 = arith.constant 896 : index
    %384 = vector.load %arg10[%c0_147, %c896] : memref<2x2048xf32, #tpu.memory_space<vmem>>, vector<2x128xf32>
    tpu.vector_store %arg10[%c0_147, %c896], %383 {strides = array<i32>} : memref<2x2048xf32, #tpu.memory_space<vmem>>, vector<2x128xf32>,
    %385 = vector.extract_strided_slice %368 {offsets = [16, 0], sizes = [2, 128], strides = [1, 1]} : vector<32x128xf32> to vector<2x128xf32>
    %c0_148 = arith.constant 0 : index
    %c1024 = arith.constant 1024 : index
    %386 = vector.load %arg10[%c0_148, %c1024] : memref<2x2048xf32, #tpu.memory_space<vmem>>, vector<2x128xf32>
    tpu.vector_store %arg10[%c0_148, %c1024], %385 {strides = array<i32>} : memref<2x2048xf32, #tpu.memory_space<vmem>>, vector<2x128xf32>,
    %387 = vector.extract_strided_slice %368 {offsets = [18, 0], sizes = [2, 128], strides = [1, 1]} : vector<32x128xf32> to vector<2x128xf32>
    %c0_149 = arith.constant 0 : index
    %c1152 = arith.constant 1152 : index
    %388 = vector.load %arg10[%c0_149, %c1152] : memref<2x2048xf32, #tpu.memory_space<vmem>>, vector<2x128xf32>
    tpu.vector_store %arg10[%c0_149, %c1152], %387 {strides = array<i32>} : memref<2x2048xf32, #tpu.memory_space<vmem>>, vector<2x128xf32>,
    %389 = vector.extract_strided_slice %368 {offsets = [20, 0], sizes = [2, 128], strides = [1, 1]} : vector<32x128xf32> to vector<2x128xf32>
    %c0_150 = arith.constant 0 : index
    %c1280 = arith.constant 1280 : index
    %390 = vector.load %arg10[%c0_150, %c1280] : memref<2x2048xf32, #tpu.memory_space<vmem>>, vector<2x128xf32>
    tpu.vector_store %arg10[%c0_150, %c1280], %389 {strides = array<i32>} : memref<2x2048xf32, #tpu.memory_space<vmem>>, vector<2x128xf32>,
    %391 = vector.extract_strided_slice %368 {offsets = [22, 0], sizes = [2, 128], strides = [1, 1]} : vector<32x128xf32> to vector<2x128xf32>
    %c0_151 = arith.constant 0 : index
    %c1408 = arith.constant 1408 : index
    %392 = vector.load %arg10[%c0_151, %c1408] : memref<2x2048xf32, #tpu.memory_space<vmem>>, vector<2x128xf32>
    tpu.vector_store %arg10[%c0_151, %c1408], %391 {strides = array<i32>} : memref<2x2048xf32, #tpu.memory_space<vmem>>, vector<2x128xf32>,
    %393 = vector.extract_strided_slice %368 {offsets = [24, 0], sizes = [2, 128], strides = [1, 1]} : vector<32x128xf32> to vector<2x128xf32>
    %c0_152 = arith.constant 0 : index
    %c1536 = arith.constant 1536 : index
    %394 = vector.load %arg10[%c0_152, %c1536] : memref<2x2048xf32, #tpu.memory_space<vmem>>, vector<2x128xf32>
    tpu.vector_store %arg10[%c0_152, %c1536], %393 {strides = array<i32>} : memref<2x2048xf32, #tpu.memory_space<vmem>>, vector<2x128xf32>,
    %395 = vector.extract_strided_slice %368 {offsets = [26, 0], sizes = [2, 128], strides = [1, 1]} : vector<32x128xf32> to vector<2x128xf32>
    %c0_153 = arith.constant 0 : index
    %c1664 = arith.constant 1664 : index
    %396 = vector.load %arg10[%c0_153, %c1664] : memref<2x2048xf32, #tpu.memory_space<vmem>>, vector<2x128xf32>
    tpu.vector_store %arg10[%c0_153, %c1664], %395 {strides = array<i32>} : memref<2x2048xf32, #tpu.memory_space<vmem>>, vector<2x128xf32>,
    %397 = vector.extract_strided_slice %368 {offsets = [28, 0], sizes = [2, 128], strides = [1, 1]} : vector<32x128xf32> to vector<2x128xf32>
    %c0_154 = arith.constant 0 : index
    %c1792 = arith.constant 1792 : index
    %398 = vector.load %arg10[%c0_154, %c1792] : memref<2x2048xf32, #tpu.memory_space<vmem>>, vector<2x128xf32>
    tpu.vector_store %arg10[%c0_154, %c1792], %397 {strides = array<i32>} : memref<2x2048xf32, #tpu.memory_space<vmem>>, vector<2x128xf32>,
    %399 = vector.extract_strided_slice %368 {offsets = [30, 0], sizes = [2, 128], strides = [1, 1]} : vector<32x128xf32> to vector<2x128xf32>
    %c0_155 = arith.constant 0 : index
    %c1920 = arith.constant 1920 : index
    %400 = vector.load %arg10[%c0_155, %c1920] : memref<2x2048xf32, #tpu.memory_space<vmem>>, vector<2x128xf32>
    tpu.vector_store %arg10[%c0_155, %c1920], %399 {strides = array<i32>} : memref<2x2048xf32, #tpu.memory_space<vmem>>, vector<2x128xf32>,
    %c4_i32_156 = arith.constant 4 : i32
    %401 = arith.muli %arg0, %c4_i32_156 : i32
    %c0_i32_157 = arith.constant 0 : i32
    %402 = arith.addi %401, %c0_i32_157 : i32
    %c0_i32_158 = arith.constant 0 : i32
    %c0_i32_159 = arith.constant 0 : i32
    %c0_i32_160 = arith.constant 0 : i32
    %c0_i32_161 = arith.constant 0 : i32
    %403 = tpu.memref_slice %arg4[%402, %c0_i32_160, %c0_i32_161] : memref<8x512x512xi8, #tpu.memory_space<any>> -> memref<1x512x512xi8, #tpu.memory_space<any>>
    %404 = tpu.memref_squeeze %403 : memref<1x512x512xi8, #tpu.memory_space<any>> -> memref<512x512xi8, #tpu.memory_space<any>>
    %c0_i32_162 = arith.constant 0 : i32
    %c0_i32_163 = arith.constant 0 : i32
    %405 = tpu.memref_slice %arg11[%c0_i32_158, %c0_i32_162, %c0_i32_163] : memref<4x512x512xi8, #tpu.memory_space<vmem>> -> memref<1x512x512xi8, #tpu.memory_space<vmem>>
    %406 = tpu.memref_squeeze %405 : memref<1x512x512xi8, #tpu.memory_space<vmem>> -> memref<512x512xi8, #tpu.memory_space<vmem>>
    %407 = tpu.memref_slice %arg12[%c0_i32_159] : memref<4x!tpu.dma_semaphore, #tpu.memory_space<semaphore_mem>> -> memref<1x!tpu.dma_semaphore, #tpu.memory_space<semaphore_mem>>
    %408 = tpu.memref_squeeze %407 : memref<1x!tpu.dma_semaphore, #tpu.memory_space<semaphore_mem>> -> memref<!tpu.dma_semaphore, #tpu.memory_space<semaphore_mem>>
    tpu.wait_dma2 semaphore(%408 : memref<!tpu.dma_semaphore, #tpu.memory_space<semaphore_mem>>) src(%404 : memref<512x512xi8, #tpu.memory_space<any>>) dst(%406 : memref<512x512xi8, #tpu.memory_space<vmem>>)
    %c0_164 = arith.constant 0 : index
    %c0_165 = arith.constant 0 : index
    %c0_166 = arith.constant 0 : index
    %409 = vector.load %arg11[%c0_164, %c0_165, %c0_166] : memref<4x512x512xi8, #tpu.memory_space<vmem>>, vector<1x512x512xi8>
    %410 = vector.shape_cast %409 : vector<1x512x512xi8> to vector<512x512xi8>
    %411 = arith.sitofp %410 : vector<512x512xi8> to vector<512x512xbf16>
    %c0_167 = arith.constant 0 : index
    %c0_168 = arith.constant 0 : index
    %412 = vector.load %arg10[%c0_167, %c0_168] : memref<2x2048xf32, #tpu.memory_space<vmem>>, vector<2x512xf32>
    %413 = arith.truncf %412 : vector<2x512xf32> to vector<2x512xbf16>
    %cst_169 = arith.constant dense<0.000000e+00> : vector<2x512xf32>
    %414 = tpu.matmul %413, %411, %cst_169 {dimension_numbers = #tpu.dot_dimension_numbers<[1], [0], [0], [1], [0, 0, 1, 1], [], []>} : vector<2x512xbf16>, vector<512x512xbf16>, vector<2x512xf32> -> vector<2x512xf32>
    %c4_i32_170 = arith.constant 4 : i32
    %415 = arith.muli %arg0, %c4_i32_170 : i32
    %c1_i32_171 = arith.constant 1 : i32
    %416 = arith.addi %415, %c1_i32_171 : i32
    %c1_i32_172 = arith.constant 1 : i32
    %c1_i32_173 = arith.constant 1 : i32
    %c0_i32_174 = arith.constant 0 : i32
    %c0_i32_175 = arith.constant 0 : i32
    %417 = tpu.memref_slice %arg4[%416, %c0_i32_174, %c0_i32_175] : memref<8x512x512xi8, #tpu.memory_space<any>> -> memref<1x512x512xi8, #tpu.memory_space<any>>
    %418 = tpu.memref_squeeze %417 : memref<1x512x512xi8, #tpu.memory_space<any>> -> memref<512x512xi8, #tpu.memory_space<any>>
    %c0_i32_176 = arith.constant 0 : i32
    %c0_i32_177 = arith.constant 0 : i32
    %419 = tpu.memref_slice %arg11[%c1_i32_172, %c0_i32_176, %c0_i32_177] : memref<4x512x512xi8, #tpu.memory_space<vmem>> -> memref<1x512x512xi8, #tpu.memory_space<vmem>>
    %420 = tpu.memref_squeeze %419 : memref<1x512x512xi8, #tpu.memory_space<vmem>> -> memref<512x512xi8, #tpu.memory_space<vmem>>
    %421 = tpu.memref_slice %arg12[%c1_i32_173] : memref<4x!tpu.dma_semaphore, #tpu.memory_space<semaphore_mem>> -> memref<1x!tpu.dma_semaphore, #tpu.memory_space<semaphore_mem>>
    %422 = tpu.memref_squeeze %421 : memref<1x!tpu.dma_semaphore, #tpu.memory_space<semaphore_mem>> -> memref<!tpu.dma_semaphore, #tpu.memory_space<semaphore_mem>>
    tpu.wait_dma2 semaphore(%422 : memref<!tpu.dma_semaphore, #tpu.memory_space<semaphore_mem>>) src(%418 : memref<512x512xi8, #tpu.memory_space<any>>) dst(%420 : memref<512x512xi8, #tpu.memory_space<vmem>>)
    %c1_178 = arith.constant 1 : index
    %c0_179 = arith.constant 0 : index
    %c0_180 = arith.constant 0 : index
    %423 = vector.load %arg11[%c1_178, %c0_179, %c0_180] : memref<4x512x512xi8, #tpu.memory_space<vmem>>, vector<1x512x512xi8>
    %424 = vector.shape_cast %423 : vector<1x512x512xi8> to vector<512x512xi8>
    %425 = arith.sitofp %424 : vector<512x512xi8> to vector<512x512xbf16>
    %c0_181 = arith.constant 0 : index
    %c512_182 = arith.constant 512 : index
    %426 = vector.load %arg10[%c0_181, %c512_182] : memref<2x2048xf32, #tpu.memory_space<vmem>>, vector<2x512xf32>
    %427 = arith.truncf %426 : vector<2x512xf32> to vector<2x512xbf16>
    %cst_183 = arith.constant dense<0.000000e+00> : vector<2x512xf32>
    %428 = tpu.matmul %427, %425, %cst_183 {dimension_numbers = #tpu.dot_dimension_numbers<[1], [0], [0], [1], [0, 0, 1, 1], [], []>} : vector<2x512xbf16>, vector<512x512xbf16>, vector<2x512xf32> -> vector<2x512xf32>
    %429 = arith.addf %414, %428 : vector<2x512xf32>
    %c4_i32_184 = arith.constant 4 : i32
    %430 = arith.muli %arg0, %c4_i32_184 : i32
    %c2_i32_185 = arith.constant 2 : i32
    %431 = arith.addi %430, %c2_i32_185 : i32
    %c2_i32_186 = arith.constant 2 : i32
    %c2_i32_187 = arith.constant 2 : i32
    %c0_i32_188 = arith.constant 0 : i32
    %c0_i32_189 = arith.constant 0 : i32
    %432 = tpu.memref_slice %arg4[%431, %c0_i32_188, %c0_i32_189] : memref<8x512x512xi8, #tpu.memory_space<any>> -> memref<1x512x512xi8, #tpu.memory_space<any>>
    %433 = tpu.memref_squeeze %432 : memref<1x512x512xi8, #tpu.memory_space<any>> -> memref<512x512xi8, #tpu.memory_space<any>>
    %c0_i32_190 = arith.constant 0 : i32
    %c0_i32_191 = arith.constant 0 : i32
    %434 = tpu.memref_slice %arg11[%c2_i32_186, %c0_i32_190, %c0_i32_191] : memref<4x512x512xi8, #tpu.memory_space<vmem>> -> memref<1x512x512xi8, #tpu.memory_space<vmem>>
    %435 = tpu.memref_squeeze %434 : memref<1x512x512xi8, #tpu.memory_space<vmem>> -> memref<512x512xi8, #tpu.memory_space<vmem>>
    %436 = tpu.memref_slice %arg12[%c2_i32_187] : memref<4x!tpu.dma_semaphore, #tpu.memory_space<semaphore_mem>> -> memref<1x!tpu.dma_semaphore, #tpu.memory_space<semaphore_mem>>
    %437 = tpu.memref_squeeze %436 : memref<1x!tpu.dma_semaphore, #tpu.memory_space<semaphore_mem>> -> memref<!tpu.dma_semaphore, #tpu.memory_space<semaphore_mem>>
    tpu.wait_dma2 semaphore(%437 : memref<!tpu.dma_semaphore, #tpu.memory_space<semaphore_mem>>) src(%433 : memref<512x512xi8, #tpu.memory_space<any>>) dst(%435 : memref<512x512xi8, #tpu.memory_space<vmem>>)
    %c2_192 = arith.constant 2 : index
    %c0_193 = arith.constant 0 : index
    %c0_194 = arith.constant 0 : index
    %438 = vector.load %arg11[%c2_192, %c0_193, %c0_194] : memref<4x512x512xi8, #tpu.memory_space<vmem>>, vector<1x512x512xi8>
    %439 = vector.shape_cast %438 : vector<1x512x512xi8> to vector<512x512xi8>
    %440 = arith.sitofp %439 : vector<512x512xi8> to vector<512x512xbf16>
    %c0_195 = arith.constant 0 : index
    %c1024_196 = arith.constant 1024 : index
    %441 = vector.load %arg10[%c0_195, %c1024_196] : memref<2x2048xf32, #tpu.memory_space<vmem>>, vector<2x512xf32>
    %442 = arith.truncf %441 : vector<2x512xf32> to vector<2x512xbf16>
    %cst_197 = arith.constant dense<0.000000e+00> : vector<2x512xf32>
    %443 = tpu.matmul %442, %440, %cst_197 {dimension_numbers = #tpu.dot_dimension_numbers<[1], [0], [0], [1], [0, 0, 1, 1], [], []>} : vector<2x512xbf16>, vector<512x512xbf16>, vector<2x512xf32> -> vector<2x512xf32>
    %444 = arith.addf %429, %443 : vector<2x512xf32>
    %c4_i32_198 = arith.constant 4 : i32
    %445 = arith.muli %arg0, %c4_i32_198 : i32
    %c3_i32_199 = arith.constant 3 : i32
    %446 = arith.addi %445, %c3_i32_199 : i32
    %c3_i32_200 = arith.constant 3 : i32
    %c3_i32_201 = arith.constant 3 : i32
    %c0_i32_202 = arith.constant 0 : i32
    %c0_i32_203 = arith.constant 0 : i32
    %447 = tpu.memref_slice %arg4[%446, %c0_i32_202, %c0_i32_203] : memref<8x512x512xi8, #tpu.memory_space<any>> -> memref<1x512x512xi8, #tpu.memory_space<any>>
    %448 = tpu.memref_squeeze %447 : memref<1x512x512xi8, #tpu.memory_space<any>> -> memref<512x512xi8, #tpu.memory_space<any>>
    %c0_i32_204 = arith.constant 0 : i32
    %c0_i32_205 = arith.constant 0 : i32
    %449 = tpu.memref_slice %arg11[%c3_i32_200, %c0_i32_204, %c0_i32_205] : memref<4x512x512xi8, #tpu.memory_space<vmem>> -> memref<1x512x512xi8, #tpu.memory_space<vmem>>
    %450 = tpu.memref_squeeze %449 : memref<1x512x512xi8, #tpu.memory_space<vmem>> -> memref<512x512xi8, #tpu.memory_space<vmem>>
    %451 = tpu.memref_slice %arg12[%c3_i32_201] : memref<4x!tpu.dma_semaphore, #tpu.memory_space<semaphore_mem>> -> memref<1x!tpu.dma_semaphore, #tpu.memory_space<semaphore_mem>>
    %452 = tpu.memref_squeeze %451 : memref<1x!tpu.dma_semaphore, #tpu.memory_space<semaphore_mem>> -> memref<!tpu.dma_semaphore, #tpu.memory_space<semaphore_mem>>
    tpu.wait_dma2 semaphore(%452 : memref<!tpu.dma_semaphore, #tpu.memory_space<semaphore_mem>>) src(%448 : memref<512x512xi8, #tpu.memory_space<any>>) dst(%450 : memref<512x512xi8, #tpu.memory_space<vmem>>)
    %c3_206 = arith.constant 3 : index
    %c0_207 = arith.constant 0 : index
    %c0_208 = arith.constant 0 : index
    %453 = vector.load %arg11[%c3_206, %c0_207, %c0_208] : memref<4x512x512xi8, #tpu.memory_space<vmem>>, vector<1x512x512xi8>
    %454 = vector.shape_cast %453 : vector<1x512x512xi8> to vector<512x512xi8>
    %455 = arith.sitofp %454 : vector<512x512xi8> to vector<512x512xbf16>
    %c0_209 = arith.constant 0 : index
    %c1536_210 = arith.constant 1536 : index
    %456 = vector.load %arg10[%c0_209, %c1536_210] : memref<2x2048xf32, #tpu.memory_space<vmem>>, vector<2x512xf32>
    %457 = arith.truncf %456 : vector<2x512xf32> to vector<2x512xbf16>
    %cst_211 = arith.constant dense<0.000000e+00> : vector<2x512xf32>
    %458 = tpu.matmul %457, %455, %cst_211 {dimension_numbers = #tpu.dot_dimension_numbers<[1], [0], [0], [1], [0, 0, 1, 1], [], []>} : vector<2x512xbf16>, vector<512x512xbf16>, vector<2x512xf32> -> vector<2x512xf32>
    %459 = arith.addf %444, %458 : vector<2x512xf32>
    %c0_212 = arith.constant 0 : index
    %c0_213 = arith.constant 0 : index
    %c0_214 = arith.constant 0 : index
    %460 = vector.load %arg5[%c0_212, %c0_213, %c0_214] : memref<1x1x512xf32, #tpu.memory_space<vmem>>, vector<1x1x512xf32>
    %461 = vector.shape_cast %460 : vector<1x1x512xf32> to vector<1x512xf32>
    %462 = vector.broadcast %461 : vector<1x512xf32> to vector<2x512xf32>
    %463 = arith.mulf %459, %462 : vector<2x512xf32>
    %c0_215 = arith.constant 0 : index
    %c0_216 = arith.constant 0 : index
    %c0_217 = arith.constant 0 : index
    %464 = vector.load %arg6[%c0_215, %c0_216, %c0_217] : memref<1x1x512xf32, #tpu.memory_space<vmem>>, vector<1x1x512xf32>
    %465 = vector.shape_cast %464 : vector<1x1x512xf32> to vector<1x512xf32>
    %466 = vector.broadcast %465 : vector<1x512xf32> to vector<2x512xf32>
    %467 = arith.addf %463, %466 : vector<2x512xf32>
    %cst_218 = arith.constant 0.000000e+00 : f32
    %468 = vector.broadcast %cst_218 : f32 to vector<2x512xf32>
    %469 = arith.maximumf %467, %468 : vector<2x512xf32>
    %c0_219 = arith.constant 0 : index
    %c0_220 = arith.constant 0 : index
    %c0_221 = arith.constant 0 : index
    %470 = vector.load %arg7[%c0_219, %c0_220, %c0_221] : memref<1x512x2xf32, #tpu.memory_space<vmem>>, vector<1x512x2xf32>
    %471 = vector.shape_cast %470 : vector<1x512x2xf32> to vector<512x2xf32>
    %cst_222 = arith.constant dense<0.000000e+00> : vector<2x2xf32>
    %472 = tpu.matmul %469, %471, %cst_222 {dimension_numbers = #tpu.dot_dimension_numbers<[1], [0], [0], [1], [0, 0, 1, 1], [], []>} : vector<2x512xf32>, vector<512x2xf32>, vector<2x2xf32> -> vector<2x2xf32>
    %473 = vector.shape_cast %472 : vector<2x2xf32> to vector<1x2x2xf32>
    %c0_223 = arith.constant 0 : index
    %c0_224 = arith.constant 0 : index
    %c0_225 = arith.constant 0 : index
    %474 = vector.load %arg8[%c0_223, %c0_224, %c0_225] : memref<1x2x2xf32, #tpu.memory_space<vmem>>, vector<1x2x2xf32>
    tpu.vector_store %arg8[%c0_223, %c0_224, %c0_225], %473 {strides = array<i32>} : memref<1x2x2xf32, #tpu.memory_space<vmem>>, vector<1x2x2xf32>,
    return
  }
  func.func @transform_0(%arg0: i32) -> (i32, i32, i32, i32) {
    %c0_i32 = arith.constant 0 : i32
    %c0_i32_0 = arith.constant 0 : i32
    %c0_i32_1 = arith.constant 0 : i32
    %c0_i32_2 = arith.constant 0 : i32
    %c0_i32_3 = arith.constant 0 : i32
    return %c0_i32, %c0_i32_0, %c0_i32_1, %c0_i32_2 : i32, i32, i32, i32
  }
  func.func @transform_1(%arg0: i32) -> (i32, i32) {
    %c0_i32 = arith.constant 0 : i32
    %c0_i32_0 = arith.constant 0 : i32
    %c0_i32_1 = arith.constant 0 : i32
    return %c0_i32, %c0_i32_0 : i32, i32
  }
  func.func @transform_2(%arg0: i32) -> (i32, i32) {
    %c0_i32 = arith.constant 0 : i32
    %c0_i32_0 = arith.constant 0 : i32
    %c0_i32_1 = arith.constant 0 : i32
    return %c0_i32, %c0_i32_0 : i32, i32
  }
  func.func @transform_4(%arg0: i32) -> (i32, i32, i32) {
    %c0_i32 = arith.constant 0 : i32
    %c0_i32_0 = arith.constant 0 : i32
    %c0_i32_1 = arith.constant 0 : i32
    return %arg0, %c0_i32, %c0_i32_0 : i32, i32, i32
  }
  func.func @transform_5(%arg0: i32) -> (i32, i32, i32) {
    %c0_i32 = arith.constant 0 : i32
    %c0_i32_0 = arith.constant 0 : i32
    %c0_i32_1 = arith.constant 0 : i32
    return %arg0, %c0_i32, %c0_i32_0 : i32, i32, i32
  }
  func.func @transform_6(%arg0: i32) -> (i32, i32, i32) {
    %c0_i32 = arith.constant 0 : i32
    %c0_i32_0 = arith.constant 0 : i32
    %c0_i32_1 = arith.constant 0 : i32
    return %arg0, %c0_i32, %c0_i32_0 : i32, i32, i32
  }
  func.func @transform_7(%arg0: i32) -> (i32, i32, i32) {
    %c0_i32 = arith.constant 0 : i32
    %c0_i32_0 = arith.constant 0 : i32
    %c0_i32_1 = arith.constant 0 : i32
    return %arg0, %c0_i32, %c0_i32_0 : i32, i32, i32
  }
}

</mosaic_0001>

<bundles_post_ra>
// kernel: regression_forward.1
= control target key start
LH: loop header
LB: loop body
LE: loop exit
PB: predicated region body
PF: predicated region fallthrough
CT: control target
= control target key end

     0   :  { %s6347_s24 = smov 0   ;;  %s9339_s0 = inlined_call_operand.vmem [shape: f32[2,14,14,512], index: 0, kind: input, shape index: {}]   ;;  %s9340_s1 = inlined_call_operand.vmem [shape: bf16[512,128], index: 1, kind: input, shape index: {}]   ;;  %s9341_s2 = inlined_call_operand.vmem [shape: f32[1,128], index: 2, kind: input, shape index: {}]   ;;  %s9342_s3 = inlined_call_operand.vmem [shape: s8[8,512,512], index: 3, kind: input, shape index: {}]   ;;  %s9343_s4 = inlined_call_operand.vmem [shape: f32[2,1,512], index: 4, kind: input, shape index: {}]   ;;  %s9344_s5 = inlined_call_operand.vmem [shape: f32[2,1,512], index: 5, kind: input, shape index: {}]   ;;  %s9345_s6 = inlined_call_operand.vmem [shape: f32[2,512,2], index: 6, kind: input, shape index: {}]   ;;  %s9346_s7 = inlined_call_operand.vmem [shape: f32[2,2,2], index: 7, kind: output, shape index: {}]  }
   0x1 LB: > { %s5432_s25 = sadd.s32 4294967295, %s6304_s24   ;;  %p5436_p0 = scmp.ge.s32.totalorder %s6304_s24, 1  ;;  %s6304_s24 = sphi %s6347_s24, %s17_s24  }
   0x2   : > { %p231_p1 = scmp.lt.s32.totalorder %s6304_s24, 3 }
   0x4   : > { %p232_p2 = pnand %p5436_p0, %p231_p1 }
   0x6   : > { %235 = sbr.rel (%p232_p2) target bundleno = 1684 (0x694), region = 44 }
   0xd   : > { %p268_p3 = scmp.lt.s32.totalorder %s5432_s25, 1  ;;  %s5995_s26 = sshll.u32 %s5432_s25, 11 }
   0xe   : > { %s6358_s29 = scalar_lea.vmem %s9342_s3, %s5995_s26 }
   0xf   : > { %s10222_s25 = smov (!%p268_p3, %s5432_s25), 1  ;;  %v6361_v0 = vld [vmem:[%s6358_s29] sm:$0xff]  ;;  %v6364_v1 = vld [vmem:[%s6358_s29 + $0x8] sm:$0xff]  ;;  %v6367_v2 = vld [vmem:[%s6358_s29 + $0x10] sm:$0xff] }
  0x10   : > { %v6370_v3 = vld [vmem:[%s6358_s29 + $0x18] sm:$0xff]  ;;  %v6373_v4 = vld [vmem:[%s6358_s29 + $0x20] sm:$0xff]  ;;  %v6376_v5 = vld [vmem:[%s6358_s29 + $0x28] sm:$0xff]  ;;  %s5437_s30 = sshll.u32 %s10222_s25, 2  ;;  %s5993_s8 = sshll.u32 %s10222_s25, 9 }
  0x11   : > { %v6379_v6 = vld [vmem:[%s6358_s29 + $0x30] sm:$0xff]  ;;  %v6382_v7 = vld [vmem:[%s6358_s29 + $0x38] sm:$0xff]  ;;  %v6385_v8 = vld [vmem:[%s6358_s29 + $0x40] sm:$0xff]  ;;  %s6390_s11 = scalar_lea.vmem %s9343_s4, %s5437_s30  ;;  %s6395_s14 = scalar_lea.vmem %s9344_s5, %s5437_s30 }
  0x12   : > { %v6398_v9 = vld [vmem:[%s6358_s29 + $0x48] sm:$0xff]  ;;  %v6401_v10 = vld [vmem:[%s6358_s29 + $0x50] sm:$0xff]  ;;  %v6404_v11 = vld [vmem:[%s6358_s29 + $0x58] sm:$0xff]  ;;  %s6409_s17 = scalar_lea.vmem %s9345_s6, %s5993_s8  ;;  %s5441_s18 = sshll.u32 %s10222_s25, 1 }
  0x13   : > { %v6412_v12 = vld [vmem:[%s6358_s29 + $0x60] sm:$0xff]  ;;  %v6415_v13 = vld [vmem:[%s6358_s29 + $0x68] sm:$0xff]  ;;  %v6418_v14 = vld [vmem:[%s6358_s29 + $0x70] sm:$0xff]  ;;  %s6423_s21 = scalar_lea.vmem %s9346_s7, %s5441_s18 }
  0x14   : > { %v6426_v15 = vld [vmem:[%s6358_s29 + $0x78] sm:$0xff]  ;;  %v6429_v16 = vld [vmem:[%s6358_s29 + $0x80] sm:$0xff]  ;;  %v6432_v17 = vld [vmem:[%s6358_s29 + $0x88] sm:$0xff] }
  0x15   : > { %v6435_v18 = vld [vmem:[%s6358_s29 + $0x90] sm:$0xff]  ;;  %v6438_v19 = vld [vmem:[%s6358_s29 + $0x98] sm:$0xff]  ;;  %v6441_v20 = vld [vmem:[%s6358_s29 + $0xa0] sm:$0xff] }
  0x16   : > { %v6444_v21 = vld [vmem:[%s6358_s29 + $0xa8] sm:$0xff]  ;;  %v6447_v22 = vld [vmem:[%s6358_s29 + $0xb0] sm:$0xff]  ;;  %v6450_v23 = vld [vmem:[%s6358_s29 + $0xb8] sm:$0xff] }
  0x17   : > { %v6453_v24 = vld [vmem:[%s6358_s29 + $0xc0] sm:$0xff]  ;;  %v6456_v25 = vld [vmem:[%s6358_s29 + $0xc8] sm:$0xff]  ;;  %v6459_v26 = vld [vmem:[%s6358_s29 + $0xd0] sm:$0xff] }
  0x18   : > { %9604 = vst [vmem:[#allocation14_spill] sm:$0xff] %v6456_v25  ;;  %9605 = vst [vmem:[#allocation15_spill] sm:$0xff] %v6459_v26  ;;  %v6462_v27 = vld [vmem:[%s6358_s29 + $0xd8] sm:$0xff]  ;;  %v6465_v28 = vld [vmem:[%s6358_s29 + $0xe0] sm:$0xff] }
  0x19   : > { %9606 = vst [vmem:[#allocation16_spill] sm:$0xff] %v6462_v27  ;;  %9607 = vst [vmem:[#allocation17_spill] sm:$0xff] %v6465_v28  ;;  %v6468_v29 = vld [vmem:[%s6358_s29 + $0xe8] sm:$0xff]  ;;  %v6471_v30 = vld [vmem:[%s6358_s29 + $0xf0] sm:$0xff] }
  0x1a   : > { %9608 = vst [vmem:[#allocation18_spill] sm:$0xff] %v6468_v29  ;;  %9609 = vst [vmem:[#allocation19_spill] sm:$0xff] %v6471_v30  ;;  %v6474_v31 = vld [vmem:[%s6358_s29 + $0xf8] sm:$0xff]  ;;  %v6477_v32 = vld [vmem:[%s6358_s29 + $0x100] sm:$0xff] }
  0x1b   : > { %9610 = vst [vmem:[#allocation20_spill] sm:$0xff] %v6474_v31  ;;  %9611 = vst [vmem:[#allocation21_spill] sm:$0xff] %v6477_v32  ;;  %v6480_v33 = vld [vmem:[%s6358_s29 + $0x108] sm:$0xff]  ;;  %v6483_v34 = vld [vmem:[%s6358_s29 + $0x110] sm:$0xff] }
  0x1c   : > { %9612 = vst [vmem:[#allocation22_spill] sm:$0xff] %v6480_v33  ;;  %9613 = vst [vmem:[#allocation23_spill] sm:$0xff] %v6483_v34  ;;  %v6486_v35 = vld [vmem:[%s6358_s29 + $0x118] sm:$0xff]  ;;  %v6489_v36 = vld [vmem:[%s6358_s29 + $0x120] sm:$0xff] }
  0x1d   : > { %9614 = vst [vmem:[#allocation24_spill] sm:$0xff] %v6486_v35  ;;  %9615 = vst [vmem:[#allocation25_spill] sm:$0xff] %v6489_v36  ;;  %v6492_v37 = vld [vmem:[%s6358_s29 + $0x128] sm:$0xff]  ;;  %v6495_v38 = vld [vmem:[%s6358_s29 + $0x130] sm:$0xff] }
  0x1e   : > { %9616 = vst [vmem:[#allocation26_spill] sm:$0xff] %v6492_v37  ;;  %9617 = vst [vmem:[#allocation27_spill] sm:$0xff] %v6495_v38  ;;  %v6498_v39 = vld [vmem:[%s6358_s29 + $0x138] sm:$0xff]  ;;  %v6501_v40 = vld [vmem:[%s6358_s29 + $0x140] sm:$0xff] }
  0x1f   : > { %9618 = vst [vmem:[#allocation28_spill] sm:$0xff] %v6498_v39  ;;  %9619 = vst [vmem:[#allocation29_spill] sm:$0xff] %v6501_v40  ;;  %v6504_v41 = vld [vmem:[%s6358_s29 + $0x148] sm:$0xff]  ;;  %v6507_v42 = vld [vmem:[%s6358_s29 + $0x150] sm:$0xff] }
  0x20   : > { %9620 = vst [vmem:[#allocation30_spill] sm:$0xff] %v6504_v41  ;;  %9621 = vst [vmem:[#allocation31_spill] sm:$0xff] %v6507_v42  ;;  %v6510_v43 = vld [vmem:[%s6358_s29 + $0x158] sm:$0xff]  ;;  %v6513_v44 = vld [vmem:[%s6358_s29 + $0x160] sm:$0xff] }
  0x21   : > { %9622 = vst [vmem:[#allocation32_spill] sm:$0xff] %v6510_v43  ;;  %9623 = vst [vmem:[#allocation33_spill] sm:$0xff] %v6513_v44  ;;  %v6516_v45 = vld [vmem:[%s6358_s29 + $0x168] sm:$0xff]  ;;  %v6519_v46 = vld [vmem:[%s6358_s29 + $0x170] sm:$0xff] }
  0x22   : > { %9624 = vst [vmem:[#allocation34_spill] sm:$0xff] %v6516_v45  ;;  %9625 = vst [vmem:[#allocation35_spill] sm:$0xff] %v6519_v46  ;;  %v6522_v47 = vld [vmem:[%s6358_s29 + $0x178] sm:$0xff]  ;;  %v6525_v48 = vld [vmem:[%s6358_s29 + $0x180] sm:$0xff] }
  0x23   : > { %9626 = vst [vmem:[#allocation36_spill] sm:$0xff] %v6522_v47  ;;  %9627 = vst [vmem:[#allocation37_spill] sm:$0xff] %v6525_v48  ;;  %v6528_v49 = vld [vmem:[%s6358_s29 + $0x188] sm:$0xff]  ;;  %v6531_v50 = vld [vmem:[%s6358_s29 + $0x190] sm:$0xff] }
  0x24   : > { %9628 = vst [vmem:[#allocation38_spill] sm:$0xff] %v6528_v49  ;;  %9629 = vst [vmem:[#allocation39_spill] sm:$0xff] %v6531_v50  ;;  %v6534_v51 = vld [vmem:[%s6358_s29 + $0x198] sm:$0xff]  ;;  %v6537_v52 = vld [vmem:[%s6358_s29 + $0x1a0] sm:$0xff] }
  0x25   : > { %9630 = vst [vmem:[#allocation40_spill] sm:$0xff] %v6534_v51  ;;  %9631 = vst [vmem:[#allocation41_spill] sm:$0xff] %v6537_v52  ;;  %v6540_v53 = vld [vmem:[%s6358_s29 + $0x1a8] sm:$0xff]  ;;  %v6543_v54 = vld [vmem:[%s6358_s29 + $0x1b0] sm:$0xff] }
  0x26   : > { %9632 = vst [vmem:[#allocation42_spill] sm:$0xff] %v6540_v53  ;;  %9633 = vst [vmem:[#allocation43_spill] sm:$0xff] %v6543_v54  ;;  %v6546_v55 = vld [vmem:[%s6358_s29 + $0x1b8] sm:$0xff]  ;;  %v6549_v56 = vld [vmem:[%s6358_s29 + $0x1c0] sm:$0xff] }
  0x27   : > { %9634 = vst [vmem:[#allocation44_spill] sm:$0xff] %v6546_v55  ;;  %9635 = vst [vmem:[#allocation45_spill] sm:$0xff] %v6549_v56  ;;  %v6552_v57 = vld [vmem:[%s6358_s29 + $0x1c8] sm:$0xff]  ;;  %v6555_v58 = vld [vmem:[%s6358_s29 + $0x1d0] sm:$0xff] }
  0x28   : > { %9636 = vst [vmem:[#allocation46_spill] sm:$0xff] %v6552_v57  ;;  %9637 = vst [vmem:[#allocation47_spill] sm:$0xff] %v6555_v58  ;;  %v6558_v59 = vld [vmem:[%s6358_s29 + $0x1d8] sm:$0xff]  ;;  %v6561_v60 = vld [vmem:[%s6358_s29 + $0x1e0] sm:$0xff] }
  0x29   : > { %9638 = vst [vmem:[#allocation48_spill] sm:$0xff] %v6558_v59  ;;  %9639 = vst [vmem:[#allocation49_spill] sm:$0xff] %v6561_v60  ;;  %v6564_v61 = vld [vmem:[%s6358_s29 + $0x1e8] sm:$0xff]  ;;  %v6567_v62 = vld [vmem:[%s6358_s29 + $0x1f0] sm:$0xff] }
  0x2a   : > { %9640 = vst [vmem:[#allocation50_spill] sm:$0xff] %v6564_v61  ;;  %9641 = vst [vmem:[#allocation51_spill] sm:$0xff] %v6567_v62  ;;  %v6570_v63 = vld [vmem:[%s6358_s29 + $0x1f8] sm:$0xff] }
  0x2b   : > { %9642 = vst [vmem:[#allocation52_spill] sm:$0xff] %v6570_v63 }
  0x2c   : > { %457 = vsyncadd [#allocation5], 8192  ;;  %v6573_v62 = vld [vmem:[%s6358_s29 + $0x200] sm:$0xff]  ;;  %v6576_v63 = vld [vmem:[%s6358_s29 + $0x208] sm:$0xff] }
  0x2d   : > { %9643 = vst [vmem:[#allocation53_spill] sm:$0xff] %v6573_v62  ;;  %9644 = vst [vmem:[#allocation54_spill] sm:$0xff] %v6576_v63  ;;  %v6579_v61 = vld [vmem:[%s6358_s29 + $0x210] sm:$0xff]  ;;  %v6582_v60 = vld [vmem:[%s6358_s29 + $0x218] sm:$0xff] }
  0x2e   : > { %9645 = vst [vmem:[#allocation55_spill] sm:$0xff] %v6579_v61  ;;  %9646 = vst [vmem:[#allocation56_spill] sm:$0xff] %v6582_v60  ;;  %v6585_v59 = vld [vmem:[%s6358_s29 + $0x220] sm:$0xff]  ;;  %v6588_v58 = vld [vmem:[%s6358_s29 + $0x228] sm:$0xff] }
  0x2f   : > { %9647 = vst [vmem:[#allocation57_spill] sm:$0xff] %v6585_v59  ;;  %9648 = vst [vmem:[#allocation58_spill] sm:$0xff] %v6588_v58  ;;  %v6591_v57 = vld [vmem:[%s6358_s29 + $0x230] sm:$0xff]  ;;  %v6594_v62 = vld [vmem:[%s6358_s29 + $0x238] sm:$0xff] }
  0x30   : > { %9649 = vst [vmem:[#allocation59_spill] sm:$0xff] %v6591_v57  ;;  %9650 = vst [vmem:[#allocation60_spill] sm:$0xff] %v6594_v62  ;;  %v6597_v63 = vld [vmem:[%s6358_s29 + $0x240] sm:$0xff]  ;;  %v6600_v61 = vld [vmem:[%s6358_s29 + $0x248] sm:$0xff] }
  0x31   : > { %9651 = vst [vmem:[#allocation61_spill] sm:$0xff] %v6597_v63  ;;  %9652 = vst [vmem:[#allocation62_spill] sm:$0xff] %v6600_v61  ;;  %v6603_v60 = vld [vmem:[%s6358_s29 + $0x250] sm:$0xff]  ;;  %v6606_v59 = vld [vmem:[%s6358_s29 + $0x258] sm:$0xff] }
  0x32   : > { %9653 = vst [vmem:[#allocation63_spill] sm:$0xff] %v6603_v60  ;;  %9654 = vst [vmem:[#allocation64_spill] sm:$0xff] %v6606_v59  ;;  %v6609_v58 = vld [vmem:[%s6358_s29 + $0x260] sm:$0xff]  ;;  %v6612_v57 = vld [vmem:[%s6358_s29 + $0x268] sm:$0xff] }
  0x33   : > { %9655 = vst [vmem:[#allocation65_spill] sm:$0xff] %v6609_v58  ;;  %9656 = vst [vmem:[#allocation66_spill] sm:$0xff] %v6612_v57  ;;  %v6615_v62 = vld [vmem:[%s6358_s29 + $0x270] sm:$0xff]  ;;  %v6618_v63 = vld [vmem:[%s6358_s29 + $0x278] sm:$0xff] }
  0x34   : > { %9657 = vst [vmem:[#allocation67_spill] sm:$0xff] %v6615_v62  ;;  %9658 = vst [vmem:[#allocation68_spill] sm:$0xff] %v6618_v63  ;;  %v6621_v61 = vld [vmem:[%s6358_s29 + $0x280] sm:$0xff]  ;;  %v6624_v60 = vld [vmem:[%s6358_s29 + $0x288] sm:$0xff] }
  0x35   : > { %9659 = vst [vmem:[#allocation69_spill] sm:$0xff] %v6621_v61  ;;  %9660 = vst [vmem:[#allocation70_spill] sm:$0xff] %v6624_v60  ;;  %v6627_v59 = vld [vmem:[%s6358_s29 + $0x290] sm:$0xff]  ;;  %v6630_v58 = vld [vmem:[%s6358_s29 + $0x298] sm:$0xff] }
  0x36   : > { %9661 = vst [vmem:[#allocation71_spill] sm:$0xff] %v6627_v59  ;;  %9662 = vst [vmem:[#allocation72_spill] sm:$0xff] %v6630_v58  ;;  %v6633_v57 = vld [vmem:[%s6358_s29 + $0x2a0] sm:$0xff]  ;;  %v6636_v62 = vld [vmem:[%s6358_s29 + $0x2a8] sm:$0xff] }
  0x37   : > { %9663 = vst [vmem:[#allocation73_spill] sm:$0xff] %v6633_v57  ;;  %9664 = vst [vmem:[#allocation74_spill] sm:$0xff] %v6636_v62  ;;  %v6639_v63 = vld [vmem:[%s6358_s29 + $0x2b0] sm:$0xff]  ;;  %v6642_v61 = vld [vmem:[%s6358_s29 + $0x2b8] sm:$0xff] }
  0x38   : > { %9665 = vst [vmem:[#allocation75_spill] sm:$0xff] %v6639_v63  ;;  %9666 = vst [vmem:[#allocation76_spill] sm:$0xff] %v6642_v61  ;;  %v6645_v60 = vld [vmem:[%s6358_s29 + $0x2c0] sm:$0xff]  ;;  %v6648_v59 = vld [vmem:[%s6358_s29 + $0x2c8] sm:$0xff] }
  0x39   : > { %9667 = vst [vmem:[#allocation77_spill] sm:$0xff] %v6645_v60  ;;  %9668 = vst [vmem:[#allocation78_spill] sm:$0xff] %v6648_v59  ;;  %v6651_v58 = vld [vmem:[%s6358_s29 + $0x2d0] sm:$0xff]  ;;  %v6654_v57 = vld [vmem:[%s6358_s29 + $0x2d8] sm:$0xff] }
  0x3a   : > { %9669 = vst [vmem:[#allocation79_spill] sm:$0xff] %v6651_v58  ;;  %9670 = vst [vmem:[#allocation80_spill] sm:$0xff] %v6654_v57  ;;  %v6657_v62 = vld [vmem:[%s6358_s29 + $0x2e0] sm:$0xff]  ;;  %v6660_v63 = vld [vmem:[%s6358_s29 + $0x2e8] sm:$0xff] }
  0x3b   : > { %9671 = vst [vmem:[#allocation81_spill] sm:$0xff] %v6657_v62  ;;  %9672 = vst [vmem:[#allocation82_spill] sm:$0xff] %v6660_v63  ;;  %v6663_v61 = vld [vmem:[%s6358_s29 + $0x2f0] sm:$0xff]  ;;  %v6666_v60 = vld [vmem:[%s6358_s29 + $0x2f8] sm:$0xff] }
  0x3c   : > { %9673 = vst [vmem:[#allocation83_spill] sm:$0xff] %v6663_v61  ;;  %9674 = vst [vmem:[#allocation84_spill] sm:$0xff] %v6666_v60  ;;  %v6669_v59 = vld [vmem:[%s6358_s29 + $0x300] sm:$0xff]  ;;  %v6672_v58 = vld [vmem:[%s6358_s29 + $0x308] sm:$0xff] }
  0x3d   : > { %9675 = vst [vmem:[#allocation85_spill] sm:$0xff] %v6669_v59  ;;  %9676 = vst [vmem:[#allocation86_spill] sm:$0xff] %v6672_v58  ;;  %v6675_v57 = vld [vmem:[%s6358_s29 + $0x310] sm:$0xff]  ;;  %v6678_v62 = vld [vmem:[%s6358_s29 + $0x318] sm:$0xff] }
  0x3e   : > { %9677 = vst [vmem:[#allocation87_spill] sm:$0xff] %v6675_v57  ;;  %9678 = vst [vmem:[#allocation88_spill] sm:$0xff] %v6678_v62  ;;  %v6681_v63 = vld [vmem:[%s6358_s29 + $0x320] sm:$0xff]  ;;  %v6684_v61 = vld [vmem:[%s6358_s29 + $0x328] sm:$0xff] }
  0x3f   : > { %9679 = vst [vmem:[#allocation89_spill] sm:$0xff] %v6681_v63  ;;  %9680 = vst [vmem:[#allocation90_spill] sm:$0xff] %v6684_v61  ;;  %v6687_v60 = vld [vmem:[%s6358_s29 + $0x330] sm:$0xff]  ;;  %v6690_v59 = vld [vmem:[%s6358_s29 + $0x338] sm:$0xff] }
  0x40   : > { %9681 = vst [vmem:[#allocation91_spill] sm:$0xff] %v6687_v60  ;;  %9682 = vst [vmem:[#allocation92_spill] sm:$0xff] %v6690_v59  ;;  %v6693_v58 = vld [vmem:[%s6358_s29 + $0x340] sm:$0xff]  ;;  %v6696_v57 = vld [vmem:[%s6358_s29 + $0x348] sm:$0xff] }
  0x41   : > { %9683 = vst [vmem:[#allocation93_spill] sm:$0xff] %v6693_v58  ;;  %9684 = vst [vmem:[#allocation94_spill] sm:$0xff] %v6696_v57  ;;  %v6699_v62 = vld [vmem:[%s6358_s29 + $0x350] sm:$0xff]  ;;  %v6702_v63 = vld [vmem:[%s6358_s29 + $0x358] sm:$0xff] }
  0x42   : > { %9685 = vst [vmem:[#allocation95_spill] sm:$0xff] %v6699_v62  ;;  %9686 = vst [vmem:[#allocation96_spill] sm:$0xff] %v6702_v63  ;;  %v6705_v61 = vld [vmem:[%s6358_s29 + $0x360] sm:$0xff]  ;;  %v6708_v60 = vld [vmem:[%s6358_s29 + $0x368] sm:$0xff] }
  0x43   : > { %9687 = vst [vmem:[#allocation97_spill] sm:$0xff] %v6705_v61  ;;  %9688 = vst [vmem:[#allocation98_spill] sm:$0xff] %v6708_v60  ;;  %v6711_v59 = vld [vmem:[%s6358_s29 + $0x370] sm:$0xff]  ;;  %v6714_v58 = vld [vmem:[%s6358_s29 + $0x378] sm:$0xff] }
  0x44   : > { %9689 = vst [vmem:[#allocation99_spill] sm:$0xff] %v6711_v59  ;;  %9690 = vst [vmem:[#allocation100_spill] sm:$0xff] %v6714_v58  ;;  %v6717_v57 = vld [vmem:[%s6358_s29 + $0x380] sm:$0xff]  ;;  %v6720_v56 = vld [vmem:[%s6358_s29 + $0x388] sm:$0xff] }
  0x45   : > { %9691 = vst [vmem:[#allocation101_spill] sm:$0xff] %v6717_v57  ;;  %9692 = vst [vmem:[#allocation102_spill] sm:$0xff] %v6720_v56  ;;  %v6723_v62 = vld [vmem:[%s6358_s29 + $0x390] sm:$0xff]  ;;  %v6726_v63 = vld [vmem:[%s6358_s29 + $0x398] sm:$0xff] }
  0x46   : > { %9693 = vst [vmem:[#allocation103_spill] sm:$0xff] %v6723_v62  ;;  %9694 = vst [vmem:[#allocation104_spill] sm:$0xff] %v6726_v63  ;;  %v6729_v55 = vld [vmem:[%s6358_s29 + $0x3a0] sm:$0xff]  ;;  %v6732_v61 = vld [vmem:[%s6358_s29 + $0x3a8] sm:$0xff] }
  0x47   : > { %9695 = vst [vmem:[#allocation105_spill] sm:$0xff] %v6729_v55  ;;  %9696 = vst [vmem:[#allocation106_spill] sm:$0xff] %v6732_v61  ;;  %v6735_v60 = vld [vmem:[%s6358_s29 + $0x3b0] sm:$0xff]  ;;  %v6738_v54 = vld [vmem:[%s6358_s29 + $0x3b8] sm:$0xff] }
  0x48   : > { %9697 = vst [vmem:[#allocation107_spill] sm:$0xff] %v6735_v60  ;;  %9698 = vst [vmem:[#allocation108_spill] sm:$0xff] %v6738_v54  ;;  %v6741_v59 = vld [vmem:[%s6358_s29 + $0x3c0] sm:$0xff]  ;;  %v6744_v58 = vld [vmem:[%s6358_s29 + $0x3c8] sm:$0xff] }
  0x49   : > { %9699 = vst [vmem:[#allocation109_spill] sm:$0xff] %v6741_v59  ;;  %9700 = vst [vmem:[#allocation110_spill] sm:$0xff] %v6744_v58  ;;  %v6747_v53 = vld [vmem:[%s6358_s29 + $0x3d0] sm:$0xff]  ;;  %v6750_v57 = vld [vmem:[%s6358_s29 + $0x3d8] sm:$0xff] }
  0x4a   : > { %9701 = vst [vmem:[#allocation111_spill] sm:$0xff] %v6747_v53  ;;  %9702 = vst [vmem:[#allocation112_spill] sm:$0xff] %v6750_v57  ;;  %v6753_v56 = vld [vmem:[%s6358_s29 + $0x3e0] sm:$0xff]  ;;  %v6756_v62 = vld [vmem:[%s6358_s29 + $0x3e8] sm:$0xff] }
  0x4b   : > { %9703 = vst [vmem:[#allocation113_spill] sm:$0xff] %v6753_v56  ;;  %9704 = vst [vmem:[#allocation114_spill] sm:$0xff] %v6756_v62  ;;  %v6759_v63 = vld [vmem:[%s6358_s29 + $0x3f0] sm:$0xff]  ;;  %v6762_v55 = vld [vmem:[%s6358_s29 + $0x3f8] sm:$0xff] }
  0x4c   : > { %9705 = vst [vmem:[#allocation115_spill] sm:$0xff] %v6759_v63  ;;  %9706 = vst [vmem:[#allocation116_spill] sm:$0xff] %v6762_v55 }
  0x4d   : > { %631 = vsyncadd [#allocation5 + $0x1], 8192  ;;  %v6765_v63 = vld [vmem:[%s6358_s29 + $0x400] sm:$0xff]  ;;  %v6768_v56 = vld [vmem:[%s6358_s29 + $0x408] sm:$0xff] }
  0x4e   : > { %9707 = vst [vmem:[#allocation117_spill] sm:$0xff] %v6765_v63  ;;  %9708 = vst [vmem:[#allocation118_spill] sm:$0xff] %v6768_v56  ;;  %v6771_v55 = vld [vmem:[%s6358_s29 + $0x410] sm:$0xff]  ;;  %v6774_v62 = vld [vmem:[%s6358_s29 + $0x418] sm:$0xff] }
  0x4f   : > { %9709 = vst [vmem:[#allocation119_spill] sm:$0xff] %v6771_v55  ;;  %9710 = vst [vmem:[#allocation120_spill] sm:$0xff] %v6774_v62  ;;  %v6777_v53 = vld [vmem:[%s6358_s29 + $0x420] sm:$0xff]  ;;  %v6780_v59 = vld [vmem:[%s6358_s29 + $0x428] sm:$0xff] }
  0x50   : > { %9711 = vst [vmem:[#allocation121_spill] sm:$0xff] %v6777_v53  ;;  %9712 = vst [vmem:[#allocation122_spill] sm:$0xff] %v6780_v59  ;;  %v6783_v57 = vld [vmem:[%s6358_s29 + $0x430] sm:$0xff]  ;;  %v6786_v63 = vld [vmem:[%s6358_s29 + $0x438] sm:$0xff] }
  0x51   : > { %9713 = vst [vmem:[#allocation123_spill] sm:$0xff] %v6783_v57  ;;  %9714 = vst [vmem:[#allocation124_spill] sm:$0xff] %v6786_v63  ;;  %v6789_v56 = vld [vmem:[%s6358_s29 + $0x440] sm:$0xff]  ;;  %v6792_v55 = vld [vmem:[%s6358_s29 + $0x448] sm:$0xff] }
  0x52   : > { %9715 = vst [vmem:[#allocation125_spill] sm:$0xff] %v6789_v56  ;;  %9716 = vst [vmem:[#allocation126_spill] sm:$0xff] %v6792_v55  ;;  %v6795_v62 = vld [vmem:[%s6358_s29 + $0x450] sm:$0xff]  ;;  %v6798_v53 = vld [vmem:[%s6358_s29 + $0x458] sm:$0xff] }
  0x53   : > { %9717 = vst [vmem:[#allocation127_spill] sm:$0xff] %v6795_v62  ;;  %9718 = vst [vmem:[#allocation128_spill] sm:$0xff] %v6798_v53  ;;  %v6801_v59 = vld [vmem:[%s6358_s29 + $0x460] sm:$0xff]  ;;  %v6804_v57 = vld [vmem:[%s6358_s29 + $0x468] sm:$0xff] }
  0x54   : > { %9719 = vst [vmem:[#allocation129_spill] sm:$0xff] %v6801_v59  ;;  %9720 = vst [vmem:[#allocation130_spill] sm:$0xff] %v6804_v57  ;;  %v6807_v63 = vld [vmem:[%s6358_s29 + $0x470] sm:$0xff]  ;;  %v6810_v56 = vld [vmem:[%s6358_s29 + $0x478] sm:$0xff] }
  0x55   : > { %9721 = vst [vmem:[#allocation131_spill] sm:$0xff] %v6807_v63  ;;  %9722 = vst [vmem:[#allocation132_spill] sm:$0xff] %v6810_v56  ;;  %v6813_v55 = vld [vmem:[%s6358_s29 + $0x480] sm:$0xff]  ;;  %v6816_v62 = vld [vmem:[%s6358_s29 + $0x488] sm:$0xff] }
  0x56   : > { %9723 = vst [vmem:[#allocation133_spill] sm:$0xff] %v6813_v55  ;;  %9724 = vst [vmem:[#allocation134_spill] sm:$0xff] %v6816_v62  ;;  %v6819_v53 = vld [vmem:[%s6358_s29 + $0x490] sm:$0xff]  ;;  %v6822_v59 = vld [vmem:[%s6358_s29 + $0x498] sm:$0xff] }
  0x57   : > { %9725 = vst [vmem:[#allocation135_spill] sm:$0xff] %v6819_v53  ;;  %9726 = vst [vmem:[#allocation136_spill] sm:$0xff] %v6822_v59  ;;  %v6825_v57 = vld [vmem:[%s6358_s29 + $0x4a0] sm:$0xff]  ;;  %v6828_v63 = vld [vmem:[%s6358_s29 + $0x4a8] sm:$0xff] }
  0x58   : > { %9727 = vst [vmem:[#allocation137_spill] sm:$0xff] %v6825_v57  ;;  %9728 = vst [vmem:[#allocation138_spill] sm:$0xff] %v6828_v63  ;;  %v6831_v56 = vld [vmem:[%s6358_s29 + $0x4b0] sm:$0xff]  ;;  %v6834_v55 = vld [vmem:[%s6358_s29 + $0x4b8] sm:$0xff] }
  0x59   : > { %9729 = vst [vmem:[#allocation139_spill] sm:$0xff] %v6831_v56  ;;  %9730 = vst [vmem:[#allocation140_spill] sm:$0xff] %v6834_v55  ;;  %v6837_v62 = vld [vmem:[%s6358_s29 + $0x4c0] sm:$0xff]  ;;  %v6840_v53 = vld [vmem:[%s6358_s29 + $0x4c8] sm:$0xff] }
  0x5a   : > { %9731 = vst [vmem:[#allocation141_spill] sm:$0xff] %v6837_v62  ;;  %9732 = vst [vmem:[#allocation142_spill] sm:$0xff] %v6840_v53  ;;  %v6843_v59 = vld [vmem:[%s6358_s29 + $0x4d0] sm:$0xff]  ;;  %v6846_v57 = vld [vmem:[%s6358_s29 + $0x4d8] sm:$0xff] }
  0x5b   : > { %9733 = vst [vmem:[#allocation143_spill] sm:$0xff] %v6843_v59  ;;  %9734 = vst [vmem:[#allocation144_spill] sm:$0xff] %v6846_v57  ;;  %v6849_v63 = vld [vmem:[%s6358_s29 + $0x4e0] sm:$0xff]  ;;  %v6852_v56 = vld [vmem:[%s6358_s29 + $0x4e8] sm:$0xff] }
  0x5c   : > { %9735 = vst [vmem:[#allocation145_spill] sm:$0xff] %v6849_v63  ;;  %9736 = vst [vmem:[#allocation146_spill] sm:$0xff] %v6852_v56  ;;  %v6855_v55 = vld [vmem:[%s6358_s29 + $0x4f0] sm:$0xff]  ;;  %v6858_v62 = vld [vmem:[%s6358_s29 + $0x4f8] sm:$0xff] }
  0x5d   : > { %9737 = vst [vmem:[#allocation147_spill] sm:$0xff] %v6855_v55  ;;  %9738 = vst [vmem:[#allocation148_spill] sm:$0xff] %v6858_v62  ;;  %v6861_v53 = vld [vmem:[%s6358_s29 + $0x500] sm:$0xff]  ;;  %v6864_v59 = vld [vmem:[%s6358_s29 + $0x508] sm:$0xff] }
  0x5e   : > { %9739 = vst [vmem:[#allocation149_spill] sm:$0xff] %v6861_v53  ;;  %9740 = vst [vmem:[#allocation150_spill] sm:$0xff] %v6864_v59  ;;  %v6867_v57 = vld [vmem:[%s6358_s29 + $0x510] sm:$0xff]  ;;  %v6870_v63 = vld [vmem:[%s6358_s29 + $0x518] sm:$0xff] }
  0x5f   : > { %9741 = vst [vmem:[#allocation151_spill] sm:$0xff] %v6867_v57  ;;  %9742 = vst [vmem:[#allocation152_spill] sm:$0xff] %v6870_v63  ;;  %v6873_v56 = vld [vmem:[%s6358_s29 + $0x520] sm:$0xff]  ;;  %v6876_v55 = vld [vmem:[%s6358_s29 + $0x528] sm:$0xff] }
  0x60   : > { %9743 = vst [vmem:[#allocation153_spill] sm:$0xff] %v6873_v56  ;;  %9744 = vst [vmem:[#allocation154_spill] sm:$0xff] %v6876_v55  ;;  %v6879_v62 = vld [vmem:[%s6358_s29 + $0x530] sm:$0xff]  ;;  %v6882_v53 = vld [vmem:[%s6358_s29 + $0x538] sm:$0xff] }
  0x61   : > { %9745 = vst [vmem:[#allocation155_spill] sm:$0xff] %v6879_v62  ;;  %9746 = vst [vmem:[#allocation156_spill] sm:$0xff] %v6882_v53  ;;  %v6885_v59 = vld [vmem:[%s6358_s29 + $0x540] sm:$0xff]  ;;  %v6888_v57 = vld [vmem:[%s6358_s29 + $0x548] sm:$0xff] }
  0x62   : > { %9747 = vst [vmem:[#allocation157_spill] sm:$0xff] %v6885_v59  ;;  %9748 = vst [vmem:[#allocation158_spill] sm:$0xff] %v6888_v57  ;;  %v6891_v63 = vld [vmem:[%s6358_s29 + $0x550] sm:$0xff]  ;;  %v6894_v56 = vld [vmem:[%s6358_s29 + $0x558] sm:$0xff] }
  0x63   : > { %9749 = vst [vmem:[#allocation159_spill] sm:$0xff] %v6891_v63  ;;  %9750 = vst [vmem:[#allocation160_spill] sm:$0xff] %v6894_v56  ;;  %v6897_v55 = vld [vmem:[%s6358_s29 + $0x560] sm:$0xff]  ;;  %v6900_v62 = vld [vmem:[%s6358_s29 + $0x568] sm:$0xff] }
  0x64   : > { %9751 = vst [vmem:[#allocation161_spill] sm:$0xff] %v6897_v55  ;;  %9752 = vst [vmem:[#allocation162_spill] sm:$0xff] %v6900_v62  ;;  %v6903_v53 = vld [vmem:[%s6358_s29 + $0x570] sm:$0xff]  ;;  %v6906_v59 = vld [vmem:[%s6358_s29 + $0x578] sm:$0xff] }
  0x65   : > { %9753 = vst [vmem:[#allocation163_spill] sm:$0xff] %v6903_v53  ;;  %9754 = vst [vmem:[#allocation164_spill] sm:$0xff] %v6906_v59  ;;  %v6909_v57 = vld [vmem:[%s6358_s29 + $0x580] sm:$0xff]  ;;  %v6912_v58 = vld [vmem:[%s6358_s29 + $0x588] sm:$0xff] }
  0x66   : > { %9755 = vst [vmem:[#allocation165_spill] sm:$0xff] %v6909_v57  ;;  %9756 = vst [vmem:[#allocation166_spill] sm:$0xff] %v6912_v58  ;;  %v6915_v63 = vld [vmem:[%s6358_s29 + $0x590] sm:$0xff]  ;;  %v6918_v56 = vld [vmem:[%s6358_s29 + $0x598] sm:$0xff] }
  0x67   : > { %9757 = vst [vmem:[#allocation167_spill] sm:$0xff] %v6915_v63  ;;  %9758 = vst [vmem:[#allocation168_spill] sm:$0xff] %v6918_v56  ;;  %v6921_v60 = vld [vmem:[%s6358_s29 + $0x5a0] sm:$0xff]  ;;  %v6924_v55 = vld [vmem:[%s6358_s29 + $0x5a8] sm:$0xff] }
  0x68   : > { %9759 = vst [vmem:[#allocation169_spill] sm:$0xff] %v6921_v60  ;;  %9760 = vst [vmem:[#allocation170_spill] sm:$0xff] %v6924_v55  ;;  %v6927_v62 = vld [vmem:[%s6358_s29 + $0x5b0] sm:$0xff]  ;;  %v6930_v54 = vld [vmem:[%s6358_s29 + $0x5b8] sm:$0xff] }
  0x69   : > { %9761 = vst [vmem:[#allocation171_spill] sm:$0xff] %v6927_v62  ;;  %9762 = vst [vmem:[#allocation172_spill] sm:$0xff] %v6930_v54  ;;  %v6933_v53 = vld [vmem:[%s6358_s29 + $0x5c0] sm:$0xff]  ;;  %v6936_v59 = vld [vmem:[%s6358_s29 + $0x5c8] sm:$0xff] }
  0x6a   : > { %9763 = vst [vmem:[#allocation173_spill] sm:$0xff] %v6933_v53  ;;  %9764 = vst [vmem:[#allocation174_spill] sm:$0xff] %v6936_v59  ;;  %v6939_v61 = vld [vmem:[%s6358_s29 + $0x5d0] sm:$0xff]  ;;  %v6942_v57 = vld [vmem:[%s6358_s29 + $0x5d8] sm:$0xff] }
  0x6b   : > { %9765 = vst [vmem:[#allocation175_spill] sm:$0xff] %v6939_v61  ;;  %9766 = vst [vmem:[#allocation176_spill] sm:$0xff] %v6942_v57  ;;  %v6945_v58 = vld [vmem:[%s6358_s29 + $0x5e0] sm:$0xff]  ;;  %v6948_v63 = vld [vmem:[%s6358_s29 + $0x5e8] sm:$0xff] }
  0x6c   : > { %9767 = vst [vmem:[#allocation177_spill] sm:$0xff] %v6945_v58  ;;  %9768 = vst [vmem:[#allocation178_spill] sm:$0xff] %v6948_v63  ;;  %v6951_v56 = vld [vmem:[%s6358_s29 + $0x5f0] sm:$0xff]  ;;  %v6954_v60 = vld [vmem:[%s6358_s29 + $0x5f8] sm:$0xff] }
  0x6d   : > { %9769 = vst [vmem:[#allocation179_spill] sm:$0xff] %v6951_v56  ;;  %9770 = vst [vmem:[#allocation180_spill] sm:$0xff] %v6954_v60 }
  0x6e   : > { %805 = vsyncadd [#allocation5 + $0x2], 8192  ;;  %v6957_v56 = vld [vmem:[%s6358_s29 + $0x600] sm:$0xff]  ;;  %v6960_v58 = vld [vmem:[%s6358_s29 + $0x608] sm:$0xff] }
  0x6f   : > { %9771 = vst [vmem:[#allocation181_spill] sm:$0xff] %v6957_v56  ;;  %9772 = vst [vmem:[#allocation182_spill] sm:$0xff] %v6960_v58  ;;  %v6963_v60 = vld [vmem:[%s6358_s29 + $0x610] sm:$0xff]  ;;  %v6966_v63 = vld [vmem:[%s6358_s29 + $0x618] sm:$0xff] }
  0x70   : > { %9773 = vst [vmem:[#allocation183_spill] sm:$0xff] %v6963_v60  ;;  %9774 = vst [vmem:[#allocation184_spill] sm:$0xff] %v6966_v63  ;;  %v6969_v61 = vld [vmem:[%s6358_s29 + $0x620] sm:$0xff]  ;;  %v6972_v53 = vld [vmem:[%s6358_s29 + $0x628] sm:$0xff] }
  0x71   : > { %9775 = vst [vmem:[#allocation185_spill] sm:$0xff] %v6969_v61  ;;  %9776 = vst [vmem:[#allocation186_spill] sm:$0xff] %v6972_v53  ;;  %v6975_v57 = vld [vmem:[%s6358_s29 + $0x630] sm:$0xff]  ;;  %v6978_v56 = vld [vmem:[%s6358_s29 + $0x638] sm:$0xff] }
  0x72   : > { %9777 = vst [vmem:[#allocation187_spill] sm:$0xff] %v6975_v57  ;;  %9778 = vst [vmem:[#allocation188_spill] sm:$0xff] %v6978_v56  ;;  %v6981_v58 = vld [vmem:[%s6358_s29 + $0x640] sm:$0xff]  ;;  %v6984_v60 = vld [vmem:[%s6358_s29 + $0x648] sm:$0xff] }
  0x73   : > { %9779 = vst [vmem:[#allocation189_spill] sm:$0xff] %v6981_v58  ;;  %9780 = vst [vmem:[#allocation190_spill] sm:$0xff] %v6984_v60  ;;  %v6987_v63 = vld [vmem:[%s6358_s29 + $0x650] sm:$0xff]  ;;  %v6990_v61 = vld [vmem:[%s6358_s29 + $0x658] sm:$0xff] }
  0x74   : > { %9781 = vst [vmem:[#allocation191_spill] sm:$0xff] %v6987_v63  ;;  %9782 = vst [vmem:[#allocation192_spill] sm:$0xff] %v6990_v61  ;;  %v6993_v53 = vld [vmem:[%s6358_s29 + $0x660] sm:$0xff]  ;;  %v6996_v57 = vld [vmem:[%s6358_s29 + $0x668] sm:$0xff] }
  0x75   : > { %9783 = vst [vmem:[#allocation193_spill] sm:$0xff] %v6993_v53  ;;  %9784 = vst [vmem:[#allocation194_spill] sm:$0xff] %v6996_v57  ;;  %v6999_v56 = vld [vmem:[%s6358_s29 + $0x670] sm:$0xff]  ;;  %v7002_v58 = vld [vmem:[%s6358_s29 + $0x678] sm:$0xff] }
  0x76   : > { %9785 = vst [vmem:[#allocation195_spill] sm:$0xff] %v6999_v56  ;;  %9786 = vst [vmem:[#allocation196_spill] sm:$0xff] %v7002_v58  ;;  %v7005_v60 = vld [vmem:[%s6358_s29 + $0x680] sm:$0xff]  ;;  %v7008_v63 = vld [vmem:[%s6358_s29 + $0x688] sm:$0xff] }
  0x77   : > { %9787 = vst [vmem:[#allocation197_spill] sm:$0xff] %v7005_v60  ;;  %9788 = vst [vmem:[#allocation198_spill] sm:$0xff] %v7008_v63  ;;  %v7011_v61 = vld [vmem:[%s6358_s29 + $0x690] sm:$0xff]  ;;  %v7014_v53 = vld [vmem:[%s6358_s29 + $0x698] sm:$0xff] }
  0x78   : > { %9789 = vst [vmem:[#allocation199_spill] sm:$0xff] %v7011_v61  ;;  %9790 = vst [vmem:[#allocation200_spill] sm:$0xff] %v7014_v53  ;;  %v7017_v57 = vld [vmem:[%s6358_s29 + $0x6a0] sm:$0xff]  ;;  %v7020_v56 = vld [vmem:[%s6358_s29 + $0x6a8] sm:$0xff] }
  0x79   : > { %9791 = vst [vmem:[#allocation201_spill] sm:$0xff] %v7017_v57  ;;  %9792 = vst [vmem:[#allocation202_spill] sm:$0xff] %v7020_v56  ;;  %v7023_v58 = vld [vmem:[%s6358_s29 + $0x6b0] sm:$0xff]  ;;  %v7026_v60 = vld [vmem:[%s6358_s29 + $0x6b8] sm:$0xff] }
  0x7a   : > { %9793 = vst [vmem:[#allocation203_spill] sm:$0xff] %v7023_v58  ;;  %9794 = vst [vmem:[#allocation204_spill] sm:$0xff] %v7026_v60  ;;  %v7029_v63 = vld [vmem:[%s6358_s29 + $0x6c0] sm:$0xff]  ;;  %v7032_v61 = vld [vmem:[%s6358_s29 + $0x6c8] sm:$0xff] }
  0x7b   : > { %9795 = vst [vmem:[#allocation205_spill] sm:$0xff] %v7029_v63  ;;  %9796 = vst [vmem:[#allocation206_spill] sm:$0xff] %v7032_v61  ;;  %v7035_v53 = vld [vmem:[%s6358_s29 + $0x6d0] sm:$0xff]  ;;  %v7038_v57 = vld [vmem:[%s6358_s29 + $0x6d8] sm:$0xff] }
  0x7c   : > { %9797 = vst [vmem:[#allocation207_spill] sm:$0xff] %v7035_v53  ;;  %9798 = vst [vmem:[#allocation208_spill] sm:$0xff] %v7038_v57  ;;  %v7041_v56 = vld [vmem:[%s6358_s29 + $0x6e0] sm:$0xff]  ;;  %v7044_v58 = vld [vmem:[%s6358_s29 + $0x6e8] sm:$0xff] }
  0x7d   : > { %9799 = vst [vmem:[#allocation209_spill] sm:$0xff] %v7041_v56  ;;  %9800 = vst [vmem:[#allocation210_spill] sm:$0xff] %v7044_v58  ;;  %v7047_v60 = vld [vmem:[%s6358_s29 + $0x6f0] sm:$0xff]  ;;  %v7050_v63 = vld [vmem:[%s6358_s29 + $0x6f8] sm:$0xff] }
  0x7e   : > { %9801 = vst [vmem:[#allocation211_spill] sm:$0xff] %v7047_v60  ;;  %9802 = vst [vmem:[#allocation212_spill] sm:$0xff] %v7050_v63  ;;  %v7053_v61 = vld [vmem:[%s6358_s29 + $0x700] sm:$0xff]  ;;  %v7056_v53 = vld [vmem:[%s6358_s29 + $0x708] sm:$0xff] }
  0x7f   : > { %9803 = vst [vmem:[#allocation213_spill] sm:$0xff] %v7053_v61  ;;  %9804 = vst [vmem:[#allocation214_spill] sm:$0xff] %v7056_v53  ;;  %v7059_v57 = vld [vmem:[%s6358_s29 + $0x710] sm:$0xff]  ;;  %v7062_v56 = vld [vmem:[%s6358_s29 + $0x718] sm:$0xff] }
  0x80   : > { %9805 = vst [vmem:[#allocation215_spill] sm:$0xff] %v7059_v57  ;;  %9806 = vst [vmem:[#allocation216_spill] sm:$0xff] %v7062_v56  ;;  %v7065_v58 = vld [vmem:[%s6358_s29 + $0x720] sm:$0xff]  ;;  %v7068_v60 = vld [vmem:[%s6358_s29 + $0x728] sm:$0xff] }
  0x81   : > { %9807 = vst [vmem:[#allocation217_spill] sm:$0xff] %v7065_v58  ;;  %9808 = vst [vmem:[#allocation218_spill] sm:$0xff] %v7068_v60  ;;  %v7071_v63 = vld [vmem:[%s6358_s29 + $0x730] sm:$0xff]  ;;  %v7074_v61 = vld [vmem:[%s6358_s29 + $0x738] sm:$0xff] }
  0x82   : > { %9809 = vst [vmem:[#allocation219_spill] sm:$0xff] %v7071_v63  ;;  %9810 = vst [vmem:[#allocation220_spill] sm:$0xff] %v7074_v61  ;;  %v7077_v53 = vld [vmem:[%s6358_s29 + $0x740] sm:$0xff]  ;;  %v7080_v57 = vld [vmem:[%s6358_s29 + $0x748] sm:$0xff] }
  0x83   : > { %9811 = vst [vmem:[#allocation221_spill] sm:$0xff] %v7077_v53  ;;  %9812 = vst [vmem:[#allocation222_spill] sm:$0xff] %v7080_v57  ;;  %v7083_v56 = vld [vmem:[%s6358_s29 + $0x750] sm:$0xff]  ;;  %v7086_v58 = vld [vmem:[%s6358_s29 + $0x758] sm:$0xff] }
  0x84   : > { %9813 = vst [vmem:[#allocation223_spill] sm:$0xff] %v7083_v56  ;;  %9814 = vst [vmem:[#allocation224_spill] sm:$0xff] %v7086_v58  ;;  %v7089_v60 = vld [vmem:[%s6358_s29 + $0x760] sm:$0xff]  ;;  %v7092_v63 = vld [vmem:[%s6358_s29 + $0x768] sm:$0xff] }
  0x85   : > { %9815 = vst [vmem:[#allocation225_spill] sm:$0xff] %v7089_v60  ;;  %9816 = vst [vmem:[#allocation226_spill] sm:$0xff] %v7092_v63  ;;  %v7095_v61 = vld [vmem:[%s6358_s29 + $0x770] sm:$0xff]  ;;  %v7098_v53 = vld [vmem:[%s6358_s29 + $0x778] sm:$0xff] }
  0x86   : > { %9817 = vst [vmem:[#allocation227_spill] sm:$0xff] %v7095_v61  ;;  %9818 = vst [vmem:[#allocation228_spill] sm:$0xff] %v7098_v53  ;;  %v7101_v57 = vld [vmem:[%s6358_s29 + $0x780] sm:$0xff]  ;;  %v7104_v59 = vld [vmem:[%s6358_s29 + $0x788] sm:$0xff] }
  0x87   : > { %9819 = vst [vmem:[#allocation229_spill] sm:$0xff] %v7101_v57  ;;  %9820 = vst [vmem:[#allocation230_spill] sm:$0xff] %v7104_v59  ;;  %v7107_v56 = vld [vmem:[%s6358_s29 + $0x790] sm:$0xff]  ;;  %v7110_v58 = vld [vmem:[%s6358_s29 + $0x798] sm:$0xff] }
  0x88   : > { %9821 = vst [vmem:[#allocation231_spill] sm:$0xff] %v7107_v56  ;;  %9822 = vst [vmem:[#allocation232_spill] sm:$0xff] %v7110_v58  ;;  %v7113_v62 = vld [vmem:[%s6358_s29 + $0x7a0] sm:$0xff]  ;;  %v7116_v60 = vld [vmem:[%s6358_s29 + $0x7a8] sm:$0xff] }
  0x89   : > { %9823 = vst [vmem:[#allocation233_spill] sm:$0xff] %v7113_v62  ;;  %9824 = vst [vmem:[#allocation234_spill] sm:$0xff] %v7116_v60  ;;  %v7119_v63 = vld [vmem:[%s6358_s29 + $0x7b0] sm:$0xff]  ;;  %v7122_v54 = vld [vmem:[%s6358_s29 + $0x7b8] sm:$0xff] }
  0x8a   : > { %9825 = vst [vmem:[#allocation235_spill] sm:$0xff] %v7119_v63  ;;  %9826 = vst [vmem:[#allocation236_spill] sm:$0xff] %v7122_v54  ;;  %v7125_v61 = vld [vmem:[%s6358_s29 + $0x7c0] sm:$0xff]  ;;  %v7128_v53 = vld [vmem:[%s6358_s29 + $0x7c8] sm:$0xff] }
  0x8b   : > { %9827 = vst [vmem:[#allocation237_spill] sm:$0xff] %v7125_v61  ;;  %9828 = vst [vmem:[#allocation238_spill] sm:$0xff] %v7128_v53  ;;  %v7131_v55 = vld [vmem:[%s6358_s29 + $0x7d0] sm:$0xff]  ;;  %v7134_v57 = vld [vmem:[%s6358_s29 + $0x7d8] sm:$0xff] }
  0x8c   : > { %9829 = vst [vmem:[#allocation239_spill] sm:$0xff] %v7131_v55  ;;  %9830 = vst [vmem:[#allocation240_spill] sm:$0xff] %v7134_v57  ;;  %v7137_v59 = vld [vmem:[%s6358_s29 + $0x7e0] sm:$0xff]  ;;  %v7140_v56 = vld [vmem:[%s6358_s29 + $0x7e8] sm:$0xff] }
  0x8d   : > { %9831 = vst [vmem:[#allocation241_spill] sm:$0xff] %v7137_v59  ;;  %9832 = vst [vmem:[#allocation242_spill] sm:$0xff] %v7140_v56  ;;  %v7143_v58 = vld [vmem:[%s6358_s29 + $0x7f0] sm:$0xff]  ;;  %v7146_v62 = vld [vmem:[%s6358_s29 + $0x7f8] sm:$0xff] }
  0x8e   : > { %9833 = vst [vmem:[#allocation243_spill] sm:$0xff] %v7143_v58  ;;  %9834 = vst [vmem:[#allocation244_spill] sm:$0xff] %v7146_v62 }
  0x8f   : > { %979 = vsyncadd [#allocation5 + $0x3], 8192  ;;  %v6254_v63 = vld [vmem:[%s9340_s1 + $0x40] sm:$0xff]   ;;  %v6258_v62 = vld [vmem:[%s9340_s1 + $0x48] sm:$0xff]   ;;  %vm1266_vm0 = vcmask 1043459   ;;  %vm1249_vm1 = vcmask 1041409  }
  0x90   : > { %v6255_v61 = vld [vmem:[%s9340_s1 + $0xc0] sm:$0xff]   ;;  %5999 = vmatprep.subr.bf16.mxu0 %v6254_v63  ;;  %v6259_v56 = vld [vmem:[%s9340_s1 + $0xc8] sm:$0xff]   ;;  %vm1380_vm2 = vcmask 1045509   ;;  %vm1465_vm3 = vcmask 1047559  }
  0x91   : > { %v6256_v59 = vld [vmem:[%s9340_s1] sm:$0xff]   ;;  %6027 = vmatprep.subr.bf16.mxu1 %v6255_v61  ;;  %v6260_v63 = vld [vmem:[%s9340_s1 + $0x8] sm:$0xff]  }
  0x92   : > { %v6257_v58 = vld [vmem:[%s9340_s1 + $0x80] sm:$0xff]   ;;  %6000 = vmatpush3.bf16.msra.mxu0 %v6256_v59  ;;  %v6261_v61 = vld [vmem:[%s9340_s1 + $0x88] sm:$0xff]   ;;  %v6262_v59 = vld [vmem:[%s9340_s1 + $0x50] sm:$0xff]  }
  0x93   : > { %6028 = vmatpush3.bf16.msra.mxu1 %v6257_v58  ;;  %6001 = vmatprep.subr.bf16.mxu0 %v6258_v62  ;;  %v6263_v58 = vld [vmem:[%s9340_s1 + $0xd0] sm:$0xff]   ;;  %v5647_v55 = vld [vmem:[%s9339_s0 + $0x48] sm:$0xff] }
  0x94   : > { %6029 = vmatprep.subr.bf16.mxu1 %v6259_v56  ;;  %v6264_v62 = vld [vmem:[%s9340_s1 + $0x10] sm:$0xff]   ;;  %v5651_v57 = vld [vmem:[%s9339_s0 + $0x68] sm:$0x3f] }
  0x95   : > { %v6265_v56 = vld [vmem:[%s9340_s1 + $0x90] sm:$0xff]   ;;  %v5659_v53 = vld [vmem:[%s9339_s0 + $0x3e8] sm:$0x3f] }
  0x96   : > { %6002 = vmatpush3.bf16.msra.mxu0 %v6260_v63  ;;  %v6266_v63 = vld [vmem:[%s9340_s1 + $0x58] sm:$0xff]   ;;  %v5667_v50 = vld [vmem:[%s9339_s0 + $0xa8] sm:$0x3f] }
  0x97   : > { %6030 = vmatpush3.bf16.msra.mxu1 %v6261_v61  ;;  %6003 = vmatprep.subr.bf16.mxu0 %v6262_v59  ;;  %v6267_v61 = vld [vmem:[%s9340_s1 + $0xd8] sm:$0xff]   ;;  %v5671_v49 = vld [vmem:[%s9339_s0 + $0x408] sm:$0xff] }
  0x98   : > { %6031 = vmatprep.subr.bf16.mxu1 %v6263_v58  ;;  %v6268_v59 = vld [vmem:[%s9340_s1 + $0x18] sm:$0xff]   ;;  %v5675_v48 = vld [vmem:[%s9339_s0 + $0x428] sm:$0x3f] }
  0x99   : > { %v6269_v58 = vld [vmem:[%s9340_s1 + $0x98] sm:$0xff]   ;;  %v5699_v47 = vld [vmem:[%s9339_s0 + $0x128] sm:$0x3f] }
  0x9a   : > { %6004 = vmatpush3.bf16.msra.mxu0 %v6264_v62  ;;  %v6270_v62 = vld [vmem:[%s9340_s1 + $0x60] sm:$0xff]   ;;  %v5731_v46 = vld [vmem:[%s9339_s0 + $0x128] sm:$0x3f] }
  0x9b   : > { %6032 = vmatpush3.bf16.msra.mxu1 %v6265_v56  ;;  %6005 = vmatprep.subr.bf16.mxu0 %v6266_v63  ;;  %v6271_v56 = vld [vmem:[%s9340_s1 + $0xe0] sm:$0xff]   ;;  %v5739_v44 = vld [vmem:[%s9339_s0 + $0x4a8] sm:$0x3f] }
  0x9c   : > { %6033 = vmatprep.subr.bf16.mxu1 %v6267_v61  ;;  %v6272_v63 = vld [vmem:[%s9340_s1 + $0x20] sm:$0xff]   ;;  %v5759_v29 = vld [vmem:[%s9339_s0 + $0x188] sm:$0xff] }
  0x9d   : > { %v6273_v61 = vld [vmem:[%s9340_s1 + $0xa0] sm:$0xff]   ;;  %v5763_v28 = vld [vmem:[%s9339_s0 + $0x1a8] sm:$0x3f] }
  0x9e   : > { %6006 = vmatpush3.bf16.msra.mxu0 %v6268_v59  ;;  %v6274_v59 = vld [vmem:[%s9340_s1 + $0x68] sm:$0xff]  }
  0x9f   : > { %6034 = vmatpush3.bf16.msra.mxu1 %v6269_v58  ;;  %6007 = vmatprep.subr.bf16.mxu0 %v6270_v62  ;;  %v6275_v58 = vld [vmem:[%s9340_s1 + $0xe8] sm:$0xff]  }
  0xa0   : > { %6035 = vmatprep.subr.bf16.mxu1 %v6271_v56  ;;  %v6276_v62 = vld [vmem:[%s9340_s1 + $0x28] sm:$0xff]  }
  0xa1   : > { %v6277_v56 = vld [vmem:[%s9340_s1 + $0xa8] sm:$0xff]  }
  0xa2   : > { %6008 = vmatpush3.bf16.msra.mxu0 %v6272_v63  ;;  %v6278_v63 = vld [vmem:[%s9340_s1 + $0x70] sm:$0xff]  }
  0xa3   : > { %6036 = vmatpush3.bf16.msra.mxu1 %v6273_v61  ;;  %6009 = vmatprep.subr.bf16.mxu0 %v6274_v59  ;;  %v6279_v61 = vld [vmem:[%s9340_s1 + $0xf0] sm:$0xff]  }
  0xa4   : > { %6037 = vmatprep.subr.bf16.mxu1 %v6275_v58  ;;  %v6280_v59 = vld [vmem:[%s9340_s1 + $0x30] sm:$0xff]  }
  0xa5   : > { %v6281_v58 = vld [vmem:[%s9340_s1 + $0xb0] sm:$0xff]  }
  0xa6   : > { %6010 = vmatpush3.bf16.msra.mxu0 %v6276_v62  ;;  %v6282_v62 = vld [vmem:[%s9340_s1 + $0x78] sm:$0xff]  }
  0xa7   : > { %6038 = vmatpush3.bf16.msra.mxu1 %v6277_v56  ;;  %6011 = vmatprep.subr.bf16.mxu0 %v6278_v63  ;;  %v6283_v56 = vld [vmem:[%s9340_s1 + $0xf8] sm:$0xff]  }
  0xa8   : > { %6039 = vmatprep.subr.bf16.mxu1 %v6279_v61  ;;  %v6284_v63 = vld [vmem:[%s9340_s1 + $0x38] sm:$0xff]  }
  0xa9   : > { %v6285_v61 = vld [vmem:[%s9340_s1 + $0xb8] sm:$0xff]  }
  0xaa   : > { %6012 = vmatpush3.bf16.msra.mxu0 %v6280_v59  ;;  %v981_v59 = vld [vmem:[%s9339_s0 + $0x8] sm:$0xff] }
  0xab   : > { %6040 = vmatpush3.bf16.msra.mxu1 %v6281_v58  ;;  %6013 = vmatprep.subr.bf16.mxu0 %v6282_v62  ;;  %v985_v58 = vld [vmem:[%s9339_s0 + $0x28] sm:$0x3f]  ;;  %v1014_v54 = vadd.f32 %v5647_v55, %v981_v59 }
  0xac   : > { %6041 = vmatprep.subr.bf16.mxu1 %v6283_v56  ;;  %v989_v62 = vld [vmem:[%s9339_s0 + $0x388] sm:$0xff]  ;;  %v1018_v60 = vadd.f32 %v5651_v57, %v985_v58 }
  0xad   : > { %v993_v56 = vld [vmem:[%s9339_s0 + $0x3a8] sm:$0x3f] }
  0xae   : > { %6014 = vmatpush3.bf16.msra.mxu0 %v6284_v63  ;;  %v5655_v63 = vld [vmem:[%s9339_s0 + $0x3c8] sm:$0xff]  ;;  %v1026_v51 = vadd.f32 %v5659_v53, %v993_v56  ;;  %v1051_v59 = vadd.f32 %v5667_v50, %v1018_v60 }
  0xaf   : > { %6042 = vmatpush3.bf16.msra.mxu1 %v6285_v61  ;;  %v1022_v52 = vadd.f32 %v5655_v63, %v989_v62  ;;  %v5663_v61 = vld [vmem:[%s9339_s0 + $0x88] sm:$0xff] }
  0xb0   : > { %v1047_v55 = vadd.f32 %v5663_v61, %v1014_v54  ;;  %v5679_v53 = vld [vmem:[%s9339_s0 + $0xc8] sm:$0xff]  ;;  %v1059_v62 = vadd.f32 %v5675_v48, %v1026_v51 }
  0xb1   : > { %v5683_v57 = vld [vmem:[%s9339_s0 + $0xe8] sm:$0x3f]  ;;  %v1055_v58 = vadd.f32 %v5671_v49, %v1022_v52 }
  0xb2   : > { %v5687_v56 = vld [vmem:[%s9339_s0 + $0x448] sm:$0xff]  ;;  %v1080_v61 = vadd.f32 %v5679_v53, %v1047_v55  ;;  %v1084_v50 = vadd.f32 %v5683_v57, %v1051_v59 }
  0xb3   : > { %v5691_v63 = vld [vmem:[%s9339_s0 + $0x468] sm:$0x3f]  ;;  %v1088_v51 = vadd.f32 %v5687_v56, %v1055_v58 }
  0xb4   : > { %v5695_v54 = vld [vmem:[%s9339_s0 + $0x108] sm:$0xff]  ;;  %v1092_v52 = vadd.f32 %v5691_v63, %v1059_v62  ;;  %v7316_v62 = vadd.f32 %v5699_v47, %v1084_v50 }
  0xb5   : > { %v5703_v48 = vld [vmem:[%s9339_s0 + $0x488] sm:$0xff]  ;;  %v1113_v45 = vadd.f32 %v5695_v54, %v1080_v61  ;;  %v1517_v57 = vadd.f32 %v5695_v54, %v5679_v53 }
  0xb6   : > { %v5707_v49 = vld [vmem:[%s9339_s0 + $0x4a8] sm:$0x3f]  ;;  %v1525_v58 = vadd.f32 %v5703_v48, %v5687_v56  ;;  %v1121_v63 = vadd.f32 %v5703_v48, %v1088_v51  ;;  %v1291_v33 = vrot.slane %v7316_v62, 2  ;;  %v1315_v47 = vrot.slane %v7316_v62, 3 }
  0xb7   : > { %v5715_v60 = vld [vmem:[%s9339_s0 + $0xe8] sm:$0x3f]  ;;  %v7318_v43 = vadd.f32 %v5707_v49, %v1092_v52  ;;  %v1137_v41 = vrot.slane %v1113_v45, 1  ;;  %v1161_v40 = vrot.slane %v1113_v45, 2  ;;  %v1185_v39 = vrot.slane %v1113_v45, 3 }
  0xb8   : > { %v5723_v55 = vld [vmem:[%s9339_s0 + $0x468] sm:$0x3f]  ;;  %v1521_v59 = vadd.f32 %v5731_v46, %v5715_v60  ;;  %v1209_v38 = vrot.slane %v1113_v45, 4  ;;  %v1141_v37 = vrot.slane %v1121_v63, 1  ;;  %v1165_v36 = vrot.slane %v1121_v63, 2 }
  0xb9   : > { %v1529_v42 = vadd.f32 %v5739_v44, %v5723_v55  ;;  %v1189_v61 = vrot.slane %v1121_v63, 3  ;;  %v1213_v35 = vrot.slane %v1121_v63, 4  ;;  %v1153_v34 = vadd.f32 %v1137_v41, %v1113_v45  ;;  %v5743_v53 = vld [vmem:[%s9339_s0 + $0x148] sm:$0xff] }
  0xba   : > { %v1295_v46 = vrot.slane %v7318_v43, 2  ;;  %v5747_v44 = vld [vmem:[%s9339_s0 + $0x168] sm:$0x3f]  ;;  %v1157_v56 = vadd.f32 %v1141_v37, %v1121_v63  ;;  %v1319_v54 = vrot.slane %v7318_v43, 3  ;;  %v1339_v41 = vrot.slane %v7316_v62, 4 }
  0xbb   : > { %v1343_v45 = vrot.slane %v7318_v43, 4  ;;  %v1177_v48 = vadd.f32 %v1161_v40, %v1153_v34  ;;  %v1307_v49 = vadd.f32 %v1291_v33, %v1153_v34  ;;  %v1400_v50 = vrot.slane %v7316_v62, 1  ;;  %v5751_v52 = vld [vmem:[%s9339_s0 + $0x4c8] sm:$0xff] }
  0xbc   : > { %v1404_v51 = vrot.slane %v7318_v43, 1  ;;  %v5755_v37 = vld [vmem:[%s9339_s0 + $0x4e8] sm:$0x3f]  ;;  %v1181_v60 = vadd.f32 %v1165_v36, %v1157_v56  ;;  %v1311_v55 = vadd.f32 %v1295_v46, %v1157_v56  ;;  %v1550_v63 = vadd.f32 %v5743_v53, %v1517_v57 }
  0xbd   : > { %v1554_v32 = vadd.f32 %v5747_v44, %v1521_v59  ;;  %v1201_v40 = vadd.f32 %v1185_v39, %v1177_v48  ;;  %v1331_v31 = vadd.f32 %v1315_v47, %v1307_v49  ;;  %v1416_v34 = vadd.f32 %v1400_v50, %v7316_v62  ;;  %v5771_v62 = vld [vmem:[%s9339_s0 + $0x528] sm:$0x3f] }
  0xbe   : > { %v1420_v30 = vadd.f32 %v1404_v51, %v7318_v43  ;;  %v1205_v27 = vadd.f32 %v1189_v61, %v1181_v60  ;;  %v1335_v26 = vadd.f32 %v1319_v54, %v1311_v55  ;;  %v1558_v36 = vadd.f32 %v5751_v52, %v1525_v58  ;;  %v5767_v43 = vld [vmem:[%s9339_s0 + $0x508] sm:$0xff] }
  0xbf   : > { %v1562_v57 = vadd.f32 %v5755_v37, %v1529_v42  ;;  %v1225_v59 = vadd.f32 %v1209_v38, %v1201_v40  ;;  %v1355_v39 = vadd.f32 %v1339_v41, %v1331_v31  ;;  %v1424_v53 = vadd.f32 %v1416_v34, %v1291_v33  ;;  %v5775_v42 = vld [vmem:[%s9339_s0 + $0x1c8] sm:$0xff] }
  0xc0   : > { %v1428_v44 = vadd.f32 %v1420_v30, %v1295_v46  ;;  %v1229_v56 = vadd.f32 %v1213_v35, %v1205_v27  ;;  %v1359_v48 = vadd.f32 %v1343_v45, %v1335_v26  ;;  %v1583_v49 = vadd.f32 %v5759_v29, %v1550_v63  ;;  %v5779_v58 = vld [vmem:[%s9339_s0 + $0x1e8] sm:$0x3f] }
  0xc1   : > { %v1587_v61 = vadd.f32 %v5763_v28, %v1554_v32  ;;  %v1233_v38 = vmul.f32 0.04, %v1225_v59  ;;  %v1363_v31 = vmul.f32 0.04, %v1355_v39  ;;  %v1432_v33 = vadd.f32 %v1424_v53, %v1315_v47  ;;  %v5783_v26 = vld [vmem:[%s9339_s0 + $0x548] sm:$0xff] }
  0xc2   : > { %v1436_v30 = vadd.f32 %v1428_v44, %v1319_v54  ;;  %v1237_v46 = vmul.f32 0.04, %v1229_v56  ;;  %v1367_v50 = vmul.f32 0.04, %v1359_v48  ;;  %v1591_v51 = vadd.f32 %v5767_v43, %v1558_v36  ;;  %v5787_v35 = vld [vmem:[%s9339_s0 + $0x568] sm:$0x3f] }
  0xc3   : > { %v1595_v52 = vadd.f32 %v5771_v62, %v1562_v57  ;;  %v1268_v27 = vrot.slane %v1233_v38, 1  ;;  %v1382_v28 = vrot.slane %v1363_v31, 2  ;;  %v1440_v29 = vadd.f32 %v1432_v33, %v1339_v41  ;;  %v983_v31 = vld [vmem:[%s9339_s0 + $0x18] sm:$0xff] }
  0xc4   : > { %v1444_v32 = vadd.f32 %v1436_v30, %v1343_v45  ;;  %v1251_v47 = vrot.slane %v1237_v46, 7  ;;  %v1383_v54 = vrot.slane %v1367_v50, 1  ;;  %v1616_v37 = vadd.f32 %v5775_v42, %v1583_v49  ;;  %v987_v33 = vld [vmem:[%s9339_s0 + $0x38] sm:$0x3f] }
  0xc5   : > { %v7366_v60 = vadd.f32 %v5779_v58, %v1587_v61  ;;  %v1269_v55 = vsel %vm1266_vm0, %v1237_v46, %v1268_v27  ;;  %v1448_v63 = vmul.f32 0.04, %v1440_v29  ;;  %v1624_v34 = vadd.f32 %v5783_v26, %v1591_v51  ;;  %v5649_v51 = vld [vmem:[%s9339_s0 + $0x58] sm:$0xff] }
  0xc6   : > { %v1452_v40 = vmul.f32 0.04, %v1444_v32  ;;  %v1252_v36 = vsel %vm1249_vm1, %v1251_v47, %v1233_v38  ;;  %1279 = vst [vmem:[#allocation2 + $0x8] sm:$0xc] %v1269_v55  ;;  %v1384_v41 = vsel %vm1380_vm2, %v1383_v54, %v1382_v28  ;;  %v7371_v45 = vadd.f32 %v5787_v35, %v1595_v52  ;;  %v5653_v52 = vld [vmem:[%s9339_s0 + $0x78] sm:$0x3f] }
  0xc7   : > { %v1640_v57 = vrot.slane %v1616_v37, 1  ;;  %1262 = vst [vmem:[#allocation2 + $0x8] sm:$0x3] %v1252_v36  ;;  %1396 = vst [vmem:[#allocation2 + $0x8] sm:$0x30] %v1384_v41  ;;  %v1467_v59 = vrot.slane %v1448_v63, 3  ;;  %v1016_v41 = vadd.f32 %v5649_v51, %v983_v31 }
  0xc8   : > { %v1468_v39 = vrot.slane %v1452_v40, 2  ;;  %v1644_v53 = vrot.slane %v1624_v34, 1  ;;  %v1664_v44 = vrot.slane %v1616_v37, 2  ;;  %v1668_v62 = vrot.slane %v1624_v34, 2  ;;  %v991_v32 = vld [vmem:[%s9339_s0 + $0x398] sm:$0xff] }
  0xc9   : > { %v1656_v43 = vadd.f32 %v1640_v57, %v1616_v37  ;;  %v1688_v56 = vrot.slane %v1616_v37, 3  ;;  %v1692_v48 = vrot.slane %v1624_v34, 3  ;;  %v1712_v42 = vrot.slane %v1616_v37, 4  ;;  %v995_v55 = vld [vmem:[%s9339_s0 + $0x3b8] sm:$0x3f] }
  0xca   : > { %v1469_v49 = vsel %vm1465_vm3, %v1468_v39, %v1467_v59  ;;  %v1660_v61 = vadd.f32 %v1644_v53, %v1624_v34  ;;  %v1716_v38 = vrot.slane %v1624_v34, 4  ;;  %v1792_v58 = vrot.slane %v7366_v60, 2  ;;  %v5657_v63 = vld [vmem:[%s9339_s0 + $0x3d8] sm:$0xff] }
  0xcb   : > { %1481 = vst [vmem:[#allocation2 + $0x8] sm:$0xc0] %v1469_v49  ;;  %v1680_v30 = vadd.f32 %v1664_v44, %v1656_v43  ;;  %v1796_v46 = vrot.slane %v7371_v45, 2  ;;  %v1816_v50 = vrot.slane %v7366_v60, 3  ;;  %v1820_v27 = vrot.slane %v7371_v45, 3 }
  0xcc   : > { %v1684_v26 = vadd.f32 %v1668_v62, %v1660_v61  ;;  %v1840_v28 = vrot.slane %v7366_v60, 4  ;;  %v1844_v29 = vrot.slane %v7371_v45, 4  ;;  %v1808_v47 = vadd.f32 %v1792_v58, %v1656_v43  ;;  %v5661_v40 = vld [vmem:[%s9339_s0 + $0x3f8] sm:$0x3f] }
  0xcd   : > { %v1704_v35 = vadd.f32 %v1688_v56, %v1680_v30  ;;  %v1812_v54 = vadd.f32 %v1796_v46, %v1660_v61  ;;  %v1900_v37 = vrot.slane %v7366_v60, 1  ;;  %v1904_v36 = vrot.slane %v7371_v45, 1  ;;  %v5665_v43 = vld [vmem:[%s9339_s0 + $0x98] sm:$0xff] }
  0xce   : > { %v1708_v34 = vadd.f32 %v1692_v48, %v1684_v26  ;;  %v1020_v57 = vadd.f32 %v5653_v52, %v987_v33  ;;  %v1832_v39 = vadd.f32 %v1816_v50, %v1808_v47  ;;  %v5669_v62 = vld [vmem:[%s9339_s0 + $0xb8] sm:$0x3f]  ;;  %v1024_v49 = vadd.f32 %v5657_v63, %v991_v32 }
  0xcf   : > { %v1728_v59 = vadd.f32 %v1712_v42, %v1704_v35  ;;  %v1836_v53 = vadd.f32 %v1820_v27, %v1812_v54  ;;  %v1916_v44 = vadd.f32 %v1900_v37, %v7366_v60  ;;  %v1920_v48 = vadd.f32 %v1904_v36, %v7371_v45  ;;  %v5673_v60 = vld [vmem:[%s9339_s0 + $0x418] sm:$0xff] }
  0xd0   : > { %v1732_v56 = vadd.f32 %v1716_v38, %v1708_v34  ;;  %v1028_v61 = vadd.f32 %v5661_v40, %v995_v55  ;;  %v1856_v33 = vadd.f32 %v1840_v28, %v1832_v39  ;;  %v5677_v51 = vld [vmem:[%s9339_s0 + $0x438] sm:$0x3f]  ;;  %v1049_v35 = vadd.f32 %v5665_v43, %v1016_v41 }
  0xd1   : > { %v1736_v31 = vmul.f32 0.04, %v1728_v59  ;;  %v1860_v42 = vadd.f32 %v1844_v29, %v1836_v53  ;;  %v1924_v30 = vadd.f32 %v1916_v44, %v1792_v58  ;;  %v1928_v26 = vadd.f32 %v1920_v48, %v1796_v46  ;;  %v5685_v45 = vld [vmem:[%s9339_s0 + $0xf8] sm:$0x3f] }
  0xd2   : > { %v1740_v52 = vmul.f32 0.04, %v1732_v56  ;;  %v1053_v38 = vadd.f32 %v5669_v62, %v1020_v57  ;;  %v1864_v47 = vmul.f32 0.04, %v1856_v33  ;;  %v1057_v63 = vadd.f32 %v5673_v60, %v1024_v49  ;;  %v5681_v34 = vld [vmem:[%s9339_s0 + $0xd8] sm:$0xff] }
  0xd3   : > { %v1769_v32 = vrot.slane %v1736_v31, 1  ;;  %v1868_v54 = vmul.f32 0.04, %v1860_v42  ;;  %v1932_v58 = vadd.f32 %v1924_v30, %v1816_v50  ;;  %v1936_v55 = vadd.f32 %v1928_v26, %v1820_v27  ;;  %v5693_v46 = vld [vmem:[%s9339_s0 + $0x478] sm:$0x3f] }
  0xd4   : > { %v1753_v37 = vrot.slane %v1740_v52, 7  ;;  %v1061_v40 = vadd.f32 %v5677_v51, %v1028_v61  ;;  %v1882_v41 = vrot.slane %v1864_v47, 2  ;;  %v5689_v50 = vld [vmem:[%s9339_s0 + $0x458] sm:$0xff]  ;;  %v1082_v43 = vadd.f32 %v5681_v34, %v1049_v35 }
  0xd5   : > { %v1770_v36 = vsel %vm1266_vm0, %v1740_v52, %v1769_v32  ;;  %v1883_v57 = vrot.slane %v1868_v54, 1  ;;  %v1940_v59 = vadd.f32 %v1932_v58, %v1840_v28  ;;  %v5697_v27 = vld [vmem:[%s9339_s0 + $0x118] sm:$0xff]  ;;  %v1944_v44 = vadd.f32 %v1936_v55, %v1844_v29 }
  0xd6   : > { %v5701_v39 = vld [vmem:[%s9339_s0 + $0x138] sm:$0x3f]  ;;  %v1754_v53 = vsel %vm1249_vm1, %v1753_v37, %v1736_v31  ;;  %1780 = vst [vmem:[#allocation2 + $0x28] sm:$0xc] %v1770_v36  ;;  %v1086_v62 = vadd.f32 %v5685_v45, %v1053_v38  ;;  %v1090_v31 = vadd.f32 %v5689_v50, %v1057_v63  ;;  %v1094_v29 = vadd.f32 %v5693_v46, %v1061_v40 }
  0xd7   : > { %v5709_v28 = vld [vmem:[%s9339_s0 + $0x4b8] sm:$0x3f]  ;;  %1764 = vst [vmem:[#allocation2 + $0x28] sm:$0x3] %v1754_v53  ;;  %v1884_v49 = vsel %vm1380_vm2, %v1883_v57, %v1882_v41  ;;  %v1948_v61 = vmul.f32 0.04, %v1940_v59  ;;  %v1115_v30 = vadd.f32 %v5697_v27, %v1082_v43  ;;  %v1519_v51 = vadd.f32 %v5697_v27, %v5681_v34 }
  0xd8   : > { %v5717_v56 = vld [vmem:[%s9339_s0 + $0xf8] sm:$0x3f]  ;;  %1896 = vst [vmem:[#allocation2 + $0x28] sm:$0x30] %v1884_v49  ;;  %v1952_v33 = vmul.f32 0.04, %v1944_v44  ;;  %v7453_v60 = vadd.f32 %v5701_v39, %v1086_v62  ;;  %v7455_v35 = vadd.f32 %v5709_v28, %v1094_v29 }
  0xd9   : > { %v5733_v48 = vld [vmem:[%s9339_s0 + $0x138] sm:$0x3f]  ;;  %v1966_v52 = vrot.slane %v1948_v61, 3  ;;  %v1139_v32 = vrot.slane %v1115_v30, 1  ;;  %v1163_v47 = vrot.slane %v1115_v30, 2  ;;  %v1187_v54 = vrot.slane %v1115_v30, 3 }
  0xda   : > { %v5705_v42 = vld [vmem:[%s9339_s0 + $0x498] sm:$0xff]  ;;  %v1523_v38 = vadd.f32 %v5733_v48, %v5717_v56  ;;  %v1967_v45 = vrot.slane %v1952_v33, 2  ;;  %v1211_v63 = vrot.slane %v1115_v30, 4  ;;  %v1293_v41 = vrot.slane %v7453_v60, 2 }
  0xdb   : > { %v1123_v26 = vadd.f32 %v5705_v42, %v1090_v31  ;;  %v1155_v46 = vadd.f32 %v1139_v32, %v1115_v30  ;;  %v5725_v34 = vld [vmem:[%s9339_s0 + $0x478] sm:$0x3f]  ;;  %v1297_v59 = vrot.slane %v7455_v35, 2  ;;  %v1317_v27 = vrot.slane %v7453_v60, 3 }
  0xdc   : > { %v1968_v40 = vsel %vm1465_vm3, %v1967_v45, %v1966_v52  ;;  %v1321_v39 = vrot.slane %v7455_v35, 3  ;;  %v5741_v53 = vld [vmem:[%s9339_s0 + $0x4b8] sm:$0x3f]  ;;  %v1341_v62 = vrot.slane %v7453_v60, 4  ;;  %v1345_v28 = vrot.slane %v7455_v35, 4 }
  0xdd   : > { %v1143_v58 = vrot.slane %v1123_v26, 1  ;;  %v1167_v37 = vrot.slane %v1123_v26, 2  ;;  %v1191_v55 = vrot.slane %v1123_v26, 3  ;;  %v1215_v36 = vrot.slane %v1123_v26, 4  ;;  %1980 = vst [vmem:[#allocation2 + $0x28] sm:$0xc0] %v1968_v40 }
  0xde   : > { %v1179_v44 = vadd.f32 %v1163_v47, %v1155_v46  ;;  %v1309_v43 = vadd.f32 %v1293_v41, %v1155_v46  ;;  %v1402_v49 = vrot.slane %v7453_v60, 1  ;;  %v1406_v61 = vrot.slane %v7455_v35, 1  ;;  %v5745_v31 = vld [vmem:[%s9339_s0 + $0x158] sm:$0xff]  ;;  %v2982_v46 = vld [vmem:[#allocation2 + $0x8] sm:$0xff] }
  0xdf   : > { %v1159_v57 = vadd.f32 %v1143_v58, %v1123_v26  ;;  %v5749_v29 = vld [vmem:[%s9339_s0 + $0x178] sm:$0x3f]  ;;  %v1527_v52 = vadd.f32 %v5705_v42, %v5689_v50  ;;  %v1531_v26 = vadd.f32 %v5741_v53, %v5725_v34 }
  0xe0   : > { %v1203_v33 = vadd.f32 %v1187_v54, %v1179_v44  ;;  %v1333_v30 = vadd.f32 %v1317_v27, %v1309_v43  ;;  %v1418_v47 = vadd.f32 %v1402_v49, %v7453_v60  ;;  %v1422_v58 = vadd.f32 %v1406_v61, %v7455_v35  ;;  %v5757_v40 = vld [vmem:[%s9339_s0 + $0x4f8] sm:$0x3f] }
  0xe1   : > { %v1183_v56 = vadd.f32 %v1167_v37, %v1159_v57  ;;  %v1313_v48 = vadd.f32 %v1297_v59, %v1159_v57  ;;  %v5753_v37 = vld [vmem:[%s9339_s0 + $0x4d8] sm:$0xff]  ;;  %v1552_v44 = vadd.f32 %v5745_v31, %v1519_v51  ;;  %v1556_v50 = vadd.f32 %v5749_v29, %v1523_v38 }
  0xe2   : > { %v1227_v57 = vadd.f32 %v1211_v63, %v1203_v33  ;;  %v1357_v54 = vadd.f32 %v1341_v62, %v1333_v30  ;;  %v1426_v34 = vadd.f32 %v1418_v47, %v1293_v41  ;;  %v1430_v53 = vadd.f32 %v1422_v58, %v1297_v59  ;;  %v5761_v60 = vld [vmem:[%s9339_s0 + $0x198] sm:$0xff] }
  0xe3   : > { %v1207_v45 = vadd.f32 %v1191_v55, %v1183_v56  ;;  %v1337_v32 = vadd.f32 %v1321_v39, %v1313_v48  ;;  %v5765_v35 = vld [vmem:[%s9339_s0 + $0x1b8] sm:$0x3f]  ;;  %v1560_v49 = vadd.f32 %v5753_v37, %v1527_v52  ;;  %v1564_v63 = vadd.f32 %v5757_v40, %v1531_v26 }
  0xe4   : > { %v2986_v43 = vld [vmem:[#allocation2 + $0x28] sm:$0xff]  ;;  %v1235_v56 = vmul.f32 0.04, %v1227_v57  ;;  %v1365_v48 = vmul.f32 0.04, %v1357_v54  ;;  %v5769_v51 = vld [vmem:[%s9339_s0 + $0x518] sm:$0xff]  ;;  %v1434_v59 = vadd.f32 %v1426_v34, %v1317_v27  ;;  %v1438_v33 = vadd.f32 %v1430_v53, %v1321_v39 }
  0xe5   : > { %v1231_v42 = vadd.f32 %v1215_v36, %v1207_v45  ;;  %v1361_v55 = vadd.f32 %v1345_v28, %v1337_v32  ;;  %v2998_v38 = vpack.c.bf16 %v2986_v43, %v2982_v46  ;;  %v5773_v61 = vld [vmem:[%s9339_s0 + $0x538] sm:$0x3f]  ;;  %v1585_v30 = vadd.f32 %v5761_v60, %v1552_v44 }
  0xe6   : > { %v1272_v31 = vrot.slane %v1235_v56, 1  ;;  %v1388_v29 = vrot.slane %v1365_v48, 2  ;;  %v5777_v52 = vld [vmem:[%s9339_s0 + $0x1d8] sm:$0xff]  ;;  %v1442_v27 = vadd.f32 %v1434_v59, %v1341_v62  ;;  %v1589_v47 = vadd.f32 %v5765_v35, %v1556_v50 }
  0xe7   : > { %v1239_v36 = vmul.f32 0.04, %v1231_v42  ;;  %v1369_v41 = vmul.f32 0.04, %v1361_v55  ;;  %v5781_v26 = vld [vmem:[%s9339_s0 + $0x1f8] sm:$0x3f]  ;;  %3300 = vmatprep.mubr.bf16.mxu0 %v2998_v38  ;;  %v1446_v40 = vadd.f32 %v1438_v33, %v1345_v28  ;;  %v1593_v46 = vadd.f32 %v5769_v51, %v1560_v49 }
  0xe8   : > { %v5785_v58 = vld [vmem:[%s9339_s0 + $0x558] sm:$0xff]  ;;  %v1597_v57 = vadd.f32 %v5773_v61, %v1564_v63  ;;  %v1450_v62 = vmul.f32 0.04, %v1442_v27  ;;  %v1618_v50 = vadd.f32 %v5777_v52, %v1585_v30  ;;  %v7513_v55 = vadd.f32 %v5781_v26, %v1589_v47  ;;  %v980_v33 = vld [vmem:[%s9339_s0] sm:$0xff] }
  0xe9   : > { %v1255_v45 = vrot.slane %v1239_v36, 7  ;;  %v1389_v32 = vrot.slane %v1369_v41, 1  ;;  %v5789_v39 = vld [vmem:[%s9339_s0 + $0x578] sm:$0x3f]  ;;  %v1273_v37 = vsel %vm1266_vm0, %v1239_v36, %v1272_v31  ;;  %v1454_v42 = vmul.f32 0.04, %v1446_v40 }
  0xea   : > { %1281 = vst [vmem:[#allocation2 + $0x18] sm:$0xc] %v1273_v37  ;;  %v1626_v34 = vadd.f32 %v5785_v58, %v1593_v46  ;;  %v7515_v53 = vadd.f32 %v5789_v39, %v1597_v57  ;;  %v1473_v60 = vrot.slane %v1450_v62, 3  ;;  %v1642_v35 = vrot.slane %v1618_v50, 1  ;;  %v5646_v30 = vld [vmem:[%s9339_s0 + $0x40] sm:$0xff] }
  0xeb   : > { %v1256_v54 = vsel %vm1249_vm1, %v1255_v45, %v1235_v56  ;;  %v1390_v44 = vsel %vm1380_vm2, %v1389_v32, %v1388_v29  ;;  %v1666_v28 = vrot.slane %v1618_v50, 2  ;;  %v1690_v43 = vrot.slane %v1618_v50, 3  ;;  %v984_v27 = vld [vmem:[%s9339_s0 + $0x20] sm:$0x3f] }
  0xec   : > { %1264 = vst [vmem:[#allocation2 + $0x18] sm:$0x3] %v1256_v54  ;;  %1398 = vst [vmem:[#allocation2 + $0x18] sm:$0x30] %v1390_v44  ;;  %v1474_v48 = vrot.slane %v1454_v42, 2  ;;  %v1646_v49 = vrot.slane %v1626_v34, 1  ;;  %v1658_v51 = vadd.f32 %v1642_v35, %v1618_v50 }
  0xed   : > { %v1670_v56 = vrot.slane %v1626_v34, 2  ;;  %v1694_v63 = vrot.slane %v1626_v34, 3  ;;  %v1714_v38 = vrot.slane %v1618_v50, 4  ;;  %v1718_v36 = vrot.slane %v1626_v34, 4  ;;  %v5650_v47 = vld [vmem:[%s9339_s0 + $0x60] sm:$0x3f] }
  0xee   : > { %v1794_v41 = vrot.slane %v7513_v55, 2  ;;  %v1475_v59 = vsel %vm1465_vm3, %v1474_v48, %v1473_v60  ;;  %v1662_v61 = vadd.f32 %v1646_v49, %v1626_v34  ;;  %v1798_v31 = vrot.slane %v7515_v53, 2  ;;  %v988_v46 = vld [vmem:[%s9339_s0 + $0x380] sm:$0xff] }
  0xef   : > { %v1818_v29 = vrot.slane %v7513_v55, 3  ;;  %1483 = vst [vmem:[#allocation2 + $0x18] sm:$0xc0] %v1475_v59  ;;  %v1682_v52 = vadd.f32 %v1666_v28, %v1658_v51  ;;  %v1822_v45 = vrot.slane %v7515_v53, 3  ;;  %v1842_v32 = vrot.slane %v7513_v55, 4  ;;  %v5654_v57 = vld [vmem:[%s9339_s0 + $0x3c0] sm:$0xff] }
  0xf0   : > { %v1810_v26 = vadd.f32 %v1794_v41, %v1658_v51  ;;  %v1686_v58 = vadd.f32 %v1670_v56, %v1662_v61  ;;  %v1814_v39 = vadd.f32 %v1798_v31, %v1662_v61  ;;  %v1846_v37 = vrot.slane %v7515_v53, 4  ;;  %v992_v50 = vld [vmem:[%s9339_s0 + $0x3a0] sm:$0x3f] }
  0xf1   : > { %v1902_v40 = vrot.slane %v7513_v55, 1  ;;  %v1706_v54 = vadd.f32 %v1690_v43, %v1682_v52  ;;  %v1906_v62 = vrot.slane %v7515_v53, 1  ;;  %v5658_v42 = vld [vmem:[%s9339_s0 + $0x3e0] sm:$0x3f]  ;;  %v1013_v34 = vadd.f32 %v5646_v30, %v980_v33 }
  0xf2   : > { %v1834_v44 = vadd.f32 %v1818_v29, %v1810_v26  ;;  %v1710_v60 = vadd.f32 %v1694_v63, %v1686_v58  ;;  %v1838_v35 = vadd.f32 %v1822_v45, %v1814_v39  ;;  %v1017_v48 = vadd.f32 %v5650_v47, %v984_v27  ;;  %v5662_v43 = vld [vmem:[%s9339_s0 + $0x80] sm:$0xff] }
  0xf3   : > { %v1918_v28 = vadd.f32 %v1902_v40, %v7513_v55  ;;  %v1730_v49 = vadd.f32 %v1714_v38, %v1706_v54  ;;  %v1922_v51 = vadd.f32 %v1906_v62, %v7515_v53  ;;  %v1021_v59 = vadd.f32 %v5654_v57, %v988_v46  ;;  %v5666_v61 = vld [vmem:[%s9339_s0 + $0xa0] sm:$0x3f] }
  0xf4   : > { %v1858_v56 = vadd.f32 %v1842_v32, %v1834_v44  ;;  %v1734_v52 = vadd.f32 %v1718_v36, %v1710_v60  ;;  %v1862_v33 = vadd.f32 %v1846_v37, %v1838_v35  ;;  %v1025_v30 = vadd.f32 %v5658_v42, %v992_v50  ;;  %v5670_v55 = vld [vmem:[%s9339_s0 + $0x400] sm:$0xff] }
  0xf5   : > { %v1926_v63 = vadd.f32 %v1918_v28, %v1794_v41  ;;  %v1738_v26 = vmul.f32 0.04, %v1730_v49  ;;  %v1930_v47 = vadd.f32 %v1922_v51, %v1798_v31  ;;  %v5674_v53 = vld [vmem:[%s9339_s0 + $0x420] sm:$0x3f]  ;;  %v1046_v38 = vadd.f32 %v5662_v43, %v1013_v34 }
  0xf6   : > { %v1866_v27 = vmul.f32 0.04, %v1858_v56  ;;  %v1742_v58 = vmul.f32 0.04, %v1734_v52  ;;  %v1870_v39 = vmul.f32 0.04, %v1862_v33  ;;  %v1050_v46 = vadd.f32 %v5666_v61, %v1017_v48 }
  0xf7   : > { %v1934_v40 = vadd.f32 %v1926_v63, %v1818_v29  ;;  %v5682_v36 = vld [vmem:[%s9339_s0 + $0xe0] sm:$0x3f]  ;;  %v1773_v41 = vrot.slane %v1738_v26, 1  ;;  %v1938_v54 = vadd.f32 %v1930_v47, %v1822_v45  ;;  %v1054_v44 = vadd.f32 %v5670_v55, %v1021_v59 }
  0xf8   : > { %v1888_v57 = vrot.slane %v1866_v27, 2  ;;  %v5678_v31 = vld [vmem:[%s9339_s0 + $0xc0] sm:$0xff]  ;;  %v1757_v50 = vrot.slane %v1742_v58, 7  ;;  %v1889_v42 = vrot.slane %v1870_v39, 1  ;;  %v1058_v34 = vadd.f32 %v5674_v53, %v1025_v30 }
  0xf9   : > { %v5686_v62 = vld [vmem:[%s9339_s0 + $0x440] sm:$0xff]  ;;  %v1942_v29 = vadd.f32 %v1934_v40, %v1842_v32  ;;  %v1774_v35 = vsel %vm1266_vm0, %v1742_v58, %v1773_v41  ;;  %v1946_v28 = vadd.f32 %v1938_v54, %v1846_v37  ;;  %v1079_v48 = vadd.f32 %v5678_v31, %v1046_v38 }
  0xfa   : > { %v5690_v60 = vld [vmem:[%s9339_s0 + $0x460] sm:$0x3f]  ;;  %v1083_v43 = vadd.f32 %v5682_v36, %v1050_v46  ;;  %v1758_v51 = vsel %vm1249_vm1, %v1757_v50, %v1738_v26  ;;  %1782 = vst [vmem:[#allocation2 + $0x38] sm:$0xc] %v1774_v35  ;;  %v1890_v59 = vsel %vm1380_vm2, %v1889_v42, %v1888_v57  ;;  %v1087_v61 = vadd.f32 %v5686_v62, %v1054_v44 }
  0xfb   : > { %v5698_v45 = vld [vmem:[%s9339_s0 + $0x120] sm:$0x3f]  ;;  %v1950_v37 = vmul.f32 0.04, %v1942_v29  ;;  %1766 = vst [vmem:[#allocation2 + $0x38] sm:$0x3] %v1758_v51  ;;  %v1091_v63 = vadd.f32 %v5690_v60, %v1058_v34 }
  0xfc   : > { %v5694_v49 = vld [vmem:[%s9339_s0 + $0x100] sm:$0xff]  ;;  %1898 = vst [vmem:[#allocation2 + $0x38] sm:$0x30] %v1890_v59  ;;  %v1954_v33 = vmul.f32 0.04, %v1946_v28  ;;  %v7597_v27 = vadd.f32 %v5698_v45, %v1083_v43 }
  0xfd   : > { %v5714_v32 = vld [vmem:[%s9339_s0 + $0xe0] sm:$0x3f]  ;;  %v1112_v55 = vadd.f32 %v5694_v49, %v1079_v48  ;;  %v1972_v26 = vrot.slane %v1950_v37, 3  ;;  %v1516_v53 = vadd.f32 %v5694_v49, %v5678_v31 }
  0xfe   : > { %v5730_v56 = vld [vmem:[%s9339_s0 + $0x120] sm:$0x3f]  ;;  %v1973_v58 = vrot.slane %v1954_v33, 2  ;;  %v1290_v60 = vrot.slane %v7597_v27, 2  ;;  %v1314_v35 = vrot.slane %v7597_v27, 3  ;;  %v1338_v49 = vrot.slane %v7597_v27, 4 }
  0xff   : > { %v5706_v52 = vld [vmem:[%s9339_s0 + $0x4a0] sm:$0x3f]  ;;  %v1520_v38 = vadd.f32 %v5730_v56, %v5714_v32  ;;  %v1136_v40 = vrot.slane %v1112_v55, 1  ;;  %v1160_v46 = vrot.slane %v1112_v55, 2  ;;  %v1184_v57 = vrot.slane %v1112_v55, 3 }
 0x100   : > { %v5702_v30 = vld [vmem:[%s9339_s0 + $0x480] sm:$0xff]  ;;  %v7599_v39 = vadd.f32 %v5706_v52, %v1091_v63  ;;  %v1974_v44 = vsel %vm1465_vm3, %v1973_v58, %v1972_v26  ;;  %v1208_v42 = vrot.slane %v1112_v55, 4  ;;  %v1399_v37 = vrot.slane %v7597_v27, 1 }
 0x101   : > { %v1120_v47 = vadd.f32 %v5702_v30, %v1087_v61  ;;  %v1152_v50 = vadd.f32 %v1136_v40, %v1112_v55  ;;  %v5722_v34 = vld [vmem:[%s9339_s0 + $0x460] sm:$0x3f]  ;;  %1982 = vst [vmem:[#allocation2 + $0x38] sm:$0xc0] %v1974_v44  ;;  %v1524_v55 = vadd.f32 %v5702_v30, %v5686_v62  ;;  %v2984_v44 = vld [vmem:[#allocation2 + $0x18] sm:$0xff] }
 0x102   : > { %v1294_v45 = vrot.slane %v7599_v39, 2  ;;  %v5738_v28 = vld [vmem:[%s9339_s0 + $0x4a0] sm:$0x3f]  ;;  %v1318_v43 = vrot.slane %v7599_v39, 3  ;;  %v1342_v32 = vrot.slane %v7599_v39, 4  ;;  %v1403_v63 = vrot.slane %v7599_v39, 1 }
 0x103   : > { %v1140_v36 = vrot.slane %v1120_v47, 1  ;;  %v1164_v41 = vrot.slane %v1120_v47, 2  ;;  %v1188_v54 = vrot.slane %v1120_v47, 3  ;;  %v1212_v29 = vrot.slane %v1120_v47, 4  ;;  %v5742_v61 = vld [vmem:[%s9339_s0 + $0x140] sm:$0xff] }
 0x104   : > { %v1176_v48 = vadd.f32 %v1160_v46, %v1152_v50  ;;  %v1306_v51 = vadd.f32 %v1290_v60, %v1152_v50  ;;  %v5746_v52 = vld [vmem:[%s9339_s0 + $0x160] sm:$0x3f]  ;;  %v1528_v26 = vadd.f32 %v5738_v28, %v5722_v34  ;;  %v1415_v46 = vadd.f32 %v1399_v37, %v7597_v27 }
 0x105   : > { %v1156_v31 = vadd.f32 %v1140_v36, %v1120_v47  ;;  %v5750_v36 = vld [vmem:[%s9339_s0 + $0x4c0] sm:$0xff]  ;;  %v1553_v62 = vadd.f32 %v5746_v52, %v1520_v38 }
 0x106   : > { %v1200_v33 = vadd.f32 %v1184_v57, %v1176_v48  ;;  %v1330_v58 = vadd.f32 %v1314_v35, %v1306_v51  ;;  %v1419_v57 = vadd.f32 %v1403_v63, %v7599_v39  ;;  %v1423_v28 = vadd.f32 %v1415_v46, %v1290_v60  ;;  %v5758_v27 = vld [vmem:[%s9339_s0 + $0x180] sm:$0xff] }
 0x107   : > { %v1180_v56 = vadd.f32 %v1164_v41, %v1156_v31  ;;  %v1310_v59 = vadd.f32 %v1294_v45, %v1156_v31  ;;  %v5754_v41 = vld [vmem:[%s9339_s0 + $0x4e0] sm:$0x3f]  ;;  %v1549_v31 = vadd.f32 %v5742_v61, %v1516_v53 }
 0x108   : > { %v1224_v50 = vadd.f32 %v1208_v42, %v1200_v33  ;;  %v2988_v48 = vld [vmem:[#allocation2 + $0x38] sm:$0xff]  ;;  %v1427_v51 = vadd.f32 %v1419_v57, %v1294_v45  ;;  %v1561_v37 = vadd.f32 %v5754_v41, %v1528_v26  ;;  %v5762_v42 = vld [vmem:[%s9339_s0 + $0x1a0] sm:$0x3f]  ;;  %v1431_v52 = vadd.f32 %v1423_v28, %v1314_v35 }
 0x109   : > { %v1204_v47 = vadd.f32 %v1188_v54, %v1180_v56  ;;  %v1334_v40 = vadd.f32 %v1318_v43, %v1310_v59  ;;  %v1354_v54 = vadd.f32 %v1338_v49, %v1330_v58  ;;  %v1557_v59 = vadd.f32 %v5750_v36, %v1524_v55  ;;  %v5766_v53 = vld [vmem:[%s9339_s0 + $0x500] sm:$0xff] }
 0x10a   : > { %v1232_v56 = vmul.f32 0.04, %v1224_v50  ;;  %v3000_v38 = vpack.c.bf16 %v2988_v48, %v2984_v44  ;;  %v1435_v33 = vadd.f32 %v1427_v51, %v1318_v43  ;;  %v5770_v45 = vld [vmem:[%s9339_s0 + $0x520] sm:$0x3f]  ;;  %v1582_v63 = vadd.f32 %v5758_v27, %v1549_v31 }
 0x10b   : > { %v1228_v30 = vadd.f32 %v1212_v29, %v1204_v47  ;;  %v1358_v34 = vadd.f32 %v1342_v32, %v1334_v40  ;;  %v1362_v29 = vmul.f32 0.04, %v1354_v54  ;;  %v5774_v55 = vld [vmem:[%s9339_s0 + $0x1c0] sm:$0xff]  ;;  %v1586_v40 = vadd.f32 %v5762_v42, %v1553_v62 }
 0x10c   : > { %v1265_v61 = vrot.slane %v1232_v56, 1  ;;  %3349 = vmatprep.mubr.bf16.mxu1 %v3000_v38  ;;  %v5778_v46 = vld [vmem:[%s9339_s0 + $0x1e0] sm:$0x3f]  ;;  %v1439_v36 = vadd.f32 %v1431_v52, %v1338_v49  ;;  %v1443_v41 = vadd.f32 %v1435_v33, %v1342_v32  ;;  %v1590_v44 = vadd.f32 %v5766_v53, %v1557_v59 }
 0x10d   : > { %v1236_v39 = vmul.f32 0.04, %v1228_v30  ;;  %v1366_v60 = vmul.f32 0.04, %v1358_v34  ;;  %v1378_v47 = vrot.slane %v1362_v29, 2  ;;  %v5782_v35 = vld [vmem:[%s9339_s0 + $0x540] sm:$0xff]  ;;  %v1594_v62 = vadd.f32 %v5770_v45, %v1561_v37 }
 0x10e   : > { %v5786_v50 = vld [vmem:[%s9339_s0 + $0x560] sm:$0x3f]  ;;  %v1615_v30 = vadd.f32 %v5774_v55, %v1582_v63  ;;  %v1447_v54 = vmul.f32 0.04, %v1439_v36  ;;  %v1451_v34 = vmul.f32 0.04, %v1443_v41  ;;  %v7657_v28 = vadd.f32 %v5778_v46, %v1586_v40 }
 0x10f   : > { %v1248_v26 = vrot.slane %v1236_v39, 7  ;;  %v1379_v58 = vrot.slane %v1366_v60, 1  ;;  %v1267_v43 = vsel %vm1266_vm0, %v1236_v39, %v1265_v61  ;;  %v1623_v49 = vadd.f32 %v5782_v35, %v1590_v44  ;;  %v982_v45 = vld [vmem:[%s9339_s0 + $0x10] sm:$0xff] }
 0x110   : > { %1278 = vst [vmem:[#allocation2] sm:$0xc] %v1267_v43  ;;  %v7659_v32 = vadd.f32 %v5786_v50, %v1594_v62  ;;  %v1639_v27 = vrot.slane %v1615_v30, 1  ;;  %v1663_v48 = vrot.slane %v1615_v30, 2  ;;  %v1687_v51 = vrot.slane %v1615_v30, 3  ;;  %v5648_v55 = vld [vmem:[%s9339_s0 + $0x50] sm:$0xff] }
 0x111   : > { %v1250_v57 = vsel %vm1249_vm1, %v1248_v26, %v1232_v56  ;;  %v1381_v31 = vsel %vm1380_vm2, %v1379_v58, %v1378_v47  ;;  %v1463_v59 = vrot.slane %v1447_v54, 3  ;;  %v1464_v42 = vrot.slane %v1451_v34, 2  ;;  %v986_v63 = vld [vmem:[%s9339_s0 + $0x30] sm:$0x3f] }
 0x112   : > { %1261 = vst [vmem:[#allocation2] sm:$0x3] %v1250_v57  ;;  %1395 = vst [vmem:[#allocation2] sm:$0x30] %v1381_v31  ;;  %v1643_v56 = vrot.slane %v1623_v49, 1  ;;  %v1667_v53 = vrot.slane %v1623_v49, 2  ;;  %v1655_v38 = vadd.f32 %v1639_v27, %v1615_v30  ;;  %v1015_v34 = vadd.f32 %v5648_v55, %v982_v45 }
 0x113   : > { %v1691_v39 = vrot.slane %v1623_v49, 3  ;;  %v1711_v37 = vrot.slane %v1615_v30, 4  ;;  %v1715_v29 = vrot.slane %v1623_v49, 4  ;;  %v1466_v60 = vsel %vm1465_vm3, %v1464_v42, %v1463_v59  ;;  %v5652_v46 = vld [vmem:[%s9339_s0 + $0x70] sm:$0x3f] }
 0x114   : > { %v1659_v61 = vadd.f32 %v1643_v56, %v1623_v49  ;;  %v1791_v52 = vrot.slane %v7657_v28, 2  ;;  %v1795_v33 = vrot.slane %v7659_v32, 2  ;;  %1480 = vst [vmem:[#allocation2] sm:$0xc0] %v1466_v60  ;;  %v1679_v26 = vadd.f32 %v1663_v48, %v1655_v38  ;;  %v990_v44 = vld [vmem:[%s9339_s0 + $0x390] sm:$0xff] }
 0x115   : > { %v1815_v47 = vrot.slane %v7657_v28, 3  ;;  %v1819_v58 = vrot.slane %v7659_v32, 3  ;;  %v1839_v40 = vrot.slane %v7657_v28, 4  ;;  %v1843_v41 = vrot.slane %v7659_v32, 4  ;;  %v5656_v50 = vld [vmem:[%s9339_s0 + $0x3d0] sm:$0xff] }
 0x116   : > { %v1683_v35 = vadd.f32 %v1667_v53, %v1659_v61  ;;  %v1807_v43 = vadd.f32 %v1791_v52, %v1655_v38  ;;  %v1811_v36 = vadd.f32 %v1795_v33, %v1659_v61  ;;  %v1703_v57 = vadd.f32 %v1687_v51, %v1679_v26  ;;  %v994_v30 = vld [vmem:[%s9339_s0 + $0x3b0] sm:$0x3f] }
 0x117   : > { %v1899_v31 = vrot.slane %v7657_v28, 1  ;;  %v1903_v62 = vrot.slane %v7659_v32, 1  ;;  %v5660_v54 = vld [vmem:[%s9339_s0 + $0x3f0] sm:$0x3f]  ;;  %v1019_v59 = vadd.f32 %v5652_v46, %v986_v63  ;;  %v1023_v38 = vadd.f32 %v5656_v50, %v990_v44 }
 0x118   : > { %v1707_v49 = vadd.f32 %v1691_v39, %v1683_v35  ;;  %v1831_v27 = vadd.f32 %v1815_v47, %v1807_v43  ;;  %v1835_v48 = vadd.f32 %v1819_v58, %v1811_v36  ;;  %v5664_v51 = vld [vmem:[%s9339_s0 + $0x90] sm:$0xff]  ;;  %v1727_v42 = vadd.f32 %v1711_v37, %v1703_v57 }
 0x119   : > { %v1915_v56 = vadd.f32 %v1899_v31, %v7657_v28  ;;  %v1919_v53 = vadd.f32 %v1903_v62, %v7659_v32  ;;  %v5668_v60 = vld [vmem:[%s9339_s0 + $0xb0] sm:$0x3f]  ;;  %v1027_v55 = vadd.f32 %v5660_v54, %v994_v30  ;;  %v1048_v32 = vadd.f32 %v5664_v51, %v1015_v34 }
 0x11a   : > { %v1731_v61 = vadd.f32 %v1715_v29, %v1707_v49  ;;  %v1855_v45 = vadd.f32 %v1839_v40, %v1831_v27  ;;  %v1859_v39 = vadd.f32 %v1843_v41, %v1835_v48  ;;  %v5672_v63 = vld [vmem:[%s9339_s0 + $0x410] sm:$0xff]  ;;  %v1735_v26 = vmul.f32 0.04, %v1727_v42 }
 0x11b   : > { %v1923_v46 = vadd.f32 %v1915_v56, %v1791_v52  ;;  %v1927_v37 = vadd.f32 %v1919_v53, %v1795_v33  ;;  %v5676_v28 = vld [vmem:[%s9339_s0 + $0x430] sm:$0x3f]  ;;  %v1052_v44 = vadd.f32 %v5668_v60, %v1019_v59  ;;  %v1056_v31 = vadd.f32 %v5672_v63, %v1023_v38 }
 0x11c   : > { %v1739_v35 = vmul.f32 0.04, %v1731_v61  ;;  %v1863_v43 = vmul.f32 0.04, %v1855_v45  ;;  %v1867_v36 = vmul.f32 0.04, %v1859_v39  ;;  %v1060_v49 = vadd.f32 %v5676_v28, %v1027_v55 }
 0x11d   : > { %v1767_v29 = vrot.slane %v1735_v26, 1  ;;  %v1931_v50 = vadd.f32 %v1923_v46, %v1815_v47  ;;  %v1935_v57 = vadd.f32 %v1927_v37, %v1819_v58  ;;  %v5680_v62 = vld [vmem:[%s9339_s0 + $0xd0] sm:$0xff] }
 0x11e   : > { %v5684_v52 = vld [vmem:[%s9339_s0 + $0xf0] sm:$0x3f]  ;;  %v1751_v30 = vrot.slane %v1739_v35, 7  ;;  %v1879_v54 = vrot.slane %v1863_v43, 2  ;;  %v1880_v34 = vrot.slane %v1867_v36, 1  ;;  %v1081_v51 = vadd.f32 %v5680_v62, %v1048_v32 }
 0x11f   : > { %v5688_v33 = vld [vmem:[%s9339_s0 + $0x450] sm:$0xff]  ;;  %v1768_v27 = vsel %vm1266_vm0, %v1739_v35, %v1767_v29  ;;  %v1939_v48 = vadd.f32 %v1931_v50, %v1839_v40  ;;  %v1943_v59 = vadd.f32 %v1935_v57, %v1843_v41  ;;  %v1085_v40 = vadd.f32 %v5684_v52, %v1052_v44 }
 0x120   : > { %v5692_v47 = vld [vmem:[%s9339_s0 + $0x470] sm:$0x3f]  ;;  %v1752_v38 = vsel %vm1249_vm1, %v1751_v30, %v1735_v26  ;;  %1779 = vst [vmem:[#allocation2 + $0x20] sm:$0xc] %v1768_v27  ;;  %v1881_v60 = vsel %vm1380_vm2, %v1880_v34, %v1879_v54  ;;  %v1089_v41 = vadd.f32 %v5688_v33, %v1056_v31 }
 0x121   : > { %v5696_v58 = vld [vmem:[%s9339_s0 + $0x110] sm:$0xff]  ;;  %1763 = vst [vmem:[#allocation2 + $0x20] sm:$0x3] %v1752_v38  ;;  %1895 = vst [vmem:[#allocation2 + $0x20] sm:$0x30] %v1881_v60  ;;  %v1093_v55 = vadd.f32 %v5692_v47, %v1060_v49 }
 0x122   : > { %v5700_v42 = vld [vmem:[%s9339_s0 + $0x130] sm:$0x3f]  ;;  %v1947_v45 = vmul.f32 0.04, %v1939_v48  ;;  %v1951_v39 = vmul.f32 0.04, %v1943_v59  ;;  %v1114_v46 = vadd.f32 %v5696_v58, %v1081_v51  ;;  %v1518_v28 = vadd.f32 %v5696_v58, %v5680_v62 }
 0x123   : > { %v5716_v56 = vld [vmem:[%s9339_s0 + $0xf0] sm:$0x3f]  ;;  %v7741_v26 = vadd.f32 %v5700_v42, %v1085_v40 }
 0x124   : > { %v5732_v53 = vld [vmem:[%s9339_s0 + $0x130] sm:$0x3f]  ;;  %v1963_v35 = vrot.slane %v1947_v45, 3  ;;  %v1964_v43 = vrot.slane %v1951_v39, 2  ;;  %v1138_v44 = vrot.slane %v1114_v46, 1  ;;  %v1162_v50 = vrot.slane %v1114_v46, 2 }
 0x125   : > { %v5708_v61 = vld [vmem:[%s9339_s0 + $0x4b0] sm:$0x3f]  ;;  %v1522_v32 = vadd.f32 %v5732_v53, %v5716_v56  ;;  %v1186_v31 = vrot.slane %v1114_v46, 3  ;;  %v1210_v34 = vrot.slane %v1114_v46, 4  ;;  %v1292_v62 = vrot.slane %v7741_v26, 2 }
 0x126   : > { %v5704_v63 = vld [vmem:[%s9339_s0 + $0x490] sm:$0xff]  ;;  %v7743_v36 = vadd.f32 %v5708_v61, %v1093_v55  ;;  %v1965_v52 = vsel %vm1465_vm3, %v1964_v43, %v1963_v35  ;;  %v1154_v30 = vadd.f32 %v1138_v44, %v1114_v46  ;;  %v1316_v59 = vrot.slane %v7741_v26, 3 }
 0x127   : > { %v1122_v37 = vadd.f32 %v5704_v63, %v1089_v41  ;;  %1979 = vst [vmem:[#allocation2 + $0x20] sm:$0xc0] %v1965_v52  ;;  %v5724_v27 = vld [vmem:[%s9339_s0 + $0x470] sm:$0x3f]  ;;  %v1340_v42 = vrot.slane %v7741_v26, 4  ;;  %v1401_v45 = vrot.slane %v7741_v26, 1  ;;  %v1526_v55 = vadd.f32 %v5704_v63, %v5688_v33 }
 0x128   : > { %v1296_v58 = vrot.slane %v7743_v36, 2  ;;  %v1178_v48 = vadd.f32 %v1162_v50, %v1154_v30  ;;  %v1320_v51 = vrot.slane %v7743_v36, 3  ;;  %v5740_v56 = vld [vmem:[%s9339_s0 + $0x4b0] sm:$0x3f]  ;;  %v1308_v38 = vadd.f32 %v1292_v62, %v1154_v30  ;;  %v2981_v50 = vld [vmem:[#allocation2] sm:$0xff] }
 0x129   : > { %v1142_v29 = vrot.slane %v1122_v37, 1  ;;  %v1166_v57 = vrot.slane %v1122_v37, 2  ;;  %v1190_v54 = vrot.slane %v1122_v37, 3  ;;  %v1214_v47 = vrot.slane %v1122_v37, 4  ;;  %v5744_v41 = vld [vmem:[%s9339_s0 + $0x150] sm:$0xff] }
 0x12a   : > { %v1344_v40 = vrot.slane %v7743_v36, 4  ;;  %v1202_v61 = vadd.f32 %v1186_v31, %v1178_v48  ;;  %v1405_v39 = vrot.slane %v7743_v36, 1  ;;  %v5748_v46 = vld [vmem:[%s9339_s0 + $0x170] sm:$0x3f]  ;;  %v1332_v35 = vadd.f32 %v1316_v59, %v1308_v38 }
 0x12b   : > { %v1158_v49 = vadd.f32 %v1142_v29, %v1122_v37  ;;  %v1530_v44 = vadd.f32 %v5740_v56, %v5724_v27  ;;  %v5752_v29 = vld [vmem:[%s9339_s0 + $0x4d0] sm:$0xff]  ;;  %v1417_v31 = vadd.f32 %v1401_v45, %v7741_v26  ;;  %v1551_v30 = vadd.f32 %v5744_v41, %v1518_v28 }
 0x12c   : > { %v1421_v52 = vadd.f32 %v1405_v39, %v7743_v36  ;;  %v1356_v63 = vadd.f32 %v1340_v42, %v1332_v35  ;;  %v1555_v48 = vadd.f32 %v5748_v46, %v1522_v32  ;;  %v5760_v27 = vld [vmem:[%s9339_s0 + $0x190] sm:$0xff] }
 0x12d   : > { %v1182_v53 = vadd.f32 %v1166_v57, %v1158_v49  ;;  %v1312_v60 = vadd.f32 %v1296_v58, %v1158_v49  ;;  %v1226_v57 = vadd.f32 %v1210_v34, %v1202_v61  ;;  %v5764_v34 = vld [vmem:[%s9339_s0 + $0x1b0] sm:$0x3f]  ;;  %v1425_v36 = vadd.f32 %v1417_v31, %v1292_v62 }
 0x12e   : > { %v2985_v26 = vld [vmem:[#allocation2 + $0x20] sm:$0xff]  ;;  %v1429_v28 = vadd.f32 %v1421_v52, %v1296_v58  ;;  %v5772_v32 = vld [vmem:[%s9339_s0 + $0x530] sm:$0x3f]  ;;  %v1364_v41 = vmul.f32 0.04, %v1356_v63  ;;  %v1588_v52 = vadd.f32 %v5764_v34, %v1555_v48 }
 0x12f   : > { %v1206_v37 = vadd.f32 %v1190_v54, %v1182_v53  ;;  %v1336_v43 = vadd.f32 %v1320_v51, %v1312_v60  ;;  %v5756_v54 = vld [vmem:[%s9339_s0 + $0x4f0] sm:$0x3f]  ;;  %v1234_v56 = vmul.f32 0.04, %v1226_v57  ;;  %v2997_v38 = vpack.c.bf16 %v2985_v26, %v2981_v50  ;;  %v5811_v63 = vld [vmem:[%s9339_s0 + $0x1e8] sm:$0x3f] }
 0x130   : > { %v5768_v53 = vld [vmem:[%s9339_s0 + $0x510] sm:$0xff]  ;;  %v1433_v39 = vadd.f32 %v1425_v36, %v1316_v59  ;;  %v1437_v46 = vadd.f32 %v1429_v28, %v1320_v51  ;;  %v1584_v50 = vadd.f32 %v5760_v27, %v1551_v30  ;;  %v5791_v51 = vld [vmem:[%s9339_s0 + $0x188] sm:$0xff] }
 0x131   : > { %v1230_v33 = vadd.f32 %v1214_v47, %v1206_v37  ;;  %v1360_v49 = vadd.f32 %v1344_v40, %v1336_v43  ;;  %v1559_v47 = vadd.f32 %v5752_v29, %v1526_v55  ;;  %v1270_v45 = vrot.slane %v1234_v56, 1  ;;  %v5776_v62 = vld [vmem:[%s9339_s0 + $0x1d0] sm:$0xff]  ;;  %3301 = vmatmul.mubr.bf16.vlgmr.msra.gmra.mrb[0].mxu0 %v2997_v38  ;;  %v5807_v30 = vld [vmem:[%s9339_s0 + $0x1c8] sm:$0xff] }
 0x132   : > { %v1563_v37 = vadd.f32 %v5756_v54, %v1530_v44  ;;  %v5780_v58 = vld [vmem:[%s9339_s0 + $0x1f0] sm:$0x3f]  ;;  %v1385_v43 = vrot.slane %v1364_v41, 2  ;;  %v1441_v57 = vadd.f32 %v1433_v39, %v1340_v42  ;;  %v1445_v31 = vadd.f32 %v1437_v46, %v1344_v40 }
 0x133   : > { %v1238_v60 = vmul.f32 0.04, %v1230_v33  ;;  %v1368_v61 = vmul.f32 0.04, %v1360_v49  ;;  %v5784_v55 = vld [vmem:[%s9339_s0 + $0x550] sm:$0xff]  ;;  %v1592_v42 = vadd.f32 %v5768_v53, %v1559_v47  ;;  %v1617_v34 = vadd.f32 %v5776_v62, %v1584_v50 }
 0x134   : > { %v5788_v59 = vld [vmem:[%s9339_s0 + $0x570] sm:$0x3f]  ;;  %v5795_v33 = vld [vmem:[%s9339_s0 + $0x1a8] sm:$0x3f]  ;;  %v1596_v40 = vadd.f32 %v5772_v32, %v1563_v37  ;;  %v1449_v48 = vmul.f32 0.04, %v1441_v57  ;;  %v7813_v26 = vadd.f32 %v5780_v58, %v1588_v52  ;;  %v2016_v38 = vadd.f32 %v5807_v30, %v5791_v51 }
 0x135   : > { %v1253_v35 = vrot.slane %v1238_v60, 7  ;;  %v1386_v29 = vrot.slane %v1368_v61, 1  ;;  %v1271_v44 = vsel %vm1266_vm0, %v1238_v60, %v1270_v45  ;;  %v1453_v27 = vmul.f32 0.04, %v1445_v31  ;;  %v5799_v58 = vld [vmem:[%s9339_s0 + $0x508] sm:$0xff] }
 0x136   : > { %1280 = vst [vmem:[#allocation2 + $0x10] sm:$0xc] %v1271_v44  ;;  %v1625_v36 = vadd.f32 %v5784_v55, %v1592_v42  ;;  %v7815_v28 = vadd.f32 %v5788_v59, %v1596_v40  ;;  %v2020_v60 = vadd.f32 %v5811_v63, %v5795_v33  ;;  %v1470_v41 = vrot.slane %v1449_v48, 3  ;;  %v5803_v55 = vld [vmem:[%s9339_s0 + $0x528] sm:$0x3f] }
 0x137   : > { %v1254_v49 = vsel %vm1249_vm1, %v1253_v35, %v1234_v56  ;;  %v1387_v54 = vsel %vm1380_vm2, %v1386_v29, %v1385_v43  ;;  %v1471_v61 = vrot.slane %v1453_v27, 2  ;;  %v1641_v56 = vrot.slane %v1617_v34, 1  ;;  %v5815_v51 = vld [vmem:[%s9339_s0 + $0x548] sm:$0xff] }
 0x138   : > { %1263 = vst [vmem:[#allocation2 + $0x10] sm:$0x3] %v1254_v49  ;;  %1397 = vst [vmem:[#allocation2 + $0x10] sm:$0x30] %v1387_v54  ;;  %v1665_v45 = vrot.slane %v1617_v34, 2  ;;  %v1645_v39 = vrot.slane %v1625_v36, 1 }
 0x139   : > { %v1669_v46 = vrot.slane %v1625_v36, 2  ;;  %v1689_v47 = vrot.slane %v1617_v34, 3  ;;  %v1693_v53 = vrot.slane %v1625_v36, 3  ;;  %v1472_v32 = vsel %vm1465_vm3, %v1471_v61, %v1470_v41  ;;  %v5819_v44 = vld [vmem:[%s9339_s0 + $0x568] sm:$0x3f] }
 0x13a   : > { %v1657_v37 = vadd.f32 %v1641_v56, %v1617_v34  ;;  %v1713_v35 = vrot.slane %v1617_v34, 4  ;;  %v1717_v62 = vrot.slane %v1625_v36, 4  ;;  %1482 = vst [vmem:[#allocation2 + $0x10] sm:$0xc0] %v1472_v32  ;;  %v1661_v43 = vadd.f32 %v1645_v39, %v1625_v36  ;;  %v5823_v42 = vld [vmem:[%s9339_s0 + $0x208] sm:$0xff] }
 0x13b   : > { %v1793_v29 = vrot.slane %v7813_v26, 2  ;;  %v1797_v50 = vrot.slane %v7815_v28, 2  ;;  %v1817_v59 = vrot.slane %v7813_v26, 3  ;;  %v1821_v31 = vrot.slane %v7815_v28, 3  ;;  %v5827_v40 = vld [vmem:[%s9339_s0 + $0x228] sm:$0x3f] }
 0x13c   : > { %v1681_v57 = vadd.f32 %v1665_v45, %v1657_v37  ;;  %v1841_v52 = vrot.slane %v7813_v26, 4  ;;  %v1845_v33 = vrot.slane %v7815_v28, 4  ;;  %v1685_v30 = vadd.f32 %v1669_v46, %v1661_v43  ;;  %v5831_v39 = vld [vmem:[%s9339_s0 + $0x588] sm:$0xff] }
 0x13d   : > { %v1809_v63 = vadd.f32 %v1793_v29, %v1657_v37  ;;  %v1813_v49 = vadd.f32 %v1797_v50, %v1661_v43  ;;  %v1901_v54 = vrot.slane %v7813_v26, 1  ;;  %v1905_v27 = vrot.slane %v7815_v28, 1  ;;  %v5835_v46 = vld [vmem:[%s9339_s0 + $0x5a8] sm:$0x3f] }
 0x13e   : > { %v1705_v48 = vadd.f32 %v1689_v47, %v1681_v57  ;;  %v2024_v34 = vadd.f32 %v5815_v51, %v5799_v58  ;;  %v2028_v36 = vadd.f32 %v5819_v44, %v5803_v55  ;;  %v1709_v41 = vadd.f32 %v1693_v53, %v1685_v30 }
 0x13f   : > { %v1833_v61 = vadd.f32 %v1817_v59, %v1809_v63  ;;  %v1837_v56 = vadd.f32 %v1821_v31, %v1813_v49  ;;  %v1917_v45 = vadd.f32 %v1901_v54, %v7813_v26  ;;  %v1921_v47 = vadd.f32 %v1905_v27, %v7815_v28  ;;  %v5843_v26 = vld [vmem:[%s9339_s0 + $0x268] sm:$0x3f] }
 0x140   : > { %v1729_v32 = vadd.f32 %v1713_v35, %v1705_v48  ;;  %v2049_v37 = vadd.f32 %v5823_v42, %v2016_v38  ;;  %v2053_v43 = vadd.f32 %v5827_v40, %v2020_v60  ;;  %v1733_v58 = vadd.f32 %v1717_v62, %v1709_v41  ;;  %v7858_v35 = vld [vmem:[%s9339_s0 + $0x248] sm:$0xff] }
 0x141   : > { %v1857_v55 = vadd.f32 %v1841_v52, %v1833_v61  ;;  %v1861_v53 = vadd.f32 %v1845_v33, %v1837_v56  ;;  %v1925_v51 = vadd.f32 %v1917_v45, %v1793_v29  ;;  %v1929_v57 = vadd.f32 %v1921_v47, %v1797_v50  ;;  %v5851_v28 = vld [vmem:[%s9339_s0 + $0x5e8] sm:$0x3f] }
 0x142   : > { %v1737_v44 = vmul.f32 0.04, %v1729_v32  ;;  %v2057_v30 = vadd.f32 %v5831_v39, %v2024_v34  ;;  %v2061_v63 = vadd.f32 %v5835_v46, %v2028_v36  ;;  %v1741_v38 = vmul.f32 0.04, %v1733_v58  ;;  %v5859_v40 = vld [vmem:[%s9339_s0 + $0x2a8] sm:$0x3f] }
 0x143   : > { %v1865_v60 = vmul.f32 0.04, %v1857_v55  ;;  %v1869_v62 = vmul.f32 0.04, %v1861_v53  ;;  %v1933_v29 = vadd.f32 %v1925_v51, %v1817_v59  ;;  %v1937_v54 = vadd.f32 %v1929_v57, %v1821_v31  ;;  %v5847_v41 = vld [vmem:[%s9339_s0 + $0x5c8] sm:$0xff] }
 0x144   : > { %v1771_v49 = vrot.slane %v1737_v44, 1  ;;  %v2082_v42 = vadd.f32 %v7858_v35, %v2049_v37  ;;  %v2086_v50 = vadd.f32 %v5843_v26, %v2053_v43  ;;  %v1755_v48 = vrot.slane %v1741_v38, 7  ;;  %v5867_v59 = vld [vmem:[%s9339_s0 + $0x628] sm:$0x3f] }
 0x145   : > { %v1885_v27 = vrot.slane %v1865_v60, 2  ;;  %v1886_v34 = vrot.slane %v1869_v62, 1  ;;  %v1941_v36 = vadd.f32 %v1933_v29, %v1841_v52  ;;  %v1945_v61 = vadd.f32 %v1937_v54, %v1845_v33  ;;  %v5855_v39 = vld [vmem:[%s9339_s0 + $0x288] sm:$0xff] }
 0x146   : > { %v1772_v31 = vsel %vm1266_vm0, %v1741_v38, %v1771_v49  ;;  %v2090_v56 = vadd.f32 %v5847_v41, %v2057_v30  ;;  %v2094_v45 = vadd.f32 %v5851_v28, %v2061_v63  ;;  %v1756_v46 = vsel %vm1249_vm1, %v1755_v48, %v1737_v44  ;;  %v5863_v47 = vld [vmem:[%s9339_s0 + $0x608] sm:$0xff] }
 0x147   : > { %1781 = vst [vmem:[#allocation2 + $0x30] sm:$0xc] %v1772_v31  ;;  %v1887_v52 = vsel %vm1380_vm2, %v1886_v34, %v1885_v27  ;;  %v1949_v32 = vmul.f32 0.04, %v1941_v36  ;;  %v2115_v37 = vadd.f32 %v5855_v39, %v2082_v42  ;;  %1765 = vst [vmem:[#allocation2 + $0x30] sm:$0x3] %v1756_v46  ;;  %v7882_v43 = vadd.f32 %v5859_v40, %v2086_v50 }
 0x148   : > { %1897 = vst [vmem:[#allocation2 + $0x30] sm:$0x30] %v1887_v52  ;;  %v1953_v33 = vmul.f32 0.04, %v1945_v61  ;;  %v2123_v58 = vadd.f32 %v5863_v47, %v2090_v56  ;;  %v7884_v55 = vadd.f32 %v5867_v59, %v2094_v45  ;;  %v5875_v36 = vld [vmem:[%s9339_s0 + $0x268] sm:$0x3f] }
 0x149   : > { %v1969_v53 = vrot.slane %v1949_v32, 3  ;;  %v2139_v51 = vrot.slane %v2115_v37, 1  ;;  %v2163_v26 = vrot.slane %v2115_v37, 2  ;;  %v2187_v44 = vrot.slane %v2115_v37, 3  ;;  %v5891_v59 = vld [vmem:[%s9339_s0 + $0x2a8] sm:$0x3f] }
 0x14a   : > { %v1970_v57 = vrot.slane %v1953_v33, 2  ;;  %v2143_v30 = vrot.slane %v2123_v58, 1  ;;  %v2167_v63 = vrot.slane %v2123_v58, 2  ;;  %v2191_v28 = vrot.slane %v2123_v58, 3  ;;  %v5899_v33 = vld [vmem:[%s9339_s0 + $0x628] sm:$0x3f] }
 0x14b   : > { %v2155_v38 = vadd.f32 %v2139_v51, %v2115_v37  ;;  %v2211_v60 = vrot.slane %v2115_v37, 4  ;;  %v2215_v62 = vrot.slane %v2123_v58, 4  ;;  %v2291_v29 = vrot.slane %v7882_v43, 2  ;;  %v5883_v37 = vld [vmem:[%s9339_s0 + $0x5e8] sm:$0x3f] }
 0x14c   : > { %v1971_v49 = vsel %vm1465_vm3, %v1970_v57, %v1969_v53  ;;  %v2159_v54 = vadd.f32 %v2143_v30, %v2123_v58  ;;  %v2295_v42 = vrot.slane %v7884_v55, 2  ;;  %v2315_v50 = vrot.slane %v7882_v43, 3 }
 0x14d   : > { %1981 = vst [vmem:[#allocation2 + $0x30] sm:$0xc0] %v1971_v49  ;;  %v2179_v40 = vadd.f32 %v2163_v26, %v2155_v38  ;;  %v2307_v48 = vadd.f32 %v2291_v29, %v2155_v38  ;;  %v2319_v27 = vrot.slane %v7884_v55, 3  ;;  %v2339_v34 = vrot.slane %v7882_v43, 4 }
 0x14e   : > { %v2183_v31 = vadd.f32 %v2167_v63, %v2159_v54  ;;  %v2311_v61 = vadd.f32 %v2295_v42, %v2159_v54  ;;  %v2343_v56 = vrot.slane %v7884_v55, 4  ;;  %v2399_v45 = vrot.slane %v7882_v43, 1  ;;  %v5907_v54 = vld [vmem:[%s9339_s0 + $0x2e8] sm:$0x3f] }
 0x14f   : > { %v2203_v46 = vadd.f32 %v2187_v44, %v2179_v40  ;;  %v2331_v52 = vadd.f32 %v2315_v50, %v2307_v48  ;;  %v2403_v32 = vrot.slane %v7884_v55, 1  ;;  %v2515_v58 = vadd.f32 %v5855_v39, %v7858_v35  ;;  %v5903_v44 = vld [vmem:[%s9339_s0 + $0x2c8] sm:$0xff]  ;;  %v2983_v40 = vld [vmem:[#allocation2 + $0x10] sm:$0xff] }
 0x150   : > { %v2207_v53 = vadd.f32 %v2191_v28, %v2183_v31  ;;  %v2335_v51 = vadd.f32 %v2319_v27, %v2311_v61  ;;  %v2415_v26 = vadd.f32 %v2399_v45, %v7882_v43  ;;  %v2519_v57 = vadd.f32 %v5891_v59, %v5875_v36  ;;  %v5911_v43 = vld [vmem:[%s9339_s0 + $0x648] sm:$0xff] }
 0x151   : > { %v2227_v30 = vadd.f32 %v2211_v60, %v2203_v46  ;;  %v2355_v63 = vadd.f32 %v2339_v34, %v2331_v52  ;;  %v2419_v38 = vadd.f32 %v2403_v32, %v7884_v55  ;;  %v2523_v49 = vadd.f32 %v5863_v47, %v5847_v41  ;;  %v5915_v60 = vld [vmem:[%s9339_s0 + $0x668] sm:$0x3f] }
 0x152   : > { %v2231_v35 = vadd.f32 %v2215_v62, %v2207_v53  ;;  %v2359_v39 = vadd.f32 %v2343_v56, %v2335_v51  ;;  %v2423_v28 = vadd.f32 %v2415_v26, %v2291_v29  ;;  %v2527_v48 = vadd.f32 %v5899_v33, %v5883_v37  ;;  %v5923_v59 = vld [vmem:[%s9339_s0 + $0x328] sm:$0x3f] }
 0x153   : > { %v2235_v36 = vmul.f32 0.04, %v2227_v30  ;;  %v2363_v55 = vmul.f32 0.04, %v2355_v63  ;;  %v2427_v41 = vadd.f32 %v2419_v38, %v2295_v42  ;;  %v2548_v47 = vadd.f32 %v5903_v44, %v2515_v58  ;;  %v5919_v46 = vld [vmem:[%s9339_s0 + $0x308] sm:$0xff]  ;;  %v5793_v44 = vld [vmem:[%s9339_s0 + $0x198] sm:$0xff] }
 0x154   : > { %v2987_v62 = vld [vmem:[#allocation2 + $0x30] sm:$0xff]  ;;  %v2239_v31 = vmul.f32 0.04, %v2231_v35  ;;  %v2367_v29 = vmul.f32 0.04, %v2359_v39  ;;  %v2431_v61 = vadd.f32 %v2423_v28, %v2315_v50  ;;  %v2552_v45 = vadd.f32 %v5907_v54, %v2519_v57  ;;  %v5927_v42 = vld [vmem:[%s9339_s0 + $0x688] sm:$0xff] }
 0x155   : > { %v2999_v52 = vpack.c.bf16 %v2987_v62, %v2983_v40  ;;  %v2268_v32 = vrot.slane %v2235_v36, 1  ;;  %v2381_v37 = vrot.slane %v2363_v55, 2  ;;  %v2435_v33 = vadd.f32 %v2427_v41, %v2319_v27  ;;  %v5931_v58 = vld [vmem:[%s9339_s0 + $0x6a8] sm:$0x3f]  ;;  %v5813_v40 = vld [vmem:[%s9339_s0 + $0x1f8] sm:$0x3f] }
 0x156   : > { %v2252_v53 = vrot.slane %v2239_v31, 7  ;;  %v2382_v51 = vrot.slane %v2367_v29, 1  ;;  %v2439_v50 = vadd.f32 %v2431_v61, %v2339_v34  ;;  %v2556_v26 = vadd.f32 %v5911_v43, %v2523_v49  ;;  %v5935_v57 = vld [vmem:[%s9339_s0 + $0x348] sm:$0xff]  ;;  %v5797_v34 = vld [vmem:[%s9339_s0 + $0x1b8] sm:$0x3f] }
 0x157   : > { %v5939_v27 = vld [vmem:[%s9339_s0 + $0x368] sm:$0x3f]  ;;  %3350 = vmatmul.mubr.bf16.vlgmr.msra.gmra.mrb[0].mxu1 %v2999_v52  ;;  %v2269_v30 = vsel %vm1266_vm0, %v2239_v31, %v2268_v32  ;;  %v2443_v63 = vadd.f32 %v2435_v33, %v2343_v56  ;;  %v2560_v38 = vadd.f32 %v5915_v60, %v2527_v48  ;;  %v2581_v54 = vadd.f32 %v5919_v46, %v2548_v47  ;;  %v5809_v49 = vld [vmem:[%s9339_s0 + $0x1d8] sm:$0xff] }
 0x158   : > { %v2253_v35 = vsel %vm1249_vm1, %v2252_v53, %v2235_v36  ;;  %2279 = vst [vmem:[#allocation2 + $0x48] sm:$0xc] %v2269_v30  ;;  %v2383_v39 = vsel %vm1380_vm2, %v2382_v51, %v2381_v37  ;;  %v2447_v56 = vmul.f32 0.04, %v2439_v50  ;;  %v2585_v28 = vadd.f32 %v5923_v59, %v2552_v45  ;;  %v5943_v48 = vld [vmem:[%s9339_s0 + $0x6c8] sm:$0xff] }
 0x159   : > { %v5947_v43 = vld [vmem:[%s9339_s0 + $0x6e8] sm:$0x3f]  ;;  %2263 = vst [vmem:[#allocation2 + $0x48] sm:$0x3] %v2253_v35  ;;  %2395 = vst [vmem:[#allocation2 + $0x48] sm:$0x30] %v2383_v39  ;;  %v2589_v55 = vadd.f32 %v5927_v42, %v2556_v26  ;;  %v2593_v41 = vadd.f32 %v5931_v58, %v2560_v38  ;;  %v2614_v47 = vadd.f32 %v5935_v57, %v2581_v54 }
 0x15a   : > { %v2451_v60 = vmul.f32 0.04, %v2443_v63  ;;  %v2465_v36 = vrot.slane %v2447_v56, 3  ;;  %v7961_v62 = vadd.f32 %v5939_v27, %v2585_v28  ;;  %v2018_v31 = vadd.f32 %v5809_v49, %v5793_v44  ;;  %v5801_v44 = vld [vmem:[%s9339_s0 + $0x518] sm:$0xff] }
 0x15b   : > { %v2022_v29 = vadd.f32 %v5813_v40, %v5797_v34  ;;  %v2622_v61 = vadd.f32 %v5943_v48, %v2589_v55  ;;  %v7963_v45 = vadd.f32 %v5947_v43, %v2593_v41  ;;  %v2638_v46 = vrot.slane %v2614_v47, 1  ;;  %v5805_v34 = vld [vmem:[%s9339_s0 + $0x538] sm:$0x3f] }
 0x15c   : > { %v2466_v59 = vrot.slane %v2451_v60, 2  ;;  %v2662_v52 = vrot.slane %v2614_v47, 2  ;;  %v2686_v32 = vrot.slane %v2614_v47, 3  ;;  %v2710_v37 = vrot.slane %v2614_v47, 4  ;;  %v5817_v49 = vld [vmem:[%s9339_s0 + $0x558] sm:$0xff] }
 0x15d   : > { %v2790_v33 = vrot.slane %v7961_v62, 2  ;;  %v2642_v42 = vrot.slane %v2622_v61, 1  ;;  %v2654_v58 = vadd.f32 %v2638_v46, %v2614_v47  ;;  %v2666_v51 = vrot.slane %v2622_v61, 2  ;;  %v5821_v40 = vld [vmem:[%s9339_s0 + $0x578] sm:$0x3f] }
 0x15e   : > { %v2467_v53 = vsel %vm1465_vm3, %v2466_v59, %v2465_v36  ;;  %v2690_v50 = vrot.slane %v2622_v61, 3  ;;  %v2714_v26 = vrot.slane %v2622_v61, 4  ;;  %v2794_v57 = vrot.slane %v7963_v45, 2  ;;  %v5825_v41 = vld [vmem:[%s9339_s0 + $0x218] sm:$0xff] }
 0x15f   : > { %2479 = vst [vmem:[#allocation2 + $0x48] sm:$0xc0] %v2467_v53  ;;  %v2814_v27 = vrot.slane %v7961_v62, 3  ;;  %v2658_v30 = vadd.f32 %v2642_v42, %v2622_v61  ;;  %v2678_v63 = vadd.f32 %v2662_v52, %v2654_v58  ;;  %v2806_v38 = vadd.f32 %v2790_v33, %v2654_v58  ;;  %v5829_v47 = vld [vmem:[%s9339_s0 + $0x238] sm:$0x3f] }
 0x160   : > { %v2818_v54 = vrot.slane %v7963_v45, 3  ;;  %v2838_v35 = vrot.slane %v7961_v62, 4  ;;  %v2842_v39 = vrot.slane %v7963_v45, 4  ;;  %v2898_v56 = vrot.slane %v7961_v62, 1  ;;  %v5833_v58 = vld [vmem:[%s9339_s0 + $0x598] sm:$0xff] }
 0x161   : > { %v2902_v28 = vrot.slane %v7963_v45, 1  ;;  %v2682_v48 = vadd.f32 %v2666_v51, %v2658_v30  ;;  %v2702_v43 = vadd.f32 %v2686_v32, %v2678_v63  ;;  %v2810_v60 = vadd.f32 %v2794_v57, %v2658_v30  ;;  %v5837_v51 = vld [vmem:[%s9339_s0 + $0x5b8] sm:$0x3f] }
 0x162   : > { %v2830_v55 = vadd.f32 %v2814_v27, %v2806_v38  ;;  %v2914_v36 = vadd.f32 %v2898_v56, %v7961_v62  ;;  %v2026_v61 = vadd.f32 %v5817_v49, %v5801_v44  ;;  %v2030_v46 = vadd.f32 %v5821_v40, %v5805_v34 }
 0x163   : > { %v2918_v59 = vadd.f32 %v2902_v28, %v7963_v45  ;;  %v2706_v52 = vadd.f32 %v2690_v50, %v2682_v48  ;;  %v2726_v53 = vadd.f32 %v2710_v37, %v2702_v43  ;;  %v2834_v42 = vadd.f32 %v2818_v54, %v2810_v60  ;;  %v5845_v37 = vld [vmem:[%s9339_s0 + $0x278] sm:$0x3f] }
 0x164   : > { %v2854_v32 = vadd.f32 %v2838_v35, %v2830_v55  ;;  %v2922_v30 = vadd.f32 %v2914_v36, %v2790_v33  ;;  %v2051_v38 = vadd.f32 %v5825_v41, %v2018_v31  ;;  %v2055_v62 = vadd.f32 %v5829_v47, %v2022_v29  ;;  %v5841_v48 = vld [vmem:[%s9339_s0 + $0x258] sm:$0xff] }
 0x165   : > { %v2926_v63 = vadd.f32 %v2918_v59, %v2794_v57  ;;  %v2730_v56 = vadd.f32 %v2714_v26, %v2706_v52  ;;  %v2734_v45 = vmul.f32 0.04, %v2726_v53  ;;  %v2858_v44 = vadd.f32 %v2842_v39, %v2834_v42  ;;  %v5853_v31 = vld [vmem:[%s9339_s0 + $0x5f8] sm:$0x3f] }
 0x166   : > { %v2862_v34 = vmul.f32 0.04, %v2854_v32  ;;  %v2930_v50 = vadd.f32 %v2922_v30, %v2814_v27  ;;  %v2059_v40 = vadd.f32 %v5833_v58, %v2026_v61  ;;  %v2063_v28 = vadd.f32 %v5837_v51, %v2030_v46  ;;  %v8012_v27 = vld [vmem:[%s9339_s0 + $0x5d8] sm:$0xff] }
 0x167   : > { %v2934_v49 = vadd.f32 %v2926_v63, %v2818_v54  ;;  %v2738_v29 = vmul.f32 0.04, %v2730_v56  ;;  %v2767_v33 = vrot.slane %v2734_v45, 1  ;;  %v2866_v26 = vmul.f32 0.04, %v2858_v44  ;;  %v5865_v42 = vld [vmem:[%s9339_s0 + $0x618] sm:$0xff] }
 0x168   : > { %v2880_v57 = vrot.slane %v2862_v34, 2  ;;  %v2938_v43 = vadd.f32 %v2930_v50, %v2838_v35  ;;  %v2084_v54 = vadd.f32 %v5841_v48, %v2051_v38  ;;  %v2088_v55 = vadd.f32 %v5845_v37, %v2055_v62  ;;  %v5861_v41 = vld [vmem:[%s9339_s0 + $0x2b8] sm:$0x3f] }
 0x169   : > { %v2942_v60 = vadd.f32 %v2934_v49, %v2842_v39  ;;  %v2751_v47 = vrot.slane %v2738_v29, 7  ;;  %v2768_v36 = vsel %vm1266_vm0, %v2738_v29, %v2767_v33  ;;  %v2881_v59 = vrot.slane %v2866_v26, 1  ;;  %v5857_v35 = vld [vmem:[%s9339_s0 + $0x298] sm:$0xff] }
 0x16a   : > { %v2092_v61 = vadd.f32 %v8012_v27, %v2059_v40  ;;  %v5869_v39 = vld [vmem:[%s9339_s0 + $0x638] sm:$0x3f]  ;;  %2778 = vst [vmem:[#allocation2 + $0x68] sm:$0xc] %v2768_v36  ;;  %v2946_v46 = vmul.f32 0.04, %v2938_v43  ;;  %v2096_v53 = vadd.f32 %v5853_v31, %v2063_v28  ;;  %v2117_v32 = vadd.f32 %v5857_v35, %v2084_v54 }
 0x16b   : > { %v2950_v52 = vmul.f32 0.04, %v2942_v60  ;;  %v2752_v58 = vsel %vm1249_vm1, %v2751_v47, %v2734_v45  ;;  %v2882_v51 = vsel %vm1380_vm2, %v2881_v59, %v2880_v57  ;;  %v8030_v30 = vadd.f32 %v5861_v41, %v2088_v55  ;;  %v5877_v43 = vld [vmem:[%s9339_s0 + $0x278] sm:$0x3f] }
 0x16c   : > { %v2125_v63 = vadd.f32 %v5865_v42, %v2092_v61  ;;  %2762 = vst [vmem:[#allocation2 + $0x68] sm:$0x3] %v2752_v58  ;;  %2894 = vst [vmem:[#allocation2 + $0x68] sm:$0x30] %v2882_v51  ;;  %v2964_v38 = vrot.slane %v2946_v46, 3  ;;  %v8032_v56 = vadd.f32 %v5869_v39, %v2096_v53  ;;  %v2141_v44 = vrot.slane %v2117_v32, 1 }
 0x16d   : > { %v2965_v62 = vrot.slane %v2950_v52, 2  ;;  %v2165_v37 = vrot.slane %v2117_v32, 2  ;;  %v2189_v49 = vrot.slane %v2117_v32, 3  ;;  %v2213_v31 = vrot.slane %v2117_v32, 4  ;;  %v5893_v47 = vld [vmem:[%s9339_s0 + $0x2b8] sm:$0x3f] }
 0x16e   : > { %v2145_v34 = vrot.slane %v2125_v63, 1  ;;  %v2169_v50 = vrot.slane %v2125_v63, 2  ;;  %v2157_v28 = vadd.f32 %v2141_v44, %v2117_v32  ;;  %v2193_v45 = vrot.slane %v2125_v63, 3  ;;  %v5885_v32 = vld [vmem:[%s9339_s0 + $0x5f8] sm:$0x3f] }
 0x16f   : > { %v2966_v40 = vsel %vm1465_vm3, %v2965_v62, %v2964_v38  ;;  %v2217_v33 = vrot.slane %v2125_v63, 4  ;;  %v2293_v26 = vrot.slane %v8030_v30, 2  ;;  %v2297_v57 = vrot.slane %v8032_v56, 2  ;;  %v5901_v58 = vld [vmem:[%s9339_s0 + $0x638] sm:$0x3f] }
 0x170   : > { %2978 = vst [vmem:[#allocation2 + $0x68] sm:$0xc0] %v2966_v40  ;;  %v2161_v29 = vadd.f32 %v2145_v34, %v2125_v63  ;;  %v2181_v60 = vadd.f32 %v2165_v37, %v2157_v28  ;;  %v2317_v54 = vrot.slane %v8030_v30, 3  ;;  %v2321_v55 = vrot.slane %v8032_v56, 3  ;;  %v5905_v34 = vld [vmem:[%s9339_s0 + $0x2d8] sm:$0xff]  ;;  %v2990_v37 = vld [vmem:[#allocation2 + $0x48] sm:$0xff] }
 0x171   : > { %v2341_v41 = vrot.slane %v8030_v30, 4  ;;  %v2309_v59 = vadd.f32 %v2293_v26, %v2157_v28  ;;  %v2345_v39 = vrot.slane %v8032_v56, 4  ;;  %v2401_v52 = vrot.slane %v8030_v30, 1 }
 0x172   : > { %v2185_v36 = vadd.f32 %v2169_v50, %v2161_v29  ;;  %v2313_v61 = vadd.f32 %v2297_v57, %v2161_v29  ;;  %v2205_v46 = vadd.f32 %v2189_v49, %v2181_v60  ;;  %v2405_v53 = vrot.slane %v8032_v56, 1 }
 0x173   : > { %v2517_v51 = vadd.f32 %v5857_v35, %v5841_v48  ;;  %v2333_v38 = vadd.f32 %v2317_v54, %v2309_v59  ;;  %v2521_v44 = vadd.f32 %v5893_v47, %v5877_v43  ;;  %v2417_v49 = vadd.f32 %v2401_v52, %v8030_v30  ;;  %v5909_v35 = vld [vmem:[%s9339_s0 + $0x2f8] sm:$0x3f] }
 0x174   : > { %v2209_v63 = vadd.f32 %v2193_v45, %v2185_v36  ;;  %v2337_v62 = vadd.f32 %v2321_v55, %v2313_v61  ;;  %v2229_v50 = vadd.f32 %v2213_v31, %v2205_v46  ;;  %v2421_v40 = vadd.f32 %v2405_v53, %v8032_v56  ;;  %v5913_v45 = vld [vmem:[%s9339_s0 + $0x658] sm:$0xff] }
 0x175   : > { %v2525_v28 = vadd.f32 %v5865_v42, %v8012_v27  ;;  %v2357_v60 = vadd.f32 %v2341_v41, %v2333_v38  ;;  %v2529_v48 = vadd.f32 %v5901_v58, %v5885_v32  ;;  %v2425_v47 = vadd.f32 %v2417_v49, %v2293_v26  ;;  %v5917_v27 = vld [vmem:[%s9339_s0 + $0x678] sm:$0x3f]  ;;  %v5794_v49 = vld [vmem:[%s9339_s0 + $0x1a0] sm:$0x3f] }
 0x176   : > { %v2233_v29 = vadd.f32 %v2217_v33, %v2209_v63  ;;  %v2361_v25 = vadd.f32 %v2345_v39, %v2337_v62  ;;  %v2237_v31 = vmul.f32 0.04, %v2229_v50  ;;  %v2429_v30 = vadd.f32 %v2421_v40, %v2297_v57  ;;  %v5921_v56 = vld [vmem:[%s9339_s0 + $0x318] sm:$0xff]  ;;  %v5806_v40 = vld [vmem:[%s9339_s0 + $0x1c0] sm:$0xff] }
 0x177   : > { %v2994_v43 = vld [vmem:[#allocation2 + $0x68] sm:$0xff]  ;;  %v2550_v42 = vadd.f32 %v5905_v34, %v2517_v51  ;;  %v2365_v59 = vmul.f32 0.04, %v2357_v60  ;;  %v5929_v46 = vld [vmem:[%s9339_s0 + $0x698] sm:$0xff]  ;;  %v2433_v26 = vadd.f32 %v2425_v47, %v2317_v54  ;;  %v2554_v53 = vadd.f32 %v5909_v35, %v2521_v44 }
 0x178   : > { %v3002_v33 = vpack.c.bf16 %v2994_v43, %v2990_v37  ;;  %v2241_v36 = vmul.f32 0.04, %v2233_v29  ;;  %v2369_v61 = vmul.f32 0.04, %v2361_v25  ;;  %v2272_v52 = vrot.slane %v2237_v31, 1  ;;  %v5937_v25 = vld [vmem:[%s9339_s0 + $0x358] sm:$0xff] }
 0x179   : > { %v2437_v57 = vadd.f32 %v2429_v30, %v2321_v55  ;;  %v5925_v32 = vld [vmem:[%s9339_s0 + $0x338] sm:$0x3f]  ;;  %v2387_v63 = vrot.slane %v2365_v59, 2  ;;  %v2558_v62 = vadd.f32 %v5913_v45, %v2525_v28  ;;  %v5790_v55 = vld [vmem:[%s9339_s0 + $0x180] sm:$0xff]  ;;  %v2441_v34 = vadd.f32 %v2433_v26, %v2341_v41 }
 0x17a   : > { %v5933_v58 = vld [vmem:[%s9339_s0 + $0x6b8] sm:$0x3f]  ;;  %3308 = vmatprep.mubr.bf16.mxu0 %v3002_v33  ;;  %v2256_v51 = vrot.slane %v2241_v36, 7  ;;  %v2388_v38 = vrot.slane %v2369_v61, 1  ;;  %v2273_v44 = vsel %vm1266_vm0, %v2241_v36, %v2272_v52  ;;  %v2562_v50 = vadd.f32 %v5917_v27, %v2529_v48  ;;  %v5810_v28 = vld [vmem:[%s9339_s0 + $0x1e0] sm:$0x3f] }
 0x17b   : > { %v5941_v54 = vld [vmem:[%s9339_s0 + $0x378] sm:$0x3f]  ;;  %v2445_v37 = vadd.f32 %v2437_v57, %v2345_v39  ;;  %2281 = vst [vmem:[#allocation2 + $0x58] sm:$0xc] %v2273_v44  ;;  %v2583_v41 = vadd.f32 %v5921_v56, %v2550_v42  ;;  %v2587_v39 = vadd.f32 %v5925_v32, %v2554_v53  ;;  %v2449_v45 = vmul.f32 0.04, %v2441_v34 }
 0x17c   : > { %v2257_v29 = vsel %vm1249_vm1, %v2256_v51, %v2237_v31  ;;  %v2389_v60 = vsel %vm1380_vm2, %v2388_v38, %v2387_v63  ;;  %v5945_v48 = vld [vmem:[%s9339_s0 + $0x6d8] sm:$0xff]  ;;  %v2591_v47 = vadd.f32 %v5929_v46, %v2558_v62  ;;  %v2595_v30 = vadd.f32 %v5933_v58, %v2562_v50  ;;  %v5798_v58 = vld [vmem:[%s9339_s0 + $0x500] sm:$0xff] }
 0x17d   : > { %v5949_v35 = vld [vmem:[%s9339_s0 + $0x6f8] sm:$0x3f]  ;;  %2265 = vst [vmem:[#allocation2 + $0x58] sm:$0x3] %v2257_v29  ;;  %2397 = vst [vmem:[#allocation2 + $0x58] sm:$0x30] %v2389_v60  ;;  %v2616_v31 = vadd.f32 %v5937_v25, %v2583_v41  ;;  %v8109_v27 = vadd.f32 %v5941_v54, %v2587_v39  ;;  %v2015_v33 = vadd.f32 %v5806_v40, %v5790_v55 }
 0x17e   : > { %v2453_v43 = vmul.f32 0.04, %v2445_v37  ;;  %v2019_v42 = vadd.f32 %v5810_v28, %v5794_v49  ;;  %v2471_v56 = vrot.slane %v2449_v45, 3  ;;  %v2624_v59 = vadd.f32 %v5945_v48, %v2591_v47  ;;  %v5802_v55 = vld [vmem:[%s9339_s0 + $0x520] sm:$0x3f] }
 0x17f   : > { %v8111_v61 = vadd.f32 %v5949_v35, %v2595_v30  ;;  %v2640_v52 = vrot.slane %v2616_v31, 1  ;;  %v2664_v26 = vrot.slane %v2616_v31, 2  ;;  %v2688_v57 = vrot.slane %v2616_v31, 3  ;;  %v5814_v44 = vld [vmem:[%s9339_s0 + $0x540] sm:$0xff] }
 0x180   : > { %v2472_v36 = vrot.slane %v2453_v43, 2  ;;  %v2712_v53 = vrot.slane %v2616_v31, 4  ;;  %v2644_v51 = vrot.slane %v2624_v59, 1  ;;  %v2668_v63 = vrot.slane %v2624_v59, 2  ;;  %v5818_v40 = vld [vmem:[%s9339_s0 + $0x560] sm:$0x3f] }
 0x181   : > { %v2692_v46 = vrot.slane %v2624_v59, 3  ;;  %v2656_v25 = vadd.f32 %v2640_v52, %v2616_v31  ;;  %v2716_v38 = vrot.slane %v2624_v59, 4  ;;  %v2792_v62 = vrot.slane %v8109_v27, 2  ;;  %v5822_v39 = vld [vmem:[%s9339_s0 + $0x200] sm:$0xff] }
 0x182   : > { %v2473_v32 = vsel %vm1465_vm3, %v2472_v36, %v2471_v56  ;;  %v2796_v54 = vrot.slane %v8111_v61, 2  ;;  %v2660_v34 = vadd.f32 %v2644_v51, %v2624_v59  ;;  %v2816_v37 = vrot.slane %v8109_v27, 3  ;;  %v5826_v47 = vld [vmem:[%s9339_s0 + $0x220] sm:$0x3f] }
 0x183   : > { %2481 = vst [vmem:[#allocation2 + $0x58] sm:$0xc0] %v2473_v32  ;;  %v2820_v50 = vrot.slane %v8111_v61, 3  ;;  %v2840_v49 = vrot.slane %v8109_v27, 4  ;;  %v2680_v28 = vadd.f32 %v2664_v26, %v2656_v25  ;;  %v2808_v29 = vadd.f32 %v2792_v62, %v2656_v25  ;;  %v5830_v59 = vld [vmem:[%s9339_s0 + $0x580] sm:$0xff] }
 0x184   : > { %v2844_v60 = vrot.slane %v8111_v61, 4  ;;  %v2900_v41 = vrot.slane %v8109_v27, 1  ;;  %v2684_v48 = vadd.f32 %v2668_v63, %v2660_v34  ;;  %v2812_v35 = vadd.f32 %v2796_v54, %v2660_v34  ;;  %v5834_v51 = vld [vmem:[%s9339_s0 + $0x5a0] sm:$0x3f] }
 0x185   : > { %v2904_v45 = vrot.slane %v8111_v61, 1  ;;  %v2023_v43 = vadd.f32 %v5814_v44, %v5798_v58  ;;  %v2704_v30 = vadd.f32 %v2688_v57, %v2680_v28  ;;  %v2832_v31 = vadd.f32 %v2816_v37, %v2808_v29 }
 0x186   : > { %v2916_v56 = vadd.f32 %v2900_v41, %v8109_v27  ;;  %v2027_v36 = vadd.f32 %v5818_v40, %v5802_v55  ;;  %v2708_v52 = vadd.f32 %v2692_v46, %v2684_v48  ;;  %v2836_v26 = vadd.f32 %v2820_v50, %v2812_v35  ;;  %v5842_v46 = vld [vmem:[%s9339_s0 + $0x260] sm:$0x3f] }
 0x187   : > { %v2920_v32 = vadd.f32 %v2904_v45, %v8111_v61  ;;  %v2048_v63 = vadd.f32 %v5822_v39, %v2015_v33  ;;  %v2728_v58 = vadd.f32 %v2712_v53, %v2704_v30  ;;  %v2856_v25 = vadd.f32 %v2840_v49, %v2832_v31  ;;  %v8154_v33 = vld [vmem:[%s9339_s0 + $0x240] sm:$0xff] }
 0x188   : > { %v2924_v57 = vadd.f32 %v2916_v56, %v2792_v62  ;;  %v2052_v44 = vadd.f32 %v5826_v47, %v2019_v42  ;;  %v2732_v34 = vadd.f32 %v2716_v38, %v2708_v52  ;;  %v2860_v27 = vadd.f32 %v2844_v60, %v2836_v26  ;;  %v5850_v38 = vld [vmem:[%s9339_s0 + $0x5e0] sm:$0x3f] }
 0x189   : > { %v2928_v55 = vadd.f32 %v2920_v32, %v2796_v54  ;;  %v2056_v40 = vadd.f32 %v5830_v59, %v2023_v43  ;;  %v2736_v28 = vmul.f32 0.04, %v2728_v58  ;;  %v2864_v29 = vmul.f32 0.04, %v2856_v25  ;;  %v5858_v43 = vld [vmem:[%s9339_s0 + $0x2a0] sm:$0x3f] }
 0x18a   : > { %v2932_v61 = vadd.f32 %v2924_v57, %v2816_v37  ;;  %v2060_v41 = vadd.f32 %v5834_v51, %v2027_v36  ;;  %v2740_v53 = vmul.f32 0.04, %v2732_v34  ;;  %v2868_v62 = vmul.f32 0.04, %v2860_v27  ;;  %v8163_v37 = vld [vmem:[%s9339_s0 + $0x5c0] sm:$0xff] }
 0x18b   : > { %v2936_v42 = vadd.f32 %v2928_v55, %v2820_v50  ;;  %v2081_v54 = vadd.f32 %v8154_v33, %v2048_v63  ;;  %v2771_v39 = vrot.slane %v2736_v28, 1  ;;  %v2886_v48 = vrot.slane %v2864_v29, 2  ;;  %v5854_v56 = vld [vmem:[%s9339_s0 + $0x280] sm:$0xff] }
 0x18c   : > { %v2940_v35 = vadd.f32 %v2932_v61, %v2840_v49  ;;  %v2085_v45 = vadd.f32 %v5842_v46, %v2052_v44  ;;  %v2755_v50 = vrot.slane %v2740_v53, 7  ;;  %v2887_v47 = vrot.slane %v2868_v62, 1  ;;  %v5866_v49 = vld [vmem:[%s9339_s0 + $0x620] sm:$0x3f] }
 0x18d   : > { %v2944_v30 = vadd.f32 %v2936_v42, %v2844_v60  ;;  %v2089_v31 = vadd.f32 %v8163_v37, %v2056_v40  ;;  %v2772_v36 = vsel %vm1266_vm0, %v2740_v53, %v2771_v39  ;;  %v2093_v52 = vadd.f32 %v5850_v38, %v2060_v41  ;;  %v5862_v63 = vld [vmem:[%s9339_s0 + $0x600] sm:$0xff] }
 0x18e   : > { %v2948_v59 = vmul.f32 0.04, %v2940_v35  ;;  %v2114_v26 = vadd.f32 %v5854_v56, %v2081_v54  ;;  %v2756_v32 = vsel %vm1249_vm1, %v2755_v50, %v2736_v28  ;;  %2780 = vst [vmem:[#allocation2 + $0x78] sm:$0xc] %v2772_v36  ;;  %v2888_v60 = vsel %vm1380_vm2, %v2887_v47, %v2886_v48 }
 0x18f   : > { %v2952_v51 = vmul.f32 0.04, %v2944_v30  ;;  %v8181_v58 = vadd.f32 %v5858_v43, %v2085_v45  ;;  %2764 = vst [vmem:[#allocation2 + $0x78] sm:$0x3] %v2756_v32  ;;  %2896 = vst [vmem:[#allocation2 + $0x78] sm:$0x30] %v2888_v60  ;;  %v2122_v57 = vadd.f32 %v5862_v63, %v2089_v31  ;;  %v8183_v44 = vadd.f32 %v5866_v49, %v2093_v52 }
 0x190   : > { %v2970_v25 = vrot.slane %v2948_v59, 3  ;;  %v2138_v34 = vrot.slane %v2114_v26, 1  ;;  %v2162_v55 = vrot.slane %v2114_v26, 2  ;;  %v2186_v40 = vrot.slane %v2114_v26, 3  ;;  %v5874_v45 = vld [vmem:[%s9339_s0 + $0x260] sm:$0x3f] }
 0x191   : > { %v2971_v27 = vrot.slane %v2952_v51, 2  ;;  %v2210_v46 = vrot.slane %v2114_v26, 4  ;;  %v2142_v28 = vrot.slane %v2122_v57, 1  ;;  %v2166_v61 = vrot.slane %v2122_v57, 2  ;;  %v5890_v43 = vld [vmem:[%s9339_s0 + $0x2a0] sm:$0x3f] }
 0x192   : > { %v2154_v29 = vadd.f32 %v2138_v34, %v2114_v26  ;;  %v2190_v41 = vrot.slane %v2122_v57, 3  ;;  %v2214_v62 = vrot.slane %v2122_v57, 4  ;;  %v2290_v42 = vrot.slane %v8181_v58, 2  ;;  %v5882_v26 = vld [vmem:[%s9339_s0 + $0x5e0] sm:$0x3f] }
 0x193   : > { %v2972_v53 = vsel %vm1465_vm3, %v2971_v27, %v2970_v25  ;;  %v2294_v38 = vrot.slane %v8183_v44, 2  ;;  %v2158_v54 = vadd.f32 %v2142_v28, %v2122_v57  ;;  %v2314_v48 = vrot.slane %v8181_v58, 3  ;;  %v5898_v32 = vld [vmem:[%s9339_s0 + $0x620] sm:$0x3f] }
 0x194   : > { %2980 = vst [vmem:[#allocation2 + $0x78] sm:$0xc0] %v2972_v53  ;;  %v2178_v39 = vadd.f32 %v2162_v55, %v2154_v29  ;;  %v2318_v35 = vrot.slane %v8183_v44, 3  ;;  %v2306_v50 = vadd.f32 %v2290_v42, %v2154_v29  ;;  %v2338_v47 = vrot.slane %v8181_v58, 4  ;;  %v5902_v28 = vld [vmem:[%s9339_s0 + $0x2c0] sm:$0xff] }
 0x195   : > { %v2342_v30 = vrot.slane %v8183_v44, 4  ;;  %v2398_v31 = vrot.slane %v8181_v58, 1  ;;  %v2182_v49 = vadd.f32 %v2166_v61, %v2158_v54  ;;  %v2310_v59 = vadd.f32 %v2294_v38, %v2158_v54  ;;  %v5906_v29 = vld [vmem:[%s9339_s0 + $0x2e0] sm:$0x3f]  ;;  %v2992_v61 = vld [vmem:[#allocation2 + $0x58] sm:$0xff] }
 0x196   : > { %v2202_v36 = vadd.f32 %v2186_v40, %v2178_v39  ;;  %v2402_v52 = vrot.slane %v8183_v44, 1  ;;  %v2330_v60 = vadd.f32 %v2314_v48, %v2306_v50  ;;  %v2514_v25 = vadd.f32 %v5854_v56, %v8154_v33  ;;  %v5910_v56 = vld [vmem:[%s9339_s0 + $0x640] sm:$0xff] }
 0x197   : > { %v2414_v51 = vadd.f32 %v2398_v31, %v8181_v58  ;;  %v2518_v57 = vadd.f32 %v5890_v43, %v5874_v45  ;;  %v2206_v34 = vadd.f32 %v2190_v41, %v2182_v49  ;;  %v2334_v55 = vadd.f32 %v2318_v35, %v2310_v59  ;;  %v5914_v45 = vld [vmem:[%s9339_s0 + $0x660] sm:$0x3f] }
 0x198   : > { %v2226_v27 = vadd.f32 %v2210_v46, %v2202_v36  ;;  %v2418_v40 = vadd.f32 %v2402_v52, %v8183_v44  ;;  %v2354_v53 = vadd.f32 %v2338_v47, %v2330_v60  ;;  %v2522_v58 = vadd.f32 %v5862_v63, %v8163_v37  ;;  %v5922_v43 = vld [vmem:[%s9339_s0 + $0x320] sm:$0x3f] }
 0x199   : > { %v2422_v54 = vadd.f32 %v2414_v51, %v2290_v42  ;;  %v2526_v33 = vadd.f32 %v5898_v32, %v5882_v26  ;;  %v2230_v46 = vadd.f32 %v2214_v62, %v2206_v34  ;;  %v2358_v41 = vadd.f32 %v2342_v30, %v2334_v55  ;;  %v5918_v62 = vld [vmem:[%s9339_s0 + $0x300] sm:$0xff] }
 0x19a   : > { %v2234_v44 = vmul.f32 0.04, %v2226_v27  ;;  %v2426_v39 = vadd.f32 %v2418_v40, %v2294_v38  ;;  %v2362_v50 = vmul.f32 0.04, %v2354_v53  ;;  %v2547_v63 = vadd.f32 %v5902_v28, %v2514_v25  ;;  %v5930_v38 = vld [vmem:[%s9339_s0 + $0x6a0] sm:$0x3f] }
 0x19b   : > { %v2996_v42 = vld [vmem:[#allocation2 + $0x78] sm:$0xff]  ;;  %v2430_v37 = vadd.f32 %v2422_v54, %v2314_v48  ;;  %v2551_v31 = vadd.f32 %v5906_v29, %v2518_v57  ;;  %v2238_v36 = vmul.f32 0.04, %v2230_v46  ;;  %v2366_v52 = vmul.f32 0.04, %v2358_v41  ;;  %v5926_v26 = vld [vmem:[%s9339_s0 + $0x680] sm:$0xff] }
 0x19c   : > { %v3004_v49 = vpack.c.bf16 %v2996_v42, %v2992_v61  ;;  %v2266_v59 = vrot.slane %v2234_v44, 1  ;;  %v2378_v32 = vrot.slane %v2362_v50, 2  ;;  %v2434_v48 = vadd.f32 %v2426_v39, %v2318_v35  ;;  %v5934_v25 = vld [vmem:[%s9339_s0 + $0x340] sm:$0xff]  ;;  %v5796_v28 = vld [vmem:[%s9339_s0 + $0x1b0] sm:$0x3f] }
 0x19d   : > { %v2438_v60 = vadd.f32 %v2430_v37, %v2338_v47  ;;  %v2555_v51 = vadd.f32 %v5910_v56, %v2522_v58  ;;  %v5938_v57 = vld [vmem:[%s9339_s0 + $0x360] sm:$0x3f]  ;;  %v2250_v27 = vrot.slane %v2238_v36, 7  ;;  %v2379_v40 = vrot.slane %v2366_v52, 1  ;;  %v5792_v58 = vld [vmem:[%s9339_s0 + $0x190] sm:$0xff] }
 0x19e   : > { %v5942_v34 = vld [vmem:[%s9339_s0 + $0x6c0] sm:$0xff]  ;;  %3357 = vmatprep.mubr.bf16.mxu1 %v3004_v49  ;;  %v2267_v55 = vsel %vm1266_vm0, %v2238_v36, %v2266_v59  ;;  %v2559_v35 = vadd.f32 %v5914_v45, %v2526_v33  ;;  %v2442_v29 = vadd.f32 %v2434_v48, %v2342_v30  ;;  %v2580_v53 = vadd.f32 %v5918_v62, %v2547_v63  ;;  %v5808_v33 = vld [vmem:[%s9339_s0 + $0x1d0] sm:$0xff] }
 0x19f   : > { %v5946_v47 = vld [vmem:[%s9339_s0 + $0x6e0] sm:$0x3f]  ;;  %2278 = vst [vmem:[#allocation2 + $0x40] sm:$0xc] %v2267_v55  ;;  %v2446_v61 = vmul.f32 0.04, %v2438_v60  ;;  %v2584_v54 = vadd.f32 %v5922_v43, %v2551_v31  ;;  %v2251_v46 = vsel %vm1249_vm1, %v2250_v27, %v2234_v44  ;;  %v2380_v41 = vsel %vm1380_vm2, %v2379_v40, %v2378_v32 }
 0x1a0   : > { %v5812_v56 = vld [vmem:[%s9339_s0 + $0x1f0] sm:$0x3f]  ;;  %v2588_v30 = vadd.f32 %v5926_v26, %v2555_v51  ;;  %v2592_v39 = vadd.f32 %v5930_v38, %v2559_v35  ;;  %2262 = vst [vmem:[#allocation2 + $0x40] sm:$0x3] %v2251_v46  ;;  %2394 = vst [vmem:[#allocation2 + $0x40] sm:$0x30] %v2380_v41  ;;  %v2613_v42 = vadd.f32 %v5934_v25, %v2580_v53 }
 0x1a1   : > { %v2450_v45 = vmul.f32 0.04, %v2442_v29  ;;  %v2462_v43 = vrot.slane %v2446_v61, 3  ;;  %v8261_v50 = vadd.f32 %v5938_v57, %v2584_v54  ;;  %v2017_v31 = vadd.f32 %v5808_v33, %v5792_v58  ;;  %v5800_v57 = vld [vmem:[%s9339_s0 + $0x510] sm:$0xff] }
 0x1a2   : > { %v2621_v37 = vadd.f32 %v5942_v34, %v2588_v30  ;;  %v8263_v63 = vadd.f32 %v5946_v47, %v2592_v39  ;;  %v2021_v62 = vadd.f32 %v5812_v56, %v5796_v28  ;;  %v2637_v36 = vrot.slane %v2613_v42, 1  ;;  %v5804_v34 = vld [vmem:[%s9339_s0 + $0x530] sm:$0x3f] }
 0x1a3   : > { %v2463_v49 = vrot.slane %v2450_v45, 2  ;;  %v2661_v59 = vrot.slane %v2613_v42, 2  ;;  %v2685_v44 = vrot.slane %v2613_v42, 3  ;;  %v2709_v38 = vrot.slane %v2613_v42, 4  ;;  %v5816_v47 = vld [vmem:[%s9339_s0 + $0x550] sm:$0xff] }
 0x1a4   : > { %v2641_v52 = vrot.slane %v2621_v37, 1  ;;  %v2665_v32 = vrot.slane %v2621_v37, 2  ;;  %v2689_v26 = vrot.slane %v2621_v37, 3  ;;  %v2653_v60 = vadd.f32 %v2637_v36, %v2613_v42  ;;  %v5820_v28 = vld [vmem:[%s9339_s0 + $0x570] sm:$0x3f] }
 0x1a5   : > { %v2464_v48 = vsel %vm1465_vm3, %v2463_v49, %v2462_v43  ;;  %v2713_v51 = vrot.slane %v2621_v37, 4  ;;  %v2789_v25 = vrot.slane %v8261_v50, 2  ;;  %v2793_v55 = vrot.slane %v8263_v63, 2  ;;  %v5824_v41 = vld [vmem:[%s9339_s0 + $0x210] sm:$0xff] }
 0x1a6   : > { %2478 = vst [vmem:[#allocation2 + $0x40] sm:$0xc0] %v2464_v48  ;;  %v2657_v27 = vadd.f32 %v2641_v52, %v2621_v37  ;;  %v2813_v40 = vrot.slane %v8261_v50, 3  ;;  %v2817_v35 = vrot.slane %v8263_v63, 3  ;;  %v2677_v29 = vadd.f32 %v2661_v59, %v2653_v60  ;;  %v5828_v30 = vld [vmem:[%s9339_s0 + $0x230] sm:$0x3f] }
 0x1a7   : > { %v2805_v61 = vadd.f32 %v2789_v25, %v2653_v60  ;;  %v2837_v53 = vrot.slane %v8261_v50, 4  ;;  %v2841_v54 = vrot.slane %v8263_v63, 4  ;;  %v2897_v56 = vrot.slane %v8261_v50, 1  ;;  %v5832_v52 = vld [vmem:[%s9339_s0 + $0x590] sm:$0xff] }
 0x1a8   : > { %v2681_v58 = vadd.f32 %v2665_v32, %v2657_v27  ;;  %v2809_v33 = vadd.f32 %v2793_v55, %v2657_v27  ;;  %v2901_v46 = vrot.slane %v8263_v63, 1  ;;  %v2701_v39 = vadd.f32 %v2685_v44, %v2677_v29  ;;  %v5836_v32 = vld [vmem:[%s9339_s0 + $0x5b0] sm:$0x3f] }
 0x1a9   : > { %v2829_v45 = vadd.f32 %v2813_v40, %v2805_v61  ;;  %v2025_v43 = vadd.f32 %v5816_v47, %v5800_v57  ;;  %v2029_v42 = vadd.f32 %v5820_v28, %v5804_v34  ;;  %v2913_v36 = vadd.f32 %v2897_v56, %v8261_v50  ;;  %v5844_v50 = vld [vmem:[%s9339_s0 + $0x270] sm:$0x3f] }
 0x1aa   : > { %v2705_v37 = vadd.f32 %v2689_v26, %v2681_v58  ;;  %v2833_v49 = vadd.f32 %v2817_v35, %v2809_v33  ;;  %v2917_v59 = vadd.f32 %v2901_v46, %v8263_v63  ;;  %v2725_v48 = vadd.f32 %v2709_v38, %v2701_v39  ;;  %v8306_v58 = vld [vmem:[%s9339_s0 + $0x250] sm:$0xff] }
 0x1ab   : > { %v2853_v60 = vadd.f32 %v2837_v53, %v2829_v45  ;;  %v2050_v44 = vadd.f32 %v5824_v41, %v2017_v31  ;;  %v2054_v27 = vadd.f32 %v5828_v30, %v2021_v62  ;;  %v2921_v26 = vadd.f32 %v2913_v36, %v2789_v25  ;;  %v5852_v25 = vld [vmem:[%s9339_s0 + $0x5f0] sm:$0x3f] }
 0x1ac   : > { %v2729_v57 = vadd.f32 %v2713_v51, %v2705_v37  ;;  %v2857_v34 = vadd.f32 %v2841_v54, %v2833_v49  ;;  %v2925_v47 = vadd.f32 %v2917_v59, %v2793_v55  ;;  %v2733_v63 = vmul.f32 0.04, %v2725_v48  ;;  %v8314_v56 = vld [vmem:[%s9339_s0 + $0x5d0] sm:$0xff] }
 0x1ad   : > { %v2861_v28 = vmul.f32 0.04, %v2853_v60  ;;  %v2058_v29 = vadd.f32 %v5832_v52, %v2025_v43  ;;  %v2062_v61 = vadd.f32 %v5836_v32, %v2029_v42  ;;  %v2929_v62 = vadd.f32 %v2921_v26, %v2813_v40  ;;  %v5856_v30 = vld [vmem:[%s9339_s0 + $0x290] sm:$0xff] }
 0x1ae   : > { %v2737_v38 = vmul.f32 0.04, %v2729_v57  ;;  %v2865_v31 = vmul.f32 0.04, %v2857_v34  ;;  %v2933_v51 = vadd.f32 %v2925_v47, %v2817_v35  ;;  %v2765_v55 = vrot.slane %v2733_v63, 1  ;;  %v5864_v48 = vld [vmem:[%s9339_s0 + $0x610] sm:$0xff] }
 0x1af   : > { %v2877_v33 = vrot.slane %v2861_v28, 2  ;;  %v2083_v46 = vadd.f32 %v8306_v58, %v2050_v44  ;;  %v2087_v41 = vadd.f32 %v5844_v50, %v2054_v27  ;;  %v2937_v39 = vadd.f32 %v2929_v62, %v2837_v53  ;;  %v5860_v43 = vld [vmem:[%s9339_s0 + $0x2b0] sm:$0x3f] }
 0x1b0   : > { %v2749_v40 = vrot.slane %v2737_v38, 7  ;;  %v2878_v35 = vrot.slane %v2865_v31, 1  ;;  %v2941_v45 = vadd.f32 %v2933_v51, %v2841_v54  ;;  %v5868_v42 = vld [vmem:[%s9339_s0 + $0x630] sm:$0x3f]  ;;  %v2766_v37 = vsel %vm1266_vm0, %v2737_v38, %v2765_v55 }
 0x1b1   : > { %v2091_v49 = vadd.f32 %v8314_v56, %v2058_v29  ;;  %v2095_v36 = vadd.f32 %v5852_v25, %v2062_v61  ;;  %v2116_v59 = vadd.f32 %v5856_v30, %v2083_v46  ;;  %2777 = vst [vmem:[#allocation2 + $0x60] sm:$0xc] %v2766_v37  ;;  %v2945_v54 = vmul.f32 0.04, %v2937_v39 }
 0x1b2   : > { %v2750_v52 = vsel %vm1249_vm1, %v2749_v40, %v2733_v63  ;;  %v2879_v53 = vsel %vm1380_vm2, %v2878_v35, %v2877_v33  ;;  %v2949_v32 = vmul.f32 0.04, %v2941_v45  ;;  %v8333_v60 = vadd.f32 %v5860_v43, %v2087_v41  ;;  %v5876_v41 = vld [vmem:[%s9339_s0 + $0x270] sm:$0x3f] }
 0x1b3   : > { %2761 = vst [vmem:[#allocation2 + $0x60] sm:$0x3] %v2750_v52  ;;  %2893 = vst [vmem:[#allocation2 + $0x60] sm:$0x30] %v2879_v53  ;;  %v2124_v44 = vadd.f32 %v5864_v48, %v2091_v49  ;;  %v8335_v27 = vadd.f32 %v5868_v42, %v2095_v36  ;;  %v2140_v57 = vrot.slane %v2116_v59, 1  ;;  %v2961_v34 = vrot.slane %v2945_v54, 3 }
 0x1b4   : > { %v2962_v26 = vrot.slane %v2949_v32, 2  ;;  %v2164_v47 = vrot.slane %v2116_v59, 2  ;;  %v2188_v50 = vrot.slane %v2116_v59, 3  ;;  %v2212_v31 = vrot.slane %v2116_v59, 4  ;;  %v5892_v40 = vld [vmem:[%s9339_s0 + $0x2b0] sm:$0x3f] }
 0x1b5   : > { %v2144_v63 = vrot.slane %v2124_v44, 1  ;;  %v2156_v28 = vadd.f32 %v2140_v57, %v2116_v59  ;;  %v2168_v29 = vrot.slane %v2124_v44, 2  ;;  %v2192_v61 = vrot.slane %v2124_v44, 3  ;;  %v5884_v59 = vld [vmem:[%s9339_s0 + $0x5f0] sm:$0x3f] }
 0x1b6   : > { %v2963_v38 = vsel %vm1465_vm3, %v2962_v26, %v2961_v34  ;;  %v2216_v62 = vrot.slane %v2124_v44, 4  ;;  %v2292_v51 = vrot.slane %v8333_v60, 2  ;;  %v2296_v33 = vrot.slane %v8335_v27, 2  ;;  %v5900_v52 = vld [vmem:[%s9339_s0 + $0x630] sm:$0x3f] }
 0x1b7   : > { %2977 = vst [vmem:[#allocation2 + $0x60] sm:$0xc0] %v2963_v38  ;;  %v2160_v25 = vadd.f32 %v2144_v63, %v2124_v44  ;;  %v2180_v55 = vadd.f32 %v2164_v47, %v2156_v28  ;;  %v2316_v46 = vrot.slane %v8333_v60, 3  ;;  %v2320_v39 = vrot.slane %v8335_v27, 3  ;;  %v5908_v63 = vld [vmem:[%s9339_s0 + $0x2f0] sm:$0x3f] }
 0x1b8   : > { %v2308_v35 = vadd.f32 %v2292_v51, %v2156_v28  ;;  %v2340_v45 = vrot.slane %v8333_v60, 4  ;;  %v2344_v43 = vrot.slane %v8335_v27, 4  ;;  %v2400_v36 = vrot.slane %v8333_v60, 1  ;;  %v2989_v28 = vld [vmem:[#allocation2 + $0x40] sm:$0xff] }
 0x1b9   : > { %v2184_v42 = vadd.f32 %v2168_v29, %v2160_v25  ;;  %v2204_v37 = vadd.f32 %v2188_v50, %v2180_v55  ;;  %v2312_v49 = vadd.f32 %v2296_v33, %v2160_v25  ;;  %v2404_v54 = vrot.slane %v8335_v27, 1  ;;  %v5904_v50 = vld [vmem:[%s9339_s0 + $0x2d0] sm:$0xff] }
 0x1ba   : > { %v2332_v53 = vadd.f32 %v2316_v46, %v2308_v35  ;;  %v2516_v32 = vadd.f32 %v5856_v30, %v8306_v58  ;;  %v2520_v44 = vadd.f32 %v5892_v40, %v5876_v41  ;;  %v2416_v47 = vadd.f32 %v2400_v36, %v8333_v60  ;;  %v5912_v60 = vld [vmem:[%s9339_s0 + $0x650] sm:$0xff] }
 0x1bb   : > { %v2208_v57 = vadd.f32 %v2192_v61, %v2184_v42  ;;  %v2228_v34 = vadd.f32 %v2212_v31, %v2204_v37  ;;  %v2336_v26 = vadd.f32 %v2320_v39, %v2312_v49  ;;  %v2420_v38 = vadd.f32 %v2404_v54, %v8335_v27  ;;  %v5916_v41 = vld [vmem:[%s9339_s0 + $0x670] sm:$0x3f] }
 0x1bc   : > { %v2356_v29 = vadd.f32 %v2340_v45, %v2332_v53  ;;  %v2524_v58 = vadd.f32 %v5864_v48, %v8314_v56  ;;  %v2528_v30 = vadd.f32 %v5900_v52, %v5884_v59  ;;  %v2424_v55 = vadd.f32 %v2416_v47, %v2292_v51  ;;  %v5924_v56 = vld [vmem:[%s9339_s0 + $0x330] sm:$0x3f] }
 0x1bd   : > { %v2232_v61 = vadd.f32 %v2216_v62, %v2208_v57  ;;  %v2236_v31 = vmul.f32 0.04, %v2228_v34  ;;  %v2360_v25 = vadd.f32 %v2344_v43, %v2336_v26  ;;  %v2428_v42 = vadd.f32 %v2420_v38, %v2296_v33  ;;  %v5920_v36 = vld [vmem:[%s9339_s0 + $0x310] sm:$0xff] }
 0x1be   : > { %v2993_v40 = vld [vmem:[#allocation2 + $0x60] sm:$0xff]  ;;  %v2364_v35 = vmul.f32 0.04, %v2356_v29  ;;  %v2549_v37 = vadd.f32 %v5904_v50, %v2516_v32  ;;  %v2553_v27 = vadd.f32 %v5908_v63, %v2520_v44  ;;  %v2432_v52 = vadd.f32 %v2424_v55, %v2316_v46  ;;  %v5928_v33 = vld [vmem:[%s9339_s0 + $0x690] sm:$0xff] }
 0x1bf   : > { %v3001_v48 = vpack.c.bf16 %v2993_v40, %v2989_v28  ;;  %v2240_v62 = vmul.f32 0.04, %v2232_v61  ;;  %v2270_v51 = vrot.slane %v2236_v31, 1  ;;  %v2368_v49 = vmul.f32 0.04, %v2360_v25  ;;  %v5936_v46 = vld [vmem:[%s9339_s0 + $0x350] sm:$0xff] }
 0x1c0   : > { %v2384_v59 = vrot.slane %v2364_v35, 2  ;;  %v2436_v53 = vadd.f32 %v2428_v42, %v2320_v39  ;;  %v2557_v54 = vadd.f32 %v5912_v60, %v2524_v58  ;;  %v5932_v32 = vld [vmem:[%s9339_s0 + $0x6b0] sm:$0x3f]  ;;  %v2561_v26 = vadd.f32 %v5916_v41, %v2528_v30 }
 0x1c1   : > { %3309 = vmatmul.mubr.bf16.gmra.mrb[4].mxu0 %v3001_v48  ;;  %v2254_v44 = vrot.slane %v2240_v62, 7  ;;  %v2271_v57 = vsel %vm1266_vm0, %v2240_v62, %v2270_v51  ;;  %v2385_v34 = vrot.slane %v2368_v49, 1  ;;  %v2440_v39 = vadd.f32 %v2432_v52, %v2340_v45  ;;  %v5940_v28 = vld [vmem:[%s9339_s0 + $0x370] sm:$0x3f] }
 0x1c2   : > { %2280 = vst [vmem:[#allocation2 + $0x50] sm:$0xc] %v2271_v57  ;;  %v2444_v47 = vadd.f32 %v2436_v53, %v2344_v43  ;;  %v2582_v50 = vadd.f32 %v5920_v36, %v2549_v37  ;;  %v2586_v63 = vadd.f32 %v5924_v56, %v2553_v27  ;;  %v5944_v29 = vld [vmem:[%s9339_s0 + $0x6d0] sm:$0xff]  ;;  %v2590_v45 = vadd.f32 %v5928_v33, %v2557_v54 }
 0x1c3   : > { %v5948_v38 = vld [vmem:[%s9339_s0 + $0x6f0] sm:$0x3f]  ;;  %v2255_v58 = vsel %vm1249_vm1, %v2254_v44, %v2236_v31  ;;  %v2386_v30 = vsel %vm1380_vm2, %v2385_v34, %v2384_v59  ;;  %v2594_v43 = vadd.f32 %v5932_v32, %v2561_v26  ;;  %v2448_v61 = vmul.f32 0.04, %v2440_v39 }
 0x1c4   : > { %2264 = vst [vmem:[#allocation2 + $0x50] sm:$0x3] %v2255_v58  ;;  %2396 = vst [vmem:[#allocation2 + $0x50] sm:$0x30] %v2386_v30  ;;  %v2452_v25 = vmul.f32 0.04, %v2444_v47  ;;  %v2615_v55 = vadd.f32 %v5936_v46, %v2582_v50  ;;  %v2619_v60 = vadd.f32 %v5940_v28, %v2586_v63  ;;  %v2623_v41 = vadd.f32 %v5944_v29, %v2590_v45 }
 0x1c5   : > { %v2627_v40 = vadd.f32 %v5948_v38, %v2594_v43  ;;  %v2468_v35 = vrot.slane %v2448_v61, 3 }
 0x1c6   : > { %v2469_v42 = vrot.slane %v2452_v25, 2  ;;  %v2639_v37 = vrot.slane %v2615_v55, 1  ;;  %v2663_v27 = vrot.slane %v2615_v55, 2  ;;  %v2643_v56 = vrot.slane %v2623_v41, 1 }
 0x1c7   : > { %v2667_v48 = vrot.slane %v2623_v41, 2  ;;  %v2687_v62 = vrot.slane %v2615_v55, 3  ;;  %v2691_v31 = vrot.slane %v2623_v41, 3  ;;  %v2711_v36 = vrot.slane %v2615_v55, 4 }
 0x1c8   : > { %v2470_v51 = vsel %vm1465_vm3, %v2469_v42, %v2468_v35  ;;  %v2655_v49 = vadd.f32 %v2639_v37, %v2615_v55  ;;  %v2715_v59 = vrot.slane %v2623_v41, 4  ;;  %v2659_v52 = vadd.f32 %v2643_v56, %v2623_v41 }
 0x1c9   : > { %2480 = vst [vmem:[#allocation2 + $0x50] sm:$0xc0] %v2470_v51  ;;  %v2791_v53 = vrot.slane %v2619_v60, 2  ;;  %v2795_v54 = vrot.slane %v2627_v40, 2  ;;  %v2815_v33 = vrot.slane %v2619_v60, 3  ;;  %v2819_v44 = vrot.slane %v2627_v40, 3 }
 0x1ca   : > { %v2679_v32 = vadd.f32 %v2663_v27, %v2655_v49  ;;  %v2839_v57 = vrot.slane %v2619_v60, 4  ;;  %v2843_v34 = vrot.slane %v2627_v40, 4  ;;  %v2683_v26 = vadd.f32 %v2667_v48, %v2659_v52 }
 0x1cb   : > { %v2807_v46 = vadd.f32 %v2791_v53, %v2655_v49  ;;  %v2811_v39 = vadd.f32 %v2795_v54, %v2659_v52  ;;  %v2899_v47 = vrot.slane %v2619_v60, 1  ;;  %v2903_v63 = vrot.slane %v2627_v40, 1 }
 0x1cc   : > { %v2703_v50 = vadd.f32 %v2687_v62, %v2679_v32  ;;  %v2707_v28 = vadd.f32 %v2691_v31, %v2683_v26 }
 0x1cd   : > { %v2831_v29 = vadd.f32 %v2815_v33, %v2807_v46  ;;  %v2835_v38 = vadd.f32 %v2819_v44, %v2811_v39  ;;  %v2915_v58 = vadd.f32 %v2899_v47, %v2619_v60  ;;  %v2919_v45 = vadd.f32 %v2903_v63, %v2627_v40 }
 0x1ce   : > { %v2727_v30 = vadd.f32 %v2711_v36, %v2703_v50  ;;  %v2731_v43 = vadd.f32 %v2715_v59, %v2707_v28 }
 0x1cf   : > { %v2855_v61 = vadd.f32 %v2839_v57, %v2831_v29  ;;  %v2859_v25 = vadd.f32 %v2843_v34, %v2835_v38  ;;  %v2923_v55 = vadd.f32 %v2915_v58, %v2791_v53  ;;  %v2927_v35 = vadd.f32 %v2919_v45, %v2795_v54 }
 0x1d0   : > { %v2735_v41 = vmul.f32 0.04, %v2727_v30  ;;  %v2739_v42 = vmul.f32 0.04, %v2731_v43  ;;  %v2991_v26 = vld [vmem:[#allocation2 + $0x50] sm:$0xff]  ;;  %v3375_v58 = vlaneseq }
 0x1d1   : > { %v2863_v37 = vmul.f32 0.04, %v2855_v61  ;;  %v2867_v27 = vmul.f32 0.04, %v2859_v25  ;;  %v2931_v56 = vadd.f32 %v2923_v55, %v2815_v33  ;;  %v2935_v51 = vadd.f32 %v2927_v35, %v2819_v44  ;;  %v5950_v30 = vld [vmem:[%s9341_s2] ss:$0 sm:$0xff] }
 0x1d2   : > { %v2769_v48 = vrot.slane %v2735_v41, 1  ;;  %v2753_v62 = vrot.slane %v2739_v42, 7  ;;  %v6306_v29 = vmov 1983009808   ;;  %v8409_v25 = vshrl.u32 %v3375_v58, 7 }
 0x1d3   : > { %v2883_v49 = vrot.slane %v2863_v37, 2  ;;  %v2884_v31 = vrot.slane %v2867_v27, 1  ;;  %v2939_v52 = vadd.f32 %v2931_v56, %v2839_v57  ;;  %v2943_v36 = vadd.f32 %v2935_v51, %v2843_v34 }
 0x1d4   : > { %v2770_v60 = vsel %vm1266_vm0, %v2739_v42, %v2769_v48  ;;  %v2754_v40 = vsel %vm1249_vm1, %v2753_v62, %v2735_v41  ;;  %v3373_v38 = vunpack.c.l.s4 %v6306_v29  ;;  %9835 = vst [vmem:[#allocation245_spill] sm:$0xff] %v8409_v25 }
 0x1d5   : > { %2779 = vst [vmem:[#allocation2 + $0x70] sm:$0xc] %v2770_v60  ;;  %v2885_v59 = vsel %vm1380_vm2, %v2884_v31, %v2883_v49  ;;  %v2947_v53 = vmul.f32 0.04, %v2939_v52  ;;  %2763 = vst [vmem:[#allocation2 + $0x70] sm:$0x3] %v2754_v40 }
 0x1d6   : > { %2895 = vst [vmem:[#allocation2 + $0x70] sm:$0x30] %v2885_v59  ;;  %v2951_v54 = vmul.f32 0.04, %v2943_v36  ;;  %v3374_v61 = vunpack.c.0.s8 %v3373_v38 }
 0x1d7   : > { %v2967_v32 = vrot.slane %v2947_v53, 3 }
 0x1d8   : > { %v2968_v33 = vrot.slane %v2951_v54, 2  ;;  %v8412_v56 = vsub.s32 %v3374_v61, %v8409_v25 }
 0x1da   : > { %v2969_v44 = vsel %vm1465_vm3, %v2968_v33, %v2967_v32 }
 0x1db   : > { %2979 = vst [vmem:[#allocation2 + $0x70] sm:$0xc0] %v2969_v44 }
 0x1e2   : > { %v2995_v46 = vld [vmem:[#allocation2 + $0x70] sm:$0xff] }
 0x1e3   : > { %v3003_v57 = vpack.c.bf16 %v2995_v46, %v2991_v26 }
 0x1e5   : > { %3358 = vmatmul.mubr.bf16.gmra.mrb[4].mxu1 %v3003_v57 }
 0x204   : > { %v6015_v39 = vpop.f32.mrb[0].mxu0 }
 0x205   : > { %v6016_v34 = vpop.f32.mrb[1].mxu0 }
 0x206   : > { %v6017_v47 = vadd.f32 %v6016_v34, %v6015_v39  ;;  %v6018_v50 = vpop.f32.mrb[2].mxu0 }
 0x207   : > { %v6019_v63 = vpop.f32.mrb[3].mxu0 }
 0x208   : > { %v6020_v28 = vadd.f32 %v6019_v63, %v6018_v50  ;;  %v3303_v43 = vadd.f32 %v6017_v47, %v5950_v30 }
 0x20a   : > { %v3306_v42 = vadd.f32 %v6020_v28, %v5950_v30 }
 0x22a   : > { %v6043_v45 = vpop.f32.mrb[0].mxu1 }
 0x22b   : > { %v6044_v55 = vpop.f32.mrb[1].mxu1 }
 0x22c   : > { %v6045_v41 = vadd.f32 %v6044_v55, %v6043_v45  ;;  %v6046_v35 = vpop.f32.mrb[2].mxu1 }
 0x22d   : > { %v6047_v37 = vpop.f32.mrb[3].mxu1 }
 0x22e   : > { %v3352_v27 = vadd.f32 %v6045_v41, %v3303_v43  ;;  %v6048_v48 = vadd.f32 %v6047_v37, %v6046_v35 }
 0x230   : > { %v3366_v51 = vmax.f32 %v3352_v27, 0.0  ;;  %v3355_v62 = vadd.f32 %v6048_v48, %v3306_v42 }
 0x232   : > { %3370 = vst [vmem:[#allocation3] sm:$0x3] %v3366_v51  ;;  %v3378_v49 = vrot.slane %v3366_v51, %v8412_v56  ;;  %v3382_v31 = vcombine.high %v3366_v51, %v3366_v51  ;;  %v3367_v52 = vmax.f32 %v3355_v62, 0.0 }
 0x234   : > { %v3379_v60 = vcombine.high %v3378_v49, %v3378_v49  ;;  %v3389_v36 = vrot.slane %v3382_v31, %v8412_v56  ;;  %5983 = vst.sshfl [vmem:[#allocation3 + $0x4] sm:$0x3 pattern:$0x76325410] %v3382_v31  ;;  %3395 = vst [vmem:[#allocation3 + $0x8] sm:$0x3] %v3367_v52  ;;  %v3403_v40 = vrot.slane %v3367_v52, %v8412_v56 }
 0x235   : > { %v3407_v59 = vcombine.high %v3367_v52, %v3367_v52 }
 0x236   : > { %3381 = vst [vmem:[#allocation3 + $0x2] sm:$0x3] %v3379_v60  ;;  %v3392_v53 = vcombine.high %v3389_v36, %v3389_v36  ;;  %v3404_v54 = vcombine.high %v3403_v40, %v3403_v40 }
 0x237   : > { %v3414_v32 = vrot.slane %v3407_v59, %v8412_v56  ;;  %5984 = vst.sshfl [vmem:[#allocation3 + $0xc] sm:$0x3 pattern:$0x76325410] %v3407_v59 }
 0x238   : > { %3394 = vst [vmem:[#allocation3 + $0x6] sm:$0x3] %v3392_v53  ;;  %3406 = vst [vmem:[#allocation3 + $0xa] sm:$0x3] %v3404_v54 }
 0x239   : > { %v3417_v33 = vcombine.high %v3414_v32, %v3414_v32 }
 0x23b   : > { %3419 = vst [vmem:[#allocation3 + $0xe] sm:$0x3] %v3417_v33 }
 0x294   : > { %v6021_v44 = vpop.f32.mrb[4].mxu0 }
 0x295   : > { %v6022_v26 = vpop.f32.mrb[5].mxu0 }
 0x296   : > { %v6023_v46 = vadd.f32 %v6022_v26, %v6021_v44  ;;  %v6024_v57 = vpop.f32.mrb[6].mxu0 }
 0x297   : > { %v6025_v39 = vpop.f32.mrb[7].mxu0 }
 0x298   : > { %v6026_v34 = vadd.f32 %v6025_v39, %v6024_v57  ;;  %v3311_v50 = vadd.f32 %v6023_v46, %v5950_v30 }
 0x29a   : > { %v3314_v38 = vadd.f32 %v6026_v34, %v5950_v30 }
 0x2b8   : > { %v6049_v47 = vpop.f32.mrb[4].mxu1 }
 0x2b9   : > { %v6050_v63 = vpop.f32.mrb[5].mxu1 }
 0x2ba   : > { %v6051_v28 = vadd.f32 %v6050_v63, %v6049_v47  ;;  %v6052_v29 = vpop.f32.mrb[6].mxu1 }
 0x2bb   : > { %v6053_v58 = vpop.f32.mrb[7].mxu1 }
 0x2bc   : > { %v3360_v45 = vadd.f32 %v6051_v28, %v3311_v50  ;;  %v6054_v43 = vadd.f32 %v6053_v58, %v6052_v29 }
 0x2be   : > { %v3368_v61 = vmax.f32 %v3360_v45, 0.0  ;;  %v3363_v55 = vadd.f32 %v6054_v43, %v3314_v38 }
 0x2c0   : > { %3420 = vst [vmem:[#allocation3 + $0x10] sm:$0x3] %v3368_v61  ;;  %v3428_v41 = vrot.slane %v3368_v61, %v8412_v56  ;;  %v3432_v35 = vcombine.high %v3368_v61, %v3368_v61  ;;  %v3369_v42 = vmax.f32 %v3363_v55, 0.0 }
 0x2c2   : > { %v3429_v37 = vcombine.high %v3428_v41, %v3428_v41  ;;  %v3439_v27 = vrot.slane %v3432_v35, %v8412_v56  ;;  %5985 = vst.sshfl [vmem:[#allocation3 + $0x14] sm:$0x3 pattern:$0x76325410] %v3432_v35  ;;  %3445 = vst [vmem:[#allocation3 + $0x18] sm:$0x3] %v3369_v42  ;;  %v3453_v48 = vrot.slane %v3369_v42, %v8412_v56 }
 0x2c3   : > { %v3457_v51 = vcombine.high %v3369_v42, %v3369_v42 }
 0x2c4   : > { %3431 = vst [vmem:[#allocation3 + $0x12] sm:$0x3] %v3429_v37  ;;  %v3442_v30 = vcombine.high %v3439_v27, %v3439_v27  ;;  %v3454_v62 = vcombine.high %v3453_v48, %v3453_v48 }
 0x2c5   : > { %v3464_v49 = vrot.slane %v3457_v51, %v8412_v56  ;;  %5986 = vst.sshfl [vmem:[#allocation3 + $0x1c] sm:$0x3 pattern:$0x76325410] %v3457_v51 }
 0x2c6   : > { %3444 = vst [vmem:[#allocation3 + $0x16] sm:$0x3] %v3442_v30  ;;  %3456 = vst [vmem:[#allocation3 + $0x1a] sm:$0x3] %v3454_v62 }
 0x2c7   : > { %v3467_v31 = vcombine.high %v3464_v49, %v3464_v49 }
 0x2c9   : > { %3469 = vst [vmem:[#allocation3 + $0x1e] sm:$0x3] %v3467_v31 }
 0x2ca   : > { %6294 = dma.done.wait [#allocation5], 8192 }
 0x2cb   : > { %6295 = vsyncadd [#allocation5], 4294959104  ;;  %v9836_v61 = vld [vmem:[#allocation14_spill] sm:$0xff]  ;;  %v9837_v35 = vld [vmem:[#allocation15_spill] sm:$0xff] }
 0x2cc   : > { %v9838_v55 = vld [vmem:[#allocation16_spill] sm:$0xff]  ;;  %v9839_v45 = vld [vmem:[#allocation17_spill] sm:$0xff]  ;;  %v9840_v38 = vld [vmem:[#allocation18_spill] sm:$0xff] }
 0x2cd   : > { %v9841_v43 = vld [vmem:[#allocation19_spill] sm:$0xff]  ;;  %v9842_v58 = vld [vmem:[#allocation20_spill] sm:$0xff]  ;;  %v9843_v28 = vld [vmem:[#allocation21_spill] sm:$0xff] }
 0x2ce   : > { %v9844_v50 = vld [vmem:[#allocation22_spill] sm:$0xff]  ;;  %v9845_v29 = vld [vmem:[#allocation23_spill] sm:$0xff]  ;;  %v9846_v63 = vld [vmem:[#allocation24_spill] sm:$0xff] }
 0x2cf   : > { %v9847_v34 = vld [vmem:[#allocation25_spill] sm:$0xff]  ;;  %v9848_v57 = vld [vmem:[#allocation26_spill] sm:$0xff]  ;;  %v9849_v47 = vld [vmem:[#allocation27_spill] sm:$0xff] }
 0x2d0   : > { %v9850_v39 = vld [vmem:[#allocation28_spill] sm:$0xff]  ;;  %v9852_v33 = vld [vmem:[#allocation30_spill] sm:$0xff]  ;;  %v9878_v41 = vld [vmem:[#allocation53_spill] sm:$0xff] }
 0x2d1   : > { %v3666_v25 = vld [vmem:[#allocation3] sm:$0xff]  ;;  %v9877_v31 = vld [vmem:[#allocation56_spill] sm:$0xff]  ;;  %v3759_v30 = vunpack.c.l.s8.bf16 %v9878_v41  ;;  %v9879_v48 = vld [vmem:[#allocation55_spill] sm:$0xff] }
 0x2d2   : > { %v3668_v42 = vcombine.high %v3666_v25, %v3666_v25  ;;  %v3675_v37 = vrot.slane %v3666_v25, %v8412_v56  ;;  %v9876_v49 = vld [vmem:[#allocation54_spill] sm:$0xff]  ;;  %v3762_v51 = vunpack.c.l.s8.bf16 %v9877_v31  ;;  %v3761_v25 = vunpack.c.l.s8.bf16 %v9879_v48 }
 0x2d3   : > { %v3760_v27 = vunpack.c.l.s8.bf16 %v9876_v49 }
 0x2d4   : > { %v3682_v60 = vrot.slane %v3668_v42, %v8412_v56  ;;  %v3683_v54 = vcombine.high %v3675_v37, %v3675_v37  ;;  %v8552_v36 = vpack.c.bf16 %v3675_v37, %v3675_v37 }
 0x2d6   : > { %v3684_v53 = vcombine.high %v3682_v60, %v3682_v60  ;;  %v8554_v32 = vpack.c.bf16 %v3683_v54, %v3683_v54  ;;  %v8556_v59 = vpack.c.bf16 %v3682_v60, %v3682_v60 }
 0x2d8   : > { %9875 = vst [vmem:[#allocation14_spill] sm:$0xff] %v8556_v59  ;;  %v8558_v62 = vpack.c.bf16 %v3684_v53, %v3684_v53 }
 0x2d9   : > { %6296 = dma.done.wait [#allocation5 + $0x1], 8192 }
 0x2da   : > { %6297 = vsyncadd [#allocation5 + $0x1], 4294959104  ;;  %v3764_v42 = vunpack.c.h.s8.bf16 %v9876_v49  ;;  %v3766_v37 = vunpack.c.h.s8.bf16 %v9877_v31  ;;  %3914 = vmatprep.subr.bf16.mxu0 %v3760_v27  ;;  %3996 = vmatprep.subr.bf16.mxu1 %v3762_v51  ;;  %v3763_v60 = vunpack.c.h.s8.bf16 %v9878_v41  ;;  %v3765_v53 = vunpack.c.h.s8.bf16 %v9879_v48  ;;  %v9880_v54 = vld [vmem:[#allocation58_spill] sm:$0xff]  ;;  %v9881_v52 = vld [vmem:[#allocation60_spill] sm:$0xff] }
 0x2db   : > { %3915 = vmatpush1.bf16.msra.mxu0 %v3759_v30  ;;  %3997 = vmatpush1.bf16.msra.mxu1 %v3761_v25  ;;  %v3768_v59 = vunpack.c.l.s8.bf16 %v9880_v54  ;;  %v3770_v40 = vunpack.c.l.s8.bf16 %v9881_v52  ;;  %v9882_v46 = vld [vmem:[#allocation57_spill] sm:$0xff]  ;;  %v9883_v26 = vld [vmem:[#allocation59_spill] sm:$0xff]  ;;  %v3772_v27 = vunpack.c.h.s8.bf16 %v9880_v54  ;;  %v3774_v41 = vunpack.c.h.s8.bf16 %v9881_v52  ;;  %v9884_v25 = vld [vmem:[#allocation62_spill] sm:$0xff] }
 0x2dc   : > { %3916 = vmatprep.subr.bf16.mxu0 %v3764_v42  ;;  %3998 = vmatprep.subr.bf16.mxu1 %v3766_v37  ;;  %v3767_v49 = vunpack.c.l.s8.bf16 %v9882_v46  ;;  %v3769_v31 = vunpack.c.l.s8.bf16 %v9883_v26  ;;  %v8574_v51 = vld [vmem:[#allocation3 + $0x8] sm:$0xff]  ;;  %v3771_v48 = vunpack.c.h.s8.bf16 %v9882_v46  ;;  %v3773_v30 = vunpack.c.h.s8.bf16 %v9883_v26  ;;  %v9885_v37 = vld [vmem:[#allocation64_spill] sm:$0xff]  ;;  %v9886_v52 = vld [vmem:[#allocation61_spill] sm:$0xff] }
 0x2dd   : > { %v3776_v42 = vunpack.c.l.s8.bf16 %v9884_v25  ;;  %v3780_v26 = vunpack.c.h.s8.bf16 %v9884_v25  ;;  %v3782_v46 = vunpack.c.h.s8.bf16 %v9885_v37  ;;  %v9890_v25 = vld [vmem:[#allocation65_spill] sm:$0xff]  ;;  %v9891_v44 = vld [vmem:[#allocation67_spill] sm:$0xff] }
 0x2df   : > { %3917 = vmatpush1.bf16.msra.mxu0 %v3763_v60  ;;  %3999 = vmatpush1.bf16.msra.mxu1 %v3765_v53  ;;  %v3778_v60 = vunpack.c.l.s8.bf16 %v9885_v37  ;;  %v9887_v53 = vld [vmem:[#allocation63_spill] sm:$0xff]  ;;  %v3783_v37 = vunpack.c.l.s8.bf16 %v9890_v25 }
 0x2e0   : > { %3918 = vmatprep.subr.bf16.mxu0 %v3768_v59  ;;  %4000 = vmatprep.subr.bf16.mxu1 %v3770_v40  ;;  %v8582_v40 = vrot.slane %v8574_v51, %v8412_v56  ;;  %v3775_v59 = vunpack.c.l.s8.bf16 %v9886_v52  ;;  %v3777_v54 = vunpack.c.l.s8.bf16 %v9887_v53 }
 0x2e3   : > { %3919 = vmatpush1.bf16.msra.mxu0 %v3767_v49  ;;  %4001 = vmatpush1.bf16.msra.mxu1 %v3769_v31  ;;  %v3904_v49 = vcombine.high %v8582_v40, %v8582_v40 }
 0x2e4   : > { %3920 = vmatprep.subr.bf16.mxu0 %v3772_v27  ;;  %4002 = vmatprep.subr.bf16.mxu1 %v3774_v41  ;;  %v3779_v27 = vunpack.c.h.s8.bf16 %v9886_v52  ;;  %v3781_v41 = vunpack.c.h.s8.bf16 %v9887_v53  ;;  %v3787_v53 = vunpack.c.h.s8.bf16 %v9890_v25 }
 0x2e5   : > { %v3911_v31 = vpack.c.bf16 %v3904_v49, %v3904_v49  ;;  %v3785_v49 = vunpack.c.l.s8.bf16 %v9891_v44 }
 0x2e7   : > { %3921 = vmatpush1.bf16.msra.mxu0 %v3771_v48  ;;  %4003 = vmatpush1.bf16.msra.mxu1 %v3773_v30  ;;  %v9888_v48 = vld [vmem:[#allocation66_spill] sm:$0xff] }
 0x2e8   : > { %3922 = vmatprep.subr.bf16.mxu0 %v3776_v42  ;;  %4004 = vmatprep.subr.bf16.mxu1 %v3778_v60  ;;  %v3784_v30 = vunpack.c.l.s8.bf16 %v9888_v48  ;;  %v9889_v42 = vld [vmem:[#allocation68_spill] sm:$0xff]  ;;  %v3788_v52 = vunpack.c.h.s8.bf16 %v9888_v48 }
 0x2e9   : > { %v3786_v60 = vunpack.c.l.s8.bf16 %v9889_v42  ;;  %3946 = vmatprep.mubr.bf16.mxu0 %v3911_v31  ;;  %4028 = vmatprep.mubr.bf16.mxu1 %v3911_v31  ;;  %v9893_v31 = vld [vmem:[#allocation72_spill] sm:$0xff] }
 0x2ea   : > { %v3798_v25 = vunpack.c.h.s8.bf16 %v9893_v31 }
 0x2eb   : > { %3923 = vmatpush1.bf16.msra.mxu0 %v3775_v59  ;;  %4005 = vmatpush1.bf16.msra.mxu1 %v3777_v54  ;;  %v3790_v59 = vunpack.c.h.s8.bf16 %v9889_v42  ;;  %v3789_v54 = vunpack.c.h.s8.bf16 %v9891_v44 }
 0x2ec   : > { %3924 = vmatprep.subr.bf16.mxu0 %v3780_v26  ;;  %4006 = vmatprep.subr.bf16.mxu1 %v3782_v46  ;;  %v9892_v26 = vld [vmem:[#allocation70_spill] sm:$0xff] }
 0x2ed   : > { %v3792_v46 = vunpack.c.l.s8.bf16 %v9892_v26  ;;  %v3796_v42 = vunpack.c.h.s8.bf16 %v9892_v26 }
 0x2ef   : > { %3925 = vmatpush1.bf16.msra.mxu0 %v3779_v27  ;;  %4007 = vmatpush1.bf16.msra.mxu1 %v3781_v41  ;;  %v3794_v27 = vunpack.c.l.s8.bf16 %v9893_v31  ;;  %v9894_v41 = vld [vmem:[#allocation69_spill] sm:$0xff] }
 0x2f0   : > { %3926 = vmatprep.subr.bf16.mxu0 %v3784_v30  ;;  %4008 = vmatprep.subr.bf16.mxu1 %v3786_v60  ;;  %v3791_v30 = vunpack.c.l.s8.bf16 %v9894_v41  ;;  %v9895_v60 = vld [vmem:[#allocation71_spill] sm:$0xff]  ;;  %v3795_v44 = vunpack.c.h.s8.bf16 %v9894_v41 }
 0x2f1   : > { %v3793_v48 = vunpack.c.l.s8.bf16 %v9895_v60 }
 0x2f3   : > { %3927 = vmatpush1.bf16.msra.mxu0 %v3783_v37  ;;  %4009 = vmatpush1.bf16.msra.mxu1 %v3785_v49  ;;  %v3797_v37 = vunpack.c.h.s8.bf16 %v9895_v60  ;;  %v9896_v49 = vld [vmem:[#allocation74_spill] sm:$0xff] }
 0x2f4   : > { %3928 = vmatprep.subr.bf16.mxu0 %v3788_v52  ;;  %4010 = vmatprep.subr.bf16.mxu1 %v3790_v59  ;;  %v3800_v52 = vunpack.c.l.s8.bf16 %v9896_v49  ;;  %v9897_v59 = vld [vmem:[#allocation76_spill] sm:$0xff]  ;;  %v3804_v31 = vunpack.c.h.s8.bf16 %v9896_v49 }
 0x2f5   : > { %v3806_v41 = vunpack.c.h.s8.bf16 %v9897_v59 }
 0x2f7   : > { %3929 = vmatpush1.bf16.msra.mxu0 %v3787_v53  ;;  %4011 = vmatpush1.bf16.msra.mxu1 %v3789_v54  ;;  %v3802_v53 = vunpack.c.l.s8.bf16 %v9897_v59  ;;  %v9898_v54 = vld [vmem:[#allocation73_spill] sm:$0xff] }
 0x2f8   : > { %3930 = vmatprep.subr.bf16.mxu0 %v3792_v46  ;;  %4012 = vmatprep.subr.bf16.mxu1 %v3794_v27  ;;  %v3799_v46 = vunpack.c.l.s8.bf16 %v9898_v54  ;;  %v9899_v27 = vld [vmem:[#allocation75_spill] sm:$0xff] }
 0x2f9   : > { %v3801_v26 = vunpack.c.l.s8.bf16 %v9899_v27  ;;  %v3805_v60 = vunpack.c.h.s8.bf16 %v9899_v27 }
 0x2fb   : > { %3931 = vmatpush1.bf16.msra.mxu0 %v3791_v30  ;;  %4013 = vmatpush1.bf16.msra.mxu1 %v3793_v48  ;;  %v3803_v30 = vunpack.c.h.s8.bf16 %v9898_v54  ;;  %v9900_v48 = vld [vmem:[#allocation78_spill] sm:$0xff] }
 0x2fc   : > { %3932 = vmatprep.subr.bf16.mxu0 %v3796_v42  ;;  %4014 = vmatprep.subr.bf16.mxu1 %v3798_v25  ;;  %v3808_v42 = vunpack.c.l.s8.bf16 %v9900_v48  ;;  %v9901_v25 = vld [vmem:[#allocation80_spill] sm:$0xff]  ;;  %v3812_v59 = vunpack.c.h.s8.bf16 %v9900_v48  ;;  %v9906_v48 = vld [vmem:[#allocation81_spill] sm:$0xff] }
 0x2fd   : > { %v3814_v54 = vunpack.c.h.s8.bf16 %v9901_v25 }
 0x2ff   : > { %3933 = vmatpush1.bf16.msra.mxu0 %v3795_v44  ;;  %4015 = vmatpush1.bf16.msra.mxu1 %v3797_v37  ;;  %v3810_v44 = vunpack.c.l.s8.bf16 %v9901_v25  ;;  %v9902_v37 = vld [vmem:[#allocation77_spill] sm:$0xff]  ;;  %v9907_v25 = vld [vmem:[#allocation83_spill] sm:$0xff] }
 0x300   : > { %3934 = vmatprep.subr.bf16.mxu0 %v3800_v52  ;;  %4016 = vmatprep.subr.bf16.mxu1 %v3802_v53  ;;  %v3807_v52 = vunpack.c.l.s8.bf16 %v9902_v37  ;;  %v9903_v53 = vld [vmem:[#allocation79_spill] sm:$0xff] }
 0x301   : > { %v3809_v49 = vunpack.c.l.s8.bf16 %v9903_v53  ;;  %v3813_v27 = vunpack.c.h.s8.bf16 %v9903_v53 }
 0x303   : > { %3935 = vmatpush1.bf16.msra.mxu0 %v3799_v46  ;;  %4017 = vmatpush1.bf16.msra.mxu1 %v3801_v26  ;;  %v3811_v46 = vunpack.c.h.s8.bf16 %v9902_v37  ;;  %v9904_v26 = vld [vmem:[#allocation82_spill] sm:$0xff] }
 0x304   : > { %3936 = vmatprep.subr.bf16.mxu0 %v3804_v31  ;;  %4018 = vmatprep.subr.bf16.mxu1 %v3806_v41  ;;  %v3816_v31 = vunpack.c.l.s8.bf16 %v9904_v26  ;;  %v9905_v41 = vld [vmem:[#allocation84_spill] sm:$0xff]  ;;  %v3820_v37 = vunpack.c.h.s8.bf16 %v9904_v26 }
 0x307   : > { %3937 = vmatpush1.bf16.msra.mxu0 %v3803_v30  ;;  %4019 = vmatpush1.bf16.msra.mxu1 %v3805_v60  ;;  %v3818_v30 = vunpack.c.l.s8.bf16 %v9905_v41  ;;  %v3889_v60 = vcombine.high %v8574_v51, %v8574_v51  ;;  %v3821_v51 = vunpack.c.h.s8.bf16 %v9907_v25 }
 0x308   : > { %3938 = vmatprep.subr.bf16.mxu0 %v3808_v42  ;;  %4020 = vmatprep.subr.bf16.mxu1 %v3810_v44  ;;  %v3815_v42 = vunpack.c.l.s8.bf16 %v9906_v48  ;;  %v3817_v44 = vunpack.c.l.s8.bf16 %v9907_v25 }
 0x309   : > { %v8633_v53 = vrot.slane %v3889_v60, %v8412_v56  ;;  %v9911_v60 = vld [vmem:[#allocation87_spill] sm:$0xff] }
 0x30b   : > { %3939 = vmatpush1.bf16.msra.mxu0 %v3807_v52  ;;  %4021 = vmatpush1.bf16.msra.mxu1 %v3809_v49  ;;  %v3822_v52 = vunpack.c.h.s8.bf16 %v9905_v41  ;;  %v3819_v49 = vunpack.c.h.s8.bf16 %v9906_v48  ;;  %v3905_v26 = vcombine.high %v8633_v53, %v8633_v53  ;;  %v9910_v41 = vld [vmem:[#allocation85_spill] sm:$0xff]  ;;  %v3825_v48 = vunpack.c.l.s8.bf16 %v9911_v60 }
 0x30c   : > { %3940 = vmatprep.subr.bf16.mxu0 %v3812_v59  ;;  %4022 = vmatprep.subr.bf16.mxu1 %v3814_v54  ;;  %v9908_v59 = vld [vmem:[#allocation86_spill] sm:$0xff] }
 0x30d   : > { %v3824_v54 = vunpack.c.l.s8.bf16 %v9908_v59 }
 0x30f   : > { %3941 = vmatpush1.bf16.msra.mxu0 %v3811_v46  ;;  %4023 = vmatpush1.bf16.msra.mxu1 %v3813_v27  ;;  %v9909_v46 = vld [vmem:[#allocation88_spill] sm:$0xff] }
 0x310   : > { %3942 = vmatprep.subr.bf16.mxu0 %v3816_v31  ;;  %4024 = vmatprep.subr.bf16.mxu1 %v3818_v30  ;;  %v3826_v27 = vunpack.c.l.s8.bf16 %v9909_v46  ;;  %v3910_v31 = vpack.c.bf16 %v8582_v40, %v8582_v40  ;;  %v3823_v30 = vunpack.c.l.s8.bf16 %v9910_v41  ;;  %v3830_v25 = vunpack.c.h.s8.bf16 %v9909_v46 }
 0x311   : > { %v3829_v40 = vunpack.c.h.s8.bf16 %v9911_v60 }
 0x313   : > { %3943 = vmatpush1.bf16.msra.mxu0 %v3815_v42  ;;  %4025 = vmatpush1.bf16.msra.mxu1 %v3817_v44  ;;  %v3828_v42 = vunpack.c.h.s8.bf16 %v9908_v59  ;;  %v3913_v44 = vpack.c.bf16 %v3905_v26, %v3905_v26  ;;  %v9914_v59 = vld [vmem:[#allocation89_spill] sm:$0xff] }
 0x314   : > { %3944 = vmatprep.subr.bf16.mxu0 %v3820_v37  ;;  %4026 = vmatprep.subr.bf16.mxu1 %v3822_v52  ;;  %v3827_v37 = vunpack.c.h.s8.bf16 %v9910_v41  ;;  %v9912_v52 = vld [vmem:[#allocation90_spill] sm:$0xff]  ;;  %v3831_v46 = vunpack.c.l.s8.bf16 %v9914_v59 }
 0x317   : > { %3945 = vmatpush1.bf16.msra.mxu0 %v3819_v49  ;;  %4027 = vmatpush1.bf16.msra.mxu1 %v3821_v51  ;;  %v3832_v49 = vunpack.c.l.s8.bf16 %v9912_v52  ;;  %v9913_v51 = vld [vmem:[#allocation92_spill] sm:$0xff] }
 0x318   : > { %3955 = vmatprep.subr.bf16.mxu0 %v3824_v54  ;;  %4037 = vmatprep.subr.bf16.mxu1 %v3826_v27  ;;  %v3834_v54 = vunpack.c.l.s8.bf16 %v9913_v51  ;;  %v9915_v27 = vld [vmem:[#allocation91_spill] sm:$0xff]  ;;  %v3838_v41 = vunpack.c.h.s8.bf16 %v9913_v51 }
 0x319   : > { %v3833_v26 = vunpack.c.l.s8.bf16 %v9915_v27  ;;  %v3837_v60 = vunpack.c.h.s8.bf16 %v9915_v27  ;;  %v9920_v27 = vld [vmem:[#allocation98_spill] sm:$0xff] }
 0x31a   : > { %3947 = vmatmul.mubr.bf16.vlgmr.msra.gmra.mrb[8].mxu0 %v3910_v31  ;;  %4029 = vmatmul.mubr.bf16.vlgmr.msra.gmra.mrb[8].mxu1 %v3910_v31  ;;  %v3836_v31 = vunpack.c.h.s8.bf16 %v9912_v52 }
 0x31b   : > { %3956 = vmatpush1.bf16.msra.mxu0 %v3823_v30  ;;  %4038 = vmatpush1.bf16.msra.mxu1 %v3825_v48  ;;  %v3835_v30 = vunpack.c.h.s8.bf16 %v9914_v59  ;;  %v9916_v48 = vld [vmem:[#allocation94_spill] sm:$0xff] }
 0x31c   : > { %3957 = vmatprep.subr.bf16.mxu0 %v3828_v42  ;;  %4039 = vmatprep.subr.bf16.mxu1 %v3830_v25  ;;  %v3840_v42 = vunpack.c.l.s8.bf16 %v9916_v48  ;;  %v9917_v25 = vld [vmem:[#allocation96_spill] sm:$0xff]  ;;  %v3844_v51 = vunpack.c.h.s8.bf16 %v9916_v48 }
 0x31d   : > { %3987 = vmatprep.mubr.bf16.mxu0 %v3913_v44  ;;  %4069 = vmatprep.mubr.bf16.mxu1 %v3913_v44  ;;  %v3842_v44 = vunpack.c.l.s8.bf16 %v9917_v25 }
 0x31f   : > { %3958 = vmatpush1.bf16.msra.mxu0 %v3827_v37  ;;  %4040 = vmatpush1.bf16.msra.mxu1 %v3829_v40  ;;  %v9918_v37 = vld [vmem:[#allocation93_spill] sm:$0xff] }
 0x320   : > { %3959 = vmatprep.subr.bf16.mxu0 %v3832_v49  ;;  %4041 = vmatprep.subr.bf16.mxu1 %v3834_v54  ;;  %v3839_v40 = vunpack.c.l.s8.bf16 %v9918_v37  ;;  %v9919_v49 = vld [vmem:[#allocation95_spill] sm:$0xff]  ;;  %v3846_v54 = vunpack.c.h.s8.bf16 %v9917_v25  ;;  %v3843_v59 = vunpack.c.h.s8.bf16 %v9918_v37  ;;  %v3852_v25 = vunpack.c.h.s8.bf16 %v9920_v27 }
 0x321   : > { %v3841_v52 = vunpack.c.l.s8.bf16 %v9919_v49 }
 0x323   : > { %3960 = vmatpush1.bf16.msra.mxu0 %v3831_v46  ;;  %4042 = vmatpush1.bf16.msra.mxu1 %v3833_v26  ;;  %v3845_v46 = vunpack.c.h.s8.bf16 %v9919_v49  ;;  %v3848_v26 = vunpack.c.l.s8.bf16 %v9920_v27  ;;  %v9924_v49 = vld [vmem:[#allocation102_spill] sm:$0xff] }
 0x324   : > { %3961 = vmatprep.subr.bf16.mxu0 %v3836_v31  ;;  %4043 = vmatprep.subr.bf16.mxu1 %v3838_v41  ;;  %v9921_v31 = vld [vmem:[#allocation100_spill] sm:$0xff] }
 0x325   : > { %v3850_v41 = vunpack.c.l.s8.bf16 %v9921_v31 }
 0x327   : > { %3962 = vmatpush1.bf16.msra.mxu0 %v3835_v30  ;;  %4044 = vmatpush1.bf16.msra.mxu1 %v3837_v60  ;;  %v9922_v30 = vld [vmem:[#allocation97_spill] sm:$0xff] }
 0x328   : > { %3963 = vmatprep.subr.bf16.mxu0 %v3840_v42  ;;  %4045 = vmatprep.subr.bf16.mxu1 %v3842_v44  ;;  %v3847_v60 = vunpack.c.l.s8.bf16 %v9922_v30  ;;  %v9923_v42 = vld [vmem:[#allocation99_spill] sm:$0xff]  ;;  %v3854_v44 = vunpack.c.h.s8.bf16 %v9921_v31  ;;  %v3851_v37 = vunpack.c.h.s8.bf16 %v9922_v30  ;;  %v3860_v31 = vunpack.c.h.s8.bf16 %v9924_v49 }
 0x329   : > { %v3849_v48 = vunpack.c.l.s8.bf16 %v9923_v42 }
 0x32b   : > { %3964 = vmatpush1.bf16.msra.mxu0 %v3839_v40  ;;  %4046 = vmatpush1.bf16.msra.mxu1 %v3841_v52  ;;  %v3853_v40 = vunpack.c.h.s8.bf16 %v9923_v42  ;;  %v3856_v52 = vunpack.c.l.s8.bf16 %v9924_v49  ;;  %v9928_v42 = vld [vmem:[#allocation106_spill] sm:$0xff] }
 0x32c   : > { %3965 = vmatprep.subr.bf16.mxu0 %v3844_v51  ;;  %4047 = vmatprep.subr.bf16.mxu1 %v3846_v54  ;;  %v9925_v51 = vld [vmem:[#allocation104_spill] sm:$0xff] }
 0x32d   : > { %v3858_v54 = vunpack.c.l.s8.bf16 %v9925_v51 }
 0x32f   : > { %3966 = vmatpush1.bf16.msra.mxu0 %v3843_v59  ;;  %4048 = vmatpush1.bf16.msra.mxu1 %v3845_v46  ;;  %v9926_v59 = vld [vmem:[#allocation101_spill] sm:$0xff] }
 0x330   : > { %3967 = vmatprep.subr.bf16.mxu0 %v3848_v26  ;;  %4049 = vmatprep.subr.bf16.mxu1 %v3850_v41  ;;  %v3855_v46 = vunpack.c.l.s8.bf16 %v9926_v59  ;;  %v9927_v26 = vld [vmem:[#allocation103_spill] sm:$0xff]  ;;  %v3862_v41 = vunpack.c.h.s8.bf16 %v9925_v51  ;;  %v3859_v30 = vunpack.c.h.s8.bf16 %v9926_v59  ;;  %v3868_v51 = vunpack.c.h.s8.bf16 %v9928_v42 }
 0x331   : > { %v3857_v27 = vunpack.c.l.s8.bf16 %v9927_v26 }
 0x333   : > { %3968 = vmatpush1.bf16.msra.mxu0 %v3847_v60  ;;  %4050 = vmatpush1.bf16.msra.mxu1 %v3849_v48  ;;  %v3861_v60 = vunpack.c.h.s8.bf16 %v9927_v26  ;;  %v3864_v48 = vunpack.c.l.s8.bf16 %v9928_v42  ;;  %v9932_v26 = vld [vmem:[#allocation110_spill] sm:$0xff] }
 0x334   : > { %3969 = vmatprep.subr.bf16.mxu0 %v3852_v25  ;;  %4051 = vmatprep.subr.bf16.mxu1 %v3854_v44  ;;  %v9929_v25 = vld [vmem:[#allocation108_spill] sm:$0xff] }
 0x335   : > { %v3866_v44 = vunpack.c.l.s8.bf16 %v9929_v25 }
 0x337   : > { %3970 = vmatpush1.bf16.msra.mxu0 %v3851_v37  ;;  %4052 = vmatpush1.bf16.msra.mxu1 %v3853_v40  ;;  %v9930_v37 = vld [vmem:[#allocation105_spill] sm:$0xff] }
 0x338   : > { %3971 = vmatprep.subr.bf16.mxu0 %v3856_v52  ;;  %4053 = vmatprep.subr.bf16.mxu1 %v3858_v54  ;;  %v3863_v40 = vunpack.c.l.s8.bf16 %v9930_v37  ;;  %v9931_v52 = vld [vmem:[#allocation107_spill] sm:$0xff]  ;;  %v3870_v54 = vunpack.c.h.s8.bf16 %v9929_v25  ;;  %v3867_v59 = vunpack.c.h.s8.bf16 %v9930_v37  ;;  %v3876_v25 = vunpack.c.h.s8.bf16 %v9932_v26 }
 0x339   : > { %v3865_v49 = vunpack.c.l.s8.bf16 %v9931_v52 }
 0x33b   : > { %3972 = vmatpush1.bf16.msra.mxu0 %v3855_v46  ;;  %4054 = vmatpush1.bf16.msra.mxu1 %v3857_v27  ;;  %v3869_v46 = vunpack.c.h.s8.bf16 %v9931_v52  ;;  %v3872_v27 = vunpack.c.l.s8.bf16 %v9932_v26  ;;  %v9936_v52 = vld [vmem:[#allocation114_spill] sm:$0xff] }
 0x33c   : > { %3973 = vmatprep.subr.bf16.mxu0 %v3860_v31  ;;  %4055 = vmatprep.subr.bf16.mxu1 %v3862_v41  ;;  %v9933_v31 = vld [vmem:[#allocation112_spill] sm:$0xff] }
 0x33d   : > { %v3874_v41 = vunpack.c.l.s8.bf16 %v9933_v31 }
 0x33f   : > { %3974 = vmatpush1.bf16.msra.mxu0 %v3859_v30  ;;  %4056 = vmatpush1.bf16.msra.mxu1 %v3861_v60  ;;  %v9934_v30 = vld [vmem:[#allocation109_spill] sm:$0xff] }
 0x340   : > { %3975 = vmatprep.subr.bf16.mxu0 %v3864_v48  ;;  %4057 = vmatprep.subr.bf16.mxu1 %v3866_v44  ;;  %v3871_v60 = vunpack.c.l.s8.bf16 %v9934_v30  ;;  %v9935_v48 = vld [vmem:[#allocation111_spill] sm:$0xff]  ;;  %v3878_v44 = vunpack.c.h.s8.bf16 %v9933_v31  ;;  %v3875_v37 = vunpack.c.h.s8.bf16 %v9934_v30  ;;  %v3884_v31 = vunpack.c.h.s8.bf16 %v9936_v52 }
 0x341   : > { %v3873_v42 = vunpack.c.l.s8.bf16 %v9935_v48 }
 0x343   : > { %3976 = vmatpush1.bf16.msra.mxu0 %v3863_v40  ;;  %4058 = vmatpush1.bf16.msra.mxu1 %v3865_v49  ;;  %v3877_v40 = vunpack.c.h.s8.bf16 %v9935_v48  ;;  %v3880_v49 = vunpack.c.l.s8.bf16 %v9936_v52  ;;  %v3912_v48 = vpack.c.bf16 %v8633_v53, %v8633_v53  ;;  %v9945_v53 = vunpack.c.h.s8.bf16 %v6370_v3 }
 0x344   : > { %3977 = vmatprep.subr.bf16.mxu0 %v3868_v51  ;;  %4059 = vmatprep.subr.bf16.mxu1 %v3870_v54  ;;  %v9937_v51 = vld [vmem:[#allocation116_spill] sm:$0xff]  ;;  %v9946_v52 = vunpack.c.h.s8.bf16 %v6361_v0 }
 0x345   : > { %v3882_v54 = vunpack.c.l.s8.bf16 %v9937_v51 }
 0x347   : > { %3978 = vmatpush1.bf16.msra.mxu0 %v3867_v59  ;;  %4060 = vmatpush1.bf16.msra.mxu1 %v3869_v46  ;;  %v9938_v59 = vld [vmem:[#allocation113_spill] sm:$0xff] }
 0x348   : > { %3979 = vmatprep.subr.bf16.mxu0 %v3872_v27  ;;  %4061 = vmatprep.subr.bf16.mxu1 %v3874_v41  ;;  %v3879_v46 = vunpack.c.l.s8.bf16 %v9938_v59  ;;  %v9939_v27 = vld [vmem:[#allocation115_spill] sm:$0xff]  ;;  %v3886_v41 = vunpack.c.h.s8.bf16 %v9937_v51  ;;  %v3883_v30 = vunpack.c.h.s8.bf16 %v9938_v59  ;;  %v9948_v51 = vunpack.c.l.s8.bf16 %v6376_v5 }
 0x349   : > { %v3881_v26 = vunpack.c.l.s8.bf16 %v9939_v27  ;;  %v9955_v59 = vunpack.c.h.s8.bf16 %v6379_v6 }
 0x34b   : > { %3980 = vmatpush1.bf16.msra.mxu0 %v3871_v60  ;;  %4062 = vmatpush1.bf16.msra.mxu1 %v3873_v42  ;;  %v3885_v60 = vunpack.c.h.s8.bf16 %v9939_v27  ;;  %v9940_v42 = vunpack.c.l.s8.bf16 %v6364_v1  ;;  %v9957_v27 = vunpack.c.l.s8.bf16 %v6404_v11 }
 0x34c   : > { %3981 = vmatprep.subr.bf16.mxu0 %v3876_v25  ;;  %4063 = vmatprep.subr.bf16.mxu1 %v3878_v44  ;;  %v9941_v25 = vunpack.c.l.s8.bf16 %v6370_v3  ;;  %v9942_v44 = vunpack.c.l.s8.bf16 %v6361_v0  ;;  %v9951_v3 = vunpack.c.l.s8.bf16 %v6379_v6  ;;  %v9953_v0 = vunpack.c.h.s8.bf16 %v6382_v7 }
 0x34d   : > { %v9962_v6 = vunpack.c.h.s8.bf16 %v6385_v8 }
 0x34f   : > { %3982 = vmatpush1.bf16.msra.mxu0 %v3875_v37  ;;  %4064 = vmatpush1.bf16.msra.mxu1 %v3877_v40  ;;  %v9943_v37 = vunpack.c.l.s8.bf16 %v6367_v2  ;;  %v9944_v40 = vunpack.c.h.s8.bf16 %v6364_v1  ;;  %v9950_v1 = vunpack.c.l.s8.bf16 %v6373_v4 }
 0x350   : > { %3983 = vmatprep.subr.bf16.mxu0 %v3880_v49  ;;  %4065 = vmatprep.subr.bf16.mxu1 %v3882_v54  ;;  %v9947_v49 = vunpack.c.h.s8.bf16 %v6367_v2  ;;  %v9949_v54 = vunpack.c.l.s8.bf16 %v6382_v7  ;;  %v9954_v2 = vunpack.c.h.s8.bf16 %v6373_v4  ;;  %v9960_v7 = vunpack.c.h.s8.bf16 %v6398_v9 }
 0x351   : > { %v9961_v4 = vunpack.c.h.s8.bf16 %v6404_v11  ;;  %v9968_v11 = vunpack.c.h.s8.bf16 %v6415_v13 }
 0x353   : > { %3984 = vmatpush1.bf16.msra.mxu0 %v3879_v46  ;;  %4066 = vmatpush1.bf16.msra.mxu1 %v3881_v26  ;;  %v9956_v46 = vunpack.c.l.s8.bf16 %v6398_v9  ;;  %v9958_v26 = vunpack.c.l.s8.bf16 %v6385_v8  ;;  %v9967_v9 = vunpack.c.l.s8.bf16 %v6418_v14  ;;  %v9969_v8 = vunpack.c.h.s8.bf16 %v6426_v15 }
 0x354   : > { %3985 = vmatprep.subr.bf16.mxu0 %v3884_v31  ;;  %4067 = vmatprep.subr.bf16.mxu1 %v3886_v41  ;;  %v9963_v31 = vunpack.c.h.s8.bf16 %v6401_v10  ;;  %v9964_v41 = vunpack.c.l.s8.bf16 %v6415_v13  ;;  %v9975_v13 = vunpack.c.l.s8.bf16 %v6435_v18 }
 0x357   : > { %3986 = vmatpush1.bf16.msra.mxu0 %v3883_v30  ;;  %4068 = vmatpush1.bf16.msra.mxu1 %v3885_v60  ;;  %v9965_v30 = vunpack.c.l.s8.bf16 %v6426_v15  ;;  %v9966_v60 = vunpack.c.l.s8.bf16 %v6412_v12  ;;  %v9976_v15 = vunpack.c.h.s8.bf16 %v6432_v17 }
 0x358   : > { %4078 = vmatprep.subr.bf16.mxu0 %v9940_v42  ;;  %4160 = vmatprep.subr.bf16.mxu1 %v9941_v25  ;;  %v9972_v42 = vunpack.c.l.s8.bf16 %v6432_v17  ;;  %v9973_v25 = vunpack.c.l.s8.bf16 %v6438_v19  ;;  %v9983_v17 = vunpack.c.l.s8.bf16 %v6447_v22 }
 0x35a   : > { %3988 = vmatmul.mubr.bf16.vlgmr.msra.gmra.mrb[8].mxu0 %v3912_v48  ;;  %4070 = vmatmul.mubr.bf16.vlgmr.msra.gmra.mrb[8].mxu1 %v3912_v48  ;;  %v9971_v48 = vunpack.c.h.s8.bf16 %v6418_v14  ;;  %v9978_v14 = vunpack.c.h.s8.bf16 %v6429_v16 }
 0x35b   : > { %4079 = vmatpush1.bf16.msra.mxu0 %v9942_v44  ;;  %4161 = vmatpush1.bf16.msra.mxu1 %v9943_v37  ;;  %v9974_v44 = vunpack.c.l.s8.bf16 %v6429_v16  ;;  %v9979_v37 = vunpack.c.h.s8.bf16 %v6435_v18  ;;  %v9985_v16 = vunpack.c.h.s8.bf16 %v6450_v23  ;;  %v9986_v18 = vunpack.c.h.s8.bf16 %v6441_v20 }
 0x35c   : > { %4080 = vmatprep.subr.bf16.mxu0 %v9944_v40  ;;  %4162 = vmatprep.subr.bf16.mxu1 %v9945_v53  ;;  %v9980_v40 = vunpack.c.l.s8.bf16 %v6444_v21  ;;  %v9981_v53 = vunpack.c.l.s8.bf16 %v6450_v23  ;;  %v9992_v23 = vunpack.c.h.s8.bf16 %v9836_v61 }
 0x35d   : > { %4110 = vmatprep.mubr.bf16.mxu0 %v8554_v32  ;;  %4192 = vmatprep.mubr.bf16.mxu1 %v8554_v32  ;;  %v9952_v32 = vunpack.c.h.s8.bf16 %v6376_v5  ;;  %v9959_v5 = vunpack.c.l.s8.bf16 %v6401_v10  ;;  %v9970_v10 = vunpack.c.h.s8.bf16 %v6412_v12  ;;  %v9977_v12 = vunpack.c.h.s8.bf16 %v6438_v19 }
 0x35e   : > { %v9984_v19 = vunpack.c.h.s8.bf16 %v6444_v21  ;;  %v9991_v21 = vunpack.c.l.s8.bf16 %v9837_v35 }
 0x35f   : > { %4081 = vmatpush1.bf16.msra.mxu0 %v9946_v52  ;;  %4163 = vmatpush1.bf16.msra.mxu1 %v9947_v49  ;;  %v9982_v52 = vunpack.c.l.s8.bf16 %v6441_v20  ;;  %v9987_v49 = vunpack.c.h.s8.bf16 %v6447_v22  ;;  %v9993_v20 = vunpack.c.h.s8.bf16 %v9838_v55  ;;  %v9994_v22 = vunpack.c.h.s8.bf16 %v6453_v24 }
 0x360   : > { %4082 = vmatprep.subr.bf16.mxu0 %v9948_v51  ;;  %4164 = vmatprep.subr.bf16.mxu1 %v9949_v54  ;;  %v9988_v51 = vunpack.c.l.s8.bf16 %v9836_v61  ;;  %v9989_v54 = vunpack.c.l.s8.bf16 %v9838_v55  ;;  %v9999_v61 = vunpack.c.l.s8.bf16 %v9841_v43  ;;  %v10000_v55 = vunpack.c.h.s8.bf16 %v9840_v38 }
 0x363   : > { %4083 = vmatpush1.bf16.msra.mxu0 %v9950_v1  ;;  %4165 = vmatpush1.bf16.msra.mxu1 %v9951_v3  ;;  %v9990_v1 = vunpack.c.l.s8.bf16 %v6453_v24  ;;  %v9995_v3 = vunpack.c.h.s8.bf16 %v9837_v35  ;;  %v10001_v24 = vunpack.c.h.s8.bf16 %v9842_v58  ;;  %v10002_v35 = vunpack.c.h.s8.bf16 %v9839_v45 }
 0x364   : > { %4084 = vmatprep.subr.bf16.mxu0 %v9952_v32  ;;  %4166 = vmatprep.subr.bf16.mxu1 %v9953_v0  ;;  %v9996_v32 = vunpack.c.l.s8.bf16 %v9840_v38  ;;  %v9997_v0 = vunpack.c.l.s8.bf16 %v9842_v58  ;;  %v10006_v38 = vunpack.c.l.s8.bf16 %v9843_v28  ;;  %v10007_v58 = vunpack.c.l.s8.bf16 %v9845_v29 }
 0x367   : > { %4085 = vmatpush1.bf16.msra.mxu0 %v9954_v2  ;;  %4167 = vmatpush1.bf16.msra.mxu1 %v9955_v59  ;;  %v9998_v2 = vunpack.c.l.s8.bf16 %v9839_v45  ;;  %v10003_v59 = vunpack.c.h.s8.bf16 %v9841_v43  ;;  %v10008_v45 = vunpack.c.h.s8.bf16 %v9844_v50  ;;  %v10009_v43 = vunpack.c.h.s8.bf16 %v9846_v63 }
 0x368   : > { %4086 = vmatprep.subr.bf16.mxu0 %v9956_v46  ;;  %4168 = vmatprep.subr.bf16.mxu1 %v9957_v27  ;;  %v10004_v46 = vunpack.c.l.s8.bf16 %v9844_v50  ;;  %v10005_v27 = vunpack.c.l.s8.bf16 %v9846_v63  ;;  %v10014_v50 = vunpack.c.l.s8.bf16 %v9847_v34  ;;  %v10015_v63 = vunpack.c.l.s8.bf16 %v9849_v47 }
 0x36b   : > { %4087 = vmatpush1.bf16.msra.mxu0 %v9958_v26  ;;  %4169 = vmatpush1.bf16.msra.mxu1 %v9959_v5  ;;  %v10010_v26 = vunpack.c.h.s8.bf16 %v9843_v28  ;;  %v10012_v5 = vunpack.c.l.s8.bf16 %v9848_v57  ;;  %v10017_v28 = vunpack.c.h.s8.bf16 %v9850_v39 }
 0x36c   : > { %4088 = vmatprep.subr.bf16.mxu0 %v9960_v7  ;;  %4170 = vmatprep.subr.bf16.mxu1 %v9961_v4  ;;  %v10013_v7 = vunpack.c.l.s8.bf16 %v9850_v39  ;;  %v10019_v4 = vunpack.c.h.s8.bf16 %v9849_v47  ;;  %v10027_v39 = vunpack.c.h.s8.bf16 %v9852_v33 }
 0x36f   : > { %4089 = vmatpush1.bf16.msra.mxu0 %v9962_v6  ;;  %4171 = vmatpush1.bf16.msra.mxu1 %v9963_v31  ;;  %v10020_v6 = vunpack.c.l.s8.bf16 %v9852_v33  ;;  %v10021_v31 = vld [vmem:[#allocation32_spill] sm:$0xff]  ;;  %v10037_v33 = vld [vmem:[#allocation35_spill] sm:$0xff] }
 0x370   : > { %4090 = vmatprep.subr.bf16.mxu0 %v9964_v41  ;;  %4172 = vmatprep.subr.bf16.mxu1 %v9965_v30  ;;  %v10022_v41 = vunpack.c.l.s8.bf16 %v10021_v31  ;;  %v10023_v30 = vld [vmem:[#allocation29_spill] sm:$0xff] }
 0x371   : > { %v10029_v47 = vunpack.c.h.s8.bf16 %v10023_v30 }
 0x373   : > { %4091 = vmatpush1.bf16.msra.mxu0 %v9966_v60  ;;  %4173 = vmatpush1.bf16.msra.mxu1 %v9967_v9  ;;  %v10024_v60 = vunpack.c.l.s8.bf16 %v10023_v30 }
 0x374   : > { %4092 = vmatprep.subr.bf16.mxu0 %v9968_v11  ;;  %4174 = vmatprep.subr.bf16.mxu1 %v9969_v8  ;;  %v10031_v8 = vld [vmem:[#allocation34_spill] sm:$0xff] }
 0x377   : > { %4093 = vmatpush1.bf16.msra.mxu0 %v9970_v10  ;;  %4175 = vmatpush1.bf16.msra.mxu1 %v9971_v48  ;;  %v10032_v10 = vunpack.c.l.s8.bf16 %v10031_v8  ;;  %v10033_v48 = vld [vmem:[#allocation36_spill] sm:$0xff] }
 0x378   : > { %4094 = vmatprep.subr.bf16.mxu0 %v9972_v42  ;;  %4176 = vmatprep.subr.bf16.mxu1 %v9973_v25  ;;  %v10034_v42 = vunpack.c.l.s8.bf16 %v10033_v48  ;;  %v10035_v25 = vld [vmem:[#allocation33_spill] sm:$0xff] }
 0x37b   : > { %4095 = vmatpush1.bf16.msra.mxu0 %v9974_v44  ;;  %4177 = vmatpush1.bf16.msra.mxu1 %v9975_v13  ;;  %v10036_v44 = vunpack.c.l.s8.bf16 %v10035_v25  ;;  %v10038_v13 = vunpack.c.l.s8.bf16 %v10037_v33 }
 0x37c   : > { %4096 = vmatprep.subr.bf16.mxu0 %v9976_v15  ;;  %4178 = vmatprep.subr.bf16.mxu1 %v9977_v12  ;;  %v10039_v15 = vunpack.c.h.s8.bf16 %v10031_v8  ;;  %v10040_v12 = vunpack.c.h.s8.bf16 %v10033_v48  ;;  %v10093_v8 = vld [vmem:[#allocation120_spill] sm:$0xff]  ;;  %v10094_v48 = vld [vmem:[#allocation117_spill] sm:$0xff] }
 0x37f   : > { %4097 = vmatpush1.bf16.msra.mxu0 %v9978_v14  ;;  %4179 = vmatpush1.bf16.msra.mxu1 %v9979_v37  ;;  %v10041_v14 = vunpack.c.h.s8.bf16 %v10035_v25  ;;  %v10042_v37 = vunpack.c.h.s8.bf16 %v10037_v33  ;;  %v10095_v25 = vld [vmem:[#allocation119_spill] sm:$0xff] }
 0x380   : > { %4098 = vmatprep.subr.bf16.mxu0 %v9980_v40  ;;  %4180 = vmatprep.subr.bf16.mxu1 %v9981_v53  ;;  %v10043_v40 = vld [vmem:[#allocation38_spill] sm:$0xff] }
 0x381   : > { %v10044_v53 = vunpack.c.l.s8.bf16 %v10043_v40 }
 0x383   : > { %4099 = vmatpush1.bf16.msra.mxu0 %v9982_v52  ;;  %4181 = vmatpush1.bf16.msra.mxu1 %v9983_v17  ;;  %v10045_v52 = vld [vmem:[#allocation40_spill] sm:$0xff] }
 0x384   : > { %4100 = vmatprep.subr.bf16.mxu0 %v9984_v19  ;;  %4182 = vmatprep.subr.bf16.mxu1 %v9985_v16  ;;  %v10046_v17 = vunpack.c.l.s8.bf16 %v10045_v52  ;;  %v10047_v19 = vld [vmem:[#allocation37_spill] sm:$0xff] }
 0x385   : > { %v10048_v16 = vunpack.c.l.s8.bf16 %v10047_v19 }
 0x387   : > { %4101 = vmatpush1.bf16.msra.mxu0 %v9986_v18  ;;  %4183 = vmatpush1.bf16.msra.mxu1 %v9987_v49  ;;  %v10049_v18 = vld [vmem:[#allocation39_spill] sm:$0xff] }
 0x388   : > { %4102 = vmatprep.subr.bf16.mxu0 %v9988_v51  ;;  %4184 = vmatprep.subr.bf16.mxu1 %v9989_v54  ;;  %v10050_v49 = vunpack.c.l.s8.bf16 %v10049_v18  ;;  %v10051_v51 = vunpack.c.h.s8.bf16 %v10043_v40  ;;  %v10052_v54 = vunpack.c.h.s8.bf16 %v10045_v52 }
 0x38b   : > { %4103 = vmatpush1.bf16.msra.mxu0 %v9990_v1  ;;  %4185 = vmatpush1.bf16.msra.mxu1 %v9991_v21  ;;  %v10053_v1 = vunpack.c.h.s8.bf16 %v10047_v19  ;;  %v10054_v21 = vunpack.c.h.s8.bf16 %v10049_v18 }
 0x38c   : > { %4104 = vmatprep.subr.bf16.mxu0 %v9992_v23  ;;  %4186 = vmatprep.subr.bf16.mxu1 %v9993_v20  ;;  %v10055_v23 = vld [vmem:[#allocation42_spill] sm:$0xff] }
 0x38d   : > { %v10056_v20 = vunpack.c.l.s8.bf16 %v10055_v23 }
 0x38f   : > { %4105 = vmatpush1.bf16.msra.mxu0 %v9994_v22  ;;  %4187 = vmatpush1.bf16.msra.mxu1 %v9995_v3  ;;  %v10057_v22 = vld [vmem:[#allocation44_spill] sm:$0xff] }
 0x390   : > { %4106 = vmatprep.subr.bf16.mxu0 %v9996_v32  ;;  %4188 = vmatprep.subr.bf16.mxu1 %v9997_v0  ;;  %v10058_v3 = vunpack.c.l.s8.bf16 %v10057_v22  ;;  %v10059_v32 = vld [vmem:[#allocation41_spill] sm:$0xff] }
 0x391   : > { %v10060_v0 = vunpack.c.l.s8.bf16 %v10059_v32 }
 0x393   : > { %4107 = vmatpush1.bf16.msra.mxu0 %v9998_v2  ;;  %4189 = vmatpush1.bf16.msra.mxu1 %v9999_v61  ;;  %v10061_v2 = vld [vmem:[#allocation43_spill] sm:$0xff] }
 0x394   : > { %4108 = vmatprep.subr.bf16.mxu0 %v10000_v55  ;;  %4190 = vmatprep.subr.bf16.mxu1 %v10001_v24  ;;  %v10062_v61 = vunpack.c.l.s8.bf16 %v10061_v2  ;;  %v10063_v55 = vunpack.c.h.s8.bf16 %v10055_v23  ;;  %v10064_v24 = vunpack.c.h.s8.bf16 %v10057_v22 }
 0x397   : > { %4109 = vmatpush1.bf16.msra.mxu0 %v10002_v35  ;;  %4191 = vmatpush1.bf16.msra.mxu1 %v10003_v59  ;;  %v10065_v35 = vunpack.c.h.s8.bf16 %v10059_v32  ;;  %v10066_v59 = vunpack.c.h.s8.bf16 %v10061_v2 }
 0x398   : > { %4119 = vmatprep.subr.bf16.mxu0 %v10004_v46  ;;  %4201 = vmatprep.subr.bf16.mxu1 %v10005_v27  ;;  %v10067_v46 = vld [vmem:[#allocation46_spill] sm:$0xff] }
 0x399   : > { %v10068_v27 = vunpack.c.l.s8.bf16 %v10067_v46 }
 0x39a   : > { %4111 = vmatmul.mubr.bf16.vlgmr.msra.gmra.mrb[8].mxu0 %v8552_v36  ;;  %4193 = vmatmul.mubr.bf16.vlgmr.msra.gmra.mrb[8].mxu1 %v8552_v36  ;;  %v10011_v36 = vunpack.c.h.s8.bf16 %v9845_v29  ;;  %v10018_v29 = vunpack.c.h.s8.bf16 %v9847_v34  ;;  %v10028_v34 = vunpack.c.h.s8.bf16 %v10021_v31 }
 0x39b   : > { %4120 = vmatpush1.bf16.msra.mxu0 %v10006_v38  ;;  %4202 = vmatpush1.bf16.msra.mxu1 %v10007_v58  ;;  %v10069_v38 = vld [vmem:[#allocation48_spill] sm:$0xff] }
 0x39c   : > { %4121 = vmatprep.subr.bf16.mxu0 %v10008_v45  ;;  %4203 = vmatprep.subr.bf16.mxu1 %v10009_v43  ;;  %v10070_v58 = vunpack.c.l.s8.bf16 %v10069_v38  ;;  %v10071_v45 = vld [vmem:[#allocation45_spill] sm:$0xff] }
 0x39d   : > { %4151 = vmatprep.mubr.bf16.mxu0 %v8558_v62  ;;  %4233 = vmatprep.mubr.bf16.mxu1 %v8558_v62  ;;  %v10016_v62 = vunpack.c.h.s8.bf16 %v9848_v57  ;;  %v10025_v57 = vld [vmem:[#allocation31_spill] sm:$0xff]  ;;  %v10072_v43 = vunpack.c.l.s8.bf16 %v10071_v45 }
 0x39e   : > { %v10026_v9 = vunpack.c.l.s8.bf16 %v10025_v57  ;;  %v10030_v11 = vunpack.c.h.s8.bf16 %v10025_v57 }
 0x39f   : > { %4122 = vmatpush1.bf16.msra.mxu0 %v10010_v26  ;;  %4204 = vmatpush1.bf16.msra.mxu1 %v10011_v36  ;;  %v10073_v26 = vld [vmem:[#allocation47_spill] sm:$0xff] }
 0x3a0   : > { %4123 = vmatprep.subr.bf16.mxu0 %v10012_v5  ;;  %4205 = vmatprep.subr.bf16.mxu1 %v10013_v7  ;;  %v10074_v36 = vunpack.c.l.s8.bf16 %v10073_v26  ;;  %v10075_v5 = vunpack.c.h.s8.bf16 %v10067_v46  ;;  %v10076_v7 = vunpack.c.h.s8.bf16 %v10069_v38 }
 0x3a3   : > { %4124 = vmatpush1.bf16.msra.mxu0 %v10014_v50  ;;  %4206 = vmatpush1.bf16.msra.mxu1 %v10015_v63  ;;  %v10077_v50 = vunpack.c.h.s8.bf16 %v10071_v45  ;;  %v10078_v63 = vunpack.c.h.s8.bf16 %v10073_v26 }
 0x3a4   : > { %4125 = vmatprep.subr.bf16.mxu0 %v10016_v62  ;;  %4207 = vmatprep.subr.bf16.mxu1 %v10017_v28  ;;  %v10079_v62 = vld [vmem:[#allocation50_spill] sm:$0xff] }
 0x3a5   : > { %v10080_v28 = vunpack.c.l.s8.bf16 %v10079_v62 }
 0x3a7   : > { %4126 = vmatpush1.bf16.msra.mxu0 %v10018_v29  ;;  %4208 = vmatpush1.bf16.msra.mxu1 %v10019_v4  ;;  %v10081_v29 = vld [vmem:[#allocation52_spill] sm:$0xff] }
 0x3a8   : > { %4127 = vmatprep.subr.bf16.mxu0 %v10020_v6  ;;  %4209 = vmatprep.subr.bf16.mxu1 %v10022_v41  ;;  %v10082_v4 = vunpack.c.l.s8.bf16 %v10081_v29  ;;  %v10083_v6 = vld [vmem:[#allocation49_spill] sm:$0xff]  ;;  %v10085_v41 = vld [vmem:[#allocation51_spill] sm:$0xff]  ;;  %v10088_v57 = vunpack.c.h.s8.bf16 %v10081_v29 }
 0x3a9   : > { %v10084_v31 = vunpack.c.l.s8.bf16 %v10083_v6  ;;  %v10086_v30 = vunpack.c.l.s8.bf16 %v10085_v41 }
 0x3ab   : > { %4128 = vmatpush1.bf16.msra.mxu0 %v10024_v60  ;;  %4210 = vmatpush1.bf16.msra.mxu1 %v10026_v9  ;;  %v10087_v60 = vunpack.c.h.s8.bf16 %v10079_v62  ;;  %v10089_v9 = vunpack.c.h.s8.bf16 %v10083_v6 }
 0x3ac   : > { %4129 = vmatprep.subr.bf16.mxu0 %v10027_v39  ;;  %4211 = vmatprep.subr.bf16.mxu1 %v10028_v34  ;;  %v10090_v39 = vunpack.c.h.s8.bf16 %v10085_v41  ;;  %v10091_v34 = vld [vmem:[#allocation14_spill] sm:$0xff] }
 0x3af   : > { %4130 = vmatpush1.bf16.msra.mxu0 %v10029_v47  ;;  %4212 = vmatpush1.bf16.msra.mxu1 %v10030_v11  ;;  %v10092_v47 = vld [vmem:[#allocation118_spill] sm:$0xff] }
 0x3b0   : > { %4131 = vmatprep.subr.bf16.mxu0 %v10032_v10  ;;  %4213 = vmatprep.subr.bf16.mxu1 %v10034_v42  ;;  %v4309_v11 = vunpack.c.l.s8.bf16 %v10092_v47  ;;  %v4311_v10 = vunpack.c.l.s8.bf16 %v10093_v8  ;;  %v4308_v42 = vunpack.c.l.s8.bf16 %v10094_v48 }
 0x3b3   : > { %4132 = vmatpush1.bf16.msra.mxu0 %v10036_v44  ;;  %4214 = vmatpush1.bf16.msra.mxu1 %v10038_v13  ;;  %v4310_v44 = vunpack.c.l.s8.bf16 %v10095_v25 }
 0x3b4   : > { %4133 = vmatprep.subr.bf16.mxu0 %v10039_v15  ;;  %4215 = vmatprep.subr.bf16.mxu1 %v10040_v12 }
 0x3b7   : > { %4134 = vmatpush1.bf16.msra.mxu0 %v10041_v14  ;;  %4216 = vmatpush1.bf16.msra.mxu1 %v10042_v37 }
 0x3b8   : > { %4135 = vmatprep.subr.bf16.mxu0 %v10044_v53  ;;  %4217 = vmatprep.subr.bf16.mxu1 %v10046_v17 }
 0x3bb   : > { %4136 = vmatpush1.bf16.msra.mxu0 %v10048_v16  ;;  %4218 = vmatpush1.bf16.msra.mxu1 %v10050_v49 }
 0x3bc   : > { %4137 = vmatprep.subr.bf16.mxu0 %v10051_v51  ;;  %4219 = vmatprep.subr.bf16.mxu1 %v10052_v54 }
 0x3bf   : > { %4138 = vmatpush1.bf16.msra.mxu0 %v10053_v1  ;;  %4220 = vmatpush1.bf16.msra.mxu1 %v10054_v21 }
 0x3c0   : > { %4139 = vmatprep.subr.bf16.mxu0 %v10056_v20  ;;  %4221 = vmatprep.subr.bf16.mxu1 %v10058_v3 }
 0x3c3   : > { %4140 = vmatpush1.bf16.msra.mxu0 %v10060_v0  ;;  %4222 = vmatpush1.bf16.msra.mxu1 %v10062_v61 }
 0x3c4   : > { %4141 = vmatprep.subr.bf16.mxu0 %v10063_v55  ;;  %4223 = vmatprep.subr.bf16.mxu1 %v10064_v24 }
 0x3c7   : > { %4142 = vmatpush1.bf16.msra.mxu0 %v10065_v35  ;;  %4224 = vmatpush1.bf16.msra.mxu1 %v10066_v59 }
 0x3c8   : > { %4143 = vmatprep.subr.bf16.mxu0 %v10068_v27  ;;  %4225 = vmatprep.subr.bf16.mxu1 %v10070_v58 }
 0x3cb   : > { %4144 = vmatpush1.bf16.msra.mxu0 %v10072_v43  ;;  %4226 = vmatpush1.bf16.msra.mxu1 %v10074_v36 }
 0x3cc   : > { %4145 = vmatprep.subr.bf16.mxu0 %v10075_v5  ;;  %4227 = vmatprep.subr.bf16.mxu1 %v10076_v7 }
 0x3cf   : > { %4146 = vmatpush1.bf16.msra.mxu0 %v10077_v50  ;;  %4228 = vmatpush1.bf16.msra.mxu1 %v10078_v63 }
 0x3d0   : > { %4147 = vmatprep.subr.bf16.mxu0 %v10080_v28  ;;  %4229 = vmatprep.subr.bf16.mxu1 %v10082_v4 }
 0x3d3   : > { %4148 = vmatpush1.bf16.msra.mxu0 %v10084_v31  ;;  %4230 = vmatpush1.bf16.msra.mxu1 %v10086_v30 }
 0x3d4   : > { %4149 = vmatprep.subr.bf16.mxu0 %v10087_v60  ;;  %4231 = vmatprep.subr.bf16.mxu1 %v10088_v57 }
 0x3d7   : > { %4150 = vmatpush1.bf16.msra.mxu0 %v10089_v9  ;;  %4232 = vmatpush1.bf16.msra.mxu1 %v10090_v39 }
 0x3da   : > { %4152 = vmatmul.mubr.bf16.vlgmr.msra.gmra.mrb[8].mxu0 %v10091_v34  ;;  %4234 = vmatmul.mubr.bf16.vlgmr.msra.gmra.mrb[8].mxu1 %v10091_v34 }
 0x3db   : > { %6298 = dma.done.wait [#allocation5 + $0x2], 8192 }
 0x3dc   : > { %6299 = vsyncadd [#allocation5 + $0x2], 4294959104  ;;  %v4313_v33 = vunpack.c.h.s8.bf16 %v10092_v47  ;;  %v4315_v13 = vunpack.c.h.s8.bf16 %v10093_v8  ;;  %4463 = vmatprep.subr.bf16.mxu0 %v4309_v11  ;;  %4545 = vmatprep.subr.bf16.mxu1 %v4311_v10  ;;  %v4312_v15 = vunpack.c.h.s8.bf16 %v10094_v48  ;;  %v4314_v12 = vunpack.c.h.s8.bf16 %v10095_v25  ;;  %v10096_v14 = vld [vmem:[#allocation122_spill] sm:$0xff]  ;;  %v10097_v40 = vld [vmem:[#allocation124_spill] sm:$0xff] }
 0x3dd   : > { %4464 = vmatpush1.bf16.msra.mxu0 %v4308_v42  ;;  %4546 = vmatpush1.bf16.msra.mxu1 %v4310_v44  ;;  %v4317_v37 = vunpack.c.l.s8.bf16 %v10096_v14  ;;  %v4319_v53 = vunpack.c.l.s8.bf16 %v10097_v40  ;;  %v10098_v52 = vld [vmem:[#allocation121_spill] sm:$0xff]  ;;  %v10099_v19 = vld [vmem:[#allocation123_spill] sm:$0xff]  ;;  %v4321_v18 = vunpack.c.h.s8.bf16 %v10096_v14  ;;  %v4323_v49 = vunpack.c.h.s8.bf16 %v10097_v40  ;;  %v8985_v51 = vld [vmem:[#allocation3 + $0x10] sm:$0xff] }
 0x3de   : > { %4465 = vmatprep.subr.bf16.mxu0 %v4313_v33  ;;  %4547 = vmatprep.subr.bf16.mxu1 %v4315_v13  ;;  %v4316_v17 = vunpack.c.l.s8.bf16 %v10098_v52  ;;  %v4318_v16 = vunpack.c.l.s8.bf16 %v10099_v19  ;;  %v4320_v54 = vunpack.c.h.s8.bf16 %v10098_v52  ;;  %v4322_v1 = vunpack.c.h.s8.bf16 %v10099_v19  ;;  %v10100_v21 = vld [vmem:[#allocation126_spill] sm:$0xff]  ;;  %v10101_v20 = vld [vmem:[#allocation128_spill] sm:$0xff]  ;;  %v10102_v32 = vld [vmem:[#allocation125_spill] sm:$0xff] }
 0x3df   : > { %v4325_v23 = vunpack.c.l.s8.bf16 %v10100_v21  ;;  %v4327_v22 = vunpack.c.l.s8.bf16 %v10101_v20  ;;  %v8993_v3 = vrot.slane %v8985_v51, %v8412_v56  ;;  %v4324_v0 = vunpack.c.l.s8.bf16 %v10102_v32  ;;  %v10103_v2 = vld [vmem:[#allocation127_spill] sm:$0xff]  ;;  %v10104_v38 = vld [vmem:[#allocation130_spill] sm:$0xff]  ;;  %v10105_v45 = vld [vmem:[#allocation132_spill] sm:$0xff] }
 0x3e0   : > { %v4326_v61 = vunpack.c.l.s8.bf16 %v10103_v2  ;;  %v4329_v55 = vunpack.c.h.s8.bf16 %v10100_v21  ;;  %v4331_v24 = vunpack.c.h.s8.bf16 %v10101_v20  ;;  %v4328_v46 = vunpack.c.h.s8.bf16 %v10102_v32  ;;  %v10106_v26 = vld [vmem:[#allocation129_spill] sm:$0xff]  ;;  %v10107_v5 = vld [vmem:[#allocation131_spill] sm:$0xff]  ;;  %v10108_v29 = vld [vmem:[#allocation134_spill] sm:$0xff] }
 0x3e1   : > { %4466 = vmatpush1.bf16.msra.mxu0 %v4312_v15  ;;  %4548 = vmatpush1.bf16.msra.mxu1 %v4314_v12  ;;  %v4453_v35 = vcombine.high %v8993_v3, %v8993_v3  ;;  %v4330_v27 = vunpack.c.h.s8.bf16 %v10103_v2  ;;  %v4333_v58 = vunpack.c.l.s8.bf16 %v10104_v38  ;;  %v4335_v43 = vunpack.c.l.s8.bf16 %v10105_v45  ;;  %v10109_v6 = vld [vmem:[#allocation136_spill] sm:$0xff]  ;;  %v10110_v41 = vld [vmem:[#allocation133_spill] sm:$0xff]  ;;  %v10111_v60 = vld [vmem:[#allocation135_spill] sm:$0xff] }
 0x3e2   : > { %4467 = vmatprep.subr.bf16.mxu0 %v4317_v37  ;;  %4549 = vmatprep.subr.bf16.mxu1 %v4319_v53  ;;  %v4332_v36 = vunpack.c.l.s8.bf16 %v10106_v26  ;;  %v4334_v7 = vunpack.c.l.s8.bf16 %v10107_v5  ;;  %v4337_v50 = vunpack.c.h.s8.bf16 %v10104_v38  ;;  %v4339_v63 = vunpack.c.h.s8.bf16 %v10105_v45  ;;  %v10112_v11 = vld [vmem:[#allocation138_spill] sm:$0xff]  ;;  %v10113_v10 = vld [vmem:[#allocation140_spill] sm:$0xff]  ;;  %v10114_v42 = vld [vmem:[#allocation137_spill] sm:$0xff] }
 0x3e3   : > { %v4460_v59 = vpack.c.bf16 %v4453_v35, %v4453_v35  ;;  %v4336_v62 = vunpack.c.h.s8.bf16 %v10106_v26  ;;  %v4338_v28 = vunpack.c.h.s8.bf16 %v10107_v5  ;;  %v4341_v4 = vunpack.c.l.s8.bf16 %v10108_v29  ;;  %v10115_v44 = vld [vmem:[#allocation139_spill] sm:$0xff]  ;;  %v10116_v37 = vld [vmem:[#allocation142_spill] sm:$0xff]  ;;  %v10117_v53 = vld [vmem:[#allocation144_spill] sm:$0xff] }
 0x3e4   : > { %v4343_v31 = vunpack.c.l.s8.bf16 %v10109_v6  ;;  %v4340_v30 = vunpack.c.l.s8.bf16 %v10110_v41  ;;  %v4342_v57 = vunpack.c.l.s8.bf16 %v10111_v60  ;;  %v4345_v9 = vunpack.c.h.s8.bf16 %v10108_v29  ;;  %v10122_v2 = vld [vmem:[#allocation145_spill] sm:$0xff]  ;;  %v10124_v38 = vld [vmem:[#allocation150_spill] sm:$0xff]  ;;  %v10125_v45 = vld [vmem:[#allocation152_spill] sm:$0xff] }
 0x3e5   : > { %4468 = vmatpush1.bf16.msra.mxu0 %v4316_v17  ;;  %4550 = vmatpush1.bf16.msra.mxu1 %v4318_v16  ;;  %v4347_v39 = vunpack.c.h.s8.bf16 %v10109_v6  ;;  %v4344_v34 = vunpack.c.h.s8.bf16 %v10110_v41  ;;  %v4346_v47 = vunpack.c.h.s8.bf16 %v10111_v60  ;;  %v4349_v8 = vunpack.c.l.s8.bf16 %v10112_v11  ;;  %v10118_v17 = vld [vmem:[#allocation141_spill] sm:$0xff]  ;;  %v10119_v16 = vld [vmem:[#allocation143_spill] sm:$0xff]  ;;  %v10128_v6 = vld [vmem:[#allocation154_spill] sm:$0xff] }
 0x3e6   : > { %4469 = vmatprep.subr.bf16.mxu0 %v4321_v18  ;;  %4551 = vmatprep.subr.bf16.mxu1 %v4323_v49  ;;  %v4351_v48 = vunpack.c.l.s8.bf16 %v10113_v10  ;;  %v4348_v25 = vunpack.c.l.s8.bf16 %v10114_v42  ;;  %v4350_v33 = vunpack.c.l.s8.bf16 %v10115_v44  ;;  %v4353_v13 = vunpack.c.h.s8.bf16 %v10112_v11  ;;  %v10126_v5 = vld [vmem:[#allocation149_spill] sm:$0xff]  ;;  %v10129_v41 = vld [vmem:[#allocation156_spill] sm:$0xff] }
 0x3e7   : > { %4495 = vmatprep.mubr.bf16.mxu0 %v4460_v59  ;;  %4577 = vmatprep.mubr.bf16.mxu1 %v4460_v59  ;;  %v4355_v15 = vunpack.c.h.s8.bf16 %v10113_v10  ;;  %v4352_v12 = vunpack.c.h.s8.bf16 %v10114_v42  ;;  %v4354_v14 = vunpack.c.h.s8.bf16 %v10115_v44  ;;  %v4357_v40 = vunpack.c.l.s8.bf16 %v10116_v37  ;;  %v10130_v60 = vld [vmem:[#allocation153_spill] sm:$0xff]  ;;  %v10132_v10 = vld [vmem:[#allocation158_spill] sm:$0xff]  ;;  %v10133_v42 = vld [vmem:[#allocation160_spill] sm:$0xff] }
 0x3e8   : > { %v4359_v52 = vunpack.c.l.s8.bf16 %v10117_v53  ;;  %v4356_v19 = vunpack.c.l.s8.bf16 %v10118_v17  ;;  %v4358_v18 = vunpack.c.l.s8.bf16 %v10119_v16  ;;  %v4361_v49 = vunpack.c.h.s8.bf16 %v10116_v37  ;;  %v10134_v44 = vld [vmem:[#allocation157_spill] sm:$0xff] }
 0x3e9   : > { %4470 = vmatpush1.bf16.msra.mxu0 %v4320_v54  ;;  %4552 = vmatpush1.bf16.msra.mxu1 %v4322_v1  ;;  %v4363_v54 = vunpack.c.h.s8.bf16 %v10117_v53  ;;  %v4360_v1 = vunpack.c.h.s8.bf16 %v10118_v17  ;;  %v4362_v21 = vunpack.c.h.s8.bf16 %v10119_v16  ;;  %v4384_v11 = vunpack.c.h.s8.bf16 %v10130_v60  ;;  %v10136_v53 = vld [vmem:[#allocation162_spill] sm:$0xff]  ;;  %v10137_v17 = vld [vmem:[#allocation164_spill] sm:$0xff]  ;;  %v10138_v16 = vld [vmem:[#allocation161_spill] sm:$0xff] }
 0x3ea   : > { %4471 = vmatprep.subr.bf16.mxu0 %v4325_v23  ;;  %4553 = vmatprep.subr.bf16.mxu1 %v4327_v22  ;;  %v10120_v23 = vld [vmem:[#allocation146_spill] sm:$0xff]  ;;  %v10121_v22 = vld [vmem:[#allocation148_spill] sm:$0xff]  ;;  %v4392_v37 = vunpack.c.h.s8.bf16 %v10134_v44 }
 0x3eb   : > { %v4365_v20 = vunpack.c.l.s8.bf16 %v10120_v23  ;;  %v4367_v32 = vunpack.c.l.s8.bf16 %v10121_v22  ;;  %v4369_v35 = vunpack.c.h.s8.bf16 %v10120_v23  ;;  %v4371_v59 = vunpack.c.h.s8.bf16 %v10121_v22  ;;  %v10140_v22 = vld [vmem:[#allocation166_spill] sm:$0xff] }
 0x3ec   : > { %v4400_v23 = vunpack.c.h.s8.bf16 %v10138_v16 }
 0x3ed   : > { %4472 = vmatpush1.bf16.msra.mxu0 %v4324_v0  ;;  %4554 = vmatpush1.bf16.msra.mxu1 %v4326_v61  ;;  %v4438_v0 = vcombine.high %v8985_v51, %v8985_v51  ;;  %v4364_v61 = vunpack.c.l.s8.bf16 %v10122_v2 }
 0x3ee   : > { %4473 = vmatprep.subr.bf16.mxu0 %v4329_v55  ;;  %4555 = vmatprep.subr.bf16.mxu1 %v4331_v24  ;;  %v10123_v55 = vld [vmem:[#allocation147_spill] sm:$0xff] }
 0x3ef   : > { %v4366_v24 = vunpack.c.l.s8.bf16 %v10123_v55  ;;  %v4370_v51 = vunpack.c.h.s8.bf16 %v10123_v55 }
 0x3f1   : > { %4474 = vmatpush1.bf16.msra.mxu0 %v4328_v46  ;;  %4556 = vmatpush1.bf16.msra.mxu1 %v4330_v27  ;;  %v9044_v46 = vrot.slane %v4438_v0, %v8412_v56  ;;  %v4368_v27 = vunpack.c.h.s8.bf16 %v10122_v2  ;;  %v10141_v0 = vld [vmem:[#allocation168_spill] sm:$0xff] }
 0x3f2   : > { %4475 = vmatprep.subr.bf16.mxu0 %v4333_v58  ;;  %4557 = vmatprep.subr.bf16.mxu1 %v4335_v43  ;;  %v4373_v58 = vunpack.c.l.s8.bf16 %v10124_v38  ;;  %v4375_v43 = vunpack.c.l.s8.bf16 %v10125_v45  ;;  %v4407_v2 = vunpack.c.l.s8.bf16 %v10141_v0 }
 0x3f3   : > { %v4454_v26 = vcombine.high %v9044_v46, %v9044_v46 }
 0x3f5   : > { %4476 = vmatpush1.bf16.msra.mxu0 %v4332_v36  ;;  %4558 = vmatpush1.bf16.msra.mxu1 %v4334_v7  ;;  %v4459_v36 = vpack.c.bf16 %v8993_v3, %v8993_v3  ;;  %v4372_v7 = vunpack.c.l.s8.bf16 %v10126_v5  ;;  %v4462_v29 = vpack.c.bf16 %v4454_v26, %v4454_v26 }
 0x3f6   : > { %4477 = vmatprep.subr.bf16.mxu0 %v4337_v50  ;;  %4559 = vmatprep.subr.bf16.mxu1 %v4339_v63  ;;  %v10127_v50 = vld [vmem:[#allocation151_spill] sm:$0xff] }
 0x3f7   : > { %v4374_v63 = vunpack.c.l.s8.bf16 %v10127_v50  ;;  %v4378_v3 = vunpack.c.h.s8.bf16 %v10127_v50 }
 0x3f9   : > { %4478 = vmatpush1.bf16.msra.mxu0 %v4336_v62  ;;  %4560 = vmatpush1.bf16.msra.mxu1 %v4338_v28  ;;  %v4377_v62 = vunpack.c.h.s8.bf16 %v10124_v38  ;;  %v4379_v28 = vunpack.c.h.s8.bf16 %v10125_v45 }
 0x3fa   : > { %4479 = vmatprep.subr.bf16.mxu0 %v4341_v4  ;;  %4561 = vmatprep.subr.bf16.mxu1 %v4343_v31  ;;  %v4376_v4 = vunpack.c.h.s8.bf16 %v10126_v5  ;;  %v4381_v31 = vunpack.c.l.s8.bf16 %v10128_v6 }
 0x3fd   : > { %4480 = vmatpush1.bf16.msra.mxu0 %v4340_v30  ;;  %4562 = vmatpush1.bf16.msra.mxu1 %v4342_v57  ;;  %v4383_v30 = vunpack.c.l.s8.bf16 %v10129_v41  ;;  %v4380_v57 = vunpack.c.l.s8.bf16 %v10130_v60  ;;  %v10151_v60 = vld [vmem:[#allocation175_spill] sm:$0xff] }
 0x3fe   : > { %4481 = vmatprep.subr.bf16.mxu0 %v4345_v9  ;;  %4563 = vmatprep.subr.bf16.mxu1 %v4347_v39  ;;  %v10131_v9 = vld [vmem:[#allocation155_spill] sm:$0xff] }
 0x3ff   : > { %v4382_v39 = vunpack.c.l.s8.bf16 %v10131_v9 }
 0x401   : > { %4482 = vmatpush1.bf16.msra.mxu0 %v4344_v34  ;;  %4564 = vmatpush1.bf16.msra.mxu1 %v4346_v47  ;;  %v4385_v34 = vunpack.c.h.s8.bf16 %v10128_v6  ;;  %v4387_v47 = vunpack.c.h.s8.bf16 %v10129_v41  ;;  %v10149_v6 = vld [vmem:[#allocation176_spill] sm:$0xff]  ;;  %v10150_v41 = vld [vmem:[#allocation173_spill] sm:$0xff] }
 0x402   : > { %4483 = vmatprep.subr.bf16.mxu0 %v4349_v8  ;;  %4565 = vmatprep.subr.bf16.mxu1 %v4351_v48  ;;  %v4386_v8 = vunpack.c.h.s8.bf16 %v10131_v9  ;;  %v4389_v48 = vunpack.c.l.s8.bf16 %v10132_v10 }
 0x405   : > { %4484 = vmatpush1.bf16.msra.mxu0 %v4348_v25  ;;  %4566 = vmatpush1.bf16.msra.mxu1 %v4350_v33  ;;  %v4391_v25 = vunpack.c.l.s8.bf16 %v10133_v42  ;;  %v4388_v33 = vunpack.c.l.s8.bf16 %v10134_v44  ;;  %v10155_v44 = vld [vmem:[#allocation179_spill] sm:$0xff] }
 0x406   : > { %4485 = vmatprep.subr.bf16.mxu0 %v4353_v13  ;;  %4567 = vmatprep.subr.bf16.mxu1 %v4355_v15  ;;  %v10135_v13 = vld [vmem:[#allocation159_spill] sm:$0xff] }
 0x407   : > { %v4390_v15 = vunpack.c.l.s8.bf16 %v10135_v13 }
 0x409   : > { %4486 = vmatpush1.bf16.msra.mxu0 %v4352_v12  ;;  %4568 = vmatpush1.bf16.msra.mxu1 %v4354_v14  ;;  %v4393_v12 = vunpack.c.h.s8.bf16 %v10132_v10  ;;  %v4395_v14 = vunpack.c.h.s8.bf16 %v10133_v42  ;;  %v10153_v10 = vld [vmem:[#allocation180_spill] sm:$0xff]  ;;  %v10154_v42 = vld [vmem:[#allocation177_spill] sm:$0xff] }
 0x40a   : > { %4487 = vmatprep.subr.bf16.mxu0 %v4357_v40  ;;  %4569 = vmatprep.subr.bf16.mxu1 %v4359_v52  ;;  %v4394_v40 = vunpack.c.h.s8.bf16 %v10135_v13  ;;  %v4397_v52 = vunpack.c.l.s8.bf16 %v10136_v53 }
 0x40d   : > { %4488 = vmatpush1.bf16.msra.mxu0 %v4356_v19  ;;  %4570 = vmatpush1.bf16.msra.mxu1 %v4358_v18  ;;  %v4399_v19 = vunpack.c.l.s8.bf16 %v10137_v17  ;;  %v4396_v18 = vunpack.c.l.s8.bf16 %v10138_v16 }
 0x40e   : > { %4489 = vmatprep.subr.bf16.mxu0 %v4361_v49  ;;  %4571 = vmatprep.subr.bf16.mxu1 %v4363_v54  ;;  %v10139_v49 = vld [vmem:[#allocation163_spill] sm:$0xff] }
 0x40f   : > { %v4398_v54 = vunpack.c.l.s8.bf16 %v10139_v49 }
 0x411   : > { %4490 = vmatpush1.bf16.msra.mxu0 %v4360_v1  ;;  %4572 = vmatpush1.bf16.msra.mxu1 %v4362_v21  ;;  %v4401_v1 = vunpack.c.h.s8.bf16 %v10136_v53  ;;  %v4403_v21 = vunpack.c.h.s8.bf16 %v10137_v17 }
 0x412   : > { %4491 = vmatprep.subr.bf16.mxu0 %v4365_v20  ;;  %4573 = vmatprep.subr.bf16.mxu1 %v4367_v32  ;;  %v4402_v20 = vunpack.c.h.s8.bf16 %v10139_v49  ;;  %v4405_v32 = vunpack.c.l.s8.bf16 %v10140_v22 }
 0x415   : > { %4492 = vmatpush1.bf16.msra.mxu0 %v4364_v61  ;;  %4574 = vmatpush1.bf16.msra.mxu1 %v4366_v24  ;;  %v10142_v61 = vld [vmem:[#allocation165_spill] sm:$0xff]  ;;  %v10143_v24 = vld [vmem:[#allocation167_spill] sm:$0xff] }
 0x416   : > { %4493 = vmatprep.subr.bf16.mxu0 %v4369_v35  ;;  %4575 = vmatprep.subr.bf16.mxu1 %v4371_v59  ;;  %v4404_v55 = vunpack.c.l.s8.bf16 %v10142_v61  ;;  %v4406_v35 = vunpack.c.l.s8.bf16 %v10143_v24  ;;  %v4409_v59 = vunpack.c.h.s8.bf16 %v10140_v22  ;;  %v4410_v38 = vunpack.c.h.s8.bf16 %v10143_v24 }
 0x419   : > { %4494 = vmatpush1.bf16.msra.mxu0 %v4368_v27  ;;  %4576 = vmatpush1.bf16.msra.mxu1 %v4370_v51  ;;  %v4411_v27 = vunpack.c.h.s8.bf16 %v10141_v0  ;;  %v4408_v51 = vunpack.c.h.s8.bf16 %v10142_v61 }
 0x41a   : > { %4504 = vmatprep.subr.bf16.mxu0 %v4373_v58  ;;  %4586 = vmatprep.subr.bf16.mxu1 %v4375_v43  ;;  %v10144_v58 = vld [vmem:[#allocation170_spill] sm:$0xff]  ;;  %v10145_v43 = vld [vmem:[#allocation172_spill] sm:$0xff] }
 0x41b   : > { %v4413_v45 = vunpack.c.l.s8.bf16 %v10144_v58  ;;  %v4415_v26 = vunpack.c.l.s8.bf16 %v10145_v43 }
 0x41c   : > { %4496 = vmatmul.mubr.bf16.vlgmr.msra.gmra.mrb[8].mxu0 %v4459_v36  ;;  %4578 = vmatmul.mubr.bf16.vlgmr.msra.gmra.mrb[8].mxu1 %v4459_v36  ;;  %v10146_v36 = vld [vmem:[#allocation169_spill] sm:$0xff] }
 0x41d   : > { %4505 = vmatpush1.bf16.msra.mxu0 %v4372_v7  ;;  %4587 = vmatpush1.bf16.msra.mxu1 %v4374_v63  ;;  %v4412_v5 = vunpack.c.l.s8.bf16 %v10146_v36  ;;  %v10147_v7 = vld [vmem:[#allocation171_spill] sm:$0xff]  ;;  %v4417_v63 = vunpack.c.h.s8.bf16 %v10144_v58 }
 0x41e   : > { %4506 = vmatprep.subr.bf16.mxu0 %v4377_v62  ;;  %4588 = vmatprep.subr.bf16.mxu1 %v4379_v28  ;;  %v4414_v50 = vunpack.c.l.s8.bf16 %v10147_v7  ;;  %v4419_v62 = vunpack.c.h.s8.bf16 %v10145_v43  ;;  %v4416_v28 = vunpack.c.h.s8.bf16 %v10146_v36 }
 0x41f   : > { %4536 = vmatprep.mubr.bf16.mxu0 %v4462_v29  ;;  %4618 = vmatprep.mubr.bf16.mxu1 %v4462_v29  ;;  %v4418_v29 = vunpack.c.h.s8.bf16 %v10147_v7 }
 0x421   : > { %4507 = vmatpush1.bf16.msra.mxu0 %v4376_v4  ;;  %4589 = vmatpush1.bf16.msra.mxu1 %v4378_v3  ;;  %v10148_v4 = vld [vmem:[#allocation174_spill] sm:$0xff] }
 0x422   : > { %4508 = vmatprep.subr.bf16.mxu0 %v4381_v31  ;;  %4590 = vmatprep.subr.bf16.mxu1 %v4383_v30  ;;  %v4421_v3 = vunpack.c.l.s8.bf16 %v10148_v4  ;;  %v4423_v31 = vunpack.c.l.s8.bf16 %v10149_v6  ;;  %v4420_v30 = vunpack.c.l.s8.bf16 %v10150_v41  ;;  %v4425_v9 = vunpack.c.h.s8.bf16 %v10148_v4 }
 0x425   : > { %4509 = vmatpush1.bf16.msra.mxu0 %v4380_v57  ;;  %4591 = vmatpush1.bf16.msra.mxu1 %v4382_v39  ;;  %v4422_v57 = vunpack.c.l.s8.bf16 %v10151_v60  ;;  %v4427_v39 = vunpack.c.h.s8.bf16 %v10149_v6 }
 0x426   : > { %4510 = vmatprep.subr.bf16.mxu0 %v4385_v34  ;;  %4592 = vmatprep.subr.bf16.mxu1 %v4387_v47  ;;  %v4424_v34 = vunpack.c.h.s8.bf16 %v10150_v41  ;;  %v4426_v47 = vunpack.c.h.s8.bf16 %v10151_v60 }
 0x429   : > { %4511 = vmatpush1.bf16.msra.mxu0 %v4384_v11  ;;  %4593 = vmatpush1.bf16.msra.mxu1 %v4386_v8  ;;  %v10152_v11 = vld [vmem:[#allocation178_spill] sm:$0xff] }
 0x42a   : > { %4512 = vmatprep.subr.bf16.mxu0 %v4389_v48  ;;  %4594 = vmatprep.subr.bf16.mxu1 %v4391_v25  ;;  %v4429_v8 = vunpack.c.l.s8.bf16 %v10152_v11  ;;  %v4431_v48 = vunpack.c.l.s8.bf16 %v10153_v10  ;;  %v4428_v25 = vunpack.c.l.s8.bf16 %v10154_v42  ;;  %v4433_v13 = vunpack.c.h.s8.bf16 %v10152_v11 }
 0x42d   : > { %4513 = vmatpush1.bf16.msra.mxu0 %v4388_v33  ;;  %4595 = vmatpush1.bf16.msra.mxu1 %v4390_v15  ;;  %v4430_v33 = vunpack.c.l.s8.bf16 %v10155_v44  ;;  %v4435_v15 = vunpack.c.h.s8.bf16 %v10153_v10 }
 0x42e   : > { %4514 = vmatprep.subr.bf16.mxu0 %v4393_v12  ;;  %4596 = vmatprep.subr.bf16.mxu1 %v4395_v14  ;;  %v4432_v12 = vunpack.c.h.s8.bf16 %v10154_v42  ;;  %v4434_v14 = vunpack.c.h.s8.bf16 %v10155_v44 }
 0x431   : > { %4515 = vmatpush1.bf16.msra.mxu0 %v4392_v37  ;;  %4597 = vmatpush1.bf16.msra.mxu1 %v4394_v40  ;;  %v4461_v37 = vpack.c.bf16 %v9044_v46, %v9044_v46  ;;  %v10156_v40 = vld [vmem:[#allocation182_spill] sm:$0xff] }
 0x432   : > { %4516 = vmatprep.subr.bf16.mxu0 %v4397_v52  ;;  %4598 = vmatprep.subr.bf16.mxu1 %v4399_v19  ;;  %v4698_v53 = vunpack.c.l.s8.bf16 %v10156_v40  ;;  %v10157_v52 = vld [vmem:[#allocation184_spill] sm:$0xff]  ;;  %v10158_v19 = vld [vmem:[#allocation181_spill] sm:$0xff] }
 0x433   : > { %v4700_v17 = vunpack.c.l.s8.bf16 %v10157_v52  ;;  %v4697_v16 = vunpack.c.l.s8.bf16 %v10158_v19 }
 0x435   : > { %4517 = vmatpush1.bf16.msra.mxu0 %v4396_v18  ;;  %4599 = vmatpush1.bf16.msra.mxu1 %v4398_v54  ;;  %v10159_v18 = vld [vmem:[#allocation183_spill] sm:$0xff] }
 0x436   : > { %4518 = vmatprep.subr.bf16.mxu0 %v4401_v1  ;;  %4600 = vmatprep.subr.bf16.mxu1 %v4403_v21  ;;  %v4699_v49 = vunpack.c.l.s8.bf16 %v10159_v18 }
 0x439   : > { %4519 = vmatpush1.bf16.msra.mxu0 %v4400_v23  ;;  %4601 = vmatpush1.bf16.msra.mxu1 %v4402_v20 }
 0x43a   : > { %4520 = vmatprep.subr.bf16.mxu0 %v4405_v32  ;;  %4602 = vmatprep.subr.bf16.mxu1 %v4407_v2 }
 0x43d   : > { %4521 = vmatpush1.bf16.msra.mxu0 %v4404_v55  ;;  %4603 = vmatpush1.bf16.msra.mxu1 %v4406_v35 }
 0x43e   : > { %4522 = vmatprep.subr.bf16.mxu0 %v4409_v59  ;;  %4604 = vmatprep.subr.bf16.mxu1 %v4411_v27 }
 0x441   : > { %4523 = vmatpush1.bf16.msra.mxu0 %v4408_v51  ;;  %4605 = vmatpush1.bf16.msra.mxu1 %v4410_v38 }
 0x442   : > { %4524 = vmatprep.subr.bf16.mxu0 %v4413_v45  ;;  %4606 = vmatprep.subr.bf16.mxu1 %v4415_v26 }
 0x445   : > { %4525 = vmatpush1.bf16.msra.mxu0 %v4412_v5  ;;  %4607 = vmatpush1.bf16.msra.mxu1 %v4414_v50 }
 0x446   : > { %4526 = vmatprep.subr.bf16.mxu0 %v4417_v63  ;;  %4608 = vmatprep.subr.bf16.mxu1 %v4419_v62 }
 0x449   : > { %4527 = vmatpush1.bf16.msra.mxu0 %v4416_v28  ;;  %4609 = vmatpush1.bf16.msra.mxu1 %v4418_v29 }
 0x44a   : > { %4528 = vmatprep.subr.bf16.mxu0 %v4421_v3  ;;  %4610 = vmatprep.subr.bf16.mxu1 %v4423_v31 }
 0x44d   : > { %4529 = vmatpush1.bf16.msra.mxu0 %v4420_v30  ;;  %4611 = vmatpush1.bf16.msra.mxu1 %v4422_v57 }
 0x44e   : > { %4530 = vmatprep.subr.bf16.mxu0 %v4425_v9  ;;  %4612 = vmatprep.subr.bf16.mxu1 %v4427_v39 }
 0x451   : > { %4531 = vmatpush1.bf16.msra.mxu0 %v4424_v34  ;;  %4613 = vmatpush1.bf16.msra.mxu1 %v4426_v47 }
 0x452   : > { %4532 = vmatprep.subr.bf16.mxu0 %v4429_v8  ;;  %4614 = vmatprep.subr.bf16.mxu1 %v4431_v48 }
 0x455   : > { %4533 = vmatpush1.bf16.msra.mxu0 %v4428_v25  ;;  %4615 = vmatpush1.bf16.msra.mxu1 %v4430_v33 }
 0x456   : > { %4534 = vmatprep.subr.bf16.mxu0 %v4433_v13  ;;  %4616 = vmatprep.subr.bf16.mxu1 %v4435_v15 }
 0x459   : > { %4535 = vmatpush1.bf16.msra.mxu0 %v4432_v12  ;;  %4617 = vmatpush1.bf16.msra.mxu1 %v4434_v14 }
 0x45c   : > { %4537 = vmatmul.mubr.bf16.vlgmr.msra.gmra.mrb[8].mxu0 %v4461_v37  ;;  %4619 = vmatmul.mubr.bf16.vlgmr.msra.gmra.mrb[8].mxu1 %v4461_v37 }
 0x45d   : > { %6300 = dma.done.wait [#allocation5 + $0x3], 8192 }
 0x45e   : > { %6301 = vsyncadd [#allocation5 + $0x3], 4294959104  ;;  %v4702_v54 = vunpack.c.h.s8.bf16 %v10156_v40  ;;  %v4704_v1 = vunpack.c.h.s8.bf16 %v10157_v52  ;;  %4852 = vmatprep.subr.bf16.mxu0 %v4698_v53  ;;  %4934 = vmatprep.subr.bf16.mxu1 %v4700_v17  ;;  %v4701_v46 = vunpack.c.h.s8.bf16 %v10158_v19  ;;  %v4703_v21 = vunpack.c.h.s8.bf16 %v10159_v18  ;;  %v10160_v23 = vld [vmem:[#allocation186_spill] sm:$0xff]  ;;  %v10161_v22 = vld [vmem:[#allocation188_spill] sm:$0xff] }
 0x45f   : > { %4853 = vmatpush1.bf16.msra.mxu0 %v4697_v16  ;;  %4935 = vmatpush1.bf16.msra.mxu1 %v4699_v49  ;;  %v4706_v20 = vunpack.c.l.s8.bf16 %v10160_v23  ;;  %v4708_v32 = vunpack.c.l.s8.bf16 %v10161_v22  ;;  %v10162_v0 = vld [vmem:[#allocation185_spill] sm:$0xff]  ;;  %v10163_v61 = vld [vmem:[#allocation187_spill] sm:$0xff]  ;;  %v4710_v24 = vunpack.c.h.s8.bf16 %v10160_v23  ;;  %v4712_v35 = vunpack.c.h.s8.bf16 %v10161_v22  ;;  %v10164_v51 = vld [vmem:[#allocation190_spill] sm:$0xff] }
 0x460   : > { %4854 = vmatprep.subr.bf16.mxu0 %v4702_v54  ;;  %4936 = vmatprep.subr.bf16.mxu1 %v4704_v1  ;;  %v4705_v2 = vunpack.c.l.s8.bf16 %v10162_v0  ;;  %v4707_v55 = vunpack.c.l.s8.bf16 %v10163_v61  ;;  %v4709_v59 = vunpack.c.h.s8.bf16 %v10162_v0  ;;  %v4711_v27 = vunpack.c.h.s8.bf16 %v10163_v61  ;;  %v10165_v58 = vld [vmem:[#allocation192_spill] sm:$0xff]  ;;  %v9136_v43 = vld [vmem:[#allocation3 + $0x18] sm:$0xff]  ;;  %v10167_v5 = vld [vmem:[#allocation191_spill] sm:$0xff] }
 0x461   : > { %v4714_v38 = vunpack.c.l.s8.bf16 %v10164_v51  ;;  %v4716_v45 = vunpack.c.l.s8.bf16 %v10165_v58  ;;  %v10166_v26 = vld [vmem:[#allocation189_spill] sm:$0xff]  ;;  %v4715_v7 = vunpack.c.l.s8.bf16 %v10167_v5  ;;  %v4718_v50 = vunpack.c.h.s8.bf16 %v10164_v51  ;;  %v10168_v3 = vld [vmem:[#allocation194_spill] sm:$0xff]  ;;  %v10169_v31 = vld [vmem:[#allocation196_spill] sm:$0xff] }
 0x462   : > { %v4713_v36 = vunpack.c.l.s8.bf16 %v10166_v26  ;;  %v4720_v63 = vunpack.c.h.s8.bf16 %v10165_v58  ;;  %v9144_v62 = vrot.slane %v9136_v43, %v8412_v56  ;;  %v4717_v29 = vunpack.c.h.s8.bf16 %v10166_v26  ;;  %v10170_v60 = vld [vmem:[#allocation193_spill] sm:$0xff]  ;;  %v10171_v9 = vld [vmem:[#allocation195_spill] sm:$0xff]  ;;  %v10172_v10 = vld [vmem:[#allocation198_spill] sm:$0xff] }
 0x463   : > { %4855 = vmatpush1.bf16.msra.mxu0 %v4701_v46  ;;  %4937 = vmatpush1.bf16.msra.mxu1 %v4703_v21  ;;  %v4719_v4 = vunpack.c.h.s8.bf16 %v10167_v5  ;;  %v4722_v6 = vunpack.c.l.s8.bf16 %v10168_v3  ;;  %v4724_v41 = vunpack.c.l.s8.bf16 %v10169_v31  ;;  %v4721_v57 = vunpack.c.l.s8.bf16 %v10170_v60  ;;  %v10173_v42 = vld [vmem:[#allocation200_spill] sm:$0xff]  ;;  %v10174_v44 = vld [vmem:[#allocation197_spill] sm:$0xff]  ;;  %v10175_v13 = vld [vmem:[#allocation199_spill] sm:$0xff] }
 0x464   : > { %4856 = vmatprep.subr.bf16.mxu0 %v4706_v20  ;;  %4938 = vmatprep.subr.bf16.mxu1 %v4708_v32  ;;  %v4842_v28 = vcombine.high %v9144_v62, %v9144_v62  ;;  %v4723_v39 = vunpack.c.l.s8.bf16 %v10171_v9  ;;  %v4726_v34 = vunpack.c.h.s8.bf16 %v10168_v3  ;;  %v4728_v47 = vunpack.c.h.s8.bf16 %v10169_v31  ;;  %v10176_v53 = vld [vmem:[#allocation202_spill] sm:$0xff]  ;;  %v10177_v17 = vld [vmem:[#allocation204_spill] sm:$0xff]  ;;  %v10178_v16 = vld [vmem:[#allocation201_spill] sm:$0xff] }
 0x465   : > { %v4725_v11 = vunpack.c.h.s8.bf16 %v10170_v60  ;;  %v4727_v8 = vunpack.c.h.s8.bf16 %v10171_v9  ;;  %v4730_v48 = vunpack.c.l.s8.bf16 %v10172_v10  ;;  %v4732_v25 = vunpack.c.l.s8.bf16 %v10173_v42  ;;  %v10179_v49 = vld [vmem:[#allocation203_spill] sm:$0xff]  ;;  %v10180_v20 = vld [vmem:[#allocation206_spill] sm:$0xff]  ;;  %v10181_v32 = vld [vmem:[#allocation208_spill] sm:$0xff] }
 0x466   : > { %v4849_v30 = vpack.c.bf16 %v4842_v28, %v4842_v28  ;;  %v4729_v33 = vunpack.c.l.s8.bf16 %v10174_v44  ;;  %v4731_v15 = vunpack.c.l.s8.bf16 %v10175_v13  ;;  %v4734_v12 = vunpack.c.h.s8.bf16 %v10172_v10  ;;  %v10186_v5 = vld [vmem:[#allocation209_spill] sm:$0xff] }
 0x467   : > { %4857 = vmatpush1.bf16.msra.mxu0 %v4705_v2  ;;  %4939 = vmatpush1.bf16.msra.mxu1 %v4707_v55  ;;  %v4736_v14 = vunpack.c.h.s8.bf16 %v10173_v42  ;;  %v4733_v37 = vunpack.c.h.s8.bf16 %v10174_v44  ;;  %v4735_v40 = vunpack.c.h.s8.bf16 %v10175_v13  ;;  %v4738_v52 = vunpack.c.l.s8.bf16 %v10176_v53  ;;  %v10182_v2 = vld [vmem:[#allocation205_spill] sm:$0xff]  ;;  %v10183_v55 = vld [vmem:[#allocation207_spill] sm:$0xff] }
 0x468   : > { %4858 = vmatprep.subr.bf16.mxu0 %v4710_v24  ;;  %4940 = vmatprep.subr.bf16.mxu1 %v4712_v35  ;;  %v4740_v19 = vunpack.c.l.s8.bf16 %v10177_v17  ;;  %v4737_v18 = vunpack.c.l.s8.bf16 %v10178_v16  ;;  %v4739_v54 = vunpack.c.l.s8.bf16 %v10179_v49  ;;  %v4742_v1 = vunpack.c.h.s8.bf16 %v10176_v53 }
 0x469   : > { %4884 = vmatprep.mubr.bf16.mxu0 %v4849_v30  ;;  %4966 = vmatprep.mubr.bf16.mxu1 %v4849_v30  ;;  %v4744_v46 = vunpack.c.h.s8.bf16 %v10177_v17  ;;  %v4741_v21 = vunpack.c.h.s8.bf16 %v10178_v16  ;;  %v4743_v23 = vunpack.c.h.s8.bf16 %v10179_v49  ;;  %v4746_v22 = vunpack.c.l.s8.bf16 %v10180_v20 }
 0x46a   : > { %v4748_v0 = vunpack.c.l.s8.bf16 %v10181_v32  ;;  %v4745_v61 = vunpack.c.l.s8.bf16 %v10182_v2  ;;  %v4747_v24 = vunpack.c.l.s8.bf16 %v10183_v55  ;;  %v4750_v35 = vunpack.c.h.s8.bf16 %v10180_v20 }
 0x46b   : > { %4859 = vmatpush1.bf16.msra.mxu0 %v4709_v59  ;;  %4941 = vmatpush1.bf16.msra.mxu1 %v4711_v27  ;;  %v4752_v59 = vunpack.c.h.s8.bf16 %v10181_v32  ;;  %v4749_v27 = vunpack.c.h.s8.bf16 %v10182_v2  ;;  %v4751_v51 = vunpack.c.h.s8.bf16 %v10183_v55  ;;  %v4757_v3 = vunpack.c.h.s8.bf16 %v10186_v5 }
 0x46c   : > { %4860 = vmatprep.subr.bf16.mxu0 %v4714_v38  ;;  %4942 = vmatprep.subr.bf16.mxu1 %v4716_v45  ;;  %v10184_v38 = vld [vmem:[#allocation210_spill] sm:$0xff]  ;;  %v10185_v45 = vld [vmem:[#allocation212_spill] sm:$0xff]  ;;  %vm5280_vm4 = vcmask 9216  }
 0x46d   : > { %v4754_v58 = vunpack.c.l.s8.bf16 %v10184_v38  ;;  %v4756_v26 = vunpack.c.l.s8.bf16 %v10185_v45  ;;  %v4758_v28 = vunpack.c.h.s8.bf16 %v10184_v38 }
 0x46f   : > { %4861 = vmatpush1.bf16.msra.mxu0 %v4713_v36  ;;  %4943 = vmatpush1.bf16.msra.mxu1 %v4715_v7  ;;  %v4827_v36 = vcombine.high %v9136_v43, %v9136_v43  ;;  %v4753_v7 = vunpack.c.l.s8.bf16 %v10186_v5  ;;  %v10206_v5 = vld [vmem:[#allocation229_spill] sm:$0xff] }
 0x470   : > { %4862 = vmatprep.subr.bf16.mxu0 %v4718_v50  ;;  %4944 = vmatprep.subr.bf16.mxu1 %v4720_v63  ;;  %v10187_v50 = vld [vmem:[#allocation211_spill] sm:$0xff] }
 0x471   : > { %v4755_v63 = vunpack.c.l.s8.bf16 %v10187_v50  ;;  %v4759_v43 = vunpack.c.h.s8.bf16 %v10187_v50  ;;  %v10207_v50 = vld [vmem:[#allocation231_spill] sm:$0xff] }
 0x473   : > { %4863 = vmatpush1.bf16.msra.mxu0 %v4717_v29  ;;  %4945 = vmatpush1.bf16.msra.mxu1 %v4719_v4  ;;  %v4760_v29 = vunpack.c.h.s8.bf16 %v10185_v45  ;;  %v9191_v4 = vrot.slane %v4827_v36, %v8412_v56  ;;  %v10190_v56 = vld [vmem:[#allocation213_spill] sm:$0xff] }
 0x474   : > { %4864 = vmatprep.subr.bf16.mxu0 %v4722_v6  ;;  %4946 = vmatprep.subr.bf16.mxu1 %v4724_v41  ;;  %v10188_v6 = vld [vmem:[#allocation214_spill] sm:$0xff]  ;;  %v10189_v41 = vld [vmem:[#allocation216_spill] sm:$0xff]  ;;  %v4761_v9 = vunpack.c.l.s8.bf16 %v10190_v56  ;;  %v4765_v10 = vunpack.c.h.s8.bf16 %v10190_v56  ;;  %v10211_v56 = vld [vmem:[#allocation235_spill] sm:$0xff] }
 0x475   : > { %v4762_v31 = vunpack.c.l.s8.bf16 %v10188_v6  ;;  %v4764_v30 = vunpack.c.l.s8.bf16 %v10189_v41  ;;  %v4843_v60 = vcombine.high %v9191_v4, %v9191_v4 }
 0x477   : > { %4865 = vmatpush1.bf16.msra.mxu0 %v4721_v57  ;;  %4947 = vmatpush1.bf16.msra.mxu1 %v4723_v39  ;;  %v4848_v57 = vpack.c.bf16 %v9144_v62, %v9144_v62  ;;  %v10191_v39 = vld [vmem:[#allocation215_spill] sm:$0xff] }
 0x478   : > { %4866 = vmatprep.subr.bf16.mxu0 %v4726_v34  ;;  %4948 = vmatprep.subr.bf16.mxu1 %v4728_v47  ;;  %v4763_v34 = vunpack.c.l.s8.bf16 %v10191_v39  ;;  %v4766_v47 = vunpack.c.h.s8.bf16 %v10188_v6  ;;  %v4767_v62 = vunpack.c.h.s8.bf16 %v10191_v39  ;;  %v10208_v6 = vld [vmem:[#allocation234_spill] sm:$0xff] }
 0x479   : > { %v4806_v39 = vunpack.c.h.s8.bf16 %v10208_v6 }
 0x47b   : > { %4867 = vmatpush1.bf16.msra.mxu0 %v4725_v11  ;;  %4949 = vmatpush1.bf16.msra.mxu1 %v4727_v8  ;;  %v4768_v11 = vunpack.c.h.s8.bf16 %v10189_v41  ;;  %v4851_v8 = vpack.c.bf16 %v4843_v60, %v4843_v60  ;;  %v10209_v41 = vld [vmem:[#allocation236_spill] sm:$0xff]  ;;  %v10210_v60 = vld [vmem:[#allocation233_spill] sm:$0xff] }
 0x47c   : > { %4868 = vmatprep.subr.bf16.mxu0 %v4730_v48  ;;  %4950 = vmatprep.subr.bf16.mxu1 %v4732_v25  ;;  %v10192_v48 = vld [vmem:[#allocation218_spill] sm:$0xff]  ;;  %v10193_v25 = vld [vmem:[#allocation220_spill] sm:$0xff] }
 0x47d   : > { %v4770_v42 = vunpack.c.l.s8.bf16 %v10192_v48  ;;  %v4772_v44 = vunpack.c.l.s8.bf16 %v10193_v25 }
 0x47f   : > { %4869 = vmatpush1.bf16.msra.mxu0 %v4729_v33  ;;  %4951 = vmatpush1.bf16.msra.mxu1 %v4731_v15  ;;  %v10194_v33 = vld [vmem:[#allocation217_spill] sm:$0xff]  ;;  %v10195_v15 = vld [vmem:[#allocation219_spill] sm:$0xff] }
 0x480   : > { %4870 = vmatprep.subr.bf16.mxu0 %v4734_v12  ;;  %4952 = vmatprep.subr.bf16.mxu1 %v4736_v14  ;;  %v4769_v13 = vunpack.c.l.s8.bf16 %v10194_v33  ;;  %v4771_v12 = vunpack.c.l.s8.bf16 %v10195_v15  ;;  %v4774_v14 = vunpack.c.h.s8.bf16 %v10192_v48  ;;  %v4775_v53 = vunpack.c.h.s8.bf16 %v10195_v15 }
 0x483   : > { %4871 = vmatpush1.bf16.msra.mxu0 %v4733_v37  ;;  %4953 = vmatpush1.bf16.msra.mxu1 %v4735_v40  ;;  %v4776_v37 = vunpack.c.h.s8.bf16 %v10193_v25  ;;  %v4773_v40 = vunpack.c.h.s8.bf16 %v10194_v33 }
 0x484   : > { %4872 = vmatprep.subr.bf16.mxu0 %v4738_v52  ;;  %4954 = vmatprep.subr.bf16.mxu1 %v4740_v19  ;;  %v10196_v52 = vld [vmem:[#allocation222_spill] sm:$0xff]  ;;  %v10197_v19 = vld [vmem:[#allocation224_spill] sm:$0xff] }
 0x485   : > { %v4778_v17 = vunpack.c.l.s8.bf16 %v10196_v52  ;;  %v4780_v16 = vunpack.c.l.s8.bf16 %v10197_v19 }
 0x487   : > { %4873 = vmatpush1.bf16.msra.mxu0 %v4737_v18  ;;  %4955 = vmatpush1.bf16.msra.mxu1 %v4739_v54  ;;  %v10198_v18 = vld [vmem:[#allocation221_spill] sm:$0xff]  ;;  %v10199_v54 = vld [vmem:[#allocation223_spill] sm:$0xff] }
 0x488   : > { %4874 = vmatprep.subr.bf16.mxu0 %v4742_v1  ;;  %4956 = vmatprep.subr.bf16.mxu1 %v4744_v46  ;;  %v4777_v49 = vunpack.c.l.s8.bf16 %v10198_v18  ;;  %v4779_v1 = vunpack.c.l.s8.bf16 %v10199_v54  ;;  %v4782_v46 = vunpack.c.h.s8.bf16 %v10196_v52  ;;  %v4783_v20 = vunpack.c.h.s8.bf16 %v10199_v54 }
 0x48b   : > { %4875 = vmatpush1.bf16.msra.mxu0 %v4741_v21  ;;  %4957 = vmatpush1.bf16.msra.mxu1 %v4743_v23  ;;  %v4784_v21 = vunpack.c.h.s8.bf16 %v10197_v19  ;;  %v4781_v23 = vunpack.c.h.s8.bf16 %v10198_v18 }
 0x48c   : > { %4876 = vmatprep.subr.bf16.mxu0 %v4746_v22  ;;  %4958 = vmatprep.subr.bf16.mxu1 %v4748_v0  ;;  %v10200_v22 = vld [vmem:[#allocation226_spill] sm:$0xff]  ;;  %v10201_v0 = vld [vmem:[#allocation228_spill] sm:$0xff] }
 0x48d   : > { %v4786_v32 = vunpack.c.l.s8.bf16 %v10200_v22  ;;  %v4788_v2 = vunpack.c.l.s8.bf16 %v10201_v0 }
 0x48f   : > { %4877 = vmatpush1.bf16.msra.mxu0 %v4745_v61  ;;  %4959 = vmatpush1.bf16.msra.mxu1 %v4747_v24  ;;  %v10202_v61 = vld [vmem:[#allocation225_spill] sm:$0xff]  ;;  %v10203_v24 = vld [vmem:[#allocation227_spill] sm:$0xff] }
 0x490   : > { %4878 = vmatprep.subr.bf16.mxu0 %v4750_v35  ;;  %4960 = vmatprep.subr.bf16.mxu1 %v4752_v59  ;;  %v4785_v55 = vunpack.c.l.s8.bf16 %v10202_v61  ;;  %v4787_v35 = vunpack.c.l.s8.bf16 %v10203_v24  ;;  %v4790_v59 = vunpack.c.h.s8.bf16 %v10200_v22  ;;  %v4791_v38 = vunpack.c.h.s8.bf16 %v10203_v24  ;;  %v5109_v24 = vld [vmem:[%s6409_s17 + $0x108] sm:$0xff] }
 0x493   : > { %4879 = vmatpush1.bf16.msra.mxu0 %v4749_v27  ;;  %4961 = vmatpush1.bf16.msra.mxu1 %v4751_v51  ;;  %v4792_v27 = vunpack.c.h.s8.bf16 %v10201_v0  ;;  %v4789_v51 = vunpack.c.h.s8.bf16 %v10202_v61  ;;  %v5077_v0 = vld [vmem:[%s6409_s17 + $0x8] sm:$0xff] }
 0x494   : > { %4880 = vmatprep.subr.bf16.mxu0 %v4754_v58  ;;  %4962 = vmatprep.subr.bf16.mxu1 %v4756_v26  ;;  %v10204_v58 = vld [vmem:[#allocation230_spill] sm:$0xff]  ;;  %v10205_v26 = vld [vmem:[#allocation232_spill] sm:$0xff] }
 0x495   : > { %v4794_v45 = vunpack.c.l.s8.bf16 %v10204_v58  ;;  %v4796_v36 = vunpack.c.l.s8.bf16 %v10205_v26 }
 0x497   : > { %4881 = vmatpush1.bf16.msra.mxu0 %v4753_v7  ;;  %4963 = vmatpush1.bf16.msra.mxu1 %v4755_v63  ;;  %v4793_v7 = vunpack.c.l.s8.bf16 %v10206_v5  ;;  %v4795_v63 = vunpack.c.l.s8.bf16 %v10207_v50 }
 0x498   : > { %4882 = vmatprep.subr.bf16.mxu0 %v4758_v28  ;;  %4964 = vmatprep.subr.bf16.mxu1 %v4760_v29  ;;  %v4798_v28 = vunpack.c.h.s8.bf16 %v10204_v58  ;;  %v4800_v29 = vunpack.c.h.s8.bf16 %v10205_v26  ;;  %v5078_v26 = vld [vmem:[%s6409_s17 + $0x10] sm:$0xff] }
 0x49b   : > { %4883 = vmatpush1.bf16.msra.mxu0 %v4757_v3  ;;  %4965 = vmatpush1.bf16.msra.mxu1 %v4759_v43  ;;  %v4797_v3 = vunpack.c.h.s8.bf16 %v10206_v5  ;;  %v4799_v43 = vunpack.c.h.s8.bf16 %v10207_v50  ;;  %v5110_v50 = vld [vmem:[%s6409_s17 + $0x110] sm:$0xff] }
 0x49c   : > { %4893 = vmatprep.subr.bf16.mxu0 %v4762_v31  ;;  %4975 = vmatprep.subr.bf16.mxu1 %v4764_v30  ;;  %v4802_v31 = vunpack.c.l.s8.bf16 %v10208_v6  ;;  %v4804_v30 = vunpack.c.l.s8.bf16 %v10209_v41 }
 0x49e   : > { %4885 = vmatmul.mubr.bf16.vlgmr.msra.gmra.mrb[8].mxu0 %v4848_v57  ;;  %4967 = vmatmul.mubr.bf16.vlgmr.msra.gmra.mrb[8].mxu1 %v4848_v57  ;;  %v4801_v57 = vunpack.c.l.s8.bf16 %v10210_v60 }
 0x49f   : > { %4894 = vmatpush1.bf16.msra.mxu0 %v4761_v9  ;;  %4976 = vmatpush1.bf16.msra.mxu1 %v4763_v34  ;;  %v4803_v9 = vunpack.c.l.s8.bf16 %v10211_v56  ;;  %v4808_v34 = vunpack.c.h.s8.bf16 %v10209_v41  ;;  %v5081_v41 = vld [vmem:[%s6409_s17 + $0x28] sm:$0xff] }
 0x4a0   : > { %4895 = vmatprep.subr.bf16.mxu0 %v4766_v47  ;;  %4977 = vmatprep.subr.bf16.mxu1 %v4768_v11  ;;  %v4805_v47 = vunpack.c.h.s8.bf16 %v10210_v60  ;;  %v4807_v11 = vunpack.c.h.s8.bf16 %v10211_v56  ;;  %v5113_v56 = vld [vmem:[%s6409_s17 + $0x128] sm:$0xff] }
 0x4a1   : > { %4925 = vmatprep.mubr.bf16.mxu0 %v4851_v8  ;;  %5007 = vmatprep.mubr.bf16.mxu1 %v4851_v8  ;;  %v10212_v8 = vld [vmem:[#allocation238_spill] sm:$0xff] }
 0x4a3   : > { %4896 = vmatpush1.bf16.msra.mxu0 %v4765_v10  ;;  %4978 = vmatpush1.bf16.msra.mxu1 %v4767_v62  ;;  %v4810_v10 = vunpack.c.l.s8.bf16 %v10212_v8  ;;  %v10213_v62 = vld [vmem:[#allocation240_spill] sm:$0xff] }
 0x4a4   : > { %4897 = vmatprep.subr.bf16.mxu0 %v4770_v42  ;;  %4979 = vmatprep.subr.bf16.mxu1 %v4772_v44  ;;  %v4812_v48 = vunpack.c.l.s8.bf16 %v10213_v62  ;;  %v10214_v42 = vld [vmem:[#allocation237_spill] sm:$0xff]  ;;  %v10215_v44 = vld [vmem:[#allocation239_spill] sm:$0xff]  ;;  %v4816_v15 = vunpack.c.h.s8.bf16 %v10213_v62 }
 0x4a5   : > { %v4809_v25 = vunpack.c.l.s8.bf16 %v10214_v42  ;;  %v4811_v33 = vunpack.c.l.s8.bf16 %v10215_v44  ;;  %v5083_v62 = vld [vmem:[%s6409_s17 + $0x38] sm:$0xff] }
 0x4a7   : > { %4898 = vmatpush1.bf16.msra.mxu0 %v4769_v13  ;;  %4980 = vmatpush1.bf16.msra.mxu1 %v4771_v12  ;;  %v4814_v13 = vunpack.c.h.s8.bf16 %v10212_v8  ;;  %v4813_v12 = vunpack.c.h.s8.bf16 %v10214_v42 }
 0x4a8   : > { %4899 = vmatprep.subr.bf16.mxu0 %v4774_v14  ;;  %4981 = vmatprep.subr.bf16.mxu1 %v4776_v37  ;;  %v4815_v14 = vunpack.c.h.s8.bf16 %v10215_v44  ;;  %v10216_v37 = vld [vmem:[#allocation242_spill] sm:$0xff]  ;;  %v5115_v44 = vld [vmem:[%s6409_s17 + $0x138] sm:$0xff] }
 0x4ab   : > { %4900 = vmatpush1.bf16.msra.mxu0 %v4773_v40  ;;  %4982 = vmatpush1.bf16.msra.mxu1 %v4775_v53  ;;  %v4818_v40 = vunpack.c.l.s8.bf16 %v10216_v37  ;;  %v10217_v53 = vld [vmem:[#allocation244_spill] sm:$0xff] }
 0x4ac   : > { %4901 = vmatprep.subr.bf16.mxu0 %v4778_v17  ;;  %4983 = vmatprep.subr.bf16.mxu1 %v4780_v16  ;;  %v4820_v52 = vunpack.c.l.s8.bf16 %v10217_v53  ;;  %v10218_v17 = vld [vmem:[#allocation241_spill] sm:$0xff]  ;;  %v10219_v16 = vld [vmem:[#allocation243_spill] sm:$0xff]  ;;  %v4824_v54 = vunpack.c.h.s8.bf16 %v10217_v53 }
 0x4ad   : > { %v4817_v19 = vunpack.c.l.s8.bf16 %v10218_v17  ;;  %v4819_v18 = vunpack.c.l.s8.bf16 %v10219_v16  ;;  %v4823_v22 = vunpack.c.h.s8.bf16 %v10219_v16  ;;  %v5085_v53 = vld [vmem:[%s6409_s17 + $0x48] sm:$0xff] }
 0x4ae   : > { %v5117_v16 = vld [vmem:[%s6409_s17 + $0x148] sm:$0xff] }
 0x4af   : > { %4902 = vmatpush1.bf16.msra.mxu0 %v4777_v49  ;;  %4984 = vmatpush1.bf16.msra.mxu1 %v4779_v1  ;;  %v4822_v49 = vunpack.c.h.s8.bf16 %v10216_v37  ;;  %v5092_v1 = vld [vmem:[%s6409_s17 + $0x80] sm:$0xff] }
 0x4b0   : > { %4903 = vmatprep.subr.bf16.mxu0 %v4782_v46  ;;  %4985 = vmatprep.subr.bf16.mxu1 %v4784_v21  ;;  %v5093_v46 = vld [vmem:[%s6409_s17 + $0x88] sm:$0xff]  ;;  %v5124_v21 = vld [vmem:[%s6409_s17 + $0x180] sm:$0xff] }
 0x4b3   : > { %4904 = vmatpush1.bf16.msra.mxu0 %v4781_v23  ;;  %4986 = vmatpush1.bf16.msra.mxu1 %v4783_v20  ;;  %v5125_v23 = vld [vmem:[%s6409_s17 + $0x188] sm:$0xff]  ;;  %v4821_v20 = vunpack.c.h.s8.bf16 %v10218_v17 }
 0x4b4   : > { %4905 = vmatprep.subr.bf16.mxu0 %v4786_v32  ;;  %4987 = vmatprep.subr.bf16.mxu1 %v4788_v2  ;;  %v5076_v32 = vld [vmem:[%s6409_s17] sm:$0xff]  ;;  %v6125_v2 = vpack.c.bf16 %v5093_v46, %v5092_v1  ;;  %v6157_v61 = vpack.c.bf16 %v5125_v23, %v5124_v21  ;;  %v5135_v1 = vld [vmem:[%s6409_s17 + $0x1d8] sm:$0xff]  ;;  %v5086_v23 = vld [vmem:[%s6409_s17 + $0x50] sm:$0xff] }
 0x4b5   : > { %v6127_v58 = vpack.c.bf16 %v5077_v0, %v5076_v32  ;;  %v5087_v32 = vld [vmem:[%s6409_s17 + $0x58] sm:$0xff]  ;;  %v5118_v0 = vld [vmem:[%s6409_s17 + $0x150] sm:$0xff] }
 0x4b7   : > { %4906 = vmatpush1.bf16.msra.mxu0 %v4785_v55  ;;  %4988 = vmatpush1.bf16.msra.mxu1 %v4787_v35  ;;  %v5108_v55 = vld [vmem:[%s6409_s17 + $0x100] sm:$0xff]  ;;  %v5094_v35 = vld [vmem:[%s6409_s17 + $0x90] sm:$0xff] }
 0x4b8   : > { %4907 = vmatprep.subr.bf16.mxu0 %v4790_v59  ;;  %4989 = vmatprep.subr.bf16.mxu1 %v4792_v27  ;;  %v5095_v59 = vld [vmem:[%s6409_s17 + $0x98] sm:$0xff]  ;;  %v5126_v27 = vld [vmem:[%s6409_s17 + $0x190] sm:$0xff] }
 0x4b9   : > { %v6129_v5 = vpack.c.bf16 %v5095_v59, %v5094_v35  ;;  %v5105_v35 = vld [vmem:[%s6409_s17 + $0xe8] sm:$0xff] }
 0x4bb   : > { %4908 = vmatpush1.bf16.msra.mxu0 %v4789_v51  ;;  %4990 = vmatpush1.bf16.msra.mxu1 %v4791_v38  ;;  %v5127_v51 = vld [vmem:[%s6409_s17 + $0x198] sm:$0xff]  ;;  %v4850_v38 = vpack.c.bf16 %v9191_v4, %v9191_v4  ;;  %v5128_v4 = vld [vmem:[%s6409_s17 + $0x1a0] sm:$0xff] }
 0x4bc   : > { %4909 = vmatprep.subr.bf16.mxu0 %v4794_v45  ;;  %4991 = vmatprep.subr.bf16.mxu1 %v4796_v36  ;;  %v6159_v45 = vpack.c.bf16 %v5109_v24, %v5108_v55  ;;  %v5079_v36 = vld [vmem:[%s6409_s17 + $0x18] sm:$0xff]  ;;  %v5104_v24 = vld [vmem:[%s6409_s17 + $0xe0] sm:$0xff] }
 0x4bd   : > { %v6149_v59 = vpack.c.bf16 %v5105_v35, %v5104_v24 }
 0x4bf   : > { %4910 = vmatpush1.bf16.msra.mxu0 %v4793_v7  ;;  %4992 = vmatpush1.bf16.msra.mxu1 %v4795_v63  ;;  %v6161_v7 = vpack.c.bf16 %v5127_v51, %v5126_v27  ;;  %v5111_v63 = vld [vmem:[%s6409_s17 + $0x118] sm:$0xff]  ;;  %v5136_v27 = vld [vmem:[%s6409_s17 + $0x1e0] sm:$0xff]  ;;  %v5137_v51 = vld [vmem:[%s6409_s17 + $0x1e8] sm:$0xff] }
 0x4c0   : > { %4911 = vmatprep.subr.bf16.mxu0 %v4798_v28  ;;  %4993 = vmatprep.subr.bf16.mxu1 %v4800_v29  ;;  %v5096_v28 = vld [vmem:[%s6409_s17 + $0xa0] sm:$0xff]  ;;  %v5097_v29 = vld [vmem:[%s6409_s17 + $0xa8] sm:$0xff]  ;;  %v6163_v6 = vpack.c.bf16 %v5111_v63, %v5110_v50  ;;  %v5106_v50 = vld [vmem:[%s6409_s17 + $0xf0] sm:$0xff] }
 0x4c1   : > { %v5107_v63 = vld [vmem:[%s6409_s17 + $0xf8] sm:$0xff] }
 0x4c3   : > { %4912 = vmatpush1.bf16.msra.mxu0 %v4797_v3  ;;  %4994 = vmatpush1.bf16.msra.mxu1 %v4799_v43  ;;  %v5129_v3 = vld [vmem:[%s6409_s17 + $0x1a8] sm:$0xff]  ;;  %v6131_v43 = vpack.c.bf16 %v5079_v36, %v5078_v26  ;;  %v5120_v26 = vld [vmem:[%s6409_s17 + $0x160] sm:$0xff] }
 0x4c4   : > { %4913 = vmatprep.subr.bf16.mxu0 %v4802_v31  ;;  %4995 = vmatprep.subr.bf16.mxu1 %v4804_v30  ;;  %v5080_v31 = vld [vmem:[%s6409_s17 + $0x20] sm:$0xff]  ;;  %v6133_v30 = vpack.c.bf16 %v5097_v29, %v5096_v28  ;;  %v6165_v60 = vpack.c.bf16 %v5129_v3, %v5128_v4  ;;  %v5138_v28 = vld [vmem:[%s6409_s17 + $0x1f0] sm:$0xff]  ;;  %v6153_v29 = vpack.c.bf16 %v5107_v63, %v5106_v50  ;;  %v5139_v4 = vld [vmem:[%s6409_s17 + $0x1f8] sm:$0xff] }
 0x4c5   : > { %v5090_v3 = vld [vmem:[%s6409_s17 + $0x70] sm:$0xff] }
 0x4c7   : > { %4914 = vmatpush1.bf16.msra.mxu0 %v4801_v57  ;;  %4996 = vmatpush1.bf16.msra.mxu1 %v4803_v9  ;;  %v5112_v57 = vld [vmem:[%s6409_s17 + $0x120] sm:$0xff]  ;;  %v5098_v9 = vld [vmem:[%s6409_s17 + $0xb0] sm:$0xff] }
 0x4c8   : > { %4915 = vmatprep.subr.bf16.mxu0 %v4806_v39  ;;  %4997 = vmatprep.subr.bf16.mxu1 %v4808_v34  ;;  %v5099_v39 = vld [vmem:[%s6409_s17 + $0xb8] sm:$0xff]  ;;  %v5130_v34 = vld [vmem:[%s6409_s17 + $0x1b0] sm:$0xff]  ;;  %v6167_v8 = vpack.c.bf16 %v5113_v56, %v5112_v57 }
 0x4c9   : > { %v10220_v57 = vld [vmem:[#allocation245_spill] sm:$0xff] }
 0x4ca   : > { %v5024_v56 = vsub.s32 0, %v10220_v57 }
 0x4cb   : > { %4916 = vmatpush1.bf16.msra.mxu0 %v4805_v47  ;;  %4998 = vmatpush1.bf16.msra.mxu1 %v4807_v11  ;;  %v5131_v47 = vld [vmem:[%s6409_s17 + $0x1b8] sm:$0xff]  ;;  %v6135_v11 = vpack.c.bf16 %v5081_v41, %v5080_v31  ;;  %v5122_v41 = vld [vmem:[%s6409_s17 + $0x170] sm:$0xff] }
 0x4cc   : > { %4917 = vmatprep.subr.bf16.mxu0 %v4810_v10  ;;  %4999 = vmatprep.subr.bf16.mxu1 %v4812_v48  ;;  %v5082_v10 = vld [vmem:[%s6409_s17 + $0x30] sm:$0xff]  ;;  %v6137_v48 = vpack.c.bf16 %v5099_v39, %v5098_v9  ;;  %v6169_v42 = vpack.c.bf16 %v5131_v47, %v5130_v34  ;;  %v5032_v9 = vsub.s32 2, %v10220_v57  ;;  %v5020_v39 = vld [vmem:[%s6390_s11] sm:$0xf]  ;;  %v5028_v34 = vsub.s32 1, %v10220_v57 }
 0x4cd   : > { %v5036_v47 = vsub.s32 3, %v10220_v57 }
 0x4cf   : > { %4918 = vmatpush1.bf16.msra.mxu0 %v4809_v25  ;;  %5000 = vmatpush1.bf16.msra.mxu1 %v4811_v33  ;;  %v5114_v25 = vld [vmem:[%s6409_s17 + $0x130] sm:$0xff]  ;;  %v5100_v33 = vld [vmem:[%s6409_s17 + $0xc0] sm:$0xff] }
 0x4d0   : > { %4919 = vmatprep.subr.bf16.mxu0 %v4814_v13  ;;  %5001 = vmatprep.subr.bf16.mxu1 %v4816_v15  ;;  %v5101_v13 = vld [vmem:[%s6409_s17 + $0xc8] sm:$0xff]  ;;  %v5132_v15 = vld [vmem:[%s6409_s17 + $0x1c0] sm:$0xff]  ;;  %v6171_v37 = vpack.c.bf16 %v5115_v44, %v5114_v25 }
 0x4d3   : > { %4920 = vmatpush1.bf16.msra.mxu0 %v4813_v12  ;;  %5002 = vmatpush1.bf16.msra.mxu1 %v4815_v14  ;;  %v5133_v12 = vld [vmem:[%s6409_s17 + $0x1c8] sm:$0xff]  ;;  %v6139_v14 = vpack.c.bf16 %v5083_v62, %v5082_v10  ;;  %v5033_v10 = vrot.slane %v5020_v39, %v5032_v9  ;;  %v5029_v62 = vrot.slane %v5020_v39, %v5028_v34 }
 0x4d4   : > { %4921 = vmatprep.subr.bf16.mxu0 %v4818_v40  ;;  %5003 = vmatprep.subr.bf16.mxu1 %v4820_v52  ;;  %v5084_v40 = vld [vmem:[%s6409_s17 + $0x40] sm:$0xff]  ;;  %v6141_v52 = vpack.c.bf16 %v5101_v13, %v5100_v33  ;;  %v6173_v17 = vpack.c.bf16 %v5133_v12, %v5132_v15 }
 0x4d5   : > { %v6143_v46 = vpack.c.bf16 %v5085_v53, %v5084_v40 }
 0x4d7   : > { %4922 = vmatpush1.bf16.msra.mxu0 %v4817_v19  ;;  %5004 = vmatpush1.bf16.msra.mxu1 %v4819_v18  ;;  %v5116_v19 = vld [vmem:[%s6409_s17 + $0x140] sm:$0xff]  ;;  %v5102_v18 = vld [vmem:[%s6409_s17 + $0xd0] sm:$0xff] }
 0x4d8   : > { %4923 = vmatprep.subr.bf16.mxu0 %v4822_v49  ;;  %5005 = vmatprep.subr.bf16.mxu1 %v4824_v54  ;;  %v5103_v49 = vld [vmem:[%s6409_s17 + $0xd8] sm:$0xff]  ;;  %v5134_v54 = vld [vmem:[%s6409_s17 + $0x1d0] sm:$0xff]  ;;  %v6175_v21 = vpack.c.bf16 %v5117_v16, %v5116_v19 }
 0x4db   : > { %4924 = vmatpush1.bf16.msra.mxu0 %v4821_v20  ;;  %5006 = vmatpush1.bf16.msra.mxu1 %v4823_v22  ;;  %v6145_v20 = vpack.c.bf16 %v5103_v49, %v5102_v18  ;;  %v6177_v22 = vpack.c.bf16 %v5135_v1, %v5134_v54 }
 0x4dc   : > { %6126 = vmatprep.subr.bf16.mxu0 %v6125_v2  ;;  %6158 = vmatprep.subr.bf16.mxu1 %v6157_v61  ;;  %v5119_v2 = vld [vmem:[%s6409_s17 + $0x158] sm:$0xff]  ;;  %v6147_v61 = vpack.c.bf16 %v5087_v32, %v5086_v23 }
 0x4dd   : > { %v6179_v55 = vpack.c.bf16 %v5119_v2, %v5118_v0 }
 0x4de   : > { %4926 = vmatmul.mubr.bf16.vlgmr.msra.gmra.mrb[8].mxu0 %v4850_v38  ;;  %5008 = vmatmul.mubr.bf16.vlgmr.msra.gmra.mrb[8].mxu1 %v4850_v38  ;;  %v5088_v38 = vld [vmem:[%s6409_s17 + $0x60] sm:$0xff] }
 0x4df   : > { %6128 = vmatpush3.bf16.msra.mxu0 %v6127_v58  ;;  %6160 = vmatpush3.bf16.msra.mxu1 %v6159_v45  ;;  %v6181_v58 = vpack.c.bf16 %v5137_v51, %v5136_v27  ;;  %v5089_v45 = vld [vmem:[%s6409_s17 + $0x68] sm:$0xff] }
 0x4e0   : > { %6130 = vmatprep.subr.bf16.mxu0 %v6129_v5  ;;  %6162 = vmatprep.subr.bf16.mxu1 %v6161_v7  ;;  %v6151_v36 = vpack.c.bf16 %v5089_v45, %v5088_v38  ;;  %v5121_v5 = vld [vmem:[%s6409_s17 + $0x168] sm:$0xff] }
 0x4e1   : > { %v6183_v7 = vpack.c.bf16 %v5121_v5, %v5120_v26 }
 0x4e3   : > { %6132 = vmatpush3.bf16.msra.mxu0 %v6131_v43  ;;  %6164 = vmatpush3.bf16.msra.mxu1 %v6163_v6  ;;  %v5091_v43 = vld [vmem:[%s6409_s17 + $0x78] sm:$0xff]  ;;  %v6185_v6 = vpack.c.bf16 %v5139_v4, %v5138_v28 }
 0x4e4   : > { %6134 = vmatprep.subr.bf16.mxu0 %v6133_v30  ;;  %6166 = vmatprep.subr.bf16.mxu1 %v6165_v60  ;;  %v6155_v31 = vpack.c.bf16 %v5091_v43, %v5090_v3  ;;  %v5123_v30 = vld [vmem:[%s6409_s17 + $0x178] sm:$0xff] }
 0x4e5   : > { %v6187_v60 = vpack.c.bf16 %v5123_v30, %v5122_v41 }
 0x4e7   : > { %6136 = vmatpush3.bf16.msra.mxu0 %v6135_v11  ;;  %6168 = vmatpush3.bf16.msra.mxu1 %v6167_v8  ;;  %v5046_v11 = vld [vmem:[%s6395_s14] sm:$0xf]  ;;  %v5025_v8 = vrot.slane %v5020_v39, %v5024_v56 }
 0x4e8   : > { %6138 = vmatprep.subr.bf16.mxu0 %v6137_v48  ;;  %6170 = vmatprep.subr.bf16.mxu1 %v6169_v42  ;;  %v5037_v48 = vrot.slane %v5020_v39, %v5036_v47  ;;  %v5051_v42 = vrot.slane %v5046_v11, %v5024_v56  ;;  %v5059_v25 = vrot.slane %v5046_v11, %v5032_v9 }
 0x4e9   : > { %v5055_v13 = vrot.slane %v5046_v11, %v5028_v34  ;;  %v5063_v15 = vrot.slane %v5046_v11, %v5036_v47 }
 0x4eb   : > { %6140 = vmatpush3.bf16.msra.mxu0 %v6139_v14  ;;  %6172 = vmatpush3.bf16.msra.mxu1 %v6171_v37 }
 0x4ec   : > { %6142 = vmatprep.subr.bf16.mxu0 %v6141_v52  ;;  %6174 = vmatprep.subr.bf16.mxu1 %v6173_v17 }
 0x4ef   : > { %6144 = vmatpush3.bf16.msra.mxu0 %v6143_v46  ;;  %6176 = vmatpush3.bf16.msra.mxu1 %v6175_v21 }
 0x4f0   : > { %6146 = vmatprep.subr.bf16.mxu0 %v6145_v20  ;;  %6178 = vmatprep.subr.bf16.mxu1 %v6177_v22 }
 0x4f3   : > { %6148 = vmatpush3.bf16.msra.mxu0 %v6147_v61  ;;  %6180 = vmatpush3.bf16.msra.mxu1 %v6179_v55 }
 0x4f4   : > { %6150 = vmatprep.subr.bf16.mxu0 %v6149_v59  ;;  %6182 = vmatprep.subr.bf16.mxu1 %v6181_v58 }
 0x4f7   : > { %6152 = vmatpush3.bf16.msra.mxu0 %v6151_v36  ;;  %6184 = vmatpush3.bf16.msra.mxu1 %v6183_v7 }
 0x4f8   : > { %6154 = vmatprep.subr.bf16.mxu0 %v6153_v29  ;;  %6186 = vmatprep.subr.bf16.mxu1 %v6185_v6 }
 0x4fb   : > { %6156 = vmatpush3.bf16.msra.mxu0 %v6155_v31  ;;  %6188 = vmatpush3.bf16.msra.mxu1 %v6187_v60 }
 0x5b1   : > { %v4927_v44 = vpop.f32.mrb[8].mxu0  ;;  %v5009_v33 = vpop.f32.mrb[8].mxu1 }
 0x5b2   : > { %v5042_v12 = vmul.f32 %v5025_v8, %v4927_v44  ;;  %v5044_v14 = vmul.f32 %v5033_v10, %v5009_v33  ;;  %v4929_v37 = vpop.f32.mrb[9].mxu0  ;;  %v5011_v40 = vpop.f32.mrb[9].mxu1 }
 0x5b3   : > { %v5043_v53 = vmul.f32 %v5029_v62, %v4929_v37  ;;  %v5045_v52 = vmul.f32 %v5037_v48, %v5011_v40  ;;  %v4931_v17 = vpop.f32.mrb[10].mxu0  ;;  %v5013_v19 = vpop.f32.mrb[10].mxu1 }
 0x5b4   : > { %v5068_v16 = vadd.f32 %v5051_v42, %v5042_v12  ;;  %v5070_v18 = vadd.f32 %v5059_v25, %v5044_v14  ;;  %v4932_v49 = vpop.f32.mrb[11].mxu0  ;;  %v5014_v54 = vpop.f32.mrb[11].mxu1 }
 0x5b5   : > { %v5069_v1 = vadd.f32 %v5055_v13, %v5043_v53  ;;  %v5071_v46 = vadd.f32 %v5063_v15, %v5045_v52 }
 0x5b6   : > { %v5072_v20 = vmax.f32 %v5068_v16, 0.0  ;;  %v5074_v22 = vmax.f32 %v5070_v18, 0.0 }
 0x5b7   : > { %v5073_v21 = vmax.f32 %v5069_v1, 0.0  ;;  %v5075_v23 = vmax.f32 %v5071_v46, 0.0 }
 0x5b9   : > { %5204 = vmatprep.mubr.f32.mxu0 %v5073_v21  ;;  %5274 = vmatprep.mubr.f32.mxu1 %v5075_v23 }
 0x5ba   : > { %5205 = vmatmul.mubr.f32.vlgmr.msra.gmra.mrb[12].mxu0 %v5072_v20  ;;  %5275 = vmatmul.mubr.f32.vlgmr.msra.gmra.mrb[12].mxu1 %v5074_v22 }
 0x68d   : > { %v6087_v32 = vpop.f32.mrb[12].mxu0  ;;  %v6122_v0 = vpop.f32.mrb[12].mxu1 }
 0x68e   : > { %v6088_v2 = vpop.f32.mrb[13].mxu0  ;;  %v6123_v61 = vpop.f32.mrb[13].mxu1 }
 0x68f   : > { %v6089_v55 = vadd.f32 %v6088_v2, %v6087_v32  ;;  %v6124_v24 = vadd.f32 %v6123_v61, %v6122_v0 }
 0x691   : > { %v5277_v35 = vadd.f32 %v6124_v24, %v6089_v55 }
 0x693   : > { %5281 = vst.msk [vmem:[%s6423_s21] sm:$0x3] %vm5280_vm4, %v5277_v35 }
 0x694 PF: > { %s17_s24 = sadd.s32 1, %s6304_s24  }
 0x695   : > { %p14_p4 = scmp.ge.s32.totalorder %s17_s24, 4  }
 0x697   :  { %16 = sbr.rel (!%p14_p4) target bundleno = 1 (0x1), region = 274 }
 0x69e   :  { %5301 = vsyncmov [#allocation5] }
 0x6a1   :  { %s5302_s11 = vpop.sfrf %5301 }
 0x6a2   :  { %p5989_p5 = scmp.ne.s32.totalorder %s5302_s11, 0 }
 0x6a4   :  { %5306 = shalt.err (%p5989_p5)  }
 0x6a5   :  { %5308 = vsyncmov [#allocation5 + $0x1] }
 0x6a8   :  { %s5309_s14 = vpop.sfrf %5308 }
 0x6a9   :  { %p5990_p6 = scmp.ne.s32.totalorder %s5309_s14, 0 }
 0x6ab   :  { %5313 = shalt.err (%p5990_p6)  }
 0x6ac   :  { %5315 = vsyncmov [#allocation5 + $0x2] }
 0x6af   :  { %s5316_s17 = vpop.sfrf %5315 }
 0x6b0   :  { %p5991_p7 = scmp.ne.s32.totalorder %s5316_s17, 0 }
 0x6b2   :  { %5320 = shalt.err (%p5991_p7)  }
 0x6b3   :  { %5322 = vsyncmov [#allocation5 + $0x3] }
 0x6b6   :  { %s5323_s21 = vpop.sfrf %5322 }
 0x6b7   :  { %p5992_p8 = scmp.ne.s32.totalorder %s5323_s21, 0 }
 0x6b9   :  { %5327 = shalt.err (%p5992_p8)  }

</bundles_post_ra>
